<compile_context>
chip_gen: v5e
topology: v5e:2x2
jax: 0.10.0
libtpu: 0.0.40
codegen_flags: <defaults>
</compile_context>

<pallas_src>
import functools

import jax
import jax.numpy as jnp
from jax import lax
from jax.experimental import pallas as pl
from jax.experimental.pallas import tpu as pltpu

_VMEM_LIMIT = 48 * 1024 * 1024  # above 32 MiB default, below physical on all gens


def _round_up(a, b):
    return -(-a // b) * b


# ---------------------------------------------------------------------------
# Kernel 1: 3x3 'same' conv + BN + ReLU (+ optional fused residual add),
# as 9 row-shifted matmuls in VMEM.
#
# The zero-padded image is flattened to (rows, Cin) with extra zero margin rows
# so every 3x3 tap is a *contiguous* constant row-offset slice of one buffer:
#   out[q] = sum_{ky,kx} xe[q + ky*Wp + kx] @ W[ky,kx]
# Border rows of `out` are garbage and get sliced off by the wrapper.
# ---------------------------------------------------------------------------
def _conv3x3_bn_relu_kernel(xe_ref, w_ref, s_ref, b_ref, *rest, wp, with_res):
    if with_res:
        res_ref, o_ref = rest
    else:
        (o_ref,) = rest
    m_rows = o_ref.shape[1]
    acc = jnp.zeros((m_rows, o_ref.shape[2]), jnp.float32)
    for ky in range(3):
        for kx in range(3):
            off = ky * wp + kx                       # static row shift of this tap
            patch = xe_ref[0, off:off + m_rows, :].astype(jnp.bfloat16)
            acc = acc + jnp.dot(patch, w_ref[3 * ky + kx],
                                preferred_element_type=jnp.float32)
    y = jnp.maximum(acc * s_ref[...] + b_ref[...], 0.0)
    if with_res:
        y = y + res_ref[0].astype(jnp.float32)       # residual in f32
    o_ref[0] = y.astype(o_ref.dtype)


def conv3x3_bn_relu(x_nhwc, w, scale, bias, *, residual_nhwc=None,
                    out_dtype=jnp.bfloat16):
    B, H, W, Cin = x_nhwc.shape
    Cout = w.shape[-1]
    Hp, Wp = H + 2, W + 2
    M = Hp * Wp                          # output rows per image (padded layout)
    Mtot = M + 2 * (Wp + 1)              # plus top/bottom margin rows

    xp = jnp.pad(x_nhwc, ((0, 0), (1, 1), (1, 1), (0, 0)))
    xe = jnp.pad(xp.reshape(B, M, Cin), ((0, 0), (Wp + 1, Wp + 1), (0, 0)))
    w9 = w.reshape(9, Cin, Cout).astype(jnp.bfloat16)

    with_res = residual_nhwc is not None
    args = [xe, w9,
            scale.reshape(1, Cout).astype(jnp.float32),
            bias.reshape(1, Cout).astype(jnp.float32)]
    in_specs = [
        pl.BlockSpec((1, Mtot, Cin), lambda bi: (bi, 0, 0)),
        pl.BlockSpec((9, Cin, Cout), lambda bi: (0, 0, 0)),
        pl.BlockSpec((1, Cout), lambda bi: (0, 0)),
        pl.BlockSpec((1, Cout), lambda bi: (0, 0)),
    ]
    if with_res:
        # Residual in the same padded (B, M, Cout) row layout; pad rows are
        # added to garbage border rows that get sliced off anyway.
        resp = jnp.pad(residual_nhwc,
                       ((0, 0), (1, 1), (1, 1), (0, 0))).reshape(B, M, Cout)
        args.append(resp)
        in_specs.append(pl.BlockSpec((1, M, Cout), lambda bi: (bi, 0, 0)))

    out = pl.pallas_call(
        functools.partial(_conv3x3_bn_relu_kernel, wp=Wp, with_res=with_res),
        out_shape=jax.ShapeDtypeStruct((B, M, Cout), out_dtype),
        grid_spec=pltpu.PrefetchScalarGridSpec(
            num_scalar_prefetch=0,
            grid=(B,),
            in_specs=in_specs,
            out_specs=pl.BlockSpec((1, M, Cout), lambda bi: (bi, 0, 0)),
        ),
        compiler_params=pltpu.CompilerParams(
            dimension_semantics=("parallel",),
            vmem_limit_bytes=_VMEM_LIMIT),
    )(*args)

    return out.reshape(B, Hp, Wp, Cout)[:, 1:1 + H, 1:1 + W, :]


# ---------------------------------------------------------------------------
# Kernel 2: fused theta/phi/g 1x1 convs + BN + ReLU + reassociated non-local
# product  y = theta @ (phi^T @ g).  theta/phi/g live only in VMEM; the
# (HW, HW) attention matrix is never materialized.
# ---------------------------------------------------------------------------
def _tpg_nonlocal_kernel(x_ref, w_ref, s_ref, b_ref, o_ref):
    x = x_ref[0].astype(jnp.bfloat16)                # (HW, Cr)

    def head(i):
        h = jnp.dot(x, w_ref[i], preferred_element_type=jnp.float32)
        return jnp.maximum(h * s_ref[i] + b_ref[i], 0.0)

    theta, phi, g = head(0), head(1), head(2)        # each (HW, ci) f32
    # Gram matrix m[a, b] = sum_s phi[s, a] * g[s, b]; f32 (only HW*ci^2 flops).
    gram = lax.dot_general(phi, g, (((0,), (0,)), ((), ())),
                           preferred_element_type=jnp.float32)       # (ci, ci)
    o = jnp.dot(theta.astype(jnp.bfloat16), gram.astype(jnp.bfloat16),
                preferred_element_type=jnp.float32)                  # (HW, ci)
    o_ref[0] = o.astype(o_ref.dtype)


def tpg_nonlocal(x3, w3, s3, b3, *, out_dtype=jnp.bfloat16):
    """x3: (B, HW, Cr); w3: (3, Cr, ci); s3/b3: (3, 1, ci)."""
    B, HW, Cr = x3.shape
    ci = w3.shape[-1]
    return pl.pallas_call(
        _tpg_nonlocal_kernel,
        out_shape=jax.ShapeDtypeStruct((B, HW, ci), out_dtype),
        grid_spec=pltpu.PrefetchScalarGridSpec(
            num_scalar_prefetch=0,
            grid=(B,),
            in_specs=[
                pl.BlockSpec((1, HW, Cr), lambda bi: (bi, 0, 0)),
                pl.BlockSpec((3, Cr, ci), lambda bi: (0, 0, 0)),
                pl.BlockSpec((3, 1, ci), lambda bi: (0, 0, 0)),
                pl.BlockSpec((3, 1, ci), lambda bi: (0, 0, 0)),
            ],
            out_specs=pl.BlockSpec((1, HW, ci), lambda bi: (bi, 0, 0)),
        ),
        compiler_params=pltpu.CompilerParams(
            dimension_semantics=("parallel",),
            vmem_limit_bytes=_VMEM_LIMIT),
    )(x3, w3.astype(jnp.bfloat16),
      s3.astype(jnp.float32), b3.astype(jnp.float32))


# ---------------------------------------------------------------------------
# Kernel 3: fused 1x1 conv (matmul) + BN + ReLU + residual add
#   out = relu((x @ w) * scale + bias) + residual
# ---------------------------------------------------------------------------
def _mm_bn_relu_add_kernel(x_ref, w_ref, s_ref, b_ref, r_ref, o_ref):
    acc = jnp.dot(x_ref[...].astype(jnp.bfloat16), w_ref[...],
                  preferred_element_type=jnp.float32)
    y = jnp.maximum(acc * s_ref[...] + b_ref[...], 0.0)
    o_ref[...] = (y + r_ref[...].astype(jnp.float32)).astype(o_ref.dtype)


def mm_bn_relu_add(x, w, scale, bias, residual, *, out_dtype=jnp.bfloat16,
                   tm_cap=2048):
    M, K = x.shape
    Kw, N = w.shape
    assert K == Kw and residual.shape == (M, N)
    tm = min(tm_cap, _round_up(M, 8))
    Mp = _round_up(M, tm)
    if Mp != M:                        # pad row tail instead of asserting
        x = jnp.pad(x, ((0, Mp - M), (0, 0)))
        residual = jnp.pad(residual, ((0, Mp - M), (0, 0)))

    out = pl.pallas_call(
        _mm_bn_relu_add_kernel,
        out_shape=jax.ShapeDtypeStruct((Mp, N), out_dtype),
        grid_spec=pltpu.PrefetchScalarGridSpec(
            num_scalar_prefetch=0,
            grid=(Mp // tm,),
            in_specs=[
                pl.BlockSpec((tm, K), lambda i: (i, 0)),
                pl.BlockSpec((K, N), lambda i: (0, 0)),
                pl.BlockSpec((1, N), lambda i: (0, 0)),
                pl.BlockSpec((1, N), lambda i: (0, 0)),
                pl.BlockSpec((tm, N), lambda i: (i, 0)),
            ],
            out_specs=pl.BlockSpec((tm, N), lambda i: (i, 0)),
        ),
        compiler_params=pltpu.CompilerParams(
            dimension_semantics=("parallel",),
            vmem_limit_bytes=_VMEM_LIMIT),
    )(x, w.astype(jnp.bfloat16),
      scale.reshape(1, N).astype(jnp.float32),
      bias.reshape(1, N).astype(jnp.float32),
      residual)
    return out[:M] if Mp != M else out


# ---------------------------------------------------------------------------
# FSM forward (mirrors the PyTorch forward exactly, including the raw
# (bs, hw, c) -> (bs, c, w, h) reshape of the non-local output).
# ---------------------------------------------------------------------------
def fsm_forward(params, origx_nchw):
    origx = jnp.transpose(origx_nchw, (0, 2, 3, 1)).astype(jnp.float32)   # NHWC
    w_x, s_x, b_x = params["for_x"]
    x = conv3x3_bn_relu(origx, w_x, s_x, b_x)                             # (B,H,W,Cr) bf16
    B, H, W, Cr = x.shape

    # Fused theta/phi/g + non-local block: one read of x, no tpg round trip.
    w_t, s_t, b_t = params["for_theta"]
    w_p, s_p, b_p = params["for_phi"]
    w_g, s_g, b_g = params["for_g"]
    ci = w_t.shape[-1]
    w3 = jnp.stack([w_t.reshape(Cr, ci), w_p.reshape(Cr, ci),
                    w_g.reshape(Cr, ci)], axis=0)                         # (3,Cr,ci)
    s3 = jnp.stack([s_t, s_p, s_g]).reshape(3, 1, ci)
    b3 = jnp.stack([b_t, b_p, b_g]).reshape(3, 1, ci)
    y_flat = tpg_nonlocal(x.reshape(B, H * W, Cr), w3, s3, b3)            # (B,HW,ci)

    # torch: torch.matmul(f, g).reshape(bs, c, w, h)  (raw row-major reshape);
    # tiny layout scramble, left to XLA.
    y_scr = jnp.transpose(y_flat.reshape(B, ci, H, W), (0, 2, 3, 1))      # NHWC view
    y_scr = y_scr.reshape(B * H * W, ci)

    # y_conv + residual add (z = y + x) fused in one kernel.
    w_y, s_y, b_y = params["y_conv"]
    z = mm_bn_relu_add(y_scr, w_y.reshape(ci, Cr), s_y, b_y,
                       x.reshape(B * H * W, Cr))
    z = z.reshape(B, H, W, Cr)

    # last_conv + final residual add fused in one kernel; output f32.
    w_l, s_l, b_l = params["last_conv"]
    out = conv3x3_bn_relu(z, w_l, s_l, b_l, residual_nhwc=origx,
                          out_dtype=jnp.float32)
    return jnp.transpose(out, (0, 3, 1, 2))                               # NCHW


# ---------------------------------------------------------------------------
# Pure-JAX f32 reference (independent path: XLA conv + original association).
# ---------------------------------------------------------------------------
def _conv3_ref(x, w, s, b):
    y = lax.conv_general_dilated(x, w, (1, 1), "SAME",
                                 dimension_numbers=("NHWC", "HWIO", "NHWC"),
                                 precision=lax.Precision.HIGHEST)
    return jnp.maximum(y * s + b, 0.0)


def _conv1_ref(x, w, s, b):
    w2 = w.reshape(w.shape[-2], w.shape[-1])
    y = jnp.einsum("bhwc,cd->bhwd", x, w2, precision=lax.Precision.HIGHEST)
    return jnp.maximum(y * s + b, 0.0)


def fsm_reference(params, origx_nchw):
    origx = jnp.transpose(origx_nchw, (0, 2, 3, 1)).astype(jnp.float32)
    x = _conv3_ref(origx, *params["for_x"])
    B, H, W, Cr = x.shape
    theta = _conv1_ref(x, *params["for_theta"])
    phi = _conv1_ref(x, *params["for_phi"])
    g = _conv1_ref(x, *params["for_g"])
    ci = theta.shape[-1]
    theta_f = theta.reshape(B, H * W, ci)
    phi_f = phi.reshape(B, H * W, ci)
    g_f = g.reshape(B, H * W, ci)
    f = jnp.einsum("bqc,bkc->bqk", theta_f, phi_f, precision=lax.Precision.HIGHEST)
    y_t = jnp.einsum("bqk,bkc->bqc", f, g_f, precision=lax.Precision.HIGHEST)
    y_scr = jnp.transpose(y_t.reshape(B, ci, H, W), (0, 2, 3, 1))
    y = _conv1_ref(y_scr, *params["y_conv"])
    z = y + x
    z = _conv3_ref(z, *params["last_conv"])
    z = z + origx
    return jnp.transpose(z, (0, 3, 1, 2))


# ---------------------------------------------------------------------------
# Deterministic parameter init (synthetic weights, BN folded to affine).
# ---------------------------------------------------------------------------
def init_params(key, channels):
    reduced = max(channels // 3, 4)
    intermed = max(reduced // 2, 2)

    def conv_params(k, kh, kw, cin, cout):
        k1, k2, k3 = jax.random.split(k, 3)
        w = jax.random.normal(k1, (kh, kw, cin, cout), jnp.float32) * 0.1
        scale = 1.0 + 0.1 * jax.random.normal(k2, (cout,), jnp.float32)
        bias = 0.1 * jax.random.normal(k3, (cout,), jnp.float32)
        return w, scale, bias

    ks = jax.random.split(key, 6)
    return {
        "for_x":     conv_params(ks[0], 3, 3, channels, reduced),
        "for_theta": conv_params(ks[1], 1, 1, reduced, intermed),
        "for_phi":   conv_params(ks[2], 1, 1, reduced, intermed),
        "for_g":     conv_params(ks[3], 1, 1, reduced, intermed),
        "y_conv":    conv_params(ks[4], 1, 1, intermed, reduced),
        "last_conv": conv_params(ks[5], 3, 3, reduced, channels),
    }


if __name__ == "__main__":
    B, C, H, W = 2, 8, 16, 16          # channels=8 -> reduced=4, intermed=2
    key = jax.random.PRNGKey(0)
    kx, kp = jax.random.split(key)
    x = jax.random.normal(kx, (B, C, H, W), jnp.float32)
    params = init_params(kp, C)

    fwd = jax.jit(functools.partial(fsm_forward, params))
    out = jax.block_until_ready(fwd(x))

    assert out.shape == (B, C, H, W)
    assert bool(jnp.all(jnp.isfinite(out)))
    ref = fsm_reference(params, x)
    max_err = float(jnp.max(jnp.abs(out - ref)))
    assert bool(jnp.allclose(out, ref, rtol=5e-2, atol=5e-2)), (
        f"mismatch vs reference (max abs err {max_err:.3e})")
    print("KERNEL_OK")
</pallas_src>

<mosaic_0001>
module attributes {stable_mosaic.version = 11 : i64} {
  func.func @_conv3x3_bn_relu_kernel(%arg0: i32, %arg1: memref<1x362x8xf32, #tpu.memory_space<vmem>>, %arg2: memref<9x8x4xbf16, #tpu.memory_space<vmem>>, %arg3: memref<1x4xf32, #tpu.memory_space<vmem>>, %arg4: memref<1x4xf32, #tpu.memory_space<vmem>>, %arg5: memref<1x324x4xbf16, #tpu.memory_space<vmem>>) attributes {dimension_semantics = [#tpu.dimension_semantics<parallel>], iteration_bounds = array<i64: 2>, scalar_prefetch = 0 : i64, scratch_operands = 0 : i64, tpu.core_type = #tpu.core_type<tc>, window_params = [{transform_indices = @transform_0, window_bounds = array<i64: 1, 362, 8>}, {pipeline_mode = #tpu.pipeline_mode<synchronous>, transform_indices = @transform_1, window_bounds = array<i64: 9, 8, 4>}, {pipeline_mode = #tpu.pipeline_mode<synchronous>, transform_indices = @transform_2, window_bounds = array<i64: 1, 4>}, {pipeline_mode = #tpu.pipeline_mode<synchronous>, transform_indices = @transform_3, window_bounds = array<i64: 1, 4>}, {transform_indices = @transform_4, window_bounds = array<i64: 1, 324, 4>}]} {
    %cst = arith.constant 0.000000e+00 : f32
    %0 = vector.broadcast %cst : f32 to vector<324x4xf32>
    %c0 = arith.constant 0 : index
    %c0_0 = arith.constant 0 : index
    %c0_1 = arith.constant 0 : index
    %1 = vector.load %arg1[%c0, %c0_0, %c0_1] : memref<1x362x8xf32, #tpu.memory_space<vmem>>, vector<1x324x8xf32>
    %2 = vector.shape_cast %1 : vector<1x324x8xf32> to vector<324x8xf32>
    %3 = arith.truncf %2 : vector<324x8xf32> to vector<324x8xbf16>
    %c0_2 = arith.constant 0 : index
    %c0_3 = arith.constant 0 : index
    %c0_4 = arith.constant 0 : index
    %4 = vector.load %arg2[%c0_2, %c0_3, %c0_4] : memref<9x8x4xbf16, #tpu.memory_space<vmem>>, vector<1x8x4xbf16>
    %5 = vector.shape_cast %4 : vector<1x8x4xbf16> to vector<8x4xbf16>
    %cst_5 = arith.constant dense<0.000000e+00> : vector<324x4xf32>
    %6 = tpu.matmul %3, %5, %cst_5 {dimension_numbers = #tpu.dot_dimension_numbers<[1], [0], [0], [1], [0, 0, 1, 1], [], []>} : vector<324x8xbf16>, vector<8x4xbf16>, vector<324x4xf32> -> vector<324x4xf32>
    %7 = arith.addf %0, %6 : vector<324x4xf32>
    %c0_6 = arith.constant 0 : index
    %c1 = arith.constant 1 : index
    %c0_7 = arith.constant 0 : index
    %8 = vector.load %arg1[%c0_6, %c1, %c0_7] : memref<1x362x8xf32, #tpu.memory_space<vmem>>, vector<1x324x8xf32>
    %9 = vector.shape_cast %8 : vector<1x324x8xf32> to vector<324x8xf32>
    %10 = arith.truncf %9 : vector<324x8xf32> to vector<324x8xbf16>
    %c1_8 = arith.constant 1 : index
    %c0_9 = arith.constant 0 : index
    %c0_10 = arith.constant 0 : index
    %11 = vector.load %arg2[%c1_8, %c0_9, %c0_10] : memref<9x8x4xbf16, #tpu.memory_space<vmem>>, vector<1x8x4xbf16>
    %12 = vector.shape_cast %11 : vector<1x8x4xbf16> to vector<8x4xbf16>
    %cst_11 = arith.constant dense<0.000000e+00> : vector<324x4xf32>
    %13 = tpu.matmul %10, %12, %cst_11 {dimension_numbers = #tpu.dot_dimension_numbers<[1], [0], [0], [1], [0, 0, 1, 1], [], []>} : vector<324x8xbf16>, vector<8x4xbf16>, vector<324x4xf32> -> vector<324x4xf32>
    %14 = arith.addf %7, %13 : vector<324x4xf32>
    %c0_12 = arith.constant 0 : index
    %c2 = arith.constant 2 : index
    %c0_13 = arith.constant 0 : index
    %15 = vector.load %arg1[%c0_12, %c2, %c0_13] : memref<1x362x8xf32, #tpu.memory_space<vmem>>, vector<1x324x8xf32>
    %16 = vector.shape_cast %15 : vector<1x324x8xf32> to vector<324x8xf32>
    %17 = arith.truncf %16 : vector<324x8xf32> to vector<324x8xbf16>
    %c2_14 = arith.constant 2 : index
    %c0_15 = arith.constant 0 : index
    %c0_16 = arith.constant 0 : index
    %18 = vector.load %arg2[%c2_14, %c0_15, %c0_16] : memref<9x8x4xbf16, #tpu.memory_space<vmem>>, vector<1x8x4xbf16>
    %19 = vector.shape_cast %18 : vector<1x8x4xbf16> to vector<8x4xbf16>
    %cst_17 = arith.constant dense<0.000000e+00> : vector<324x4xf32>
    %20 = tpu.matmul %17, %19, %cst_17 {dimension_numbers = #tpu.dot_dimension_numbers<[1], [0], [0], [1], [0, 0, 1, 1], [], []>} : vector<324x8xbf16>, vector<8x4xbf16>, vector<324x4xf32> -> vector<324x4xf32>
    %21 = arith.addf %14, %20 : vector<324x4xf32>
    %c0_18 = arith.constant 0 : index
    %c18 = arith.constant 18 : index
    %c0_19 = arith.constant 0 : index
    %22 = vector.load %arg1[%c0_18, %c18, %c0_19] : memref<1x362x8xf32, #tpu.memory_space<vmem>>, vector<1x324x8xf32>
    %23 = vector.shape_cast %22 : vector<1x324x8xf32> to vector<324x8xf32>
    %24 = arith.truncf %23 : vector<324x8xf32> to vector<324x8xbf16>
    %c3 = arith.constant 3 : index
    %c0_20 = arith.constant 0 : index
    %c0_21 = arith.constant 0 : index
    %25 = vector.load %arg2[%c3, %c0_20, %c0_21] : memref<9x8x4xbf16, #tpu.memory_space<vmem>>, vector<1x8x4xbf16>
    %26 = vector.shape_cast %25 : vector<1x8x4xbf16> to vector<8x4xbf16>
    %cst_22 = arith.constant dense<0.000000e+00> : vector<324x4xf32>
    %27 = tpu.matmul %24, %26, %cst_22 {dimension_numbers = #tpu.dot_dimension_numbers<[1], [0], [0], [1], [0, 0, 1, 1], [], []>} : vector<324x8xbf16>, vector<8x4xbf16>, vector<324x4xf32> -> vector<324x4xf32>
    %28 = arith.addf %21, %27 : vector<324x4xf32>
    %c0_23 = arith.constant 0 : index
    %c19 = arith.constant 19 : index
    %c0_24 = arith.constant 0 : index
    %29 = vector.load %arg1[%c0_23, %c19, %c0_24] : memref<1x362x8xf32, #tpu.memory_space<vmem>>, vector<1x324x8xf32>
    %30 = vector.shape_cast %29 : vector<1x324x8xf32> to vector<324x8xf32>
    %31 = arith.truncf %30 : vector<324x8xf32> to vector<324x8xbf16>
    %c4 = arith.constant 4 : index
    %c0_25 = arith.constant 0 : index
    %c0_26 = arith.constant 0 : index
    %32 = vector.load %arg2[%c4, %c0_25, %c0_26] : memref<9x8x4xbf16, #tpu.memory_space<vmem>>, vector<1x8x4xbf16>
    %33 = vector.shape_cast %32 : vector<1x8x4xbf16> to vector<8x4xbf16>
    %cst_27 = arith.constant dense<0.000000e+00> : vector<324x4xf32>
    %34 = tpu.matmul %31, %33, %cst_27 {dimension_numbers = #tpu.dot_dimension_numbers<[1], [0], [0], [1], [0, 0, 1, 1], [], []>} : vector<324x8xbf16>, vector<8x4xbf16>, vector<324x4xf32> -> vector<324x4xf32>
    %35 = arith.addf %28, %34 : vector<324x4xf32>
    %c0_28 = arith.constant 0 : index
    %c20 = arith.constant 20 : index
    %c0_29 = arith.constant 0 : index
    %36 = vector.load %arg1[%c0_28, %c20, %c0_29] : memref<1x362x8xf32, #tpu.memory_space<vmem>>, vector<1x324x8xf32>
    %37 = vector.shape_cast %36 : vector<1x324x8xf32> to vector<324x8xf32>
    %38 = arith.truncf %37 : vector<324x8xf32> to vector<324x8xbf16>
    %c5 = arith.constant 5 : index
    %c0_30 = arith.constant 0 : index
    %c0_31 = arith.constant 0 : index
    %39 = vector.load %arg2[%c5, %c0_30, %c0_31] : memref<9x8x4xbf16, #tpu.memory_space<vmem>>, vector<1x8x4xbf16>
    %40 = vector.shape_cast %39 : vector<1x8x4xbf16> to vector<8x4xbf16>
    %cst_32 = arith.constant dense<0.000000e+00> : vector<324x4xf32>
    %41 = tpu.matmul %38, %40, %cst_32 {dimension_numbers = #tpu.dot_dimension_numbers<[1], [0], [0], [1], [0, 0, 1, 1], [], []>} : vector<324x8xbf16>, vector<8x4xbf16>, vector<324x4xf32> -> vector<324x4xf32>
    %42 = arith.addf %35, %41 : vector<324x4xf32>
    %c0_33 = arith.constant 0 : index
    %c36 = arith.constant 36 : index
    %c0_34 = arith.constant 0 : index
    %43 = vector.load %arg1[%c0_33, %c36, %c0_34] : memref<1x362x8xf32, #tpu.memory_space<vmem>>, vector<1x324x8xf32>
    %44 = vector.shape_cast %43 : vector<1x324x8xf32> to vector<324x8xf32>
    %45 = arith.truncf %44 : vector<324x8xf32> to vector<324x8xbf16>
    %c6 = arith.constant 6 : index
    %c0_35 = arith.constant 0 : index
    %c0_36 = arith.constant 0 : index
    %46 = vector.load %arg2[%c6, %c0_35, %c0_36] : memref<9x8x4xbf16, #tpu.memory_space<vmem>>, vector<1x8x4xbf16>
    %47 = vector.shape_cast %46 : vector<1x8x4xbf16> to vector<8x4xbf16>
    %cst_37 = arith.constant dense<0.000000e+00> : vector<324x4xf32>
    %48 = tpu.matmul %45, %47, %cst_37 {dimension_numbers = #tpu.dot_dimension_numbers<[1], [0], [0], [1], [0, 0, 1, 1], [], []>} : vector<324x8xbf16>, vector<8x4xbf16>, vector<324x4xf32> -> vector<324x4xf32>
    %49 = arith.addf %42, %48 : vector<324x4xf32>
    %c0_38 = arith.constant 0 : index
    %c37 = arith.constant 37 : index
    %c0_39 = arith.constant 0 : index
    %50 = vector.load %arg1[%c0_38, %c37, %c0_39] : memref<1x362x8xf32, #tpu.memory_space<vmem>>, vector<1x324x8xf32>
    %51 = vector.shape_cast %50 : vector<1x324x8xf32> to vector<324x8xf32>
    %52 = arith.truncf %51 : vector<324x8xf32> to vector<324x8xbf16>
    %c7 = arith.constant 7 : index
    %c0_40 = arith.constant 0 : index
    %c0_41 = arith.constant 0 : index
    %53 = vector.load %arg2[%c7, %c0_40, %c0_41] : memref<9x8x4xbf16, #tpu.memory_space<vmem>>, vector<1x8x4xbf16>
    %54 = vector.shape_cast %53 : vector<1x8x4xbf16> to vector<8x4xbf16>
    %cst_42 = arith.constant dense<0.000000e+00> : vector<324x4xf32>
    %55 = tpu.matmul %52, %54, %cst_42 {dimension_numbers = #tpu.dot_dimension_numbers<[1], [0], [0], [1], [0, 0, 1, 1], [], []>} : vector<324x8xbf16>, vector<8x4xbf16>, vector<324x4xf32> -> vector<324x4xf32>
    %56 = arith.addf %49, %55 : vector<324x4xf32>
    %c0_43 = arith.constant 0 : index
    %c38 = arith.constant 38 : index
    %c0_44 = arith.constant 0 : index
    %57 = vector.load %arg1[%c0_43, %c38, %c0_44] : memref<1x362x8xf32, #tpu.memory_space<vmem>>, vector<1x324x8xf32>
    %58 = vector.shape_cast %57 : vector<1x324x8xf32> to vector<324x8xf32>
    %59 = arith.truncf %58 : vector<324x8xf32> to vector<324x8xbf16>
    %c8 = arith.constant 8 : index
    %c0_45 = arith.constant 0 : index
    %c0_46 = arith.constant 0 : index
    %60 = vector.load %arg2[%c8, %c0_45, %c0_46] : memref<9x8x4xbf16, #tpu.memory_space<vmem>>, vector<1x8x4xbf16>
    %61 = vector.shape_cast %60 : vector<1x8x4xbf16> to vector<8x4xbf16>
    %cst_47 = arith.constant dense<0.000000e+00> : vector<324x4xf32>
    %62 = tpu.matmul %59, %61, %cst_47 {dimension_numbers = #tpu.dot_dimension_numbers<[1], [0], [0], [1], [0, 0, 1, 1], [], []>} : vector<324x8xbf16>, vector<8x4xbf16>, vector<324x4xf32> -> vector<324x4xf32>
    %63 = arith.addf %56, %62 : vector<324x4xf32>
    %c0_48 = arith.constant 0 : index
    %c0_49 = arith.constant 0 : index
    %64 = vector.load %arg3[%c0_48, %c0_49] : memref<1x4xf32, #tpu.memory_space<vmem>>, vector<1x4xf32>
    %65 = vector.broadcast %64 : vector<1x4xf32> to vector<324x4xf32>
    %66 = arith.mulf %63, %65 : vector<324x4xf32>
    %c0_50 = arith.constant 0 : index
    %c0_51 = arith.constant 0 : index
    %67 = vector.load %arg4[%c0_50, %c0_51] : memref<1x4xf32, #tpu.memory_space<vmem>>, vector<1x4xf32>
    %68 = vector.broadcast %67 : vector<1x4xf32> to vector<324x4xf32>
    %69 = arith.addf %66, %68 : vector<324x4xf32>
    %cst_52 = arith.constant 0.000000e+00 : f32
    %70 = vector.broadcast %cst_52 : f32 to vector<324x4xf32>
    %71 = arith.maximumf %69, %70 : vector<324x4xf32>
    %72 = arith.truncf %71 : vector<324x4xf32> to vector<324x4xbf16>
    %c0_53 = arith.constant 0 : index
    %c0_54 = arith.constant 0 : index
    %c0_55 = arith.constant 0 : index
    %73 = vector.load %arg5[%c0_53, %c0_54, %c0_55] : memref<1x324x4xbf16, #tpu.memory_space<vmem>>, vector<1x324x4xbf16>
    %74 = vector.shape_cast %73 : vector<1x324x4xbf16> to vector<324x4xbf16>
    %75 = vector.shape_cast %72 : vector<324x4xbf16> to vector<1x324x4xbf16>
    tpu.vector_store %arg5[%c0_53, %c0_54, %c0_55], %75 {strides = array<i32>} : memref<1x324x4xbf16, #tpu.memory_space<vmem>>, vector<1x324x4xbf16>,
    return
  }
  func.func @transform_0(%arg0: i32) -> (i32, i32, i32) {
    %c0_i32 = arith.constant 0 : i32
    %c0_i32_0 = arith.constant 0 : i32
    %c0_i32_1 = arith.constant 0 : i32
    return %arg0, %c0_i32, %c0_i32_0 : i32, i32, i32
  }
  func.func @transform_1(%arg0: i32) -> (i32, i32, i32) {
    %c0_i32 = arith.constant 0 : i32
    %c0_i32_0 = arith.constant 0 : i32
    %c0_i32_1 = arith.constant 0 : i32
    %c0_i32_2 = arith.constant 0 : i32
    return %c0_i32, %c0_i32_0, %c0_i32_1 : i32, i32, i32
  }
  func.func @transform_2(%arg0: i32) -> (i32, i32) {
    %c0_i32 = arith.constant 0 : i32
    %c0_i32_0 = arith.constant 0 : i32
    %c0_i32_1 = arith.constant 0 : i32
    return %c0_i32, %c0_i32_0 : i32, i32
  }
  func.func @transform_3(%arg0: i32) -> (i32, i32) {
    %c0_i32 = arith.constant 0 : i32
    %c0_i32_0 = arith.constant 0 : i32
    %c0_i32_1 = arith.constant 0 : i32
    return %c0_i32, %c0_i32_0 : i32, i32
  }
  func.func @transform_4(%arg0: i32) -> (i32, i32, i32) {
    %c0_i32 = arith.constant 0 : i32
    %c0_i32_0 = arith.constant 0 : i32
    %c0_i32_1 = arith.constant 0 : i32
    return %arg0, %c0_i32, %c0_i32_0 : i32, i32, i32
  }
}

module attributes {stable_mosaic.version = 11 : i64} {
  func.func @_tpg_nonlocal_kernel(%arg0: i32, %arg1: memref<1x256x4xbf16, #tpu.memory_space<vmem>>, %arg2: memref<3x4x2xbf16, #tpu.memory_space<vmem>>, %arg3: memref<3x1x2xf32, #tpu.memory_space<vmem>>, %arg4: memref<3x1x2xf32, #tpu.memory_space<vmem>>, %arg5: memref<1x256x2xbf16, #tpu.memory_space<vmem>>) attributes {dimension_semantics = [#tpu.dimension_semantics<parallel>], iteration_bounds = array<i64: 2>, scalar_prefetch = 0 : i64, scratch_operands = 0 : i64, tpu.core_type = #tpu.core_type<tc>, window_params = [{transform_indices = @transform_0, window_bounds = array<i64: 1, 256, 4>}, {pipeline_mode = #tpu.pipeline_mode<synchronous>, transform_indices = @transform_1, window_bounds = array<i64: 3, 4, 2>}, {pipeline_mode = #tpu.pipeline_mode<synchronous>, transform_indices = @transform_2, window_bounds = array<i64: 3, 1, 2>}, {pipeline_mode = #tpu.pipeline_mode<synchronous>, transform_indices = @transform_3, window_bounds = array<i64: 3, 1, 2>}, {transform_indices = @transform_4, window_bounds = array<i64: 1, 256, 2>}]} {
    %c0 = arith.constant 0 : index
    %c0_0 = arith.constant 0 : index
    %c0_1 = arith.constant 0 : index
    %0 = vector.load %arg1[%c0, %c0_0, %c0_1] : memref<1x256x4xbf16, #tpu.memory_space<vmem>>, vector<1x256x4xbf16>
    %1 = vector.shape_cast %0 : vector<1x256x4xbf16> to vector<256x4xbf16>
    %c0_2 = arith.constant 0 : index
    %c0_3 = arith.constant 0 : index
    %c0_4 = arith.constant 0 : index
    %2 = vector.load %arg2[%c0_2, %c0_3, %c0_4] : memref<3x4x2xbf16, #tpu.memory_space<vmem>>, vector<1x4x2xbf16>
    %3 = vector.shape_cast %2 : vector<1x4x2xbf16> to vector<4x2xbf16>
    %cst = arith.constant dense<0.000000e+00> : vector<256x2xf32>
    %4 = tpu.matmul %1, %3, %cst {dimension_numbers = #tpu.dot_dimension_numbers<[1], [0], [0], [1], [0, 0, 1, 1], [], []>} : vector<256x4xbf16>, vector<4x2xbf16>, vector<256x2xf32> -> vector<256x2xf32>
    %c0_5 = arith.constant 0 : index
    %c0_6 = arith.constant 0 : index
    %c0_7 = arith.constant 0 : index
    %5 = vector.load %arg3[%c0_5, %c0_6, %c0_7] : memref<3x1x2xf32, #tpu.memory_space<vmem>>, vector<1x1x2xf32>
    %6 = vector.shape_cast %5 : vector<1x1x2xf32> to vector<1x2xf32>
    %7 = vector.broadcast %6 : vector<1x2xf32> to vector<256x2xf32>
    %8 = arith.mulf %4, %7 : vector<256x2xf32>
    %c0_8 = arith.constant 0 : index
    %c0_9 = arith.constant 0 : index
    %c0_10 = arith.constant 0 : index
    %9 = vector.load %arg4[%c0_8, %c0_9, %c0_10] : memref<3x1x2xf32, #tpu.memory_space<vmem>>, vector<1x1x2xf32>
    %10 = vector.shape_cast %9 : vector<1x1x2xf32> to vector<1x2xf32>
    %11 = vector.broadcast %10 : vector<1x2xf32> to vector<256x2xf32>
    %12 = arith.addf %8, %11 : vector<256x2xf32>
    %cst_11 = arith.constant 0.000000e+00 : f32
    %13 = vector.broadcast %cst_11 : f32 to vector<256x2xf32>
    %14 = arith.maximumf %12, %13 : vector<256x2xf32>
    %c1 = arith.constant 1 : index
    %c0_12 = arith.constant 0 : index
    %c0_13 = arith.constant 0 : index
    %15 = vector.load %arg2[%c1, %c0_12, %c0_13] : memref<3x4x2xbf16, #tpu.memory_space<vmem>>, vector<1x4x2xbf16>
    %16 = vector.shape_cast %15 : vector<1x4x2xbf16> to vector<4x2xbf16>
    %cst_14 = arith.constant dense<0.000000e+00> : vector<256x2xf32>
    %17 = tpu.matmul %1, %16, %cst_14 {dimension_numbers = #tpu.dot_dimension_numbers<[1], [0], [0], [1], [0, 0, 1, 1], [], []>} : vector<256x4xbf16>, vector<4x2xbf16>, vector<256x2xf32> -> vector<256x2xf32>
    %c1_15 = arith.constant 1 : index
    %c0_16 = arith.constant 0 : index
    %c0_17 = arith.constant 0 : index
    %18 = vector.load %arg3[%c1_15, %c0_16, %c0_17] : memref<3x1x2xf32, #tpu.memory_space<vmem>>, vector<1x1x2xf32>
    %19 = vector.shape_cast %18 : vector<1x1x2xf32> to vector<1x2xf32>
    %20 = vector.broadcast %19 : vector<1x2xf32> to vector<256x2xf32>
    %21 = arith.mulf %17, %20 : vector<256x2xf32>
    %c1_18 = arith.constant 1 : index
    %c0_19 = arith.constant 0 : index
    %c0_20 = arith.constant 0 : index
    %22 = vector.load %arg4[%c1_18, %c0_19, %c0_20] : memref<3x1x2xf32, #tpu.memory_space<vmem>>, vector<1x1x2xf32>
    %23 = vector.shape_cast %22 : vector<1x1x2xf32> to vector<1x2xf32>
    %24 = vector.broadcast %23 : vector<1x2xf32> to vector<256x2xf32>
    %25 = arith.addf %21, %24 : vector<256x2xf32>
    %cst_21 = arith.constant 0.000000e+00 : f32
    %26 = vector.broadcast %cst_21 : f32 to vector<256x2xf32>
    %27 = arith.maximumf %25, %26 : vector<256x2xf32>
    %c2 = arith.constant 2 : index
    %c0_22 = arith.constant 0 : index
    %c0_23 = arith.constant 0 : index
    %28 = vector.load %arg2[%c2, %c0_22, %c0_23] : memref<3x4x2xbf16, #tpu.memory_space<vmem>>, vector<1x4x2xbf16>
    %29 = vector.shape_cast %28 : vector<1x4x2xbf16> to vector<4x2xbf16>
    %cst_24 = arith.constant dense<0.000000e+00> : vector<256x2xf32>
    %30 = tpu.matmul %1, %29, %cst_24 {dimension_numbers = #tpu.dot_dimension_numbers<[1], [0], [0], [1], [0, 0, 1, 1], [], []>} : vector<256x4xbf16>, vector<4x2xbf16>, vector<256x2xf32> -> vector<256x2xf32>
    %c2_25 = arith.constant 2 : index
    %c0_26 = arith.constant 0 : index
    %c0_27 = arith.constant 0 : index
    %31 = vector.load %arg3[%c2_25, %c0_26, %c0_27] : memref<3x1x2xf32, #tpu.memory_space<vmem>>, vector<1x1x2xf32>
    %32 = vector.shape_cast %31 : vector<1x1x2xf32> to vector<1x2xf32>
    %33 = vector.broadcast %32 : vector<1x2xf32> to vector<256x2xf32>
    %34 = arith.mulf %30, %33 : vector<256x2xf32>
    %c2_28 = arith.constant 2 : index
    %c0_29 = arith.constant 0 : index
    %c0_30 = arith.constant 0 : index
    %35 = vector.load %arg4[%c2_28, %c0_29, %c0_30] : memref<3x1x2xf32, #tpu.memory_space<vmem>>, vector<1x1x2xf32>
    %36 = vector.shape_cast %35 : vector<1x1x2xf32> to vector<1x2xf32>
    %37 = vector.broadcast %36 : vector<1x2xf32> to vector<256x2xf32>
    %38 = arith.addf %34, %37 : vector<256x2xf32>
    %cst_31 = arith.constant 0.000000e+00 : f32
    %39 = vector.broadcast %cst_31 : f32 to vector<256x2xf32>
    %40 = arith.maximumf %38, %39 : vector<256x2xf32>
    %cst_32 = arith.constant dense<0.000000e+00> : vector<2x2xf32>
    %41 = tpu.matmul %27, %40, %cst_32 {dimension_numbers = #tpu.dot_dimension_numbers<[0], [0], [1], [1], [0, 1, 1, 1], [], []>} : vector<256x2xf32>, vector<256x2xf32>, vector<2x2xf32> -> vector<2x2xf32>
    %42 = arith.truncf %14 : vector<256x2xf32> to vector<256x2xbf16>
    %43 = arith.truncf %41 : vector<2x2xf32> to vector<2x2xbf16>
    %cst_33 = arith.constant dense<0.000000e+00> : vector<256x2xf32>
    %44 = tpu.matmul %42, %43, %cst_33 {dimension_numbers = #tpu.dot_dimension_numbers<[1], [0], [0], [1], [0, 0, 1, 1], [], []>} : vector<256x2xbf16>, vector<2x2xbf16>, vector<256x2xf32> -> vector<256x2xf32>
    %45 = arith.truncf %44 : vector<256x2xf32> to vector<256x2xbf16>
    %c0_34 = arith.constant 0 : index
    %c0_35 = arith.constant 0 : index
    %c0_36 = arith.constant 0 : index
    %46 = vector.load %arg5[%c0_34, %c0_35, %c0_36] : memref<1x256x2xbf16, #tpu.memory_space<vmem>>, vector<1x256x2xbf16>
    %47 = vector.shape_cast %46 : vector<1x256x2xbf16> to vector<256x2xbf16>
    %48 = vector.shape_cast %45 : vector<256x2xbf16> to vector<1x256x2xbf16>
    tpu.vector_store %arg5[%c0_34, %c0_35, %c0_36], %48 {strides = array<i32>} : memref<1x256x2xbf16, #tpu.memory_space<vmem>>, vector<1x256x2xbf16>,
    return
  }
  func.func @transform_0(%arg0: i32) -> (i32, i32, i32) {
    %c0_i32 = arith.constant 0 : i32
    %c0_i32_0 = arith.constant 0 : i32
    %c0_i32_1 = arith.constant 0 : i32
    return %arg0, %c0_i32, %c0_i32_0 : i32, i32, i32
  }
  func.func @transform_1(%arg0: i32) -> (i32, i32, i32) {
    %c0_i32 = arith.constant 0 : i32
    %c0_i32_0 = arith.constant 0 : i32
    %c0_i32_1 = arith.constant 0 : i32
    %c0_i32_2 = arith.constant 0 : i32
    return %c0_i32, %c0_i32_0, %c0_i32_1 : i32, i32, i32
  }
  func.func @transform_2(%arg0: i32) -> (i32, i32, i32) {
    %c0_i32 = arith.constant 0 : i32
    %c0_i32_0 = arith.constant 0 : i32
    %c0_i32_1 = arith.constant 0 : i32
    %c0_i32_2 = arith.constant 0 : i32
    return %c0_i32, %c0_i32_0, %c0_i32_1 : i32, i32, i32
  }
  func.func @transform_3(%arg0: i32) -> (i32, i32, i32) {
    %c0_i32 = arith.constant 0 : i32
    %c0_i32_0 = arith.constant 0 : i32
    %c0_i32_1 = arith.constant 0 : i32
    %c0_i32_2 = arith.constant 0 : i32
    return %c0_i32, %c0_i32_0, %c0_i32_1 : i32, i32, i32
  }
  func.func @transform_4(%arg0: i32) -> (i32, i32, i32) {
    %c0_i32 = arith.constant 0 : i32
    %c0_i32_0 = arith.constant 0 : i32
    %c0_i32_1 = arith.constant 0 : i32
    return %arg0, %c0_i32, %c0_i32_0 : i32, i32, i32
  }
}

module attributes {stable_mosaic.version = 11 : i64} {
  func.func @_mm_bn_relu_add_kernel(%arg0: i32, %arg1: memref<512x2xbf16, #tpu.memory_space<vmem>>, %arg2: memref<2x4xbf16, #tpu.memory_space<vmem>>, %arg3: memref<1x4xf32, #tpu.memory_space<vmem>>, %arg4: memref<1x4xf32, #tpu.memory_space<vmem>>, %arg5: memref<512x4xbf16, #tpu.memory_space<vmem>>, %arg6: memref<512x4xbf16, #tpu.memory_space<vmem>>) attributes {dimension_semantics = [#tpu.dimension_semantics<parallel>], iteration_bounds = array<i64: 1>, scalar_prefetch = 0 : i64, scratch_operands = 0 : i64, tpu.core_type = #tpu.core_type<tc>, window_params = [{transform_indices = @transform_0, window_bounds = array<i64: 512, 2>}, {pipeline_mode = #tpu.pipeline_mode<synchronous>, transform_indices = @transform_1, window_bounds = array<i64: 2, 4>}, {pipeline_mode = #tpu.pipeline_mode<synchronous>, transform_indices = @transform_2, window_bounds = array<i64: 1, 4>}, {pipeline_mode = #tpu.pipeline_mode<synchronous>, transform_indices = @transform_3, window_bounds = array<i64: 1, 4>}, {transform_indices = @transform_4, window_bounds = array<i64: 512, 4>}, {transform_indices = @transform_5, window_bounds = array<i64: 512, 4>}]} {
    %c0 = arith.constant 0 : index
    %c0_0 = arith.constant 0 : index
    %0 = vector.load %arg1[%c0, %c0_0] : memref<512x2xbf16, #tpu.memory_space<vmem>>, vector<512x2xbf16>
    %c0_1 = arith.constant 0 : index
    %c0_2 = arith.constant 0 : index
    %1 = vector.load %arg2[%c0_1, %c0_2] : memref<2x4xbf16, #tpu.memory_space<vmem>>, vector<2x4xbf16>
    %cst = arith.constant dense<0.000000e+00> : vector<512x4xf32>
    %2 = tpu.matmul %0, %1, %cst {dimension_numbers = #tpu.dot_dimension_numbers<[1], [0], [0], [1], [0, 0, 1, 1], [], []>} : vector<512x2xbf16>, vector<2x4xbf16>, vector<512x4xf32> -> vector<512x4xf32>
    %c0_3 = arith.constant 0 : index
    %c0_4 = arith.constant 0 : index
    %3 = vector.load %arg3[%c0_3, %c0_4] : memref<1x4xf32, #tpu.memory_space<vmem>>, vector<1x4xf32>
    %4 = vector.broadcast %3 : vector<1x4xf32> to vector<512x4xf32>
    %5 = arith.mulf %2, %4 : vector<512x4xf32>
    %c0_5 = arith.constant 0 : index
    %c0_6 = arith.constant 0 : index
    %6 = vector.load %arg4[%c0_5, %c0_6] : memref<1x4xf32, #tpu.memory_space<vmem>>, vector<1x4xf32>
    %7 = vector.broadcast %6 : vector<1x4xf32> to vector<512x4xf32>
    %8 = arith.addf %5, %7 : vector<512x4xf32>
    %cst_7 = arith.constant 0.000000e+00 : f32
    %9 = vector.broadcast %cst_7 : f32 to vector<512x4xf32>
    %10 = arith.maximumf %8, %9 : vector<512x4xf32>
    %c0_8 = arith.constant 0 : index
    %c0_9 = arith.constant 0 : index
    %11 = vector.load %arg5[%c0_8, %c0_9] : memref<512x4xbf16, #tpu.memory_space<vmem>>, vector<512x4xbf16>
    %12 = arith.extf %11 : vector<512x4xbf16> to vector<512x4xf32>
    %13 = arith.addf %10, %12 : vector<512x4xf32>
    %14 = arith.truncf %13 : vector<512x4xf32> to vector<512x4xbf16>
    %c0_10 = arith.constant 0 : index
    %c0_11 = arith.constant 0 : index
    %15 = vector.load %arg6[%c0_10, %c0_11] : memref<512x4xbf16, #tpu.memory_space<vmem>>, vector<512x4xbf16>
    tpu.vector_store %arg6[%c0_10, %c0_11], %14 {strides = array<i32>} : memref<512x4xbf16, #tpu.memory_space<vmem>>, vector<512x4xbf16>,
    return
  }
  func.func @transform_0(%arg0: i32) -> (i32, i32) {
    %c0_i32 = arith.constant 0 : i32
    %c0_i32_0 = arith.constant 0 : i32
    return %arg0, %c0_i32 : i32, i32
  }
  func.func @transform_1(%arg0: i32) -> (i32, i32) {
    %c0_i32 = arith.constant 0 : i32
    %c0_i32_0 = arith.constant 0 : i32
    %c0_i32_1 = arith.constant 0 : i32
    return %c0_i32, %c0_i32_0 : i32, i32
  }
  func.func @transform_2(%arg0: i32) -> (i32, i32) {
    %c0_i32 = arith.constant 0 : i32
    %c0_i32_0 = arith.constant 0 : i32
    %c0_i32_1 = arith.constant 0 : i32
    return %c0_i32, %c0_i32_0 : i32, i32
  }
  func.func @transform_3(%arg0: i32) -> (i32, i32) {
    %c0_i32 = arith.constant 0 : i32
    %c0_i32_0 = arith.constant 0 : i32
    %c0_i32_1 = arith.constant 0 : i32
    return %c0_i32, %c0_i32_0 : i32, i32
  }
  func.func @transform_4(%arg0: i32) -> (i32, i32) {
    %c0_i32 = arith.constant 0 : i32
    %c0_i32_0 = arith.constant 0 : i32
    return %arg0, %c0_i32 : i32, i32
  }
  func.func @transform_5(%arg0: i32) -> (i32, i32) {
    %c0_i32 = arith.constant 0 : i32
    %c0_i32_0 = arith.constant 0 : i32
    return %arg0, %c0_i32 : i32, i32
  }
}

module attributes {stable_mosaic.version = 11 : i64} {
  func.func @_conv3x3_bn_relu_kernel(%arg0: i32, %arg1: memref<1x362x4xbf16, #tpu.memory_space<vmem>>, %arg2: memref<9x4x8xbf16, #tpu.memory_space<vmem>>, %arg3: memref<1x8xf32, #tpu.memory_space<vmem>>, %arg4: memref<1x8xf32, #tpu.memory_space<vmem>>, %arg5: memref<1x324x8xf32, #tpu.memory_space<vmem>>, %arg6: memref<1x324x8xf32, #tpu.memory_space<vmem>>) attributes {dimension_semantics = [#tpu.dimension_semantics<parallel>], iteration_bounds = array<i64: 2>, scalar_prefetch = 0 : i64, scratch_operands = 0 : i64, tpu.core_type = #tpu.core_type<tc>, window_params = [{transform_indices = @transform_0, window_bounds = array<i64: 1, 362, 4>}, {pipeline_mode = #tpu.pipeline_mode<synchronous>, transform_indices = @transform_1, window_bounds = array<i64: 9, 4, 8>}, {pipeline_mode = #tpu.pipeline_mode<synchronous>, transform_indices = @transform_2, window_bounds = array<i64: 1, 8>}, {pipeline_mode = #tpu.pipeline_mode<synchronous>, transform_indices = @transform_3, window_bounds = array<i64: 1, 8>}, {transform_indices = @transform_4, window_bounds = array<i64: 1, 324, 8>}, {transform_indices = @transform_5, window_bounds = array<i64: 1, 324, 8>}]} {
    %cst = arith.constant 0.000000e+00 : f32
    %0 = vector.broadcast %cst : f32 to vector<324x8xf32>
    %c0 = arith.constant 0 : index
    %c0_0 = arith.constant 0 : index
    %c0_1 = arith.constant 0 : index
    %1 = vector.load %arg1[%c0, %c0_0, %c0_1] : memref<1x362x4xbf16, #tpu.memory_space<vmem>>, vector<1x324x4xbf16>
    %2 = vector.shape_cast %1 : vector<1x324x4xbf16> to vector<324x4xbf16>
    %c0_2 = arith.constant 0 : index
    %c0_3 = arith.constant 0 : index
    %c0_4 = arith.constant 0 : index
    %3 = vector.load %arg2[%c0_2, %c0_3, %c0_4] : memref<9x4x8xbf16, #tpu.memory_space<vmem>>, vector<1x4x8xbf16>
    %4 = vector.shape_cast %3 : vector<1x4x8xbf16> to vector<4x8xbf16>
    %cst_5 = arith.constant dense<0.000000e+00> : vector<324x8xf32>
    %5 = tpu.matmul %2, %4, %cst_5 {dimension_numbers = #tpu.dot_dimension_numbers<[1], [0], [0], [1], [0, 0, 1, 1], [], []>} : vector<324x4xbf16>, vector<4x8xbf16>, vector<324x8xf32> -> vector<324x8xf32>
    %6 = arith.addf %0, %5 : vector<324x8xf32>
    %c0_6 = arith.constant 0 : index
    %c1 = arith.constant 1 : index
    %c0_7 = arith.constant 0 : index
    %7 = vector.load %arg1[%c0_6, %c1, %c0_7] : memref<1x362x4xbf16, #tpu.memory_space<vmem>>, vector<1x324x4xbf16>
    %8 = vector.shape_cast %7 : vector<1x324x4xbf16> to vector<324x4xbf16>
    %c1_8 = arith.constant 1 : index
    %c0_9 = arith.constant 0 : index
    %c0_10 = arith.constant 0 : index
    %9 = vector.load %arg2[%c1_8, %c0_9, %c0_10] : memref<9x4x8xbf16, #tpu.memory_space<vmem>>, vector<1x4x8xbf16>
    %10 = vector.shape_cast %9 : vector<1x4x8xbf16> to vector<4x8xbf16>
    %cst_11 = arith.constant dense<0.000000e+00> : vector<324x8xf32>
    %11 = tpu.matmul %8, %10, %cst_11 {dimension_numbers = #tpu.dot_dimension_numbers<[1], [0], [0], [1], [0, 0, 1, 1], [], []>} : vector<324x4xbf16>, vector<4x8xbf16>, vector<324x8xf32> -> vector<324x8xf32>
    %12 = arith.addf %6, %11 : vector<324x8xf32>
    %c0_12 = arith.constant 0 : index
    %c2 = arith.constant 2 : index
    %c0_13 = arith.constant 0 : index
    %13 = vector.load %arg1[%c0_12, %c2, %c0_13] : memref<1x362x4xbf16, #tpu.memory_space<vmem>>, vector<1x324x4xbf16>
    %14 = vector.shape_cast %13 : vector<1x324x4xbf16> to vector<324x4xbf16>
    %c2_14 = arith.constant 2 : index
    %c0_15 = arith.constant 0 : index
    %c0_16 = arith.constant 0 : index
    %15 = vector.load %arg2[%c2_14, %c0_15, %c0_16] : memref<9x4x8xbf16, #tpu.memory_space<vmem>>, vector<1x4x8xbf16>
    %16 = vector.shape_cast %15 : vector<1x4x8xbf16> to vector<4x8xbf16>
    %cst_17 = arith.constant dense<0.000000e+00> : vector<324x8xf32>
    %17 = tpu.matmul %14, %16, %cst_17 {dimension_numbers = #tpu.dot_dimension_numbers<[1], [0], [0], [1], [0, 0, 1, 1], [], []>} : vector<324x4xbf16>, vector<4x8xbf16>, vector<324x8xf32> -> vector<324x8xf32>
    %18 = arith.addf %12, %17 : vector<324x8xf32>
    %c0_18 = arith.constant 0 : index
    %c18 = arith.constant 18 : index
    %c0_19 = arith.constant 0 : index
    %19 = vector.load %arg1[%c0_18, %c18, %c0_19] : memref<1x362x4xbf16, #tpu.memory_space<vmem>>, vector<1x324x4xbf16>
    %20 = vector.shape_cast %19 : vector<1x324x4xbf16> to vector<324x4xbf16>
    %c3 = arith.constant 3 : index
    %c0_20 = arith.constant 0 : index
    %c0_21 = arith.constant 0 : index
    %21 = vector.load %arg2[%c3, %c0_20, %c0_21] : memref<9x4x8xbf16, #tpu.memory_space<vmem>>, vector<1x4x8xbf16>
    %22 = vector.shape_cast %21 : vector<1x4x8xbf16> to vector<4x8xbf16>
    %cst_22 = arith.constant dense<0.000000e+00> : vector<324x8xf32>
    %23 = tpu.matmul %20, %22, %cst_22 {dimension_numbers = #tpu.dot_dimension_numbers<[1], [0], [0], [1], [0, 0, 1, 1], [], []>} : vector<324x4xbf16>, vector<4x8xbf16>, vector<324x8xf32> -> vector<324x8xf32>
    %24 = arith.addf %18, %23 : vector<324x8xf32>
    %c0_23 = arith.constant 0 : index
    %c19 = arith.constant 19 : index
    %c0_24 = arith.constant 0 : index
    %25 = vector.load %arg1[%c0_23, %c19, %c0_24] : memref<1x362x4xbf16, #tpu.memory_space<vmem>>, vector<1x324x4xbf16>
    %26 = vector.shape_cast %25 : vector<1x324x4xbf16> to vector<324x4xbf16>
    %c4 = arith.constant 4 : index
    %c0_25 = arith.constant 0 : index
    %c0_26 = arith.constant 0 : index
    %27 = vector.load %arg2[%c4, %c0_25, %c0_26] : memref<9x4x8xbf16, #tpu.memory_space<vmem>>, vector<1x4x8xbf16>
    %28 = vector.shape_cast %27 : vector<1x4x8xbf16> to vector<4x8xbf16>
    %cst_27 = arith.constant dense<0.000000e+00> : vector<324x8xf32>
    %29 = tpu.matmul %26, %28, %cst_27 {dimension_numbers = #tpu.dot_dimension_numbers<[1], [0], [0], [1], [0, 0, 1, 1], [], []>} : vector<324x4xbf16>, vector<4x8xbf16>, vector<324x8xf32> -> vector<324x8xf32>
    %30 = arith.addf %24, %29 : vector<324x8xf32>
    %c0_28 = arith.constant 0 : index
    %c20 = arith.constant 20 : index
    %c0_29 = arith.constant 0 : index
    %31 = vector.load %arg1[%c0_28, %c20, %c0_29] : memref<1x362x4xbf16, #tpu.memory_space<vmem>>, vector<1x324x4xbf16>
    %32 = vector.shape_cast %31 : vector<1x324x4xbf16> to vector<324x4xbf16>
    %c5 = arith.constant 5 : index
    %c0_30 = arith.constant 0 : index
    %c0_31 = arith.constant 0 : index
    %33 = vector.load %arg2[%c5, %c0_30, %c0_31] : memref<9x4x8xbf16, #tpu.memory_space<vmem>>, vector<1x4x8xbf16>
    %34 = vector.shape_cast %33 : vector<1x4x8xbf16> to vector<4x8xbf16>
    %cst_32 = arith.constant dense<0.000000e+00> : vector<324x8xf32>
    %35 = tpu.matmul %32, %34, %cst_32 {dimension_numbers = #tpu.dot_dimension_numbers<[1], [0], [0], [1], [0, 0, 1, 1], [], []>} : vector<324x4xbf16>, vector<4x8xbf16>, vector<324x8xf32> -> vector<324x8xf32>
    %36 = arith.addf %30, %35 : vector<324x8xf32>
    %c0_33 = arith.constant 0 : index
    %c36 = arith.constant 36 : index
    %c0_34 = arith.constant 0 : index
    %37 = vector.load %arg1[%c0_33, %c36, %c0_34] : memref<1x362x4xbf16, #tpu.memory_space<vmem>>, vector<1x324x4xbf16>
    %38 = vector.shape_cast %37 : vector<1x324x4xbf16> to vector<324x4xbf16>
    %c6 = arith.constant 6 : index
    %c0_35 = arith.constant 0 : index
    %c0_36 = arith.constant 0 : index
    %39 = vector.load %arg2[%c6, %c0_35, %c0_36] : memref<9x4x8xbf16, #tpu.memory_space<vmem>>, vector<1x4x8xbf16>
    %40 = vector.shape_cast %39 : vector<1x4x8xbf16> to vector<4x8xbf16>
    %cst_37 = arith.constant dense<0.000000e+00> : vector<324x8xf32>
    %41 = tpu.matmul %38, %40, %cst_37 {dimension_numbers = #tpu.dot_dimension_numbers<[1], [0], [0], [1], [0, 0, 1, 1], [], []>} : vector<324x4xbf16>, vector<4x8xbf16>, vector<324x8xf32> -> vector<324x8xf32>
    %42 = arith.addf %36, %41 : vector<324x8xf32>
    %c0_38 = arith.constant 0 : index
    %c37 = arith.constant 37 : index
    %c0_39 = arith.constant 0 : index
    %43 = vector.load %arg1[%c0_38, %c37, %c0_39] : memref<1x362x4xbf16, #tpu.memory_space<vmem>>, vector<1x324x4xbf16>
    %44 = vector.shape_cast %43 : vector<1x324x4xbf16> to vector<324x4xbf16>
    %c7 = arith.constant 7 : index
    %c0_40 = arith.constant 0 : index
    %c0_41 = arith.constant 0 : index
    %45 = vector.load %arg2[%c7, %c0_40, %c0_41] : memref<9x4x8xbf16, #tpu.memory_space<vmem>>, vector<1x4x8xbf16>
    %46 = vector.shape_cast %45 : vector<1x4x8xbf16> to vector<4x8xbf16>
    %cst_42 = arith.constant dense<0.000000e+00> : vector<324x8xf32>
    %47 = tpu.matmul %44, %46, %cst_42 {dimension_numbers = #tpu.dot_dimension_numbers<[1], [0], [0], [1], [0, 0, 1, 1], [], []>} : vector<324x4xbf16>, vector<4x8xbf16>, vector<324x8xf32> -> vector<324x8xf32>
    %48 = arith.addf %42, %47 : vector<324x8xf32>
    %c0_43 = arith.constant 0 : index
    %c38 = arith.constant 38 : index
    %c0_44 = arith.constant 0 : index
    %49 = vector.load %arg1[%c0_43, %c38, %c0_44] : memref<1x362x4xbf16, #tpu.memory_space<vmem>>, vector<1x324x4xbf16>
    %50 = vector.shape_cast %49 : vector<1x324x4xbf16> to vector<324x4xbf16>
    %c8 = arith.constant 8 : index
    %c0_45 = arith.constant 0 : index
    %c0_46 = arith.constant 0 : index
    %51 = vector.load %arg2[%c8, %c0_45, %c0_46] : memref<9x4x8xbf16, #tpu.memory_space<vmem>>, vector<1x4x8xbf16>
    %52 = vector.shape_cast %51 : vector<1x4x8xbf16> to vector<4x8xbf16>
    %cst_47 = arith.constant dense<0.000000e+00> : vector<324x8xf32>
    %53 = tpu.matmul %50, %52, %cst_47 {dimension_numbers = #tpu.dot_dimension_numbers<[1], [0], [0], [1], [0, 0, 1, 1], [], []>} : vector<324x4xbf16>, vector<4x8xbf16>, vector<324x8xf32> -> vector<324x8xf32>
    %54 = arith.addf %48, %53 : vector<324x8xf32>
    %c0_48 = arith.constant 0 : index
    %c0_49 = arith.constant 0 : index
    %55 = vector.load %arg3[%c0_48, %c0_49] : memref<1x8xf32, #tpu.memory_space<vmem>>, vector<1x8xf32>
    %56 = vector.broadcast %55 : vector<1x8xf32> to vector<324x8xf32>
    %57 = arith.mulf %54, %56 : vector<324x8xf32>
    %c0_50 = arith.constant 0 : index
    %c0_51 = arith.constant 0 : index
    %58 = vector.load %arg4[%c0_50, %c0_51] : memref<1x8xf32, #tpu.memory_space<vmem>>, vector<1x8xf32>
    %59 = vector.broadcast %58 : vector<1x8xf32> to vector<324x8xf32>
    %60 = arith.addf %57, %59 : vector<324x8xf32>
    %cst_52 = arith.constant 0.000000e+00 : f32
    %61 = vector.broadcast %cst_52 : f32 to vector<324x8xf32>
    %62 = arith.maximumf %60, %61 : vector<324x8xf32>
    %c0_53 = arith.constant 0 : index
    %c0_54 = arith.constant 0 : index
    %c0_55 = arith.constant 0 : index
    %63 = vector.load %arg5[%c0_53, %c0_54, %c0_55] : memref<1x324x8xf32, #tpu.memory_space<vmem>>, vector<1x324x8xf32>
    %64 = vector.shape_cast %63 : vector<1x324x8xf32> to vector<324x8xf32>
    %65 = arith.addf %62, %64 : vector<324x8xf32>
    %c0_56 = arith.constant 0 : index
    %c0_57 = arith.constant 0 : index
    %c0_58 = arith.constant 0 : index
    %66 = vector.load %arg6[%c0_56, %c0_57, %c0_58] : memref<1x324x8xf32, #tpu.memory_space<vmem>>, vector<1x324x8xf32>
    %67 = vector.shape_cast %66 : vector<1x324x8xf32> to vector<324x8xf32>
    %68 = vector.shape_cast %65 : vector<324x8xf32> to vector<1x324x8xf32>
    tpu.vector_store %arg6[%c0_56, %c0_57, %c0_58], %68 {strides = array<i32>} : memref<1x324x8xf32, #tpu.memory_space<vmem>>, vector<1x324x8xf32>,
    return
  }
  func.func @transform_0(%arg0: i32) -> (i32, i32, i32) {
    %c0_i32 = arith.constant 0 : i32
    %c0_i32_0 = arith.constant 0 : i32
    %c0_i32_1 = arith.constant 0 : i32
    return %arg0, %c0_i32, %c0_i32_0 : i32, i32, i32
  }
  func.func @transform_1(%arg0: i32) -> (i32, i32, i32) {
    %c0_i32 = arith.constant 0 : i32
    %c0_i32_0 = arith.constant 0 : i32
    %c0_i32_1 = arith.constant 0 : i32
    %c0_i32_2 = arith.constant 0 : i32
    return %c0_i32, %c0_i32_0, %c0_i32_1 : i32, i32, i32
  }
  func.func @transform_2(%arg0: i32) -> (i32, i32) {
    %c0_i32 = arith.constant 0 : i32
    %c0_i32_0 = arith.constant 0 : i32
    %c0_i32_1 = arith.constant 0 : i32
    return %c0_i32, %c0_i32_0 : i32, i32
  }
  func.func @transform_3(%arg0: i32) -> (i32, i32) {
    %c0_i32 = arith.constant 0 : i32
    %c0_i32_0 = arith.constant 0 : i32
    %c0_i32_1 = arith.constant 0 : i32
    return %c0_i32, %c0_i32_0 : i32, i32
  }
  func.func @transform_4(%arg0: i32) -> (i32, i32, i32) {
    %c0_i32 = arith.constant 0 : i32
    %c0_i32_0 = arith.constant 0 : i32
    %c0_i32_1 = arith.constant 0 : i32
    return %arg0, %c0_i32, %c0_i32_0 : i32, i32, i32
  }
  func.func @transform_5(%arg0: i32) -> (i32, i32, i32) {
    %c0_i32 = arith.constant 0 : i32
    %c0_i32_0 = arith.constant 0 : i32
    %c0_i32_1 = arith.constant 0 : i32
    return %arg0, %c0_i32, %c0_i32_0 : i32, i32, i32
  }
}

</mosaic_0001>

<bundles_post_ra>
// kernel: fsm_forward.5
= control target key start
LH: loop header
LB: loop body
LE: loop exit
PB: predicated region body
PF: predicated region fallthrough
CT: control target
= control target key end

     0   :  { %s1595_s15 = smov 0   ;;  %s2224_s0 = inlined_call_operand.vmem [shape: bf16[2,256,4], index: 0, kind: input, shape index: {}]   ;;  %s2225_s1 = inlined_call_operand.vmem [shape: bf16[3,4,2], index: 1, kind: input, shape index: {}]   ;;  %s2226_s2 = inlined_call_operand.vmem [shape: f32[3,1,2], index: 2, kind: input, shape index: {}]   ;;  %s2227_s3 = inlined_call_operand.vmem [shape: f32[3,1,2], index: 3, kind: input, shape index: {}]   ;;  %s2228_s4 = inlined_call_operand.vmem [shape: bf16[2,256,2], index: 4, kind: output, shape index: {}]  }
   0x1 LB: > { %s1341_s16 = sadd.s32 4294967295, %s1566_s15   ;;  %p1345_p0 = scmp.ge.s32.totalorder %s1566_s15, 1  ;;  %s1566_s15 = sphi %s1595_s15, %s14_s15  }
   0x2   : > { %p162_p1 = scmp.lt.s32.totalorder %s1566_s15, 3 }
   0x4   : > { %p163_p2 = pnand %p1345_p0, %p162_p1 }
   0x5   : > { %p188_p3 = scmp.lt.s32.totalorder (!%p163_p2), %s1341_s16, 1 }
   0x6   : > { %166 = sbr.rel (%p163_p2) target bundleno = 1003 (0x3eb), region = 36 }
   0xb   : > { %vm361_vm0 = vcmask 1041408   ;;  %v1430_v0 = vld [vmem:[%s2225_s1 + $0x2] sm:$0x3]  ;;  %v1449_v1 = vld [vmem:[%s2225_s1 + $0x4] sm:$0x3]  ;;  %s2230_s16 = smov (!%p188_p3, %s1341_s16), 1 }
   0xc   : > { %v561_v2 = vsel %vm361_vm0, %v1430_v0, 0  ;;  %v761_v3 = vsel %vm361_vm0, %v1449_v1, 0  ;;  %s1486_s21 = sshll.u32 %s2230_s16, 7  ;;  %vm312_vm1 = vcmask 31744   ;;  %v231_v19 = vld [vmem:[%s2225_s1] sm:$0x3] }
   0xd   : > { %570 = vmatpush.bf16.msra.mxu1 %v561_v2  ;;  %770 = vmatpush.bf16.msra.mxu2 %v761_v3  ;;  %s1619_s24 = scalar_lea.vmem %s2224_s0, %s1486_s21  ;;  %v363_v20 = vsel %vm361_vm0, %v231_v19, 0  ;;  %v1765_v51 = vld [vmem:[%s2226_s2 + $0x1] ss:$0 sm:$0xff]  ;;  %v1773_v55 = vld [vmem:[%s2226_s2 + $0x2] ss:$0 sm:$0xff]  ;;  %vm1128_vm2 = vcmask 1040384   ;;  %s2141_s17 = scalar_lea.vmem %s2228_s4, %s1486_s21 }
   0xe   : > { %v1488_v4 = vld [vmem:[%s1619_s24] sm:$0xff]  ;;  %v1489_v5 = vld [vmem:[%s1619_s24 + $0x8] sm:$0xff]  ;;  %v1490_v6 = vld [vmem:[%s1619_s24 + $0x10] sm:$0xff]  ;;  %372 = vmatpush.bf16.msra.mxu0 %v363_v20  ;;  %vm1079_vm3 = vcmask 15360   ;;  %vm1253_vm4 = vcmask 11264  }
   0xf   : > { %v1491_v7 = vld [vmem:[%s1619_s24 + $0x18] sm:$0xff]  ;;  %v1492_v8 = vld [vmem:[%s1619_s24 + $0x20] sm:$0xff]  ;;  %v1637_v9 = vld [vmem:[%s1619_s24 + $0x28] sm:$0xff] }
  0x10   : > { %1431 = vmatmul.msk.bf16.vlgmr.msra.gmra.mxu1 %vm312_vm1, %v1488_v4  ;;  %1450 = vmatmul.msk.bf16.vlgmr.msra.gmra.mxu2 %vm312_vm1, %v1488_v4  ;;  %v1644_v10 = vld [vmem:[%s1619_s24 + $0x30] sm:$0xff]  ;;  %v1651_v11 = vld [vmem:[%s1619_s24 + $0x38] sm:$0xff]  ;;  %v1658_v12 = vld [vmem:[%s1619_s24 + $0x40] sm:$0xff] }
  0x11   : > { %v1673_v17 = vld [vmem:[%s1619_s24 + $0x48] sm:$0xff]  ;;  %1414 = vmatmul.msk.bf16.vlgmr.msra.gmra.mxu0 %vm312_vm1, %v1488_v4  ;;  %v1693_v24 = vld [vmem:[%s1619_s24 + $0x50] sm:$0xff]  ;;  %v1709_v29 = vld [vmem:[%s1619_s24 + $0x58] sm:$0xff] }
  0x12   : > { %v1725_v34 = vld [vmem:[%s1619_s24 + $0x60] sm:$0xff]  ;;  %v1739_v39 = vld [vmem:[%s1619_s24 + $0x68] sm:$0xff]  ;;  %v1747_v44 = vld [vmem:[%s1619_s24 + $0x70] sm:$0xff] }
  0x13   : > { %v1756_v49 = vld [vmem:[%s1619_s24 + $0x78] sm:$0xff]  ;;  %v1780_v58 = vld [vmem:[%s2227_s3 + $0x1] ss:$0 sm:$0xff]  ;;  %v1789_v63 = vld [vmem:[%s2227_s3 + $0x2] ss:$0 sm:$0xff] }
  0x20   : > { %1432 = vmatmul.msk.bf16.gmra.mxu1 %vm312_vm1, %v1489_v5  ;;  %1451 = vmatmul.msk.bf16.gmra.mxu2 %vm312_vm1, %v1489_v5 }
  0x21   : > { %1415 = vmatmul.msk.bf16.gmra.mxu0 %vm312_vm1, %v1489_v5 }
  0x30   : > { %1433 = vmatmul.msk.bf16.gmra.mxu1 %vm312_vm1, %v1490_v6  ;;  %1452 = vmatmul.msk.bf16.gmra.mxu2 %vm312_vm1, %v1490_v6 }
  0x31   : > { %1416 = vmatmul.msk.bf16.gmra.mxu0 %vm312_vm1, %v1490_v6 }
  0x40   : > { %1434 = vmatmul.msk.bf16.gmra.mxu1 %vm312_vm1, %v1491_v7  ;;  %1453 = vmatmul.msk.bf16.gmra.mxu2 %vm312_vm1, %v1491_v7 }
  0x41   : > { %1417 = vmatmul.msk.bf16.gmra.mxu0 %vm312_vm1, %v1491_v7 }
  0x50   : > { %1435 = vmatmul.msk.bf16.gmra.mxu1 %vm312_vm1, %v1492_v8  ;;  %1454 = vmatmul.msk.bf16.gmra.mxu2 %vm312_vm1, %v1492_v8 }
  0x51   : > { %1418 = vmatmul.msk.bf16.gmra.mxu0 %vm312_vm1, %v1492_v8 }
  0x60   : > { %1436 = vmatmul.msk.bf16.gmra.mxu1 %vm312_vm1, %v1637_v9  ;;  %1455 = vmatmul.msk.bf16.gmra.mxu2 %vm312_vm1, %v1637_v9 }
  0x61   : > { %1419 = vmatmul.msk.bf16.gmra.mxu0 %vm312_vm1, %v1637_v9 }
  0x70   : > { %1437 = vmatmul.msk.bf16.gmra.mxu1 %vm312_vm1, %v1644_v10  ;;  %1456 = vmatmul.msk.bf16.gmra.mxu2 %vm312_vm1, %v1644_v10 }
  0x71   : > { %1420 = vmatmul.msk.bf16.gmra.mxu0 %vm312_vm1, %v1644_v10 }
  0x80   : > { %1438 = vmatmul.msk.bf16.gmra.mxu1 %vm312_vm1, %v1651_v11  ;;  %1457 = vmatmul.msk.bf16.gmra.mxu2 %vm312_vm1, %v1651_v11 }
  0x81   : > { %1421 = vmatmul.msk.bf16.gmra.mxu0 %vm312_vm1, %v1651_v11 }
  0x8d   : > { %v1660_v13 = vpop.f32.mrf.mxu1 }
  0x90   : > { %1439 = vmatmul.msk.bf16.gmra.mxu1 %vm312_vm1, %v1658_v12  ;;  %1458 = vmatmul.msk.bf16.gmra.mxu2 %vm312_vm1, %v1658_v12 }
  0x91   : > { %1422 = vmatmul.msk.bf16.gmra.mxu0 %vm312_vm1, %v1658_v12  ;;  %v1886_v12 = vld [vmem:[%s2226_s2] ss:$0 sm:$0xff] }
  0x93   : > { %v1666_v14 = vpop.f32.mrf.mxu2 }
  0x95   : > { %v1668_v15 = vpop.f32.mrf.mxu1 }
  0x9b   : > { %v1670_v16 = vpop.f32.mrf.mxu2 }
  0x9d   : > { %v1675_v18 = vpop.f32.mrf.mxu1 }
  0xa0   : > { %1440 = vmatmul.msk.bf16.gmra.mxu1 %vm312_vm1, %v1673_v17  ;;  %1459 = vmatmul.msk.bf16.gmra.mxu2 %vm312_vm1, %v1673_v17 }
  0xa1   : > { %1423 = vmatmul.msk.bf16.gmra.mxu0 %vm312_vm1, %v1673_v17 }
  0xa3   : > { %v1685_v21 = vpop.f32.mrf.mxu2 }
  0xa5   : > { %v1688_v22 = vpop.f32.mrf.mxu1 }
  0xab   : > { %v1690_v23 = vpop.f32.mrf.mxu2 }
  0xad   : > { %v1695_v25 = vpop.f32.mrf.mxu1 }
  0xb0   : > { %1441 = vmatmul.msk.bf16.gmra.mxu1 %vm312_vm1, %v1693_v24  ;;  %1460 = vmatmul.msk.bf16.gmra.mxu2 %vm312_vm1, %v1693_v24 }
  0xb1   : > { %1424 = vmatmul.msk.bf16.gmra.mxu0 %vm312_vm1, %v1693_v24 }
  0xb3   : > { %v1701_v26 = vpop.f32.mrf.mxu2 }
  0xb5   : > { %v1704_v27 = vpop.f32.mrf.mxu1 }
  0xbb   : > { %v1706_v28 = vpop.f32.mrf.mxu2 }
  0xbd   : > { %v1711_v30 = vpop.f32.mrf.mxu1 }
  0xc0   : > { %1442 = vmatmul.msk.bf16.gmra.mxu1 %vm312_vm1, %v1709_v29  ;;  %1461 = vmatmul.msk.bf16.gmra.mxu2 %vm312_vm1, %v1709_v29 }
  0xc1   : > { %1425 = vmatmul.msk.bf16.gmra.mxu0 %vm312_vm1, %v1709_v29 }
  0xc3   : > { %v1717_v31 = vpop.f32.mrf.mxu2 }
  0xc5   : > { %v1720_v32 = vpop.f32.mrf.mxu1 }
  0xcb   : > { %v1722_v33 = vpop.f32.mrf.mxu2 }
  0xcc   : > { %v864_v11 = vmul.f32 %v1773_v55, %v1722_v33 }
  0xcd   : > { %v1727_v35 = vpop.f32.mrf.mxu1 }
  0xd0   : > { %1443 = vmatmul.msk.bf16.gmra.mxu1 %vm312_vm1, %v1725_v34  ;;  %1462 = vmatmul.msk.bf16.gmra.mxu2 %vm312_vm1, %v1725_v34 }
  0xd3   : > { %v1733_v36 = vpop.f32.mrf.mxu2 }
  0xd5   : > { %v594_v37 = vpop.f32.mrf.mxu1 }
  0xdb   : > { %v1736_v38 = vpop.f32.mrf.mxu2 }
  0xdd   : > { %v597_v40 = vpop.f32.mrf.mxu1 }
  0xe0   : > { %1444 = vmatmul.msk.bf16.gmra.mxu1 %vm312_vm1, %v1739_v39  ;;  %1463 = vmatmul.msk.bf16.gmra.mxu2 %vm312_vm1, %v1739_v39 }
  0xe3   : > { %v797_v41 = vpop.f32.mrf.mxu2 }
  0xe5   : > { %v599_v42 = vpop.f32.mrf.mxu1 }
  0xe6   : > { %v668_v7 = vmul.f32 %v1765_v51, %v599_v42  ;;  %v666_v42 = vmul.f32 %v1765_v51, %v594_v37  ;;  %v866_v37 = vmul.f32 %v1773_v55, %v1736_v38 }
  0xeb   : > { %v799_v43 = vpop.f32.mrf.mxu2 }
  0xed   : > { %v602_v45 = vpop.f32.mrf.mxu1 }
  0xee   : > { %v669_v62 = vmul.f32 %v1765_v51, %v602_v45 }
  0xf0   : > { %1445 = vmatmul.msk.bf16.gmra.mxu1 %vm312_vm1, %v1747_v44  ;;  %1464 = vmatmul.msk.bf16.gmra.mxu2 %vm312_vm1, %v1747_v44  ;;  %v706_v9 = vadd.f32 %v1780_v58, %v669_v62  ;;  %v703_v62 = vadd.f32 %v1780_v58, %v666_v42  ;;  %v861_v42 = vmul.f32 %v1773_v55, %v1701_v26 }
  0xf3   : > { %v802_v46 = vpop.f32.mrf.mxu2 }
  0xf4   : > { %v869_v10 = vmul.f32 %v1773_v55, %v802_v46  ;;  %v867_v46 = vmul.f32 %v1773_v55, %v797_v41  ;;  %v664_v41 = vmul.f32 %v1765_v51, %v1720_v32 }
  0xf5   : > { %v604_v47 = vpop.f32.mrf.mxu1 }
  0xf6   : > { %v670_v56 = vmul.f32 %v1765_v51, %v604_v47  ;;  %v667_v47 = vmul.f32 %v1765_v51, %v597_v40 }
  0xf8   : > { %v707_v2 = vadd.f32 %v1780_v58, %v670_v56  ;;  %v906_v56 = vadd.f32 %v1789_v63, %v869_v10 }
  0xfa   : > { %v739_v45 = vmax.f32 %v707_v2, 0.0  ;;  %v938_v38 = vmax.f32 %v906_v56, 0.0  ;;  %v663_v2 = vmul.f32 %v1765_v51, %v1711_v30  ;;  %v863_v30 = vmul.f32 %v1773_v55, %v1717_v31 }
  0xfb   : > { %v804_v48 = vpop.f32.mrf.mxu2  ;;  %v661_v31 = vmul.f32 %v1765_v51, %v1695_v25  ;;  %v860_v25 = vmul.f32 %v1773_v55, %v1690_v23  ;;  %v658_v23 = vmul.f32 %v1765_v51, %v1668_v15 }
  0xfc   : > { %v870_v0 = vmul.f32 %v1773_v55, %v804_v48  ;;  %v868_v48 = vmul.f32 %v1773_v55, %v799_v43  ;;  %v704_v43 = vadd.f32 %v1780_v58, %v667_v47 }
  0xfd   : > { %v607_v50 = vpop.f32.mrf.mxu1 }
  0xfe   : > { %v671_v53 = vmul.f32 %v1765_v51, %v607_v50  ;;  %v907_v19 = vadd.f32 %v1789_v63, %v870_v0  ;;  %v865_v0 = vmul.f32 %v1773_v55, %v1733_v36  ;;  %v736_v32 = vmax.f32 %v704_v43, 0.0 }
  0xff   : > { %v662_v36 = vmul.f32 %v1765_v51, %v1704_v27  ;;  %v862_v27 = vmul.f32 %v1773_v55, %v1706_v28  ;;  %v660_v28 = vmul.f32 %v1765_v51, %v1688_v22  ;;  %v698_v43 = vadd.f32 %v1780_v58, %v661_v31 }
 0x100   : > { %1446 = vmatmul.msk.bf16.gmra.mxu1 %vm312_vm1, %v1756_v49  ;;  %1465 = vmatmul.msk.bf16.gmra.mxu2 %vm312_vm1, %v1756_v49  ;;  %v708_v61 = vadd.f32 %v1780_v58, %v671_v53  ;;  %v738_v53 = vmax.f32 %v706_v9, 0.0  ;;  %v902_v9 = vadd.f32 %v1789_v63, %v865_v0  ;;  %v898_v22 = vadd.f32 %v1789_v63, %v861_v42 }
 0x101   : > { %v899_v56 = vadd.f32 %v1789_v63, %v862_v27  ;;  %v730_v15 = vmax.f32 %v698_v43, 0.0 }
 0x102   : > { %v740_v6 = vmax.f32 %v708_v61, 0.0 }
 0x103   : > { %v807_v52 = vpop.f32.mrf.mxu2  ;;  %v931_v0 = vmax.f32 %v899_v56, 0.0 }
 0x104   : > { %v871_v59 = vmul.f32 %v1773_v55, %v807_v52 }
 0x105   : > { %v609_v54 = vpop.f32.mrf.mxu1 }
 0x106   : > { %v672_v57 = vmul.f32 %v1765_v51, %v609_v54  ;;  %v908_v4 = vadd.f32 %v1789_v63, %v871_v59  ;;  %v705_v54 = vadd.f32 %v1780_v58, %v668_v7  ;;  %v665_v59 = vmul.f32 %v1765_v51, %v1727_v35 }
 0x107   : > { %v701_v7 = vadd.f32 %v1780_v58, %v664_v41 }
 0x108   : > { %v709_v60 = vadd.f32 %v1780_v58, %v672_v57  ;;  %v940_v50 = vmax.f32 %v908_v4, 0.0  ;;  %v939_v57 = vmax.f32 %v907_v19, 0.0  ;;  %v737_v35 = vmax.f32 %v705_v54, 0.0 }
 0x109   : > { %v903_v4 = vadd.f32 %v1789_v63, %v866_v37  ;;  %v934_v54 = vmax.f32 %v902_v9, 0.0  ;;  %v859_v37 = vmul.f32 %v1773_v55, %v1685_v21  ;;  %v374_v21 = vpop.f32.mrf.mxu0 }
 0x10a   : > { %v741_v1 = vmax.f32 %v709_v60, 0.0  ;;  %v905_v60 = vadd.f32 %v1789_v63, %v868_v48  ;;  %v458_v9 = vmul.f32 %v1886_v12, %v374_v21 }
 0x10b   : > { %v809_v3 = vpop.f32.mrf.mxu2  ;;  %v935_v47 = vmax.f32 %v903_v4, 0.0  ;;  %v695_v4 = vadd.f32 %v1780_v58, %v658_v23 }
 0x10c   : > { %v872_v5 = vmul.f32 %v1773_v55, %v809_v3  ;;  %1507 = vmatpush.lsf.msrb.mxu0 %v741_v1  ;;  %v904_v1 = vadd.f32 %v1789_v63, %v867_v46  ;;  %v702_v3 = vadd.f32 %v1780_v58, %v665_v59  ;;  %v659_v59 = vmul.f32 %v1765_v51, %v1675_v18 }
 0x10d   : > { %v1796_v8 = vpop.f32.mrf.mxu1  ;;  %v858_v18 = vmul.f32 %v1773_v55, %v1670_v16  ;;  %v896_v16 = vadd.f32 %v1789_v63, %v859_v37 }
 0x10e   : > { %v909_v20 = vadd.f32 %v1789_v63, %v872_v5  ;;  %1508 = vmatpush.lsf.msrb.mxu0 %v740_v6  ;;  %v937_v5 = vmax.f32 %v905_v60, 0.0  ;;  %v735_v6 = vmax.f32 %v703_v62, 0.0  ;;  %v936_v10 = vmax.f32 %v904_v1, 0.0 }
 0x10f   : > { %v734_v33 = vmax.f32 %v702_v3, 0.0  ;;  %v897_v62 = vadd.f32 %v1789_v63, %v860_v25  ;;  %v657_v1 = vmul.f32 %v1765_v51, %v1660_v13  ;;  %v930_v3 = vmax.f32 %v898_v22, 0.0 }
 0x110   : > { %v941_v52 = vmax.f32 %v909_v20, 0.0  ;;  %1509 = vmatpush.lsf.msrb.mxu0 %v739_v45  ;;  %v700_v20 = vadd.f32 %v1780_v58, %v663_v2  ;;  %v901_v45 = vadd.f32 %v1789_v63, %v864_v11  ;;  %v696_v2 = vadd.f32 %v1780_v58, %v659_v59 }
 0x111   : > { %v895_v13 = vadd.f32 %v1789_v63, %v858_v18  ;;  %v376_v27 = vpop.f32.mrf.mxu0  ;;  %1426 = vmatmul.msk.bf16.gmra.mxu0 %vm312_vm1, %v1725_v34 }
 0x112   : > { %1022 = vmatpush.msra.mxu0 %v941_v52  ;;  %v699_v52 = vadd.f32 %v1780_v58, %v662_v36  ;;  %v732_v46 = vmax.f32 %v700_v20, 0.0  ;;  %v728_v36 = vmax.f32 %v696_v2, 0.0  ;;  %v459_v31 = vmul.f32 %v1886_v12, %v376_v27 }
 0x113   : > { %v1810_v40 = vpop.f32.mrf.mxu2  ;;  %v927_v20 = vmax.f32 %v895_v13, 0.0 }
 0x114   : > { %1510 = vmatpush.lsf.msrb.mxu0 %v738_v53  ;;  %v900_v53 = vadd.f32 %v1789_v63, %v863_v30  ;;  %v731_v26 = vmax.f32 %v699_v52, 0.0  ;;  %v928_v30 = vmax.f32 %v896_v16, 0.0 }
 0x115   : > { %v1818_v61 = vpop.f32.mrf.mxu1 }
 0x116   : > { %1023 = vmatpush.msra.mxu0 %v940_v50  ;;  %v733_v50 = vmax.f32 %v701_v7, 0.0  ;;  %v932_v60 = vmax.f32 %v900_v53, 0.0 }
 0x118   : > { %1024 = vmatpush.msra.mxu0 %v939_v57  ;;  %v933_v57 = vmax.f32 %v901_v45, 0.0 }
 0x119   : > { %v379_v56 = vpop.f32.mrf.mxu0 }
 0x11a   : > { %1511 = vmatpush.lsf.msrb.mxu0 %v737_v35  ;;  %v697_v35 = vadd.f32 %v1780_v58, %v660_v28 }
 0x11b   : > { %v1838_v19 = vpop.f32.mrf.mxu2 }
 0x11c   : > { %1025 = vmatpush.msra.mxu0 %v938_v38  ;;  %v729_v11 = vmax.f32 %v697_v35, 0.0 }
 0x11d   : > { %v1846_v48 = vpop.f32.mrf.mxu1 }
 0x11e   : > { %1512 = vmatpush.lsf.msrb.mxu0 %v736_v32  ;;  %v857_v32 = vmul.f32 %v1773_v55, %v1666_v14  ;;  %v1891_v14 = vld [vmem:[%s2227_s3] ss:$0 sm:$0xff] }
 0x11f   : > { %v495_v42 = vadd.f32 %v1891_v14, %v459_v31 }
 0x120   : > { %1026 = vmatpush.msra.mxu0 %v937_v5  ;;  %v929_v5 = vmax.f32 %v897_v62, 0.0  ;;  %v894_v7 = vadd.f32 %v1789_v63, %v857_v32 }
 0x121   : > { %v381_v37 = vpop.f32.mrf.mxu0  ;;  %1427 = vmatmul.msk.bf16.gmra.mxu0 %vm312_vm1, %v1739_v39 }
 0x122   : > { %1513 = vmatpush.lsf.msrb.mxu0 %v735_v6  ;;  %v694_v6 = vadd.f32 %v1780_v58, %v657_v1  ;;  %v926_v52 = vmax.f32 %v894_v7, 0.0  ;;  %v461_v22 = vmul.f32 %v1886_v12, %v381_v37 }
 0x123   : > { %v1865_v41 = vpop.f32.mrf.mxu2 }
 0x124   : > { %1027 = vmatpush.msra.mxu0 %v936_v10  ;;  %v497_v23 = vadd.f32 %v1891_v14, %v461_v22 }
 0x125   : > { %v1873_v38 = vpop.f32.mrf.mxu1 }
 0x126   : > { %1514 = vmatpush.lsf.msrb.mxu0 %v734_v33  ;;  %v727_v33 = vmax.f32 %v695_v4, 0.0  ;;  %v529_v17 = vmax.f32 %v497_v23, 0.0 }
 0x128   : > { %1028 = vmatpush.msra.mxu0 %v935_v47  ;;  %v494_v47 = vadd.f32 %v1891_v14, %v458_v9 }
 0x12a   : > { %1515 = vmatpush.lsf.msrb.mxu0 %v733_v50  ;;  %v726_v50 = vmax.f32 %v694_v6, 0.0  ;;  %v526_v53 = vmax.f32 %v494_v47, 0.0 }
 0x12b   : > { %v1896_v10 = vpop.f32.mrf.mxu2 }
 0x12c   : > { %1029 = vmatpush.msra.mxu0 %v934_v54  ;;  %v527_v54 = vmax.f32 %v495_v42, 0.0 }
 0x12d   : > { %v1898_v45 = vpop.f32.mrf.mxu1 }
 0x12e   : > { %1516 = vmatpush.lsf.msrb.mxu0 %v732_v46  ;;  %v1909_v25 = vpack.c.bf16 %v527_v54, %v526_v53 }
 0x130   : > { %1030 = vmatpush.msra.mxu0 %v933_v57  ;;  %v460_v57 = vmul.f32 %v1886_v12, %v379_v56 }
 0x132   : > { %1517 = vmatpush.lsf.msrb.mxu0 %v731_v26  ;;  %v496_v43 = vadd.f32 %v1891_v14, %v460_v57 }
 0x133   : > { %v1903_v28 = vpop.f32.mrf.mxu2 }
 0x134   : > { %1031 = vmatpush.msra.mxu0 %v932_v60  ;;  %v528_v60 = vmax.f32 %v496_v43, 0.0 }
 0x135   : > { %v1905_v46 = vpop.f32.mrf.mxu1 }
 0x136   : > { %1032 = vmatpush.msra.mxu0 %v931_v0  ;;  %v1925_v62 = vpack.c.bf16 %v529_v17, %v528_v60  ;;  %v384_v0 = vpop.f32.mrf.mxu0 }
 0x137   : > { %v462_v21 = vmul.f32 %v1886_v12, %v384_v0 }
 0x138   : > { %1518 = vmatpush.lsf.msrb.mxu0 %v730_v15 }
 0x139   : > { %v498_v2 = vadd.f32 %v1891_v14, %v462_v21 }
 0x13a   : > { %1033 = vmatpush.msra.mxu0 %v930_v3 }
 0x13b   : > { %v1912_v59 = vpop.f32.mrf.mxu2  ;;  %v530_v3 = vmax.f32 %v498_v2, 0.0 }
 0x13c   : > { %1519 = vmatpush.lsf.msrb.mxu0 %v729_v11 }
 0x13d   : > { %v1914_v26 = vpop.f32.mrf.mxu1 }
 0x13e   : > { %1034 = vmatpush.msra.mxu0 %v929_v5  ;;  %v386_v32 = vpop.f32.mrf.mxu0 }
 0x13f   : > { %v463_v16 = vmul.f32 %v1886_v12, %v386_v32  ;;  %1428 = vmatmul.msk.bf16.gmra.mxu0 %vm312_vm1, %v1747_v44 }
 0x140   : > { %1520 = vmatpush.lsf.msrb.mxu0 %v728_v36 }
 0x141   : > { %v499_v11 = vadd.f32 %v1891_v14, %v463_v16 }
 0x142   : > { %1035 = vmatpush.msra.mxu0 %v928_v30 }
 0x143   : > { %v1919_v35 = vpop.f32.mrf.mxu2  ;;  %v531_v24 = vmax.f32 %v499_v11, 0.0 }
 0x144   : > { %1521 = vmatpush.lsf.msrb.mxu0 %v727_v33 }
 0x145   : > { %v1921_v18 = vpop.f32.mrf.mxu1  ;;  %v1941_v5 = vpack.c.bf16 %v531_v24, %v530_v3 }
 0x146   : > { %1036 = vmatpush.msra.mxu0 %v927_v20  ;;  %v389_v36 = vpop.f32.mrf.mxu0 }
 0x147   : > { %v464_v6 = vmul.f32 %v1886_v12, %v389_v36 }
 0x148   : > { %1522 = vmatpush.lsf.msrb.mxu0 %v726_v50 }
 0x149   : > { %1523 = vllmr.1.mxu0  ;;  %v500_v9 = vadd.f32 %v1891_v14, %v464_v6 }
 0x14a   : > { %1037 = vmatpush.msra.mxu0 %v926_v52 }
 0x14b   : > { %v1928_v1 = vpop.f32.mrf.mxu2  ;;  %v532_v27 = vmax.f32 %v500_v9, 0.0 }
 0x14d   : > { %v1930_v15 = vpop.f32.mrf.mxu1 }
 0x14e   : > { %v391_v33 = vpop.f32.mrf.mxu0 }
 0x14f   : > { %v465_v20 = vmul.f32 %v1886_v12, %v391_v33  ;;  %1429 = vmatmul.msk.bf16.gmra.mxu0 %vm312_vm1, %v1756_v49  ;;  %v880_v49 = vmul.f32 %v1773_v55, %v1928_v1  ;;  %v676_v1 = vmul.f32 %v1765_v51, %v1873_v38 }
 0x151   : > { %v501_v47 = vadd.f32 %v1891_v14, %v465_v20 }
 0x153   : > { %v1935_v4 = vpop.f32.mrf.mxu2  ;;  %v533_v50 = vmax.f32 %v501_v47, 0.0 }
 0x155   : > { %v1937_v13 = vpop.f32.mrf.mxu1  ;;  %v1953_v52 = vpack.c.bf16 %v533_v50, %v532_v27 }
 0x156   : > { %v394_v42 = vpop.f32.mrf.mxu0 }
 0x157   : > { %v466_v53 = vmul.f32 %v1886_v12, %v394_v42 }
 0x159   : > { %v502_v57 = vadd.f32 %v1891_v14, %v466_v53 }
 0x15b   : > { %v1944_v7 = vpop.f32.mrf.mxu2  ;;  %v534_v22 = vmax.f32 %v502_v57, 0.0 }
 0x15d   : > { %v637_v30 = vpop.f32.mrf.mxu1 }
 0x15e   : > { %v396_v43 = vpop.f32.mrf.mxu0 }
 0x15f   : > { %v467_v37 = vmul.f32 %v1886_v12, %v396_v43 }
 0x161   : > { %v503_v60 = vadd.f32 %v1891_v14, %v467_v37 }
 0x163   : > { %v1949_v31 = vpop.f32.mrf.mxu2  ;;  %v535_v17 = vmax.f32 %v503_v60, 0.0 }
 0x165   : > { %v639_v29 = vpop.f32.mrf.mxu1  ;;  %v1961_v34 = vpack.c.bf16 %v535_v17, %v534_v22 }
 0x166   : > { %v399_v21 = vpop.f32.mrf.mxu0 }
 0x167   : > { %v468_v2 = vmul.f32 %v1886_v12, %v399_v21 }
 0x169   : > { %v504_v3 = vadd.f32 %v1891_v14, %v468_v2 }
 0x16a   : > { %1524 = vmatmul.lmr.bf16.vlgmr.msra.gmra.1.mxu0 }
 0x16b   : > { %v839_v54 = vpop.f32.mrf.mxu2  ;;  %v536_v36 = vmax.f32 %v504_v3, 0.0 }
 0x16d   : > { %v642_v56 = vpop.f32.mrf.mxu1 }
 0x16e   : > { %v401_v11 = vpop.f32.mrf.mxu0  ;;  %v685_v37 = vmul.f32 %v1765_v51, %v642_v56 }
 0x16f   : > { %v469_v24 = vmul.f32 %v1886_v12, %v401_v11  ;;  %v683_v11 = vmul.f32 %v1765_v51, %v637_v30 }
 0x170   : > { %v722_v56 = vadd.f32 %v1780_v58, %v685_v37 }
 0x171   : > { %v505_v6 = vadd.f32 %v1891_v14, %v469_v24 }
 0x173   : > { %v842_v23 = vpop.f32.mrf.mxu2  ;;  %v537_v33 = vmax.f32 %v505_v6, 0.0 }
 0x175   : > { %v644_v0 = vpop.f32.mrf.mxu1  ;;  %v1970_v27 = vpack.c.bf16 %v537_v33, %v536_v36  ;;  %v682_v33 = vmul.f32 %v1765_v51, %v1937_v13  ;;  %v883_v13 = vmul.f32 %v1773_v55, %v1949_v31  ;;  %v679_v31 = vmul.f32 %v1765_v51, %v1914_v26 }
 0x176   : > { %v686_v47 = vmul.f32 %v1765_v51, %v644_v0  ;;  %v404_v42 = vpop.f32.mrf.mxu0  ;;  %v684_v0 = vmul.f32 %v1765_v51, %v639_v29  ;;  %v678_v26 = vmul.f32 %v1765_v51, %v1905_v46 }
 0x177   : > { %v470_v22 = vmul.f32 %v1886_v12, %v404_v42  ;;  %v754_v42 = vmax.f32 %v722_v56, 0.0 }
 0x178   : > { %v723_v17 = vadd.f32 %v1780_v58, %v686_v47  ;;  %v884_v47 = vmul.f32 %v1773_v55, %v839_v54 }
 0x179   : > { %v506_v24 = vadd.f32 %v1891_v14, %v470_v22 }
 0x17a   : > { %v755_v29 = vmax.f32 %v723_v17, 0.0  ;;  %v882_v17 = vmul.f32 %v1773_v55, %v1944_v7  ;;  %v920_v7 = vadd.f32 %v1789_v63, %v883_v13  ;;  %v674_v13 = vmul.f32 %v1765_v51, %v1818_v61 }
 0x17b   : > { %v844_v32 = vpop.f32.mrf.mxu2 }
 0x17c   : > { %v886_v60 = vmul.f32 %v1773_v55, %v844_v32  ;;  %v885_v32 = vmul.f32 %v1773_v55, %v842_v23 }
 0x17d   : > { %v647_v16 = vpop.f32.mrf.mxu1 }
 0x17e   : > { %v687_v20 = vmul.f32 %v1765_v51, %v647_v16  ;;  %v923_v36 = vadd.f32 %v1789_v63, %v886_v60  ;;  %v922_v37 = vadd.f32 %v1789_v63, %v885_v32  ;;  %v719_v60 = vadd.f32 %v1780_v58, %v682_v33 }
 0x17f   : > { %v919_v32 = vadd.f32 %v1789_v63, %v882_v17 }
 0x180   : > { %v724_v43 = vadd.f32 %v1780_v58, %v687_v20  ;;  %v721_v20 = vadd.f32 %v1780_v58, %v684_v0  ;;  %v955_v22 = vmax.f32 %v923_v36, 0.0  ;;  %v921_v0 = vadd.f32 %v1789_v63, %v884_v47 }
 0x181   : > { %v751_v56 = vmax.f32 %v719_v60, 0.0  ;;  %v917_v47 = vadd.f32 %v1789_v63, %v880_v49  ;;  %v873_v49 = vmul.f32 %v1773_v55, %v1810_v40 }
 0x182   : > { %v756_v3 = vmax.f32 %v724_v43, 0.0  ;;  %v753_v54 = vmax.f32 %v721_v20, 0.0  ;;  %v953_v36 = vmax.f32 %v921_v0, 0.0  ;;  %v952_v20 = vmax.f32 %v920_v7, 0.0 }
 0x183   : > { %v847_v9 = vpop.f32.mrf.mxu2  ;;  %v949_v60 = vmax.f32 %v917_v47, 0.0 }
 0x184   : > { %v887_v53 = vmul.f32 %v1773_v55, %v847_v9  ;;  %v406_v9 = vpop.f32.mrf.mxu0 }
 0x185   : > { %v649_v39 = vpop.f32.mrf.mxu1  ;;  %v471_v30 = vmul.f32 %v1886_v12, %v406_v9  ;;  %v879_v9 = vmul.f32 %v1773_v55, %v1919_v35  ;;  %v675_v35 = vmul.f32 %v1765_v51, %v1846_v48  ;;  %v713_v48 = vadd.f32 %v1780_v58, %v676_v1 }
 0x186   : > { %v688_v50 = vmul.f32 %v1765_v51, %v649_v39  ;;  %v924_v2 = vadd.f32 %v1789_v63, %v887_v53  ;;  %v681_v39 = vmul.f32 %v1765_v51, %v1930_v15  ;;  %v720_v53 = vadd.f32 %v1780_v58, %v683_v11 }
 0x187   : > { %v507_v43 = vadd.f32 %v1891_v14, %v471_v30  ;;  %v680_v15 = vmul.f32 %v1765_v51, %v1921_v18  ;;  %v712_v61 = vadd.f32 %v1780_v58, %v675_v35 }
 0x188   : > { %v725_v57 = vadd.f32 %v1780_v58, %v688_v50  ;;  %v956_v23 = vmax.f32 %v924_v2, 0.0  ;;  %v718_v2 = vadd.f32 %v1780_v58, %v681_v39  ;;  %v878_v39 = vmul.f32 %v1773_v55, %v1912_v59 }
 0x18a   : > { %v757_v44 = vmax.f32 %v725_v57, 0.0  ;;  %v538_v57 = vmax.f32 %v506_v24, 0.0  ;;  %v717_v24 = vadd.f32 %v1780_v58, %v680_v15  ;;  %v673_v15 = vmul.f32 %v1765_v51, %v1796_v8 }
 0x18b   : > { %v849_v21 = vpop.f32.mrf.mxu2  ;;  %v745_v8 = vmax.f32 %v713_v48, 0.0 }
 0x18c   : > { %v888_v16 = vmul.f32 %v1773_v55, %v849_v21  ;;  %1528 = vmatpush.lsf.msrb.mxu1 %v757_v44  ;;  %v539_v44 = vmax.f32 %v507_v43, 0.0  ;;  %v752_v21 = vmax.f32 %v720_v53, 0.0  ;;  %v409_v11 = vpop.f32.mrf.mxu0  ;;  %v749_v30 = vmax.f32 %v717_v24, 0.0 }
 0x18d   : > { %v472_v46 = vmul.f32 %v1886_v12, %v409_v11  ;;  %v877_v53 = vmul.f32 %v1773_v55, %v1903_v28  ;;  %v876_v28 = vmul.f32 %v1773_v55, %v1896_v10  ;;  %v711_v10 = vadd.f32 %v1780_v58, %v674_v13 }
 0x18e   : > { %v925_v6 = vadd.f32 %v1789_v63, %v888_v16  ;;  %1529 = vmatpush.lsf.msrb.mxu1 %v756_v3  ;;  %v2013_v18 = vpack.c.bf16 %v539_v44, %v538_v57  ;;  %v881_v16 = vmul.f32 %v1773_v55, %v1935_v4  ;;  %v954_v3 = vmax.f32 %v922_v37, 0.0 }
 0x18f   : > { %v677_v4 = vmul.f32 %v1765_v51, %v1898_v45  ;;  %v715_v45 = vadd.f32 %v1780_v58, %v678_v26  ;;  %v508_v38 = vadd.f32 %v1891_v14, %v472_v46  ;;  %v916_v57 = vadd.f32 %v1789_v63, %v879_v9 }
 0x190   : > { %v957_v50 = vmax.f32 %v925_v6, 0.0  ;;  %1530 = vmatpush.lsf.msrb.mxu1 %v755_v29  ;;  %v750_v6 = vmax.f32 %v718_v2, 0.0  ;;  %v716_v29 = vadd.f32 %v1780_v58, %v679_v31  ;;  %v918_v33 = vadd.f32 %v1789_v63, %v881_v16 }
 0x191   : > { %v747_v37 = vmax.f32 %v715_v45, 0.0  ;;  %v540_v17 = vmax.f32 %v508_v38, 0.0  ;;  %v914_v31 = vadd.f32 %v1789_v63, %v877_v53  ;;  %v875_v51 = vmul.f32 %v1773_v55, %v1865_v41 }
 0x192   : > { %1042 = vmatpush.msra.mxu1 %v957_v50  ;;  %v748_v50 = vmax.f32 %v716_v29, 0.0  ;;  %v950_v43 = vmax.f32 %v918_v33, 0.0  ;;  %v913_v16 = vadd.f32 %v1789_v63, %v876_v28  ;;  %v744_v11 = vmax.f32 %v712_v61, 0.0 }
 0x193   : > { %v710_v26 = vadd.f32 %v1780_v58, %v673_v15  ;;  %v946_v41 = vmax.f32 %v914_v31, 0.0  ;;  %v910_v29 = vadd.f32 %v1789_v63, %v873_v49 }
 0x194   : > { %1531 = vmatpush.lsf.msrb.mxu1 %v754_v42  ;;  %v714_v42 = vadd.f32 %v1780_v58, %v677_v4  ;;  %v411_v59 = vpop.f32.mrf.mxu0  ;;  %v945_v4 = vmax.f32 %v913_v16, 0.0 }
 0x195   : > { %v942_v33 = vmax.f32 %v910_v29, 0.0 }
 0x196   : > { %1043 = vmatpush.msra.mxu1 %v956_v23  ;;  %v951_v23 = vmax.f32 %v919_v32, 0.0  ;;  %v746_v44 = vmax.f32 %v714_v42, 0.0  ;;  %v912_v32 = vadd.f32 %v1789_v63, %v875_v51 }
 0x198   : > { %1532 = vmatpush.lsf.msrb.mxu1 %v753_v54  ;;  %v915_v54 = vadd.f32 %v1789_v63, %v878_v39  ;;  %v944_v46 = vmax.f32 %v912_v32, 0.0 }
 0x19a   : > { %1044 = vmatpush.msra.mxu1 %v955_v22  ;;  %v473_v22 = vmul.f32 %v1886_v12, %v411_v59  ;;  %v947_v7 = vmax.f32 %v915_v54, 0.0 }
 0x19c   : > { %1533 = vmatpush.lsf.msrb.mxu1 %v752_v21  ;;  %v509_v0 = vadd.f32 %v1891_v14, %v473_v22  ;;  %v948_v21 = vmax.f32 %v916_v57, 0.0  ;;  %v414_v24 = vpop.f32.mrf.mxu0 }
 0x19d   : > { %v474_v58 = vmul.f32 %v1886_v12, %v414_v24 }
 0x19e   : > { %1045 = vmatpush.msra.mxu1 %v954_v3  ;;  %v541_v2 = vmax.f32 %v509_v0, 0.0  ;;  %v874_v3 = vmul.f32 %v1773_v55, %v1838_v19 }
 0x19f   : > { %v510_v55 = vadd.f32 %v1891_v14, %v474_v58 }
 0x1a0   : > { %1534 = vmatpush.lsf.msrb.mxu1 %v751_v56  ;;  %v2063_v56 = vpack.c.bf16 %v541_v2, %v540_v17  ;;  %v911_v19 = vadd.f32 %v1789_v63, %v874_v3 }
 0x1a1   : > { %v542_v1 = vmax.f32 %v510_v55, 0.0 }
 0x1a2   : > { %1046 = vmatpush.msra.mxu1 %v953_v36  ;;  %v743_v36 = vmax.f32 %v711_v10, 0.0  ;;  %v943_v9 = vmax.f32 %v911_v19, 0.0 }
 0x1a4   : > { %1535 = vmatpush.lsf.msrb.mxu1 %v750_v6  ;;  %v742_v6 = vmax.f32 %v710_v26, 0.0  ;;  %v416_v40 = vpop.f32.mrf.mxu0 }
 0x1a6   : > { %1047 = vmatpush.msra.mxu1 %v952_v20  ;;  %v475_v20 = vmul.f32 %v1886_v12, %v416_v40 }
 0x1a8   : > { %1536 = vmatpush.lsf.msrb.mxu1 %v749_v30  ;;  %v511_v30 = vadd.f32 %v1891_v14, %v475_v20 }
 0x1aa   : > { %1048 = vmatpush.msra.mxu1 %v951_v23  ;;  %v543_v45 = vmax.f32 %v511_v30, 0.0 }
 0x1ac   : > { %1537 = vmatpush.lsf.msrb.mxu1 %v748_v50  ;;  %v2074_v39 = vpack.c.bf16 %v543_v45, %v542_v1  ;;  %v419_v63 = vpop.f32.mrf.mxu0 }
 0x1ad   : > { %v476_v47 = vmul.f32 %v1886_v12, %v419_v63 }
 0x1ae   : > { %1049 = vmatpush.msra.mxu1 %v950_v43 }
 0x1af   : > { %v512_v23 = vadd.f32 %v1891_v14, %v476_v47 }
 0x1b0   : > { %1538 = vmatpush.lsf.msrb.mxu1 %v747_v37 }
 0x1b1   : > { %v544_v42 = vmax.f32 %v512_v23, 0.0 }
 0x1b2   : > { %1050 = vmatpush.msra.mxu1 %v949_v60 }
 0x1b4   : > { %1539 = vmatpush.lsf.msrb.mxu1 %v746_v44  ;;  %v421_v35 = vpop.f32.mrf.mxu0 }
 0x1b5   : > { %v477_v50 = vmul.f32 %v1886_v12, %v421_v35 }
 0x1b6   : > { %1051 = vmatpush.msra.mxu1 %v948_v21 }
 0x1b7   : > { %v513_v38 = vadd.f32 %v1891_v14, %v477_v50 }
 0x1b8   : > { %1540 = vmatpush.lsf.msrb.mxu1 %v745_v8 }
 0x1b9   : > { %v545_v53 = vmax.f32 %v513_v38, 0.0 }
 0x1ba   : > { %1052 = vmatpush.msra.mxu1 %v947_v7 }
 0x1bb   : > { %v2080_v57 = vpack.c.bf16 %v545_v53, %v544_v42 }
 0x1bc   : > { %1541 = vmatpush.lsf.msrb.mxu1 %v744_v11  ;;  %v424_v43 = vpop.f32.mrf.mxu0 }
 0x1bd   : > { %v478_v59 = vmul.f32 %v1886_v12, %v424_v43 }
 0x1be   : > { %1053 = vmatpush.msra.mxu1 %v946_v41 }
 0x1bf   : > { %v514_v13 = vadd.f32 %v1891_v14, %v478_v59 }
 0x1c0   : > { %1542 = vmatpush.lsf.msrb.mxu1 %v743_v36 }
 0x1c1   : > { %v546_v22 = vmax.f32 %v514_v13, 0.0 }
 0x1c2   : > { %1054 = vmatpush.msra.mxu1 %v945_v4 }
 0x1c4   : > { %1543 = vmatpush.lsf.msrb.mxu1 %v742_v6  ;;  %v426_v37 = vpop.f32.mrf.mxu0 }
 0x1c5   : > { %1544 = vllmr.1.mxu1  ;;  %v479_v48 = vmul.f32 %v1886_v12, %v426_v37 }
 0x1c6   : > { %1055 = vmatpush.msra.mxu1 %v944_v46 }
 0x1c7   : > { %v515_v15 = vadd.f32 %v1891_v14, %v479_v48 }
 0x1c8   : > { %1056 = vmatpush.msra.mxu1 %v943_v9 }
 0x1c9   : > { %v547_v28 = vmax.f32 %v515_v15, 0.0 }
 0x1ca   : > { %1057 = vmatpush.msra.mxu1 %v942_v33 }
 0x1cb   : > { %v2086_v54 = vpack.c.bf16 %v547_v28, %v546_v22 }
 0x1cc   : > { %v429_v60 = vpop.f32.mrf.mxu0 }
 0x1cd   : > { %v480_v44 = vmul.f32 %v1886_v12, %v429_v60 }
 0x1cf   : > { %v516_v61 = vadd.f32 %v1891_v14, %v480_v44 }
 0x1d1   : > { %v548_v31 = vmax.f32 %v516_v61, 0.0 }
 0x1d4   : > { %v431_v17 = vpop.f32.mrf.mxu0 }
 0x1d5   : > { %v481_v0 = vmul.f32 %v1886_v12, %v431_v17 }
 0x1d7   : > { %v517_v21 = vadd.f32 %v1891_v14, %v481_v0 }
 0x1d9   : > { %v549_v51 = vmax.f32 %v517_v21, 0.0 }
 0x1db   : > { %v2092_v8 = vpack.c.bf16 %v549_v51, %v548_v31 }
 0x1dc   : > { %v434_v10 = vpop.f32.mrf.mxu0 }
 0x1dd   : > { %v482_v2 = vmul.f32 %v1886_v12, %v434_v10 }
 0x1df   : > { %v518_v16 = vadd.f32 %v1891_v14, %v482_v2 }
 0x1e1   : > { %v550_v11 = vmax.f32 %v518_v16, 0.0 }
 0x1e4   : > { %v436_v7 = vpop.f32.mrf.mxu0 }
 0x1e5   : > { %v483_v3 = vmul.f32 %v1886_v12, %v436_v7 }
 0x1e6   : > { %1545 = vmatmul.lmr.bf16.vlgmr.msra.gmra.1.mxu1 }
 0x1e7   : > { %v519_v26 = vadd.f32 %v1891_v14, %v483_v3 }
 0x1e9   : > { %v551_v41 = vmax.f32 %v519_v26, 0.0 }
 0x1eb   : > { %v2098_v24 = vpack.c.bf16 %v551_v41, %v550_v11 }
 0x1ec   : > { %v439_v49 = vpop.f32.mrf.mxu0 }
 0x1ed   : > { %v484_v32 = vmul.f32 %v1886_v12, %v439_v49 }
 0x1ef   : > { %v520_v36 = vadd.f32 %v1891_v14, %v484_v32 }
 0x1f1   : > { %v552_v6 = vmax.f32 %v520_v36, 0.0 }
 0x1f4   : > { %v441_v4 = vpop.f32.mrf.mxu0 }
 0x1f5   : > { %v485_v19 = vmul.f32 %v1886_v12, %v441_v4 }
 0x1f7   : > { %v521_v58 = vadd.f32 %v1891_v14, %v485_v19 }
 0x1f9   : > { %v553_v29 = vmax.f32 %v521_v58, 0.0 }
 0x1fb   : > { %v2104_v46 = vpack.c.bf16 %v553_v29, %v552_v6 }
 0x1fc   : > { %v444_v9 = vpop.f32.mrf.mxu0 }
 0x1fd   : > { %v486_v55 = vmul.f32 %v1886_v12, %v444_v9 }
 0x1ff   : > { %v522_v40 = vadd.f32 %v1891_v14, %v486_v55 }
 0x201   : > { %v554_v1 = vmax.f32 %v522_v40, 0.0 }
 0x204   : > { %v446_v33 = vpop.f32.mrf.mxu0 }
 0x205   : > { %v487_v20 = vmul.f32 %v1886_v12, %v446_v33 }
 0x207   : > { %v523_v30 = vadd.f32 %v1891_v14, %v487_v20 }
 0x209   : > { %v555_v45 = vmax.f32 %v523_v30, 0.0 }
 0x20b   : > { %v2110_v63 = vpack.c.bf16 %v555_v45, %v554_v1 }
 0x20c   : > { %v449_v47 = vpop.f32.mrf.mxu0 }
 0x20d   : > { %v488_v23 = vmul.f32 %v1886_v12, %v449_v47 }
 0x20f   : > { %v524_v35 = vadd.f32 %v1891_v14, %v488_v23 }
 0x211   : > { %v556_v38 = vmax.f32 %v524_v35, 0.0 }
 0x214   : > { %v451_v50 = vpop.f32.mrf.mxu0 }
 0x215   : > { %v489_v42 = vmul.f32 %v1886_v12, %v451_v50 }
 0x217   : > { %v525_v53 = vadd.f32 %v1891_v14, %v489_v42 }
 0x219   : > { %v557_v43 = vmax.f32 %v525_v53, 0.0 }
 0x21b   : > { %v2116_v59 = vpack.c.bf16 %v557_v43, %v556_v38 }
 0x21c   : > { %v1039_v13 = vpop.f32.mrf.mxu0 }
 0x263   : > { %v1059_v37 = vpop.f32.mrf.mxu1 }
 0x264   : > { %v1060_v48 = vadd.f32 %v1059_v37, %v1039_v13 }
 0x266   : > { %v1078_v22 = vpack.c.bf16 %v1060_v48, %v1060_v48 }
 0x268   : > { %v1130_v15 = vsel %vm1128_vm2, %v1078_v22, 0 }
 0x269   : > { %1139 = vmatpush.bf16.msra.mxu3 %v1130_v15 }
 0x26c   : > { %1468 = vmatmul.msk.bf16.vlgmr.msra.gmra.mxu3 %vm1079_vm3, %v1909_v25 }
 0x27c   : > { %1469 = vmatmul.msk.bf16.gmra.mxu3 %vm1079_vm3, %v1925_v62 }
 0x28c   : > { %1470 = vmatmul.msk.bf16.gmra.mxu3 %vm1079_vm3, %v1941_v5 }
 0x29c   : > { %1471 = vmatmul.msk.bf16.gmra.mxu3 %vm1079_vm3, %v1953_v52 }
 0x2ac   : > { %1472 = vmatmul.msk.bf16.gmra.mxu3 %vm1079_vm3, %v1961_v34 }
 0x2bc   : > { %1473 = vmatmul.msk.bf16.gmra.mxu3 %vm1079_vm3, %v1970_v27 }
 0x2cc   : > { %1474 = vmatmul.msk.bf16.gmra.mxu3 %vm1079_vm3, %v2013_v18 }
 0x2dc   : > { %1475 = vmatmul.msk.bf16.gmra.mxu3 %vm1079_vm3, %v2063_v56 }
 0x2ec   : > { %1476 = vmatmul.msk.bf16.gmra.mxu3 %vm1079_vm3, %v2074_v39 }
 0x2ef   : > { %v1141_v12 = vpop.f32.mrf.mxu3 }
 0x2f0   : > { %v1221_v14 = vpack.c.bf16 %v1141_v12, %v1141_v12 }
 0x2f2   : > { %1254 = vst.msk [vmem:[%s2141_s17] sm:$0xf] %vm1253_vm4, %v1221_v14 }
 0x2f7   : > { %v1143_v25 = vpop.f32.mrf.mxu3 }
 0x2f8   : > { %v1222_v62 = vpack.c.bf16 %v1143_v25, %v1143_v25 }
 0x2fa   : > { %1255 = vst.msk [vmem:[%s2141_s17 + $0x4] sm:$0xf] %vm1253_vm4, %v1222_v62 }
 0x2fc   : > { %1477 = vmatmul.msk.bf16.gmra.mxu3 %vm1079_vm3, %v2080_v57 }
 0x2ff   : > { %v1146_v5 = vpop.f32.mrf.mxu3 }
 0x300   : > { %v1223_v52 = vpack.c.bf16 %v1146_v5, %v1146_v5 }
 0x302   : > { %1256 = vst.msk [vmem:[%s2141_s17 + $0x8] sm:$0xf] %vm1253_vm4, %v1223_v52 }
 0x307   : > { %v1148_v34 = vpop.f32.mrf.mxu3 }
 0x308   : > { %v1224_v27 = vpack.c.bf16 %v1148_v34, %v1148_v34 }
 0x30a   : > { %1257 = vst.msk [vmem:[%s2141_s17 + $0xc] sm:$0xf] %vm1253_vm4, %v1224_v27 }
 0x30c   : > { %1478 = vmatmul.msk.bf16.gmra.mxu3 %vm1079_vm3, %v2086_v54 }
 0x30f   : > { %v1151_v18 = vpop.f32.mrf.mxu3 }
 0x310   : > { %v1225_v56 = vpack.c.bf16 %v1151_v18, %v1151_v18 }
 0x312   : > { %1258 = vst.msk [vmem:[%s2141_s17 + $0x10] sm:$0xf] %vm1253_vm4, %v1225_v56 }
 0x317   : > { %v1153_v39 = vpop.f32.mrf.mxu3 }
 0x318   : > { %v1226_v57 = vpack.c.bf16 %v1153_v39, %v1153_v39 }
 0x31a   : > { %1259 = vst.msk [vmem:[%s2141_s17 + $0x14] sm:$0xf] %vm1253_vm4, %v1226_v57 }
 0x31c   : > { %1479 = vmatmul.msk.bf16.gmra.mxu3 %vm1079_vm3, %v2092_v8 }
 0x31f   : > { %v1156_v28 = vpop.f32.mrf.mxu3 }
 0x320   : > { %v1227_v60 = vpack.c.bf16 %v1156_v28, %v1156_v28 }
 0x322   : > { %1260 = vst.msk [vmem:[%s2141_s17 + $0x18] sm:$0xf] %vm1253_vm4, %v1227_v60 }
 0x327   : > { %v1158_v44 = vpop.f32.mrf.mxu3 }
 0x328   : > { %v1228_v54 = vpack.c.bf16 %v1158_v44, %v1158_v44 }
 0x32a   : > { %1261 = vst.msk [vmem:[%s2141_s17 + $0x1c] sm:$0xf] %vm1253_vm4, %v1228_v54 }
 0x32c   : > { %1480 = vmatmul.msk.bf16.gmra.mxu3 %vm1079_vm3, %v2098_v24 }
 0x32f   : > { %v1161_v61 = vpop.f32.mrf.mxu3 }
 0x330   : > { %v1229_v17 = vpack.c.bf16 %v1161_v61, %v1161_v61 }
 0x332   : > { %1262 = vst.msk [vmem:[%s2141_s17 + $0x20] sm:$0xf] %vm1253_vm4, %v1229_v17 }
 0x337   : > { %v1163_v0 = vpop.f32.mrf.mxu3 }
 0x338   : > { %v1230_v31 = vpack.c.bf16 %v1163_v0, %v1163_v0 }
 0x33a   : > { %1263 = vst.msk [vmem:[%s2141_s17 + $0x24] sm:$0xf] %vm1253_vm4, %v1230_v31 }
 0x33c   : > { %1481 = vmatmul.msk.bf16.gmra.mxu3 %vm1079_vm3, %v2104_v46 }
 0x33f   : > { %v1166_v21 = vpop.f32.mrf.mxu3 }
 0x340   : > { %v1231_v51 = vpack.c.bf16 %v1166_v21, %v1166_v21 }
 0x342   : > { %1264 = vst.msk [vmem:[%s2141_s17 + $0x28] sm:$0xf] %vm1253_vm4, %v1231_v51 }
 0x347   : > { %v1168_v8 = vpop.f32.mrf.mxu3 }
 0x348   : > { %v1232_v10 = vpack.c.bf16 %v1168_v8, %v1168_v8 }
 0x34a   : > { %1265 = vst.msk [vmem:[%s2141_s17 + $0x2c] sm:$0xf] %vm1253_vm4, %v1232_v10 }
 0x34c   : > { %1482 = vmatmul.msk.bf16.gmra.mxu3 %vm1079_vm3, %v2110_v63 }
 0x34f   : > { %v1171_v2 = vpop.f32.mrf.mxu3 }
 0x350   : > { %v1233_v16 = vpack.c.bf16 %v1171_v2, %v1171_v2 }
 0x352   : > { %1266 = vst.msk [vmem:[%s2141_s17 + $0x30] sm:$0xf] %vm1253_vm4, %v1233_v16 }
 0x357   : > { %v1173_v7 = vpop.f32.mrf.mxu3 }
 0x358   : > { %v1234_v3 = vpack.c.bf16 %v1173_v7, %v1173_v7 }
 0x35a   : > { %1267 = vst.msk [vmem:[%s2141_s17 + $0x34] sm:$0xf] %vm1253_vm4, %v1234_v3 }
 0x35c   : > { %1483 = vmatmul.msk.bf16.gmra.mxu3 %vm1079_vm3, %v2116_v59 }
 0x35f   : > { %v1176_v11 = vpop.f32.mrf.mxu3 }
 0x360   : > { %v1235_v26 = vpack.c.bf16 %v1176_v11, %v1176_v11 }
 0x362   : > { %1268 = vst.msk [vmem:[%s2141_s17 + $0x38] sm:$0xf] %vm1253_vm4, %v1235_v26 }
 0x367   : > { %v1178_v41 = vpop.f32.mrf.mxu3 }
 0x368   : > { %v1236_v24 = vpack.c.bf16 %v1178_v41, %v1178_v41 }
 0x36a   : > { %1269 = vst.msk [vmem:[%s2141_s17 + $0x3c] sm:$0xf] %vm1253_vm4, %v1236_v24 }
 0x36f   : > { %v1181_v49 = vpop.f32.mrf.mxu3 }
 0x370   : > { %v1237_v32 = vpack.c.bf16 %v1181_v49, %v1181_v49 }
 0x372   : > { %1270 = vst.msk [vmem:[%s2141_s17 + $0x40] sm:$0xf] %vm1253_vm4, %v1237_v32 }
 0x377   : > { %v1183_v36 = vpop.f32.mrf.mxu3 }
 0x378   : > { %v1238_v4 = vpack.c.bf16 %v1183_v36, %v1183_v36 }
 0x37a   : > { %1271 = vst.msk [vmem:[%s2141_s17 + $0x44] sm:$0xf] %vm1253_vm4, %v1238_v4 }
 0x37f   : > { %v1186_v19 = vpop.f32.mrf.mxu3 }
 0x380   : > { %v1239_v6 = vpack.c.bf16 %v1186_v19, %v1186_v19 }
 0x382   : > { %1272 = vst.msk [vmem:[%s2141_s17 + $0x48] sm:$0xf] %vm1253_vm4, %v1239_v6 }
 0x387   : > { %v1188_v58 = vpop.f32.mrf.mxu3 }
 0x388   : > { %v1240_v29 = vpack.c.bf16 %v1188_v58, %v1188_v58 }
 0x38a   : > { %1273 = vst.msk [vmem:[%s2141_s17 + $0x4c] sm:$0xf] %vm1253_vm4, %v1240_v29 }
 0x38f   : > { %v1191_v46 = vpop.f32.mrf.mxu3 }
 0x390   : > { %v1241_v9 = vpack.c.bf16 %v1191_v46, %v1191_v46 }
 0x392   : > { %1274 = vst.msk [vmem:[%s2141_s17 + $0x50] sm:$0xf] %vm1253_vm4, %v1241_v9 }
 0x397   : > { %v1193_v55 = vpop.f32.mrf.mxu3 }
 0x398   : > { %v1242_v40 = vpack.c.bf16 %v1193_v55, %v1193_v55 }
 0x39a   : > { %1275 = vst.msk [vmem:[%s2141_s17 + $0x54] sm:$0xf] %vm1253_vm4, %v1242_v40 }
 0x39f   : > { %v1196_v33 = vpop.f32.mrf.mxu3 }
 0x3a0   : > { %v1243_v20 = vpack.c.bf16 %v1196_v33, %v1196_v33 }
 0x3a2   : > { %1276 = vst.msk [vmem:[%s2141_s17 + $0x58] sm:$0xf] %vm1253_vm4, %v1243_v20 }
 0x3a7   : > { %v1198_v1 = vpop.f32.mrf.mxu3 }
 0x3a8   : > { %v1244_v30 = vpack.c.bf16 %v1198_v1, %v1198_v1 }
 0x3aa   : > { %1277 = vst.msk [vmem:[%s2141_s17 + $0x5c] sm:$0xf] %vm1253_vm4, %v1244_v30 }
 0x3af   : > { %v1201_v45 = vpop.f32.mrf.mxu3 }
 0x3b0   : > { %v1245_v63 = vpack.c.bf16 %v1201_v45, %v1201_v45 }
 0x3b2   : > { %1278 = vst.msk [vmem:[%s2141_s17 + $0x60] sm:$0xf] %vm1253_vm4, %v1245_v63 }
 0x3b7   : > { %v1203_v47 = vpop.f32.mrf.mxu3 }
 0x3b8   : > { %v1246_v23 = vpack.c.bf16 %v1203_v47, %v1203_v47 }
 0x3ba   : > { %1279 = vst.msk [vmem:[%s2141_s17 + $0x64] sm:$0xf] %vm1253_vm4, %v1246_v23 }
 0x3bf   : > { %v1206_v35 = vpop.f32.mrf.mxu3 }
 0x3c0   : > { %v1247_v50 = vpack.c.bf16 %v1206_v35, %v1206_v35 }
 0x3c2   : > { %1280 = vst.msk [vmem:[%s2141_s17 + $0x68] sm:$0xf] %vm1253_vm4, %v1247_v50 }
 0x3c7   : > { %v1208_v42 = vpop.f32.mrf.mxu3 }
 0x3c8   : > { %v1248_v38 = vpack.c.bf16 %v1208_v42, %v1208_v42 }
 0x3ca   : > { %1281 = vst.msk [vmem:[%s2141_s17 + $0x6c] sm:$0xf] %vm1253_vm4, %v1248_v38 }
 0x3cf   : > { %v1211_v53 = vpop.f32.mrf.mxu3 }
 0x3d0   : > { %v1249_v43 = vpack.c.bf16 %v1211_v53, %v1211_v53 }
 0x3d2   : > { %1282 = vst.msk [vmem:[%s2141_s17 + $0x70] sm:$0xf] %vm1253_vm4, %v1249_v43 }
 0x3d7   : > { %v1213_v59 = vpop.f32.mrf.mxu3 }
 0x3d8   : > { %v1250_v13 = vpack.c.bf16 %v1213_v59, %v1213_v59 }
 0x3da   : > { %1283 = vst.msk [vmem:[%s2141_s17 + $0x74] sm:$0xf] %vm1253_vm4, %v1250_v13 }
 0x3df   : > { %v1216_v37 = vpop.f32.mrf.mxu3 }
 0x3e0   : > { %v1251_v48 = vpack.c.bf16 %v1216_v37, %v1216_v37 }
 0x3e2   : > { %1284 = vst.msk [vmem:[%s2141_s17 + $0x78] sm:$0xf] %vm1253_vm4, %v1251_v48 }
 0x3e7   : > { %v1218_v22 = vpop.f32.mrf.mxu3 }
 0x3e8   : > { %v1252_v15 = vpack.c.bf16 %v1218_v22, %v1218_v22 }
 0x3ea   : > { %1285 = vst.msk [vmem:[%s2141_s17 + $0x7c] sm:$0xf] %vm1253_vm4, %v1252_v15 }
 0x3eb PF: > { %s14_s15 = sadd.s32 1, %s1566_s15  }
 0x3ec   : > { %p11_p4 = scmp.ge.s32.totalorder %s14_s15, 4  }
 0x3ee   :  { %13 = sbr.rel (!%p11_p4) target bundleno = 1 (0x1), region = 72 }

// kernel: fsm_forward.6
= control target key start
LH: loop header
LB: loop body
LE: loop exit
PB: predicated region body
PF: predicated region fallthrough
CT: control target
= control target key end

     0   :  { %vm343_vm0 = vcmask 1040384   ;;  %vm246_vm1 = vcmask 15360   ;;  %vm972_vm2 = vcmask 27648   ;;  %s2100_s1 = inlined_call_operand.vmem [shape: bf16[2,4], index: 1, kind: input, shape index: {}]   ;;  %s2101_s0 = inlined_call_operand.vmem [shape: bf16[512,2], index: 0, kind: input, shape index: {}]   ;;  %s2102_s2 = inlined_call_operand.vmem [shape: f32[1,4], index: 2, kind: input, shape index: {}]   ;;  %s2103_s3 = inlined_call_operand.vmem [shape: f32[1,4], index: 3, kind: input, shape index: {}]   ;;  %s2104_s4 = inlined_call_operand.vmem [shape: bf16[512,4], index: 4, kind: input, shape index: {}]   ;;  %s2105_s5 = inlined_call_operand.vmem [shape: bf16[512,4], index: 5, kind: output, shape index: {}]  }
   0x1   :  { %v85_v0 = vld [vmem:[%s2100_s1] sm:$0x1]  ;;  %v1202_v6 = vld [vmem:[%s2101_s0 + $0x8] sm:$0xff]  ;;  %v1203_v10 = vld [vmem:[%s2101_s0 + $0x10] sm:$0xff] }
   0x2   :  { %v345_v1 = vsel %vm343_vm0, %v85_v0, 0  ;;  %v1201_v2 = vld [vmem:[%s2101_s0] sm:$0xff]  ;;  %v1210_v7 = vld [vmem:[%s2101_s0 + $0x48] sm:$0xff]  ;;  %v1211_v11 = vld [vmem:[%s2101_s0 + $0x50] sm:$0xff] }
   0x3   :  { %v1209_v3 = vld [vmem:[%s2101_s0 + $0x40] sm:$0xff]  ;;  %354 = vmatpush.bf16.msra.mxu0 %v345_v1  ;;  %1392 = vmatpush.bf16.msra.mxu1 %v345_v1  ;;  %v1218_v8 = vld [vmem:[%s2101_s0 + $0x88] sm:$0xff]  ;;  %v1219_v12 = vld [vmem:[%s2101_s0 + $0x90] sm:$0xff] }
   0x4   :  { %v1217_v4 = vld [vmem:[%s2101_s0 + $0x80] sm:$0xff]  ;;  %1393 = vmatpush.bf16.msra.mxu2 %v345_v1  ;;  %1394 = vmatpush.bf16.msra.mxu3 %v345_v1  ;;  %v1226_v9 = vld [vmem:[%s2101_s0 + $0xc8] sm:$0xff]  ;;  %v1227_v13 = vld [vmem:[%s2101_s0 + $0xd0] sm:$0xff] }
   0x5   :  { %v1225_v5 = vld [vmem:[%s2101_s0 + $0xc0] sm:$0xff]  ;;  %v1204_v14 = vld [vmem:[%s2101_s0 + $0x18] sm:$0xff]  ;;  %v1206_v22 = vld [vmem:[%s2101_s0 + $0x28] sm:$0xff] }
   0x6   :  { %1169 = vmatmul.msk.bf16.vlgmr.msra.gmra.mxu0 %vm246_vm1, %v1201_v2  ;;  %1177 = vmatmul.msk.bf16.vlgmr.msra.gmra.mxu1 %vm246_vm1, %v1209_v3  ;;  %v1212_v15 = vld [vmem:[%s2101_s0 + $0x58] sm:$0xff]  ;;  %v1205_v18 = vld [vmem:[%s2101_s0 + $0x20] sm:$0xff]  ;;  %v1214_v23 = vld [vmem:[%s2101_s0 + $0x68] sm:$0xff] }
   0x7   :  { %1185 = vmatmul.msk.bf16.vlgmr.msra.gmra.mxu2 %vm246_vm1, %v1217_v4  ;;  %1193 = vmatmul.msk.bf16.vlgmr.msra.gmra.mxu3 %vm246_vm1, %v1225_v5  ;;  %v1220_v16 = vld [vmem:[%s2101_s0 + $0x98] sm:$0xff]  ;;  %v1213_v19 = vld [vmem:[%s2101_s0 + $0x60] sm:$0xff]  ;;  %v1222_v24 = vld [vmem:[%s2101_s0 + $0xa8] sm:$0xff] }
   0x8   :  { %v1228_v17 = vld [vmem:[%s2101_s0 + $0xd8] sm:$0xff]  ;;  %v1221_v20 = vld [vmem:[%s2101_s0 + $0xa0] sm:$0xff]  ;;  %v1230_v25 = vld [vmem:[%s2101_s0 + $0xe8] sm:$0xff] }
   0x9   :  { %v1229_v21 = vld [vmem:[%s2101_s0 + $0xe0] sm:$0xff]  ;;  %v1207_v26 = vld [vmem:[%s2101_s0 + $0x30] sm:$0xff]  ;;  %v1208_v30 = vld [vmem:[%s2101_s0 + $0x38] sm:$0xff] }
   0xa   :  { %v1215_v27 = vld [vmem:[%s2101_s0 + $0x70] sm:$0xff]  ;;  %v1216_v31 = vld [vmem:[%s2101_s0 + $0x78] sm:$0xff]  ;;  %v1563_v34 = vld [vmem:[%s2102_s2] ss:$0 sm:$0xff] }
   0xb   :  { %v1223_v28 = vld [vmem:[%s2101_s0 + $0xb0] sm:$0xff]  ;;  %v1224_v32 = vld [vmem:[%s2101_s0 + $0xb8] sm:$0xff]  ;;  %v1568_v35 = vld [vmem:[%s2103_s3] ss:$0 sm:$0xff] }
   0xc   :  { %v1231_v29 = vld [vmem:[%s2101_s0 + $0xf0] sm:$0xff]  ;;  %v1232_v33 = vld [vmem:[%s2101_s0 + $0xf8] sm:$0xff]  ;;  %v1234_v37 = vld [vmem:[%s2104_s4] sm:$0xff]  }
   0xd   :  { %v1368_v39 = vld [vmem:[%s2104_s4 + $0x40] sm:$0xff]   ;;  %v1235_v43 = vunpack.c.l.bf16 %v1234_v37  ;;  %v1236_v3 = vunpack.c.h.bf16 %v1234_v37 }
   0xe   :  { %v1267_v45 = vunpack.c.l.bf16 %v1368_v39  ;;  %v1376_v51 = vld [vmem:[%s2104_s4 + $0x80] sm:$0xff]   ;;  %v1268_v5 = vunpack.c.h.bf16 %v1368_v39 }
   0xf   :  { %v1384_v53 = vld [vmem:[%s2104_s4 + $0xc0] sm:$0xff]   ;;  %v1299_v63 = vunpack.c.l.bf16 %v1376_v51 }
  0x10   :  { %v1331_v1 = vunpack.c.l.bf16 %v1384_v53 }
  0x16   :  { %1170 = vmatmul.msk.bf16.gmra.mxu0 %vm246_vm1, %v1202_v6  ;;  %1178 = vmatmul.msk.bf16.gmra.mxu1 %vm246_vm1, %v1210_v7 }
  0x17   :  { %1186 = vmatmul.msk.bf16.gmra.mxu2 %vm246_vm1, %v1218_v8  ;;  %1194 = vmatmul.msk.bf16.gmra.mxu3 %vm246_vm1, %v1226_v9 }
  0x26   :  { %1171 = vmatmul.msk.bf16.gmra.mxu0 %vm246_vm1, %v1203_v10  ;;  %1179 = vmatmul.msk.bf16.gmra.mxu1 %vm246_vm1, %v1211_v11 }
  0x27   :  { %1187 = vmatmul.msk.bf16.gmra.mxu2 %vm246_vm1, %v1219_v12  ;;  %1195 = vmatmul.msk.bf16.gmra.mxu3 %vm246_vm1, %v1227_v13 }
  0x36   :  { %1172 = vmatmul.msk.bf16.gmra.mxu0 %vm246_vm1, %v1204_v14  ;;  %1180 = vmatmul.msk.bf16.gmra.mxu1 %vm246_vm1, %v1212_v15 }
  0x37   :  { %1188 = vmatmul.msk.bf16.gmra.mxu2 %vm246_vm1, %v1220_v16  ;;  %1196 = vmatmul.msk.bf16.gmra.mxu3 %vm246_vm1, %v1228_v17 }
  0x46   :  { %1173 = vmatmul.msk.bf16.gmra.mxu0 %vm246_vm1, %v1205_v18  ;;  %1181 = vmatmul.msk.bf16.gmra.mxu1 %vm246_vm1, %v1213_v19 }
  0x47   :  { %1189 = vmatmul.msk.bf16.gmra.mxu2 %vm246_vm1, %v1221_v20  ;;  %1197 = vmatmul.msk.bf16.gmra.mxu3 %vm246_vm1, %v1229_v21  ;;  %v1361_v21 = vld [vmem:[%s2104_s4 + $0x8] sm:$0xff]  }
  0x56   :  { %1174 = vmatmul.msk.bf16.gmra.mxu0 %vm246_vm1, %v1206_v22  ;;  %1182 = vmatmul.msk.bf16.gmra.mxu1 %vm246_vm1, %v1214_v23  ;;  %v1369_v23 = vld [vmem:[%s2104_s4 + $0x48] sm:$0xff]  }
  0x57   :  { %1190 = vmatmul.msk.bf16.gmra.mxu2 %vm246_vm1, %v1222_v24  ;;  %1198 = vmatmul.msk.bf16.gmra.mxu3 %vm246_vm1, %v1230_v25  ;;  %v1271_v37 = vunpack.c.l.bf16 %v1369_v23 }
  0x66   :  { %1175 = vmatmul.msk.bf16.gmra.mxu0 %vm246_vm1, %v1207_v26  ;;  %1183 = vmatmul.msk.bf16.gmra.mxu1 %vm246_vm1, %v1215_v27 }
  0x67   :  { %1191 = vmatmul.msk.bf16.gmra.mxu2 %vm246_vm1, %v1223_v28  ;;  %1199 = vmatmul.msk.bf16.gmra.mxu3 %vm246_vm1, %v1231_v29  ;;  %v1300_v29 = vunpack.c.h.bf16 %v1376_v51 }
  0x76   :  { %1176 = vmatmul.msk.bf16.gmra.mxu0 %vm246_vm1, %v1208_v30  ;;  %1184 = vmatmul.msk.bf16.gmra.mxu1 %vm246_vm1, %v1216_v31  ;;  %v1332_v31 = vunpack.c.h.bf16 %v1384_v53 }
  0x77   :  { %1192 = vmatmul.msk.bf16.gmra.mxu2 %vm246_vm1, %v1224_v32  ;;  %1200 = vmatmul.msk.bf16.gmra.mxu3 %vm246_vm1, %v1232_v33  ;;  %v1239_v33 = vunpack.c.l.bf16 %v1361_v21 }
  0x83   :  { %v356_v36 = vpop.f32.mrf.mxu0  ;;  %v396_v38 = vpop.f32.mrf.mxu1 }
  0x84   :  { %v520_v40 = vmul.f32 %v1563_v34, %v356_v36  ;;  %v536_v41 = vmul.f32 %v1563_v34, %v396_v38 }
  0x86   :  { %v588_v42 = vadd.f32 %v1568_v35, %v520_v40  ;;  %v604_v44 = vadd.f32 %v1568_v35, %v536_v41 }
  0x88   :  { %v652_v46 = vmax.f32 %v588_v42, 0.0  ;;  %v668_v47 = vmax.f32 %v604_v44, 0.0 }
  0x8a   :  { %v844_v48 = vadd.f32 %v1235_v43, %v652_v46  ;;  %v860_v49 = vadd.f32 %v1267_v45, %v668_v47  ;;  %v436_v50 = vpop.f32.mrf.mxu2  ;;  %v476_v52 = vpop.f32.mrf.mxu3  ;;  %v1635_v47 = vld [vmem:[%s2104_s4 + $0x88] sm:$0xff]  }
  0x8b   :  { %v552_v54 = vmul.f32 %v1563_v34, %v436_v50  ;;  %v568_v55 = vmul.f32 %v1563_v34, %v476_v52  ;;  %v358_v56 = vpop.f32.mrf.mxu0  ;;  %v398_v57 = vpop.f32.mrf.mxu1 }
  0x8c   :  { %v908_v58 = vpack.c.bf16 %v844_v48, %v844_v48  ;;  %v924_v59 = vpack.c.bf16 %v860_v49, %v860_v49  ;;  %v521_v60 = vmul.f32 %v1563_v34, %v358_v56  ;;  %v537_v61 = vmul.f32 %v1563_v34, %v398_v57  ;;  %v1640_v49 = vld [vmem:[%s2104_s4 + $0xc8] sm:$0xff]  }
  0x8d   :  { %v620_v62 = vadd.f32 %v1568_v35, %v552_v54  ;;  %v636_v0 = vadd.f32 %v1568_v35, %v568_v55 }
  0x8e   :  { %973 = vst.msk [vmem:[%s2105_s5] sm:$0xf] %vm972_vm2, %v908_v58  ;;  %v589_v2 = vadd.f32 %v1568_v35, %v521_v60  ;;  %v605_v4 = vadd.f32 %v1568_v35, %v537_v61  ;;  %v1303_v61 = vunpack.c.l.bf16 %v1635_v47 }
  0x8f   :  { %989 = vst.msk [vmem:[%s2105_s5 + $0x40] sm:$0xf] %vm972_vm2, %v924_v59  ;;  %v684_v6 = vmax.f32 %v620_v62, 0.0  ;;  %v700_v7 = vmax.f32 %v636_v0, 0.0 }
  0x90   :  { %v653_v8 = vmax.f32 %v589_v2, 0.0  ;;  %v669_v9 = vmax.f32 %v605_v4, 0.0 }
  0x91   :  { %v876_v10 = vadd.f32 %v1299_v63, %v684_v6  ;;  %v892_v11 = vadd.f32 %v1331_v1, %v700_v7  ;;  %v1335_v63 = vunpack.c.l.bf16 %v1640_v49  ;;  %v1240_v1 = vunpack.c.h.bf16 %v1361_v21  ;;  %v1370_v21 = vld [vmem:[%s2104_s4 + $0x50] sm:$0xff]  }
  0x92   :  { %v845_v12 = vadd.f32 %v1236_v3, %v653_v8  ;;  %v861_v13 = vadd.f32 %v1268_v5, %v669_v9  ;;  %v438_v14 = vpop.f32.mrf.mxu2  ;;  %v478_v15 = vpop.f32.mrf.mxu3  ;;  %v1272_v3 = vunpack.c.h.bf16 %v1369_v23 }
  0x93   :  { %v940_v16 = vpack.c.bf16 %v876_v10, %v876_v10  ;;  %v956_v17 = vpack.c.bf16 %v892_v11, %v892_v11  ;;  %v553_v18 = vmul.f32 %v1563_v34, %v438_v14  ;;  %v569_v19 = vmul.f32 %v1563_v34, %v478_v15  ;;  %v361_v20 = vpop.f32.mrf.mxu0  ;;  %v401_v22 = vpop.f32.mrf.mxu1 }
  0x94   :  { %v909_v24 = vpack.c.bf16 %v845_v12, %v845_v12  ;;  %v925_v25 = vpack.c.bf16 %v861_v13, %v861_v13  ;;  %v522_v26 = vmul.f32 %v1563_v34, %v361_v20  ;;  %v538_v27 = vmul.f32 %v1563_v34, %v401_v22 }
  0x95   :  { %1005 = vst.msk [vmem:[%s2105_s5 + $0x80] sm:$0xf] %vm972_vm2, %v940_v16  ;;  %v621_v28 = vadd.f32 %v1568_v35, %v553_v18  ;;  %v637_v30 = vadd.f32 %v1568_v35, %v569_v19  ;;  %v1362_v19 = vld [vmem:[%s2104_s4 + $0x10] sm:$0xff]  }
  0x96   :  { %1021 = vst.msk [vmem:[%s2105_s5 + $0xc0] sm:$0xf] %vm972_vm2, %v956_v17  ;;  %v590_v32 = vadd.f32 %v1568_v35, %v522_v26  ;;  %v606_v36 = vadd.f32 %v1568_v35, %v538_v27  ;;  %v1304_v27 = vunpack.c.h.bf16 %v1635_v47  ;;  %v1708_v47 = vld [vmem:[%s2104_s4 + $0xd0] sm:$0xff]  }
  0x97   :  { %974 = vst.msk [vmem:[%s2105_s5 + $0x4] sm:$0xf] %vm972_vm2, %v909_v24  ;;  %v685_v38 = vmax.f32 %v621_v28, 0.0  ;;  %v701_v39 = vmax.f32 %v637_v30, 0.0 }
  0x98   :  { %990 = vst.msk [vmem:[%s2105_s5 + $0x44] sm:$0xf] %vm972_vm2, %v925_v25  ;;  %v654_v40 = vmax.f32 %v590_v32, 0.0  ;;  %v670_v41 = vmax.f32 %v606_v36, 0.0 }
  0x99   :  { %v877_v42 = vadd.f32 %v1300_v29, %v685_v38  ;;  %v893_v43 = vadd.f32 %v1332_v31, %v701_v39  ;;  %v1336_v29 = vunpack.c.h.bf16 %v1640_v49  ;;  %v1243_v31 = vunpack.c.l.bf16 %v1362_v19 }
  0x9a   :  { %v846_v44 = vadd.f32 %v1239_v33, %v654_v40  ;;  %v862_v45 = vadd.f32 %v1271_v37, %v670_v41  ;;  %v441_v46 = vpop.f32.mrf.mxu2  ;;  %v481_v48 = vpop.f32.mrf.mxu3  ;;  %v1275_v33 = vunpack.c.l.bf16 %v1370_v21 }
  0x9b   :  { %v941_v50 = vpack.c.bf16 %v877_v42, %v877_v42  ;;  %v957_v51 = vpack.c.bf16 %v893_v43, %v893_v43  ;;  %v554_v52 = vmul.f32 %v1563_v34, %v441_v46  ;;  %v570_v53 = vmul.f32 %v1563_v34, %v481_v48  ;;  %v363_v54 = vpop.f32.mrf.mxu0  ;;  %v403_v55 = vpop.f32.mrf.mxu1 }
  0x9c   :  { %v910_v56 = vpack.c.bf16 %v846_v44, %v846_v44  ;;  %v926_v57 = vpack.c.bf16 %v862_v45, %v862_v45  ;;  %v523_v58 = vmul.f32 %v1563_v34, %v363_v54  ;;  %v539_v59 = vmul.f32 %v1563_v34, %v403_v55  ;;  %v1703_v45 = vld [vmem:[%s2104_s4 + $0x90] sm:$0xff]  }
  0x9d   :  { %1006 = vst.msk [vmem:[%s2105_s5 + $0x84] sm:$0xf] %vm972_vm2, %v941_v50  ;;  %v622_v60 = vadd.f32 %v1568_v35, %v554_v52  ;;  %v638_v62 = vadd.f32 %v1568_v35, %v570_v53 }
  0x9e   :  { %1022 = vst.msk [vmem:[%s2105_s5 + $0xc4] sm:$0xf] %vm972_vm2, %v957_v51  ;;  %v591_v0 = vadd.f32 %v1568_v35, %v523_v58  ;;  %v607_v2 = vadd.f32 %v1568_v35, %v539_v59  ;;  %v1307_v59 = vunpack.c.l.bf16 %v1703_v45 }
  0x9f   :  { %975 = vst.msk [vmem:[%s2105_s5 + $0x8] sm:$0xf] %vm972_vm2, %v910_v56  ;;  %v686_v4 = vmax.f32 %v622_v60, 0.0  ;;  %v702_v5 = vmax.f32 %v638_v62, 0.0 }
  0xa0   :  { %991 = vst.msk [vmem:[%s2105_s5 + $0x48] sm:$0xf] %vm972_vm2, %v926_v57  ;;  %v655_v6 = vmax.f32 %v591_v0, 0.0  ;;  %v671_v7 = vmax.f32 %v607_v2, 0.0 }
  0xa1   :  { %v878_v8 = vadd.f32 %v1303_v61, %v686_v4  ;;  %v894_v9 = vadd.f32 %v1335_v63, %v702_v5  ;;  %v1339_v61 = vunpack.c.l.bf16 %v1708_v47  ;;  %v1244_v63 = vunpack.c.h.bf16 %v1362_v19  ;;  %v1371_v19 = vld [vmem:[%s2104_s4 + $0x58] sm:$0xff]  }
  0xa2   :  { %v847_v10 = vadd.f32 %v1240_v1, %v655_v6  ;;  %v863_v11 = vadd.f32 %v1272_v3, %v671_v7  ;;  %v443_v12 = vpop.f32.mrf.mxu2  ;;  %v483_v13 = vpop.f32.mrf.mxu3  ;;  %v1276_v1 = vunpack.c.h.bf16 %v1370_v21 }
  0xa3   :  { %v942_v14 = vpack.c.bf16 %v878_v8, %v878_v8  ;;  %v958_v15 = vpack.c.bf16 %v894_v9, %v894_v9  ;;  %v555_v16 = vmul.f32 %v1563_v34, %v443_v12  ;;  %v571_v17 = vmul.f32 %v1563_v34, %v483_v13  ;;  %v366_v18 = vpop.f32.mrf.mxu0  ;;  %v406_v20 = vpop.f32.mrf.mxu1 }
  0xa4   :  { %v911_v22 = vpack.c.bf16 %v847_v10, %v847_v10  ;;  %v927_v23 = vpack.c.bf16 %v863_v11, %v863_v11  ;;  %v524_v24 = vmul.f32 %v1563_v34, %v366_v18  ;;  %v540_v25 = vmul.f32 %v1563_v34, %v406_v20 }
  0xa5   :  { %1007 = vst.msk [vmem:[%s2105_s5 + $0x88] sm:$0xf] %vm972_vm2, %v942_v14  ;;  %v623_v26 = vadd.f32 %v1568_v35, %v555_v16  ;;  %v639_v28 = vadd.f32 %v1568_v35, %v571_v17  ;;  %v1363_v17 = vld [vmem:[%s2104_s4 + $0x18] sm:$0xff]  }
  0xa6   :  { %1023 = vst.msk [vmem:[%s2105_s5 + $0xc8] sm:$0xf] %vm972_vm2, %v958_v15  ;;  %v592_v30 = vadd.f32 %v1568_v35, %v524_v24  ;;  %v608_v32 = vadd.f32 %v1568_v35, %v540_v25  ;;  %v1308_v25 = vunpack.c.h.bf16 %v1703_v45  ;;  %v1776_v45 = vld [vmem:[%s2104_s4 + $0xd8] sm:$0xff]  }
  0xa7   :  { %976 = vst.msk [vmem:[%s2105_s5 + $0xc] sm:$0xf] %vm972_vm2, %v911_v22  ;;  %v687_v36 = vmax.f32 %v623_v26, 0.0  ;;  %v703_v37 = vmax.f32 %v639_v28, 0.0 }
  0xa8   :  { %992 = vst.msk [vmem:[%s2105_s5 + $0x4c] sm:$0xf] %vm972_vm2, %v927_v23  ;;  %v656_v38 = vmax.f32 %v592_v30, 0.0  ;;  %v672_v39 = vmax.f32 %v608_v32, 0.0 }
  0xa9   :  { %v879_v40 = vadd.f32 %v1304_v27, %v687_v36  ;;  %v895_v41 = vadd.f32 %v1336_v29, %v703_v37  ;;  %v1340_v27 = vunpack.c.h.bf16 %v1708_v47  ;;  %v1247_v29 = vunpack.c.l.bf16 %v1363_v17 }
  0xaa   :  { %v848_v42 = vadd.f32 %v1243_v31, %v656_v38  ;;  %v864_v43 = vadd.f32 %v1275_v33, %v672_v39  ;;  %v446_v44 = vpop.f32.mrf.mxu2  ;;  %v486_v46 = vpop.f32.mrf.mxu3  ;;  %v1279_v31 = vunpack.c.l.bf16 %v1371_v19 }
  0xab   :  { %v943_v48 = vpack.c.bf16 %v879_v40, %v879_v40  ;;  %v959_v49 = vpack.c.bf16 %v895_v41, %v895_v41  ;;  %v556_v50 = vmul.f32 %v1563_v34, %v446_v44  ;;  %v572_v51 = vmul.f32 %v1563_v34, %v486_v46  ;;  %v368_v52 = vpop.f32.mrf.mxu0  ;;  %v408_v53 = vpop.f32.mrf.mxu1 }
  0xac   :  { %v912_v54 = vpack.c.bf16 %v848_v42, %v848_v42  ;;  %v928_v55 = vpack.c.bf16 %v864_v43, %v864_v43  ;;  %v525_v56 = vmul.f32 %v1563_v34, %v368_v52  ;;  %v541_v57 = vmul.f32 %v1563_v34, %v408_v53  ;;  %v1771_v43 = vld [vmem:[%s2104_s4 + $0x98] sm:$0xff]  }
  0xad   :  { %1008 = vst.msk [vmem:[%s2105_s5 + $0x8c] sm:$0xf] %vm972_vm2, %v943_v48  ;;  %v624_v58 = vadd.f32 %v1568_v35, %v556_v50  ;;  %v640_v60 = vadd.f32 %v1568_v35, %v572_v51 }
  0xae   :  { %1024 = vst.msk [vmem:[%s2105_s5 + $0xcc] sm:$0xf] %vm972_vm2, %v959_v49  ;;  %v593_v62 = vadd.f32 %v1568_v35, %v525_v56  ;;  %v609_v0 = vadd.f32 %v1568_v35, %v541_v57  ;;  %v1311_v57 = vunpack.c.l.bf16 %v1771_v43 }
  0xaf   :  { %977 = vst.msk [vmem:[%s2105_s5 + $0x10] sm:$0xf] %vm972_vm2, %v912_v54  ;;  %v688_v2 = vmax.f32 %v624_v58, 0.0  ;;  %v704_v3 = vmax.f32 %v640_v60, 0.0 }
  0xb0   :  { %993 = vst.msk [vmem:[%s2105_s5 + $0x50] sm:$0xf] %vm972_vm2, %v928_v55  ;;  %v657_v4 = vmax.f32 %v593_v62, 0.0  ;;  %v673_v5 = vmax.f32 %v609_v0, 0.0 }
  0xb1   :  { %v880_v6 = vadd.f32 %v1307_v59, %v688_v2  ;;  %v896_v7 = vadd.f32 %v1339_v61, %v704_v3  ;;  %v1343_v59 = vunpack.c.l.bf16 %v1776_v45  ;;  %v1248_v61 = vunpack.c.h.bf16 %v1363_v17  ;;  %v1372_v17 = vld [vmem:[%s2104_s4 + $0x60] sm:$0xff]  }
  0xb2   :  { %v849_v8 = vadd.f32 %v1244_v63, %v657_v4  ;;  %v865_v9 = vadd.f32 %v1276_v1, %v673_v5  ;;  %v448_v10 = vpop.f32.mrf.mxu2  ;;  %v488_v11 = vpop.f32.mrf.mxu3  ;;  %v1280_v63 = vunpack.c.h.bf16 %v1371_v19 }
  0xb3   :  { %v944_v12 = vpack.c.bf16 %v880_v6, %v880_v6  ;;  %v960_v13 = vpack.c.bf16 %v896_v7, %v896_v7  ;;  %v557_v14 = vmul.f32 %v1563_v34, %v448_v10  ;;  %v573_v15 = vmul.f32 %v1563_v34, %v488_v11  ;;  %v371_v16 = vpop.f32.mrf.mxu0  ;;  %v411_v18 = vpop.f32.mrf.mxu1 }
  0xb4   :  { %v913_v20 = vpack.c.bf16 %v849_v8, %v849_v8  ;;  %v929_v21 = vpack.c.bf16 %v865_v9, %v865_v9  ;;  %v526_v22 = vmul.f32 %v1563_v34, %v371_v16  ;;  %v542_v23 = vmul.f32 %v1563_v34, %v411_v18 }
  0xb5   :  { %1009 = vst.msk [vmem:[%s2105_s5 + $0x90] sm:$0xf] %vm972_vm2, %v944_v12  ;;  %v625_v24 = vadd.f32 %v1568_v35, %v557_v14  ;;  %v641_v26 = vadd.f32 %v1568_v35, %v573_v15  ;;  %v1364_v15 = vld [vmem:[%s2104_s4 + $0x20] sm:$0xff]  }
  0xb6   :  { %1025 = vst.msk [vmem:[%s2105_s5 + $0xd0] sm:$0xf] %vm972_vm2, %v960_v13  ;;  %v594_v28 = vadd.f32 %v1568_v35, %v526_v22  ;;  %v610_v30 = vadd.f32 %v1568_v35, %v542_v23  ;;  %v1312_v23 = vunpack.c.h.bf16 %v1771_v43  ;;  %v1844_v43 = vld [vmem:[%s2104_s4 + $0xe0] sm:$0xff]  }
  0xb7   :  { %978 = vst.msk [vmem:[%s2105_s5 + $0x14] sm:$0xf] %vm972_vm2, %v913_v20  ;;  %v689_v32 = vmax.f32 %v625_v24, 0.0  ;;  %v705_v33 = vmax.f32 %v641_v26, 0.0 }
  0xb8   :  { %994 = vst.msk [vmem:[%s2105_s5 + $0x54] sm:$0xf] %vm972_vm2, %v929_v21  ;;  %v658_v36 = vmax.f32 %v594_v28, 0.0  ;;  %v674_v37 = vmax.f32 %v610_v30, 0.0 }
  0xb9   :  { %v881_v38 = vadd.f32 %v1308_v25, %v689_v32  ;;  %v897_v39 = vadd.f32 %v1340_v27, %v705_v33  ;;  %v1344_v25 = vunpack.c.h.bf16 %v1776_v45  ;;  %v1251_v27 = vunpack.c.l.bf16 %v1364_v15 }
  0xba   :  { %v850_v40 = vadd.f32 %v1247_v29, %v658_v36  ;;  %v866_v41 = vadd.f32 %v1279_v31, %v674_v37  ;;  %v451_v42 = vpop.f32.mrf.mxu2  ;;  %v491_v44 = vpop.f32.mrf.mxu3  ;;  %v1283_v29 = vunpack.c.l.bf16 %v1372_v17 }
  0xbb   :  { %v945_v46 = vpack.c.bf16 %v881_v38, %v881_v38  ;;  %v961_v47 = vpack.c.bf16 %v897_v39, %v897_v39  ;;  %v558_v48 = vmul.f32 %v1563_v34, %v451_v42  ;;  %v574_v49 = vmul.f32 %v1563_v34, %v491_v44  ;;  %v373_v50 = vpop.f32.mrf.mxu0  ;;  %v413_v51 = vpop.f32.mrf.mxu1 }
  0xbc   :  { %v914_v52 = vpack.c.bf16 %v850_v40, %v850_v40  ;;  %v930_v53 = vpack.c.bf16 %v866_v41, %v866_v41  ;;  %v527_v54 = vmul.f32 %v1563_v34, %v373_v50  ;;  %v543_v55 = vmul.f32 %v1563_v34, %v413_v51  ;;  %v1839_v41 = vld [vmem:[%s2104_s4 + $0xa0] sm:$0xff]  }
  0xbd   :  { %1010 = vst.msk [vmem:[%s2105_s5 + $0x94] sm:$0xf] %vm972_vm2, %v945_v46  ;;  %v626_v56 = vadd.f32 %v1568_v35, %v558_v48  ;;  %v642_v58 = vadd.f32 %v1568_v35, %v574_v49 }
  0xbe   :  { %1026 = vst.msk [vmem:[%s2105_s5 + $0xd4] sm:$0xf] %vm972_vm2, %v961_v47  ;;  %v595_v60 = vadd.f32 %v1568_v35, %v527_v54  ;;  %v611_v62 = vadd.f32 %v1568_v35, %v543_v55  ;;  %v1315_v55 = vunpack.c.l.bf16 %v1839_v41 }
  0xbf   :  { %979 = vst.msk [vmem:[%s2105_s5 + $0x18] sm:$0xf] %vm972_vm2, %v914_v52  ;;  %v690_v0 = vmax.f32 %v626_v56, 0.0  ;;  %v706_v1 = vmax.f32 %v642_v58, 0.0 }
  0xc0   :  { %995 = vst.msk [vmem:[%s2105_s5 + $0x58] sm:$0xf] %vm972_vm2, %v930_v53  ;;  %v659_v2 = vmax.f32 %v595_v60, 0.0  ;;  %v675_v3 = vmax.f32 %v611_v62, 0.0 }
  0xc1   :  { %v882_v4 = vadd.f32 %v1311_v57, %v690_v0  ;;  %v898_v5 = vadd.f32 %v1343_v59, %v706_v1  ;;  %v1347_v57 = vunpack.c.l.bf16 %v1844_v43  ;;  %v1252_v59 = vunpack.c.h.bf16 %v1364_v15  ;;  %v1373_v15 = vld [vmem:[%s2104_s4 + $0x68] sm:$0xff]  }
  0xc2   :  { %v851_v6 = vadd.f32 %v1248_v61, %v659_v2  ;;  %v867_v7 = vadd.f32 %v1280_v63, %v675_v3  ;;  %v453_v8 = vpop.f32.mrf.mxu2  ;;  %v493_v9 = vpop.f32.mrf.mxu3  ;;  %v1284_v61 = vunpack.c.h.bf16 %v1372_v17 }
  0xc3   :  { %v946_v10 = vpack.c.bf16 %v882_v4, %v882_v4  ;;  %v962_v11 = vpack.c.bf16 %v898_v5, %v898_v5  ;;  %v559_v12 = vmul.f32 %v1563_v34, %v453_v8  ;;  %v575_v13 = vmul.f32 %v1563_v34, %v493_v9  ;;  %v376_v14 = vpop.f32.mrf.mxu0  ;;  %v416_v16 = vpop.f32.mrf.mxu1 }
  0xc4   :  { %v915_v18 = vpack.c.bf16 %v851_v6, %v851_v6  ;;  %v931_v19 = vpack.c.bf16 %v867_v7, %v867_v7  ;;  %v528_v20 = vmul.f32 %v1563_v34, %v376_v14  ;;  %v544_v21 = vmul.f32 %v1563_v34, %v416_v16 }
  0xc5   :  { %1011 = vst.msk [vmem:[%s2105_s5 + $0x98] sm:$0xf] %vm972_vm2, %v946_v10  ;;  %v627_v22 = vadd.f32 %v1568_v35, %v559_v12  ;;  %v643_v24 = vadd.f32 %v1568_v35, %v575_v13  ;;  %v1365_v13 = vld [vmem:[%s2104_s4 + $0x28] sm:$0xff]  }
  0xc6   :  { %1027 = vst.msk [vmem:[%s2105_s5 + $0xd8] sm:$0xf] %vm972_vm2, %v962_v11  ;;  %v596_v26 = vadd.f32 %v1568_v35, %v528_v20  ;;  %v612_v28 = vadd.f32 %v1568_v35, %v544_v21  ;;  %v1316_v21 = vunpack.c.h.bf16 %v1839_v41  ;;  %v1912_v41 = vld [vmem:[%s2104_s4 + $0xe8] sm:$0xff]  }
  0xc7   :  { %980 = vst.msk [vmem:[%s2105_s5 + $0x1c] sm:$0xf] %vm972_vm2, %v915_v18  ;;  %v691_v30 = vmax.f32 %v627_v22, 0.0  ;;  %v707_v31 = vmax.f32 %v643_v24, 0.0 }
  0xc8   :  { %996 = vst.msk [vmem:[%s2105_s5 + $0x5c] sm:$0xf] %vm972_vm2, %v931_v19  ;;  %v660_v32 = vmax.f32 %v596_v26, 0.0  ;;  %v676_v33 = vmax.f32 %v612_v28, 0.0 }
  0xc9   :  { %v883_v36 = vadd.f32 %v1312_v23, %v691_v30  ;;  %v899_v37 = vadd.f32 %v1344_v25, %v707_v31  ;;  %v1348_v23 = vunpack.c.h.bf16 %v1844_v43  ;;  %v1255_v25 = vunpack.c.l.bf16 %v1365_v13 }
  0xca   :  { %v852_v38 = vadd.f32 %v1251_v27, %v660_v32  ;;  %v868_v39 = vadd.f32 %v1283_v29, %v676_v33  ;;  %v456_v40 = vpop.f32.mrf.mxu2  ;;  %v496_v42 = vpop.f32.mrf.mxu3  ;;  %v1287_v27 = vunpack.c.l.bf16 %v1373_v15 }
  0xcb   :  { %v947_v44 = vpack.c.bf16 %v883_v36, %v883_v36  ;;  %v963_v45 = vpack.c.bf16 %v899_v37, %v899_v37  ;;  %v560_v46 = vmul.f32 %v1563_v34, %v456_v40  ;;  %v576_v47 = vmul.f32 %v1563_v34, %v496_v42  ;;  %v378_v48 = vpop.f32.mrf.mxu0  ;;  %v418_v49 = vpop.f32.mrf.mxu1 }
  0xcc   :  { %v916_v50 = vpack.c.bf16 %v852_v38, %v852_v38  ;;  %v932_v51 = vpack.c.bf16 %v868_v39, %v868_v39  ;;  %v529_v52 = vmul.f32 %v1563_v34, %v378_v48  ;;  %v545_v53 = vmul.f32 %v1563_v34, %v418_v49  ;;  %v1907_v39 = vld [vmem:[%s2104_s4 + $0xa8] sm:$0xff]  }
  0xcd   :  { %1012 = vst.msk [vmem:[%s2105_s5 + $0x9c] sm:$0xf] %vm972_vm2, %v947_v44  ;;  %v628_v54 = vadd.f32 %v1568_v35, %v560_v46  ;;  %v644_v56 = vadd.f32 %v1568_v35, %v576_v47 }
  0xce   :  { %1028 = vst.msk [vmem:[%s2105_s5 + $0xdc] sm:$0xf] %vm972_vm2, %v963_v45  ;;  %v597_v58 = vadd.f32 %v1568_v35, %v529_v52  ;;  %v613_v60 = vadd.f32 %v1568_v35, %v545_v53  ;;  %v1319_v53 = vunpack.c.l.bf16 %v1907_v39 }
  0xcf   :  { %981 = vst.msk [vmem:[%s2105_s5 + $0x20] sm:$0xf] %vm972_vm2, %v916_v50  ;;  %v692_v62 = vmax.f32 %v628_v54, 0.0  ;;  %v708_v63 = vmax.f32 %v644_v56, 0.0 }
  0xd0   :  { %997 = vst.msk [vmem:[%s2105_s5 + $0x60] sm:$0xf] %vm972_vm2, %v932_v51  ;;  %v661_v0 = vmax.f32 %v597_v58, 0.0  ;;  %v677_v1 = vmax.f32 %v613_v60, 0.0 }
  0xd1   :  { %v884_v2 = vadd.f32 %v1315_v55, %v692_v62  ;;  %v900_v3 = vadd.f32 %v1347_v57, %v708_v63  ;;  %v1351_v55 = vunpack.c.l.bf16 %v1912_v41  ;;  %v1256_v57 = vunpack.c.h.bf16 %v1365_v13  ;;  %v1374_v13 = vld [vmem:[%s2104_s4 + $0x70] sm:$0xff]  }
  0xd2   :  { %v853_v4 = vadd.f32 %v1252_v59, %v661_v0  ;;  %v869_v5 = vadd.f32 %v1284_v61, %v677_v1  ;;  %v458_v6 = vpop.f32.mrf.mxu2  ;;  %v498_v7 = vpop.f32.mrf.mxu3  ;;  %v1288_v59 = vunpack.c.h.bf16 %v1373_v15 }
  0xd3   :  { %v948_v8 = vpack.c.bf16 %v884_v2, %v884_v2  ;;  %v964_v9 = vpack.c.bf16 %v900_v3, %v900_v3  ;;  %v561_v10 = vmul.f32 %v1563_v34, %v458_v6  ;;  %v577_v11 = vmul.f32 %v1563_v34, %v498_v7  ;;  %v381_v12 = vpop.f32.mrf.mxu0  ;;  %v421_v14 = vpop.f32.mrf.mxu1 }
  0xd4   :  { %v917_v16 = vpack.c.bf16 %v853_v4, %v853_v4  ;;  %v933_v17 = vpack.c.bf16 %v869_v5, %v869_v5  ;;  %v530_v18 = vmul.f32 %v1563_v34, %v381_v12  ;;  %v546_v19 = vmul.f32 %v1563_v34, %v421_v14 }
  0xd5   :  { %1013 = vst.msk [vmem:[%s2105_s5 + $0xa0] sm:$0xf] %vm972_vm2, %v948_v8  ;;  %v629_v20 = vadd.f32 %v1568_v35, %v561_v10  ;;  %v645_v22 = vadd.f32 %v1568_v35, %v577_v11  ;;  %v1366_v11 = vld [vmem:[%s2104_s4 + $0x30] sm:$0xff]  }
  0xd6   :  { %1029 = vst.msk [vmem:[%s2105_s5 + $0xe0] sm:$0xf] %vm972_vm2, %v964_v9  ;;  %v598_v24 = vadd.f32 %v1568_v35, %v530_v18  ;;  %v614_v26 = vadd.f32 %v1568_v35, %v546_v19  ;;  %v1320_v19 = vunpack.c.h.bf16 %v1907_v39  ;;  %v1980_v39 = vld [vmem:[%s2104_s4 + $0xf0] sm:$0xff]  }
  0xd7   :  { %982 = vst.msk [vmem:[%s2105_s5 + $0x24] sm:$0xf] %vm972_vm2, %v917_v16  ;;  %v693_v28 = vmax.f32 %v629_v20, 0.0  ;;  %v709_v29 = vmax.f32 %v645_v22, 0.0 }
  0xd8   :  { %998 = vst.msk [vmem:[%s2105_s5 + $0x64] sm:$0xf] %vm972_vm2, %v933_v17  ;;  %v662_v30 = vmax.f32 %v598_v24, 0.0  ;;  %v678_v31 = vmax.f32 %v614_v26, 0.0 }
  0xd9   :  { %v885_v32 = vadd.f32 %v1316_v21, %v693_v28  ;;  %v901_v33 = vadd.f32 %v1348_v23, %v709_v29  ;;  %v1352_v21 = vunpack.c.h.bf16 %v1912_v41  ;;  %v1259_v23 = vunpack.c.l.bf16 %v1366_v11 }
  0xda   :  { %v854_v36 = vadd.f32 %v1255_v25, %v662_v30  ;;  %v870_v37 = vadd.f32 %v1287_v27, %v678_v31  ;;  %v461_v38 = vpop.f32.mrf.mxu2  ;;  %v501_v40 = vpop.f32.mrf.mxu3  ;;  %v1291_v25 = vunpack.c.l.bf16 %v1374_v13 }
  0xdb   :  { %v949_v42 = vpack.c.bf16 %v885_v32, %v885_v32  ;;  %v965_v43 = vpack.c.bf16 %v901_v33, %v901_v33  ;;  %v562_v44 = vmul.f32 %v1563_v34, %v461_v38  ;;  %v578_v45 = vmul.f32 %v1563_v34, %v501_v40  ;;  %v383_v46 = vpop.f32.mrf.mxu0  ;;  %v423_v47 = vpop.f32.mrf.mxu1 }
  0xdc   :  { %v918_v48 = vpack.c.bf16 %v854_v36, %v854_v36  ;;  %v934_v49 = vpack.c.bf16 %v870_v37, %v870_v37  ;;  %v531_v50 = vmul.f32 %v1563_v34, %v383_v46  ;;  %v547_v51 = vmul.f32 %v1563_v34, %v423_v47  ;;  %v1975_v37 = vld [vmem:[%s2104_s4 + $0xb0] sm:$0xff]  }
  0xdd   :  { %1014 = vst.msk [vmem:[%s2105_s5 + $0xa4] sm:$0xf] %vm972_vm2, %v949_v42  ;;  %v630_v52 = vadd.f32 %v1568_v35, %v562_v44  ;;  %v646_v54 = vadd.f32 %v1568_v35, %v578_v45 }
  0xde   :  { %1030 = vst.msk [vmem:[%s2105_s5 + $0xe4] sm:$0xf] %vm972_vm2, %v965_v43  ;;  %v599_v56 = vadd.f32 %v1568_v35, %v531_v50  ;;  %v615_v58 = vadd.f32 %v1568_v35, %v547_v51  ;;  %v1323_v51 = vunpack.c.l.bf16 %v1975_v37 }
  0xdf   :  { %983 = vst.msk [vmem:[%s2105_s5 + $0x28] sm:$0xf] %vm972_vm2, %v918_v48  ;;  %v694_v60 = vmax.f32 %v630_v52, 0.0  ;;  %v710_v61 = vmax.f32 %v646_v54, 0.0 }
  0xe0   :  { %999 = vst.msk [vmem:[%s2105_s5 + $0x68] sm:$0xf] %vm972_vm2, %v934_v49  ;;  %v663_v62 = vmax.f32 %v599_v56, 0.0  ;;  %v679_v63 = vmax.f32 %v615_v58, 0.0 }
  0xe1   :  { %v886_v0 = vadd.f32 %v1319_v53, %v694_v60  ;;  %v902_v1 = vadd.f32 %v1351_v55, %v710_v61  ;;  %v1355_v53 = vunpack.c.l.bf16 %v1980_v39  ;;  %v1260_v55 = vunpack.c.h.bf16 %v1366_v11  ;;  %v1375_v11 = vld [vmem:[%s2104_s4 + $0x78] sm:$0xff]  }
  0xe2   :  { %v855_v2 = vadd.f32 %v1256_v57, %v663_v62  ;;  %v871_v3 = vadd.f32 %v1288_v59, %v679_v63  ;;  %v463_v4 = vpop.f32.mrf.mxu2  ;;  %v503_v5 = vpop.f32.mrf.mxu3  ;;  %v1292_v57 = vunpack.c.h.bf16 %v1374_v13 }
  0xe3   :  { %v950_v6 = vpack.c.bf16 %v886_v0, %v886_v0  ;;  %v966_v7 = vpack.c.bf16 %v902_v1, %v902_v1  ;;  %v563_v8 = vmul.f32 %v1563_v34, %v463_v4  ;;  %v579_v9 = vmul.f32 %v1563_v34, %v503_v5  ;;  %v386_v10 = vpop.f32.mrf.mxu0  ;;  %v426_v12 = vpop.f32.mrf.mxu1 }
  0xe4   :  { %v919_v14 = vpack.c.bf16 %v855_v2, %v855_v2  ;;  %v935_v15 = vpack.c.bf16 %v871_v3, %v871_v3  ;;  %v532_v16 = vmul.f32 %v1563_v34, %v386_v10  ;;  %v548_v17 = vmul.f32 %v1563_v34, %v426_v12 }
  0xe5   :  { %1015 = vst.msk [vmem:[%s2105_s5 + $0xa8] sm:$0xf] %vm972_vm2, %v950_v6  ;;  %v631_v18 = vadd.f32 %v1568_v35, %v563_v8  ;;  %v647_v20 = vadd.f32 %v1568_v35, %v579_v9  ;;  %v1367_v9 = vld [vmem:[%s2104_s4 + $0x38] sm:$0xff]  }
  0xe6   :  { %1031 = vst.msk [vmem:[%s2105_s5 + $0xe8] sm:$0xf] %vm972_vm2, %v966_v7  ;;  %v600_v22 = vadd.f32 %v1568_v35, %v532_v16  ;;  %v616_v24 = vadd.f32 %v1568_v35, %v548_v17  ;;  %v1324_v17 = vunpack.c.h.bf16 %v1975_v37  ;;  %v1391_v37 = vld [vmem:[%s2104_s4 + $0xf8] sm:$0xff]  }
  0xe7   :  { %984 = vst.msk [vmem:[%s2105_s5 + $0x2c] sm:$0xf] %vm972_vm2, %v919_v14  ;;  %v695_v26 = vmax.f32 %v631_v18, 0.0  ;;  %v711_v27 = vmax.f32 %v647_v20, 0.0 }
  0xe8   :  { %1000 = vst.msk [vmem:[%s2105_s5 + $0x6c] sm:$0xf] %vm972_vm2, %v935_v15  ;;  %v664_v28 = vmax.f32 %v600_v22, 0.0  ;;  %v680_v29 = vmax.f32 %v616_v24, 0.0 }
  0xe9   :  { %v887_v30 = vadd.f32 %v1320_v19, %v695_v26  ;;  %v903_v31 = vadd.f32 %v1352_v21, %v711_v27  ;;  %v1356_v19 = vunpack.c.h.bf16 %v1980_v39  ;;  %v1263_v21 = vunpack.c.l.bf16 %v1367_v9 }
  0xea   :  { %v856_v32 = vadd.f32 %v1259_v23, %v664_v28  ;;  %v872_v33 = vadd.f32 %v1291_v25, %v680_v29  ;;  %v466_v36 = vpop.f32.mrf.mxu2  ;;  %v506_v38 = vpop.f32.mrf.mxu3  ;;  %v1295_v23 = vunpack.c.l.bf16 %v1375_v11 }
  0xeb   :  { %v951_v40 = vpack.c.bf16 %v887_v30, %v887_v30  ;;  %v967_v41 = vpack.c.bf16 %v903_v31, %v903_v31  ;;  %v564_v42 = vmul.f32 %v1563_v34, %v466_v36  ;;  %v580_v43 = vmul.f32 %v1563_v34, %v506_v38  ;;  %v388_v44 = vpop.f32.mrf.mxu0  ;;  %v428_v45 = vpop.f32.mrf.mxu1 }
  0xec   :  { %v920_v46 = vpack.c.bf16 %v856_v32, %v856_v32  ;;  %v936_v47 = vpack.c.bf16 %v872_v33, %v872_v33  ;;  %v533_v48 = vmul.f32 %v1563_v34, %v388_v44  ;;  %v549_v49 = vmul.f32 %v1563_v34, %v428_v45  ;;  %v1383_v33 = vld [vmem:[%s2104_s4 + $0xb8] sm:$0xff]  }
  0xed   :  { %1016 = vst.msk [vmem:[%s2105_s5 + $0xac] sm:$0xf] %vm972_vm2, %v951_v40  ;;  %v632_v50 = vadd.f32 %v1568_v35, %v564_v42  ;;  %v648_v52 = vadd.f32 %v1568_v35, %v580_v43 }
  0xee   :  { %1032 = vst.msk [vmem:[%s2105_s5 + $0xec] sm:$0xf] %vm972_vm2, %v967_v41  ;;  %v601_v54 = vadd.f32 %v1568_v35, %v533_v48  ;;  %v617_v56 = vadd.f32 %v1568_v35, %v549_v49  ;;  %v1327_v49 = vunpack.c.l.bf16 %v1383_v33 }
  0xef   :  { %985 = vst.msk [vmem:[%s2105_s5 + $0x30] sm:$0xf] %vm972_vm2, %v920_v46  ;;  %v696_v58 = vmax.f32 %v632_v50, 0.0  ;;  %v712_v59 = vmax.f32 %v648_v52, 0.0 }
  0xf0   :  { %1001 = vst.msk [vmem:[%s2105_s5 + $0x70] sm:$0xf] %vm972_vm2, %v936_v47  ;;  %v665_v60 = vmax.f32 %v601_v54, 0.0  ;;  %v681_v61 = vmax.f32 %v617_v56, 0.0  ;;  %v1296_v54 = vunpack.c.h.bf16 %v1375_v11  ;;  %v1360_v11 = vunpack.c.h.bf16 %v1391_v37 }
  0xf1   :  { %v888_v62 = vadd.f32 %v1323_v51, %v696_v58  ;;  %v904_v63 = vadd.f32 %v1355_v53, %v712_v59  ;;  %v1359_v51 = vunpack.c.l.bf16 %v1391_v37  ;;  %v1264_v53 = vunpack.c.h.bf16 %v1367_v9 }
  0xf2   :  { %v857_v0 = vadd.f32 %v1260_v55, %v665_v60  ;;  %v873_v1 = vadd.f32 %v1292_v57, %v681_v61  ;;  %v468_v2 = vpop.f32.mrf.mxu2  ;;  %v508_v3 = vpop.f32.mrf.mxu3  ;;  %v1328_v9 = vunpack.c.h.bf16 %v1383_v33 }
  0xf3   :  { %v952_v4 = vpack.c.bf16 %v888_v62, %v888_v62  ;;  %v968_v5 = vpack.c.bf16 %v904_v63, %v904_v63  ;;  %v565_v6 = vmul.f32 %v1563_v34, %v468_v2  ;;  %v581_v7 = vmul.f32 %v1563_v34, %v508_v3  ;;  %v391_v8 = vpop.f32.mrf.mxu0  ;;  %v431_v10 = vpop.f32.mrf.mxu1  ;;  %v1397_v2 = vld [vmem:[%s2102_s2] ss:$0 sm:$0xff] }
  0xf4   :  { %v921_v12 = vpack.c.bf16 %v857_v0, %v857_v0  ;;  %v937_v13 = vpack.c.bf16 %v873_v1, %v873_v1  ;;  %v534_v14 = vmul.f32 %v1563_v34, %v391_v8  ;;  %v550_v15 = vmul.f32 %v1563_v34, %v431_v10 }
  0xf5   :  { %1017 = vst.msk [vmem:[%s2105_s5 + $0xb0] sm:$0xf] %vm972_vm2, %v952_v4  ;;  %v633_v16 = vadd.f32 %v1568_v35, %v565_v6  ;;  %v649_v18 = vadd.f32 %v1568_v35, %v581_v7  ;;  %v1398_v7 = vld [vmem:[%s2103_s3] ss:$0 sm:$0xff] }
  0xf6   :  { %1033 = vst.msk [vmem:[%s2105_s5 + $0xf0] sm:$0xf] %vm972_vm2, %v968_v5  ;;  %v602_v20 = vadd.f32 %v1568_v35, %v534_v14  ;;  %v618_v22 = vadd.f32 %v1568_v35, %v550_v15 }
  0xf7   :  { %986 = vst.msk [vmem:[%s2105_s5 + $0x34] sm:$0xf] %vm972_vm2, %v921_v12  ;;  %v697_v24 = vmax.f32 %v633_v16, 0.0  ;;  %v713_v25 = vmax.f32 %v649_v18, 0.0 }
  0xf8   :  { %1002 = vst.msk [vmem:[%s2105_s5 + $0x74] sm:$0xf] %vm972_vm2, %v937_v13  ;;  %v666_v26 = vmax.f32 %v602_v20, 0.0  ;;  %v682_v27 = vmax.f32 %v618_v22, 0.0 }
  0xf9   :  { %v889_v28 = vadd.f32 %v1324_v17, %v697_v24  ;;  %v905_v29 = vadd.f32 %v1356_v19, %v713_v25 }
  0xfa   :  { %v858_v30 = vadd.f32 %v1263_v21, %v666_v26  ;;  %v874_v31 = vadd.f32 %v1295_v23, %v682_v27  ;;  %v471_v32 = vpop.f32.mrf.mxu2  ;;  %v511_v36 = vpop.f32.mrf.mxu3 }
  0xfb   :  { %v953_v38 = vpack.c.bf16 %v889_v28, %v889_v28  ;;  %v969_v39 = vpack.c.bf16 %v905_v29, %v905_v29  ;;  %v566_v40 = vmul.f32 %v1563_v34, %v471_v32  ;;  %v582_v41 = vmul.f32 %v1563_v34, %v511_v36  ;;  %v393_v42 = vpop.f32.mrf.mxu0  ;;  %v433_v43 = vpop.f32.mrf.mxu1 }
  0xfc   :  { %v922_v44 = vpack.c.bf16 %v858_v30, %v858_v30  ;;  %v938_v45 = vpack.c.bf16 %v874_v31, %v874_v31  ;;  %v535_v46 = vmul.f32 %v1563_v34, %v393_v42  ;;  %v551_v47 = vmul.f32 %v1563_v34, %v433_v43 }
  0xfd   :  { %1018 = vst.msk [vmem:[%s2105_s5 + $0xb4] sm:$0xf] %vm972_vm2, %v953_v38  ;;  %v634_v48 = vadd.f32 %v1568_v35, %v566_v40  ;;  %v650_v50 = vadd.f32 %v1568_v35, %v582_v41 }
  0xfe   :  { %1034 = vst.msk [vmem:[%s2105_s5 + $0xf4] sm:$0xf] %vm972_vm2, %v969_v39  ;;  %v603_v52 = vadd.f32 %v1568_v35, %v535_v46  ;;  %v619_v34 = vadd.f32 %v1568_v35, %v551_v47 }
  0xff   :  { %987 = vst.msk [vmem:[%s2105_s5 + $0x38] sm:$0xf] %vm972_vm2, %v922_v44  ;;  %v698_v55 = vmax.f32 %v634_v48, 0.0  ;;  %v714_v56 = vmax.f32 %v650_v50, 0.0 }
 0x100   :  { %1003 = vst.msk [vmem:[%s2105_s5 + $0x78] sm:$0xf] %vm972_vm2, %v938_v45  ;;  %v667_v57 = vmax.f32 %v603_v52, 0.0  ;;  %v683_v58 = vmax.f32 %v619_v34, 0.0 }
 0x101   :  { %v890_v59 = vadd.f32 %v1327_v49, %v698_v55  ;;  %v906_v60 = vadd.f32 %v1359_v51, %v714_v56 }
 0x102   :  { %v859_v61 = vadd.f32 %v1264_v53, %v667_v57  ;;  %v875_v62 = vadd.f32 %v1296_v54, %v683_v58  ;;  %v473_v35 = vpop.f32.mrf.mxu2  ;;  %v513_v63 = vpop.f32.mrf.mxu3 }
 0x103   :  { %v954_v0 = vpack.c.bf16 %v890_v59, %v890_v59  ;;  %v970_v1 = vpack.c.bf16 %v906_v60, %v906_v60  ;;  %v567_v3 = vmul.f32 %v1397_v2, %v473_v35  ;;  %v583_v4 = vmul.f32 %v1397_v2, %v513_v63 }
 0x104   :  { %v923_v5 = vpack.c.bf16 %v859_v61, %v859_v61  ;;  %v939_v6 = vpack.c.bf16 %v875_v62, %v875_v62 }
 0x105   :  { %1019 = vst.msk [vmem:[%s2105_s5 + $0xb8] sm:$0xf] %vm972_vm2, %v954_v0  ;;  %v635_v8 = vadd.f32 %v1398_v7, %v567_v3  ;;  %v651_v10 = vadd.f32 %v1398_v7, %v583_v4 }
 0x106   :  { %1035 = vst.msk [vmem:[%s2105_s5 + $0xf8] sm:$0xf] %vm972_vm2, %v970_v1 }
 0x107   :  { %988 = vst.msk [vmem:[%s2105_s5 + $0x3c] sm:$0xf] %vm972_vm2, %v923_v5  ;;  %v699_v12 = vmax.f32 %v635_v8, 0.0  ;;  %v715_v13 = vmax.f32 %v651_v10, 0.0 }
 0x108   :  { %1004 = vst.msk [vmem:[%s2105_s5 + $0x7c] sm:$0xf] %vm972_vm2, %v939_v6 }
 0x109   :  { %v891_v14 = vadd.f32 %v1328_v9, %v699_v12  ;;  %v907_v15 = vadd.f32 %v1360_v11, %v715_v13 }
 0x10b   :  { %v955_v16 = vpack.c.bf16 %v891_v14, %v891_v14  ;;  %v971_v17 = vpack.c.bf16 %v907_v15, %v907_v15 }
 0x10d   :  { %1020 = vst.msk [vmem:[%s2105_s5 + $0xbc] sm:$0xf] %vm972_vm2, %v955_v16 }
 0x10e   :  { %1036 = vst.msk [vmem:[%s2105_s5 + $0xfc] sm:$0xf] %vm972_vm2, %v971_v17 }

// kernel: fsm_forward.4
= control target key start
LH: loop header
LB: loop body
LE: loop exit
PB: predicated region body
PF: predicated region fallthrough
CT: control target
= control target key end

     0   :  { %s3200_s15 = smov 0   ;;  %s4480_s0 = inlined_call_operand.vmem [shape: f32[2,362,8], index: 0, kind: input, shape index: {}]   ;;  %s4481_s1 = inlined_call_operand.vmem [shape: bf16[9,8,4], index: 1, kind: input, shape index: {}]   ;;  %s4482_s2 = inlined_call_operand.vmem [shape: f32[1,4], index: 2, kind: input, shape index: {}]   ;;  %s4483_s3 = inlined_call_operand.vmem [shape: f32[1,4], index: 3, kind: input, shape index: {}]   ;;  %s4484_s4 = inlined_call_operand.vmem [shape: bf16[2,324,4], index: 4, kind: output, shape index: {}]  }
   0x1 LB: > { %s2944_s16 = sadd.s32 4294967295, %s3173_s15   ;;  %p2948_p0 = scmp.ge.s32.totalorder %s3173_s15, 1  ;;  %s3173_s15 = sphi %s3200_s15, %s14_s15  }
   0x2   : > { %p162_p1 = scmp.lt.s32.totalorder %s3173_s15, 3 }
   0x4   : > { %p163_p2 = pnand %p2948_p0, %p162_p1 }
   0x6   : > { %166 = sbr.rel (%p163_p2) target bundleno = 920 (0x398), region = 36 }
   0xb   : > { %v2951_v0 = vld [vmem:[%s4481_s1 + $0x4] sm:$0xf]  ;;  %vm390_vm0 = vcmask 1043456   ;;  %p188_p3 = scmp.lt.s32.totalorder %s2944_s16, 1  ;;  %v2994_v2 = vld [vmem:[%s4481_s1 + $0x8] sm:$0xf] }
   0xc   : > { %v392_v1 = vsel %vm390_vm0, %v2951_v0, 0  ;;  %v261_v3 = vld [vmem:[%s4481_s1] sm:$0xf]  ;;  %v814_v4 = vsel %vm390_vm0, %v2994_v2, 0  ;;  %v3038_v6 = vld [vmem:[%s4481_s1 + $0x10] sm:$0xf] }
   0xd   : > { %3150 = vmatpush.bf16.msra.mxu1 %v392_v1  ;;  %3151 = vmatpush.bf16.msra.mxu2 %v392_v1  ;;  %s4500_s16 = smov (!%p188_p3, %s2944_s16), 1  ;;  %v571_v5 = vsel %vm390_vm0, %v261_v3, 0  ;;  %v1382_v7 = vsel %vm390_vm0, %v3038_v6, 0  ;;  %vm326_vm1 = vcmask 64512   ;;  %v3016_v29 = vld [vmem:[%s4481_s1 + $0xc] sm:$0xf] }
   0xe   : > { %401 = vmatpush.bf16.msra.mxu0 %v392_v1  ;;  %s3153_s25 = smul.u32 368, %s4500_s16  ;;  %3152 = vmatpush.bf16.msra.mxu3 %v392_v1  ;;  %v1098_v32 = vsel %vm390_vm0, %v3016_v29, 0  ;;  %v3082_v2 = vld [vmem:[%s4481_s1 + $0x18] sm:$0xf]  ;;  %v3104_v3 = vld [vmem:[%s4481_s1 + $0x1c] sm:$0xf] }
   0xf   : > { %v2234_v6 = vsel %vm390_vm0, %v3104_v3, 0  ;;  %s3154_s19 = smul.u32 164, %s4500_s16  ;;  %vm2846_vm2 = vcmask 27648   ;;  %vm2887_vm3 = vcmask 25600  }
  0x10   : > { %s3230_s28 = scalar_lea.vmem %s4480_s0, %s3153_s25 }
  0x11   : > { %823 = vmatpush.bf16.msrb.mxu2 %v814_v4  ;;  %580 = vmatpush.bf16.msrb.mxu1 %v571_v5  ;;  %v274_v8 = vld [vmem:[%s3230_s28 + $0x61] sm:$0xff]  ;;  %v275_v9 = vld [vmem:[%s3230_s28 + $0x69] sm:$0xff]  ;;  %v276_v20 = vld [vmem:[%s3230_s28 + $0x71] sm:$0xff]  ;;  %v1950_v5 = vsel %vm390_vm0, %v3082_v2, 0  ;;  %s4053_s22 = scalar_lea.vmem %s4484_s4, %s3154_s19 }
  0x12   : > { %1391 = vmatpush.bf16.msrb.mxu0 %v1382_v7  ;;  %v286_v10 = vld [vmem:[%s3230_s28 + $0xc1] sm:$0xff]  ;;  %v309_v11 = vpack.c.bf16 %v275_v9, %v274_v8  ;;  %v287_v12 = vld [vmem:[%s3230_s28 + $0xc9] sm:$0xff]  ;;  %v277_v21 = vld [vmem:[%s3230_s28 + $0x79] sm:$0xff]  ;;  %1107 = vmatpush.bf16.msrb.mxu3 %v1098_v32 }
  0x13   : > { %v262_v13 = vld [vmem:[%s3230_s28 + $0x1] sm:$0xff]  ;;  %v263_v14 = vld [vmem:[%s3230_s28 + $0x9] sm:$0xff]  ;;  %v315_v15 = vpack.c.bf16 %v287_v12, %v286_v10  ;;  %v288_v22 = vld [vmem:[%s3230_s28 + $0xd1] sm:$0xff]  ;;  %v310_v26 = vpack.c.bf16 %v277_v21, %v276_v20 }
  0x14   : > { %v303_v16 = vpack.c.bf16 %v263_v14, %v262_v13  ;;  %2958 = vmatmul.msk.bf16.vlgmr.msra.gmra.mxu1 %vm326_vm1, %v309_v11  ;;  %v298_v17 = vld [vmem:[%s3230_s28 + $0x121] sm:$0xff]  ;;  %v299_v18 = vld [vmem:[%s3230_s28 + $0x129] sm:$0xff]  ;;  %v289_v23 = vld [vmem:[%s3230_s28 + $0xd9] sm:$0xff] }
  0x15   : > { %2964 = vmatmul.msk.bf16.vlgmr.msra.gmra.mxu2 %vm326_vm1, %v315_v15  ;;  %v321_v19 = vpack.c.bf16 %v299_v18, %v298_v17  ;;  %v264_v24 = vld [vmem:[%s3230_s28 + $0x11] sm:$0xff]  ;;  %v265_v25 = vld [vmem:[%s3230_s28 + $0x19] sm:$0xff]  ;;  %v316_v27 = vpack.c.bf16 %v289_v23, %v288_v22  ;;  %v278_v34 = vld [vmem:[%s3230_s28 + $0x81] sm:$0xff] }
  0x16   : > { %2952 = vmatmul.msk.bf16.vlgmr.msra.gmra.mxu0 %vm326_vm1, %v303_v16  ;;  %v304_v28 = vpack.c.bf16 %v265_v25, %v264_v24  ;;  %v300_v30 = vld [vmem:[%s3230_s28 + $0x131] sm:$0xff]  ;;  %v301_v31 = vld [vmem:[%s3230_s28 + $0x139] sm:$0xff]  ;;  %v279_v35 = vld [vmem:[%s3230_s28 + $0x89] sm:$0xff]  ;;  %1959 = vmatpush.bf16.msra.mxu2 %v1950_v5 }
  0x17   : > { %2970 = vmatmul.msk.bf16.vlgmr.msra.gmra.mxu3 %vm326_vm1, %v321_v19  ;;  %v322_v33 = vpack.c.bf16 %v301_v31, %v300_v30  ;;  %v290_v36 = vld [vmem:[%s3230_s28 + $0xe1] sm:$0xff]  ;;  %v291_v37 = vld [vmem:[%s3230_s28 + $0xe9] sm:$0xff]  ;;  %v311_v40 = vpack.c.bf16 %v279_v35, %v278_v34  ;;  %v280_v45 = vld [vmem:[%s3230_s28 + $0x91] sm:$0xff] }
  0x18   : > { %v266_v38 = vld [vmem:[%s3230_s28 + $0x21] sm:$0xff]  ;;  %v267_v39 = vld [vmem:[%s3230_s28 + $0x29] sm:$0xff]  ;;  %v317_v41 = vpack.c.bf16 %v291_v37, %v290_v36  ;;  %v281_v46 = vld [vmem:[%s3230_s28 + $0x99] sm:$0xff]  ;;  %2243 = vmatpush.bf16.msra.mxu3 %v2234_v6 }
  0x19   : > { %v305_v42 = vpack.c.bf16 %v267_v39, %v266_v38  ;;  %v302_v43 = vld [vmem:[%s3230_s28 + $0x141] sm:$0xf]  ;;  %v292_v47 = vld [vmem:[%s3230_s28 + $0xf1] sm:$0xff]  ;;  %v293_v48 = vld [vmem:[%s3230_s28 + $0xf9] sm:$0xff]  ;;  %v312_v51 = vpack.c.bf16 %v281_v46, %v280_v45 }
  0x1a   : > { %v323_v44 = vpack.c.bf16 %v302_v43, %v302_v43  ;;  %v268_v49 = vld [vmem:[%s3230_s28 + $0x31] sm:$0xff]  ;;  %v269_v50 = vld [vmem:[%s3230_s28 + $0x39] sm:$0xff]  ;;  %v318_v52 = vpack.c.bf16 %v293_v48, %v292_v47  ;;  %v282_v57 = vld [vmem:[%s3230_s28 + $0xa1] sm:$0xff] }
  0x1b   : > { %v306_v53 = vpack.c.bf16 %v269_v50, %v268_v49  ;;  %v970_v54 = vld [vmem:[%s3230_s28 + $0x12] sm:$0xff]  ;;  %v971_v55 = vld [vmem:[%s3230_s28 + $0x1a] sm:$0xff]  ;;  %v283_v58 = vld [vmem:[%s3230_s28 + $0xa9] sm:$0xff] }
  0x1c   : > { %v3282_v56 = vpack.c.bf16 %v971_v55, %v970_v54  ;;  %v294_v59 = vld [vmem:[%s3230_s28 + $0x101] sm:$0xff]  ;;  %v295_v60 = vld [vmem:[%s3230_s28 + $0x109] sm:$0xff]  ;;  %v313_v63 = vpack.c.bf16 %v283_v58, %v282_v57  ;;  %v3060_v4 = vld [vmem:[%s4481_s1 + $0x14] sm:$0xf] }
  0x1d   : > { %v270_v61 = vld [vmem:[%s3230_s28 + $0x41] sm:$0xff]  ;;  %v271_v62 = vld [vmem:[%s3230_s28 + $0x49] sm:$0xff]  ;;  %v319_v0 = vpack.c.bf16 %v295_v60, %v294_v59  ;;  %v1666_v7 = vsel %vm390_vm0, %v3060_v4, 0  ;;  %v284_v13 = vld [vmem:[%s3230_s28 + $0xb1] sm:$0xff] }
  0x1e   : > { %v307_v1 = vpack.c.bf16 %v271_v62, %v270_v61  ;;  %v972_v8 = vld [vmem:[%s3230_s28 + $0x22] sm:$0xff]  ;;  %v973_v9 = vld [vmem:[%s3230_s28 + $0x2a] sm:$0xff]  ;;  %1675 = vmatpush.bf16.msra.mxu1 %v1666_v7  ;;  %v285_v14 = vld [vmem:[%s3230_s28 + $0xb9] sm:$0xff] }
  0x1f   : > { %v1012_v10 = vpack.c.bf16 %v973_v9, %v972_v8  ;;  %v3126_v11 = vld [vmem:[%s4481_s1 + $0x20] sm:$0xf]  ;;  %v296_v15 = vld [vmem:[%s3230_s28 + $0x111] sm:$0xff]  ;;  %v314_v19 = vpack.c.bf16 %v285_v14, %v284_v13  ;;  %v204_v47 = vld [vmem:[%s3230_s28 + $0x28] sm:$0xff] }
  0x20   : > { %v2518_v12 = vsel %vm390_vm0, %v3126_v11, 0  ;;  %v297_v16 = vld [vmem:[%s3230_s28 + $0x119] sm:$0xff]  ;;  %v272_v17 = vld [vmem:[%s3230_s28 + $0x51] sm:$0xff]  ;;  %v976_v34 = vld [vmem:[%s3230_s28 + $0x42] sm:$0xff] }
  0x21   : > { %2527 = vmatpush.bf16.msra.mxu0 %v2518_v12  ;;  %v273_v18 = vld [vmem:[%s3230_s28 + $0x59] sm:$0xff]  ;;  %v320_v20 = vpack.c.bf16 %v297_v16, %v296_v15  ;;  %v977_v35 = vld [vmem:[%s3230_s28 + $0x4a] sm:$0xff]  ;;  %v980_v57 = vld [vmem:[%s3230_s28 + $0x62] sm:$0xff] }
  0x22   : > { %v308_v21 = vpack.c.bf16 %v273_v18, %v272_v17  ;;  %v974_v22 = vld [vmem:[%s3230_s28 + $0x32] sm:$0xff]  ;;  %v975_v23 = vld [vmem:[%s3230_s28 + $0x3a] sm:$0xff]  ;;  %v3337_v36 = vpack.c.bf16 %v977_v35, %v976_v34  ;;  %v1256_v39 = vld [vmem:[%s3230_s28 + $0x23] sm:$0xff] }
  0x23   : > { %v1013_v24 = vpack.c.bf16 %v975_v23, %v974_v22  ;;  %v199_v25 = vld [vmem:[%s3230_s28] sm:$0xff]  ;;  %v1254_v29 = vld [vmem:[%s3230_s28 + $0x13] sm:$0xff]  ;;  %v981_v58 = vld [vmem:[%s3230_s28 + $0x6a] sm:$0xff] }
  0x24   : > { %2959 = vmatmul.msk.bf16.gmra.mxu1 %vm326_vm1, %v310_v26  ;;  %v200_v26 = vld [vmem:[%s3230_s28 + $0x8] sm:$0xff]  ;;  %v1255_v30 = vld [vmem:[%s3230_s28 + $0x1b] sm:$0xff]  ;;  %v201_v37 = vld [vmem:[%s3230_s28 + $0x10] sm:$0xff]  ;;  %v3374_v59 = vpack.c.bf16 %v981_v58, %v980_v57 }
  0x25   : > { %2965 = vmatmul.msk.bf16.gmra.mxu2 %vm326_vm1, %v316_v27  ;;  %v686_v27 = vld [vmem:[%s3230_s28 + $0x2] sm:$0xff]  ;;  %v240_v31 = vpack.c.bf16 %v200_v26, %v199_v25  ;;  %v202_v38 = vld [vmem:[%s3230_s28 + $0x18] sm:$0xff]  ;;  %v205_v60 = vld [vmem:[%s3230_s28 + $0x30] sm:$0xff] }
  0x26   : > { %2953 = vmatmul.msk.bf16.gmra.mxu0 %vm326_vm1, %v304_v28  ;;  %v687_v28 = vld [vmem:[%s3230_s28 + $0xa] sm:$0xff]  ;;  %v978_v43 = vld [vmem:[%s3230_s28 + $0x52] sm:$0xff]  ;;  %v203_v46 = vld [vmem:[%s3230_s28 + $0x20] sm:$0xff] }
  0x27   : > { %2971 = vmatmul.msk.bf16.gmra.mxu3 %vm326_vm1, %v322_v33  ;;  %v727_v32 = vpack.c.bf16 %v687_v28, %v686_v27  ;;  %v1295_v33 = vpack.c.bf16 %v1255_v30, %v1254_v29  ;;  %v1258_v48 = vld [vmem:[%s3230_s28 + $0x33] sm:$0xff]  ;;  %v1259_v49 = vld [vmem:[%s3230_s28 + $0x3b] sm:$0xff]  ;;  %v242_v50 = vpack.c.bf16 %v204_v47, %v203_v46  ;;  %v1260_v62 = vld [vmem:[%s3230_s28 + $0x43] sm:$0xff] }
  0x28   : > { %v206_v61 = vld [vmem:[%s3230_s28 + $0x38] sm:$0xff]  ;;  %v207_v13 = vld [vmem:[%s3230_s28 + $0x40] sm:$0xff]  ;;  %v208_v14 = vld [vmem:[%s3230_s28 + $0x48] sm:$0xff] }
  0x29   : > { %v983_v11 = vld [vmem:[%s3230_s28 + $0x7a] sm:$0xff]  ;;  %v244_v18 = vpack.c.bf16 %v208_v14, %v207_v13  ;;  %v984_v27 = vld [vmem:[%s3230_s28 + $0x82] sm:$0xff]  ;;  %v985_v28 = vld [vmem:[%s3230_s28 + $0x8a] sm:$0xff] }
  0x2a   : > { %v1262_v15 = vld [vmem:[%s3230_s28 + $0x53] sm:$0xff]  ;;  %v1263_v16 = vld [vmem:[%s3230_s28 + $0x5b] sm:$0xff]  ;;  %v3433_v29 = vpack.c.bf16 %v985_v28, %v984_v27  ;;  %v989_v13 = vld [vmem:[%s3230_s28 + $0xaa] sm:$0xff] }
  0x2b   : > { %v209_v30 = vld [vmem:[%s3230_s28 + $0x50] sm:$0xff]  ;;  %v987_v46 = vld [vmem:[%s3230_s28 + $0x9a] sm:$0xff] }
  0x34   : > { %2960 = vmatmul.msk.bf16.gmra.mxu1 %vm326_vm1, %v311_v40  ;;  %v1257_v40 = vld [vmem:[%s3230_s28 + $0x2b] sm:$0xff] }
  0x35   : > { %2966 = vmatmul.msk.bf16.gmra.mxu2 %vm326_vm1, %v317_v41  ;;  %v241_v41 = vpack.c.bf16 %v202_v38, %v201_v37 }
  0x36   : > { %2954 = vmatmul.msk.bf16.gmra.mxu0 %vm326_vm1, %v305_v42  ;;  %v1296_v42 = vpack.c.bf16 %v1257_v40, %v1256_v39 }
  0x37   : > { %2972 = vmatmul.msk.bf16.gmra.mxu3 %vm326_vm1, %v323_v44  ;;  %v979_v44 = vld [vmem:[%s3230_s28 + $0x5a] sm:$0xff] }
  0x38   : > { %v3351_v45 = vpack.c.bf16 %v979_v44, %v978_v43  ;;  %v986_v44 = vld [vmem:[%s3230_s28 + $0x92] sm:$0xff] }
  0x39   : > { %v3461_v47 = vpack.c.bf16 %v987_v46, %v986_v44  ;;  %v990_v44 = vld [vmem:[%s3230_s28 + $0xb2] sm:$0xff]  ;;  %v991_v46 = vld [vmem:[%s3230_s28 + $0xba] sm:$0xff] }
  0x44   : > { %2961 = vmatmul.msk.bf16.gmra.mxu1 %vm326_vm1, %v312_v51 }
  0x45   : > { %2967 = vmatmul.msk.bf16.gmra.mxu2 %vm326_vm1, %v318_v52  ;;  %v1297_v52 = vpack.c.bf16 %v1259_v49, %v1258_v48  ;;  %v211_v48 = vld [vmem:[%s3230_s28 + $0x60] sm:$0xff]  ;;  %v212_v49 = vld [vmem:[%s3230_s28 + $0x68] sm:$0xff] }
  0x46   : > { %2955 = vmatmul.msk.bf16.gmra.mxu0 %vm326_vm1, %v306_v53  ;;  %v246_v57 = vpack.c.bf16 %v212_v49, %v211_v48  ;;  %v3517_v48 = vpack.c.bf16 %v991_v46, %v990_v44  ;;  %v215_v49 = vld [vmem:[%s3230_s28 + $0x80] sm:$0xff] }
  0x47   : > { %3017 = vmatmul.msk.bf16.vlgmr.msrb.gmra.mxu3 %vm326_vm1, %v3282_v56 }
  0x54   : > { %2962 = vmatmul.msk.bf16.gmra.mxu1 %vm326_vm1, %v313_v63  ;;  %v1261_v63 = vld [vmem:[%s3230_s28 + $0x4b] sm:$0xff] }
  0x55   : > { %2968 = vmatmul.msk.bf16.gmra.mxu2 %vm326_vm1, %v319_v0  ;;  %v1298_v3 = vpack.c.bf16 %v1261_v63, %v1260_v62 }
  0x56   : > { %2956 = vmatmul.msk.bf16.gmra.mxu0 %vm326_vm1, %v307_v1  ;;  %v243_v1 = vpack.c.bf16 %v206_v61, %v205_v60 }
  0x57   : > { %3018 = vmatmul.msk.bf16.gmra.mxu3 %vm326_vm1, %v1012_v10 }
  0x64   : > { %2963 = vmatmul.msk.bf16.gmra.mxu1 %vm326_vm1, %v314_v19 }
  0x65   : > { %2969 = vmatmul.msk.bf16.gmra.mxu2 %vm326_vm1, %v320_v20  ;;  %v1299_v20 = vpack.c.bf16 %v1263_v16, %v1262_v15  ;;  %v213_v15 = vld [vmem:[%s3230_s28 + $0x70] sm:$0xff]  ;;  %v214_v16 = vld [vmem:[%s3230_s28 + $0x78] sm:$0xff] }
  0x66   : > { %2957 = vmatmul.msk.bf16.gmra.mxu0 %vm326_vm1, %v308_v21  ;;  %v247_v27 = vpack.c.bf16 %v214_v16, %v213_v15 }
  0x67   : > { %3019 = vmatmul.msk.bf16.gmra.mxu3 %vm326_vm1, %v1013_v24 }
  0x74   : > { %2973 = vmatmul.msk.bf16.vlgmr.msrb.gmra.mxu1 %vm326_vm1, %v240_v31  ;;  %v210_v31 = vld [vmem:[%s3230_s28 + $0x58] sm:$0xff] }
  0x75   : > { %2995 = vmatmul.msk.bf16.vlgmr.msrb.gmra.mxu2 %vm326_vm1, %v727_v32  ;;  %v1264_v32 = vld [vmem:[%s3230_s28 + $0x63] sm:$0xff]  ;;  %v245_v35 = vpack.c.bf16 %v210_v31, %v209_v30 }
  0x76   : > { %3039 = vmatmul.msk.bf16.vlgmr.msrb.gmra.mxu0 %vm326_vm1, %v1295_v33  ;;  %v1265_v33 = vld [vmem:[%s3230_s28 + $0x6b] sm:$0xff] }
  0x77   : > { %3020 = vmatmul.msk.bf16.gmra.mxu3 %vm326_vm1, %v3337_v36  ;;  %v1300_v37 = vpack.c.bf16 %v1265_v33, %v1264_v32 }
  0x84   : > { %2974 = vmatmul.msk.bf16.gmra.mxu1 %vm326_vm1, %v241_v41 }
  0x85   : > { %2996 = vmatmul.msk.bf16.gmra.mxu2 %vm326_vm1, %v3282_v56 }
  0x86   : > { %3040 = vmatmul.msk.bf16.gmra.mxu0 %vm326_vm1, %v1296_v42 }
  0x87   : > { %3021 = vmatmul.msk.bf16.gmra.mxu3 %vm326_vm1, %v3351_v45 }
  0x91   : > { %v3359_v51 = vpop.f32.mrf.mxu1 }
  0x93   : > { %v3361_v53 = vpop.f32.mrf.mxu0 }
  0x94   : > { %2975 = vmatmul.msk.bf16.gmra.mxu1 %vm326_vm1, %v242_v50  ;;  %v1267_v50 = vld [vmem:[%s3230_s28 + $0x7b] sm:$0xff] }
  0x95   : > { %2997 = vmatmul.msk.bf16.gmra.mxu2 %vm326_vm1, %v1012_v10  ;;  %v982_v10 = vld [vmem:[%s3230_s28 + $0x72] sm:$0xff] }
  0x96   : > { %3041 = vmatmul.msk.bf16.gmra.mxu0 %vm326_vm1, %v1297_v52  ;;  %v3403_v12 = vpack.c.bf16 %v983_v11, %v982_v10  ;;  %v988_v11 = vld [vmem:[%s3230_s28 + $0xa2] sm:$0xff] }
  0x97   : > { %3022 = vmatmul.msk.bf16.gmra.mxu3 %vm326_vm1, %v3374_v59  ;;  %v3489_v14 = vpack.c.bf16 %v989_v13, %v988_v11 }
  0x98   : > { %v3366_v54 = vpop.f32.mrf.mxu2 }
  0x99   : > { %v3368_v55 = vpop.f32.mrf.mxu1 }
  0x9a   : > { %v3386_v4 = vpop.f32.mrf.mxu3 }
  0x9b   : > { %v3370_v56 = vpop.f32.mrf.mxu0 }
  0xa0   : > { %v3382_v0 = vpop.f32.mrf.mxu2 }
  0xa1   : > { %v3384_v2 = vpop.f32.mrf.mxu1 }
  0xa2   : > { %v3397_v8 = vpop.f32.mrf.mxu3 }
  0xa3   : > { %v3388_v5 = vpop.f32.mrf.mxu0 }
  0xa4   : > { %2976 = vmatmul.msk.bf16.gmra.mxu1 %vm326_vm1, %v243_v1 }
  0xa5   : > { %2998 = vmatmul.msk.bf16.gmra.mxu2 %vm326_vm1, %v1013_v24 }
  0xa6   : > { %3042 = vmatmul.msk.bf16.gmra.mxu0 %vm326_vm1, %v1298_v3 }
  0xa7   : > { %3023 = vmatmul.msk.bf16.gmra.mxu3 %vm326_vm1, %v3403_v12 }
  0xa8   : > { %v3393_v6 = vpop.f32.mrf.mxu2 }
  0xa9   : > { %v3395_v7 = vpop.f32.mrf.mxu1 }
  0xaa   : > { %v3415_v21 = vpop.f32.mrf.mxu3 }
  0xab   : > { %v3399_v9 = vpop.f32.mrf.mxu0  ;;  %4485 = vst [vmem:[#allocation2_spill] sm:$0xff] %v3415_v21  ;;  %v1273_v21 = vld [vmem:[%s3230_s28 + $0xab] sm:$0xff] }
  0xb0   : > { %v3411_v17 = vpop.f32.mrf.mxu2 }
  0xb1   : > { %v3413_v19 = vpop.f32.mrf.mxu1 }
  0xb2   : > { %v3427_v25 = vpop.f32.mrf.mxu3 }
  0xb3   : > { %v3417_v22 = vpop.f32.mrf.mxu0  ;;  %4486 = vst [vmem:[#allocation3_spill] sm:$0xff] %v3427_v25 }
  0xb4   : > { %2977 = vmatmul.msk.bf16.gmra.mxu1 %vm326_vm1, %v244_v18  ;;  %v1268_v18 = vld [vmem:[%s3230_s28 + $0x83] sm:$0xff] }
  0xb5   : > { %2999 = vmatmul.msk.bf16.gmra.mxu2 %vm326_vm1, %v3337_v36 }
  0xb6   : > { %3043 = vmatmul.msk.bf16.gmra.mxu0 %vm326_vm1, %v1299_v20  ;;  %v1269_v20 = vld [vmem:[%s3230_s28 + $0x8b] sm:$0xff] }
  0xb7   : > { %3024 = vmatmul.msk.bf16.gmra.mxu3 %vm326_vm1, %v3433_v29  ;;  %v1302_v30 = vpack.c.bf16 %v1269_v20, %v1268_v18 }
  0xb8   : > { %v3423_v23 = vpop.f32.mrf.mxu2 }
  0xb9   : > { %v3425_v24 = vpop.f32.mrf.mxu1 }
  0xba   : > { %v3445_v38 = vpop.f32.mrf.mxu3 }
  0xbb   : > { %v3429_v26 = vpop.f32.mrf.mxu0  ;;  %4487 = vst [vmem:[#allocation4_spill] sm:$0xff] %v3445_v38  ;;  %v218_v38 = vld [vmem:[%s3230_s28 + $0x98] sm:$0xff] }
  0xc0   : > { %v3441_v34 = vpop.f32.mrf.mxu2 }
  0xc1   : > { %v3443_v36 = vpop.f32.mrf.mxu1 }
  0xc2   : > { %v505_v42 = vpop.f32.mrf.mxu3 }
  0xc3   : > { %v3447_v39 = vpop.f32.mrf.mxu0 }
  0xc4   : > { %2978 = vmatmul.msk.bf16.gmra.mxu1 %vm326_vm1, %v245_v35 }
  0xc5   : > { %3000 = vmatmul.msk.bf16.gmra.mxu2 %vm326_vm1, %v3351_v45  ;;  %v1266_v45 = vld [vmem:[%s3230_s28 + $0x73] sm:$0xff] }
  0xc6   : > { %3044 = vmatmul.msk.bf16.gmra.mxu0 %vm326_vm1, %v1300_v37  ;;  %v1301_v60 = vpack.c.bf16 %v1267_v50, %v1266_v45  ;;  %v216_v45 = vld [vmem:[%s3230_s28 + $0x88] sm:$0xff]  ;;  %v1270_v50 = vld [vmem:[%s3230_s28 + $0x93] sm:$0xff] }
  0xc7   : > { %3025 = vmatmul.msk.bf16.gmra.mxu3 %vm326_vm1, %v3461_v47 }
  0xc8   : > { %v3453_v40 = vpop.f32.mrf.mxu2 }
  0xc9   : > { %v3455_v41 = vpop.f32.mrf.mxu1 }
  0xca   : > { %v1109_v62 = vpop.f32.mrf.mxu3 }
  0xcb   : > { %v3457_v43 = vpop.f32.mrf.mxu0 }
  0xd0   : > { %v3469_v52 = vpop.f32.mrf.mxu2 }
  0xd1   : > { %v3471_v58 = vpop.f32.mrf.mxu1 }
  0xd2   : > { %v3485_v10 = vpop.f32.mrf.mxu3 }
  0xd3   : > { %v3473_v61 = vpop.f32.mrf.mxu0 }
  0xd4   : > { %2979 = vmatmul.msk.bf16.gmra.mxu1 %vm326_vm1, %v246_v57  ;;  %v1271_v57 = vld [vmem:[%s3230_s28 + $0x9b] sm:$0xff] }
  0xd5   : > { %3001 = vmatmul.msk.bf16.gmra.mxu2 %vm326_vm1, %v3374_v59  ;;  %v1303_v13 = vpack.c.bf16 %v1271_v57, %v1270_v50  ;;  %v993_v50 = vld [vmem:[%s3230_s28 + $0xca] sm:$0xff] }
  0xd6   : > { %3045 = vmatmul.msk.bf16.gmra.mxu0 %vm326_vm1, %v1301_v60  ;;  %v248_v60 = vpack.c.bf16 %v216_v45, %v215_v49  ;;  %v992_v45 = vld [vmem:[%s3230_s28 + $0xc2] sm:$0xff] }
  0xd7   : > { %3026 = vmatmul.msk.bf16.gmra.mxu3 %vm326_vm1, %v3489_v14  ;;  %v3538_v57 = vpack.c.bf16 %v993_v50, %v992_v45 }
  0xd8   : > { %v3479_v63 = vpop.f32.mrf.mxu2 }
  0xd9   : > { %v3481_v1 = vpop.f32.mrf.mxu1 }
  0xda   : > { %v1114_v32 = vpop.f32.mrf.mxu3 }
  0xdb   : > { %v3483_v3 = vpop.f32.mrf.mxu0 }
  0xe0   : > { %v3497_v59 = vpop.f32.mrf.mxu2 }
  0xe1   : > { %v3499_v28 = vpop.f32.mrf.mxu1 }
  0xe2   : > { %v3513_v42 = vpop.f32.mrf.mxu3 }
  0xe3   : > { %v3501_v31 = vpop.f32.mrf.mxu0 }
  0xe4   : > { %2980 = vmatmul.msk.bf16.gmra.mxu1 %vm326_vm1, %v247_v27 }
  0xe5   : > { %3002 = vmatmul.msk.bf16.gmra.mxu2 %vm326_vm1, %v3403_v12 }
  0xe6   : > { %3046 = vmatmul.msk.bf16.gmra.mxu0 %vm326_vm1, %v1302_v30 }
  0xe7   : > { %3027 = vmatmul.msk.bf16.gmra.mxu3 %vm326_vm1, %v3517_v48 }
  0xe8   : > { %v3507_v33 = vpop.f32.mrf.mxu2 }
  0xe9   : > { %v3509_v35 = vpop.f32.mrf.mxu1 }
  0xea   : > { %v3527_v16 = vpop.f32.mrf.mxu3 }
  0xeb   : > { %v3511_v37 = vpop.f32.mrf.mxu0 }
  0xf0   : > { %v3525_v12 = vpop.f32.mrf.mxu2 }
  0xf1   : > { %v582_v11 = vpop.f32.mrf.mxu1 }
  0xf2   : > { %v583_v18 = vadd.f32 %v582_v11, %v3361_v53  ;;  %v3534_v46 = vpop.f32.mrf.mxu3 }
  0xf3   : > { %v1393_v15 = vpop.f32.mrf.mxu0 }
  0xf4   : > { %2981 = vmatmul.msk.bf16.gmra.mxu1 %vm326_vm1, %v248_v60  ;;  %v217_v60 = vld [vmem:[%s3230_s28 + $0x90] sm:$0xff] }
  0xf5   : > { %3003 = vmatmul.msk.bf16.gmra.mxu2 %vm326_vm1, %v3433_v29  ;;  %v1272_v29 = vld [vmem:[%s3230_s28 + $0xa3] sm:$0xff] }
  0xf6   : > { %3047 = vmatmul.msk.bf16.gmra.mxu0 %vm326_vm1, %v1303_v13  ;;  %v249_v13 = vpack.c.bf16 %v218_v38, %v217_v60 }
  0xf7   : > { %3028 = vmatmul.msk.bf16.gmra.mxu3 %vm326_vm1, %v3538_v57 }
  0xf8   : > { %v825_v20 = vpop.f32.mrf.mxu2 }
  0xf9   : > { %v929_v27 = vadd.f32 %v825_v20, %v583_v18  ;;  %v584_v30 = vpop.f32.mrf.mxu1 }
  0xfa   : > { %v585_v53 = vadd.f32 %v584_v30, %v3370_v56  ;;  %v3549_v45 = vpop.f32.mrf.mxu3 }
  0xfb   : > { %v1395_v44 = vpop.f32.mrf.mxu0  ;;  %v1213_v49 = vadd.f32 %v1109_v62, %v929_v27  ;;  %v1304_v62 = vpack.c.bf16 %v1273_v21, %v1272_v29  ;;  %v994_v29 = vld [vmem:[%s3230_s28 + $0xd2] sm:$0xff] }
  0xfd   : > { %v3542_v25 = vadd.f32 %v1393_v15, %v1213_v49 }
 0x100   : > { %v827_v11 = vpop.f32.mrf.mxu2 }
 0x101   : > { %v930_v18 = vadd.f32 %v827_v11, %v585_v53  ;;  %v587_v20 = vpop.f32.mrf.mxu1  ;;  %v995_v53 = vld [vmem:[%s3230_s28 + $0xda] sm:$0xff] }
 0x102   : > { %v588_v21 = vadd.f32 %v587_v20, %v3388_v5  ;;  %v3559_v60 = vpop.f32.mrf.mxu3  ;;  %v3563_v11 = vpack.c.bf16 %v995_v53, %v994_v29 }
 0x103   : > { %v1398_v27 = vpop.f32.mrf.mxu0  ;;  %v1214_v15 = vadd.f32 %v3485_v10, %v930_v18 }
 0x104   : > { %2982 = vmatmul.msk.bf16.gmra.mxu1 %vm326_vm1, %v249_v13  ;;  %v220_v13 = vld [vmem:[%s3230_s28 + $0xa8] sm:$0xff] }
 0x105   : > { %3004 = vmatmul.msk.bf16.gmra.mxu2 %vm326_vm1, %v3461_v47  ;;  %v3556_v56 = vadd.f32 %v1395_v44, %v1214_v15  ;;  %v219_v47 = vld [vmem:[%s3230_s28 + $0xa0] sm:$0xff] }
 0x106   : > { %3048 = vmatmul.msk.bf16.gmra.mxu0 %vm326_vm1, %v1304_v62  ;;  %v1274_v62 = vld [vmem:[%s3230_s28 + $0xb3] sm:$0xff]  ;;  %v1275_v44 = vld [vmem:[%s3230_s28 + $0xbb] sm:$0xff]  ;;  %v250_v15 = vpack.c.bf16 %v220_v13, %v219_v47 }
 0x107   : > { %3029 = vmatmul.msk.bf16.gmra.mxu3 %vm326_vm1, %v3563_v11 }
 0x108   : > { %v830_v38 = vpop.f32.mrf.mxu2 }
 0x109   : > { %v931_v30 = vadd.f32 %v830_v38, %v588_v21  ;;  %v589_v49 = vpop.f32.mrf.mxu1 }
 0x10a   : > { %v590_v5 = vadd.f32 %v589_v49, %v3399_v9  ;;  %v3574_v29 = vpop.f32.mrf.mxu3 }
 0x10b   : > { %v1400_v50 = vpop.f32.mrf.mxu0  ;;  %v1215_v10 = vadd.f32 %v1114_v32, %v931_v30  ;;  %v1305_v32 = vpack.c.bf16 %v1275_v44, %v1274_v62  ;;  %v996_v44 = vld [vmem:[%s3230_s28 + $0xe2] sm:$0xff] }
 0x10d   : > { %v3567_v18 = vadd.f32 %v1398_v27, %v1215_v10 }
 0x110   : > { %v832_v20 = vpop.f32.mrf.mxu2 }
 0x111   : > { %v932_v21 = vadd.f32 %v832_v20, %v590_v5  ;;  %v592_v38 = vpop.f32.mrf.mxu1  ;;  %v997_v5 = vld [vmem:[%s3230_s28 + $0xea] sm:$0xff] }
 0x112   : > { %v593_v49 = vadd.f32 %v592_v38, %v3417_v22  ;;  %v3584_v62 = vpop.f32.mrf.mxu3  ;;  %v3589_v20 = vpack.c.bf16 %v997_v5, %v996_v44 }
 0x113   : > { %v1403_v30 = vpop.f32.mrf.mxu0  ;;  %v1216_v27 = vadd.f32 %v3513_v42, %v932_v21 }
 0x114   : > { %2983 = vmatmul.msk.bf16.gmra.mxu1 %vm326_vm1, %v250_v15  ;;  %v222_v15 = vld [vmem:[%s3230_s28 + $0xb8] sm:$0xff] }
 0x115   : > { %3005 = vmatmul.msk.bf16.gmra.mxu2 %vm326_vm1, %v3489_v14  ;;  %v3581_v9 = vadd.f32 %v1400_v50, %v1216_v27  ;;  %v221_v14 = vld [vmem:[%s3230_s28 + $0xb0] sm:$0xff]  ;;  %v1276_v50 = vld [vmem:[%s3230_s28 + $0xc3] sm:$0xff] }
 0x116   : > { %3049 = vmatmul.msk.bf16.gmra.mxu0 %vm326_vm1, %v1305_v32  ;;  %v1277_v32 = vld [vmem:[%s3230_s28 + $0xcb] sm:$0xff]  ;;  %v251_v27 = vpack.c.bf16 %v222_v15, %v221_v14 }
 0x117   : > { %3030 = vmatmul.msk.bf16.gmra.mxu3 %vm326_vm1, %v3589_v20 }
 0x118   : > { %v835_v10 = vpop.f32.mrf.mxu2 }
 0x119   : > { %v933_v53 = vadd.f32 %v835_v10, %v593_v49  ;;  %v594_v47 = vpop.f32.mrf.mxu1 }
 0x11a   : > { %v595_v22 = vadd.f32 %v594_v47, %v3429_v26  ;;  %v3600_v44 = vpop.f32.mrf.mxu3 }
 0x11b   : > { %v1405_v13 = vpop.f32.mrf.mxu0  ;;  %v1217_v42 = vadd.f32 %v3527_v16, %v933_v53  ;;  %v1306_v16 = vpack.c.bf16 %v1277_v32, %v1276_v50  ;;  %v998_v32 = vld [vmem:[%s3230_s28 + $0xf2] sm:$0xff] }
 0x11d   : > { %v3593_v21 = vadd.f32 %v1403_v30, %v1217_v42 }
 0x120   : > { %v837_v38 = vpop.f32.mrf.mxu2 }
 0x121   : > { %v934_v49 = vadd.f32 %v837_v38, %v595_v22  ;;  %v597_v10 = vpop.f32.mrf.mxu1  ;;  %v999_v22 = vld [vmem:[%s3230_s28 + $0xfa] sm:$0xff] }
 0x122   : > { %v598_v47 = vadd.f32 %v597_v10, %v3447_v39  ;;  %v3610_v50 = vpop.f32.mrf.mxu3  ;;  %v3615_v38 = vpack.c.bf16 %v999_v22, %v998_v32 }
 0x123   : > { %v1408_v53 = vpop.f32.mrf.mxu0  ;;  %v1218_v30 = vadd.f32 %v3534_v46, %v934_v49 }
 0x124   : > { %2984 = vmatmul.msk.bf16.gmra.mxu1 %vm326_vm1, %v251_v27  ;;  %v224_v27 = vld [vmem:[%s3230_s28 + $0xc8] sm:$0xff] }
 0x125   : > { %3006 = vmatmul.msk.bf16.gmra.mxu2 %vm326_vm1, %v3517_v48  ;;  %v3607_v26 = vadd.f32 %v1405_v13, %v1218_v30  ;;  %v223_v48 = vld [vmem:[%s3230_s28 + $0xc0] sm:$0xff]  ;;  %v1278_v13 = vld [vmem:[%s3230_s28 + $0xd3] sm:$0xff] }
 0x126   : > { %3050 = vmatmul.msk.bf16.gmra.mxu0 %vm326_vm1, %v1306_v16  ;;  %v1279_v16 = vld [vmem:[%s3230_s28 + $0xdb] sm:$0xff]  ;;  %v252_v30 = vpack.c.bf16 %v224_v27, %v223_v48 }
 0x127   : > { %3031 = vmatmul.msk.bf16.gmra.mxu3 %vm326_vm1, %v3615_v38 }
 0x128   : > { %v840_v42 = vpop.f32.mrf.mxu2 }
 0x129   : > { %v935_v5 = vadd.f32 %v840_v42, %v598_v47  ;;  %v599_v14 = vpop.f32.mrf.mxu1 }
 0x12a   : > { %v600_v39 = vadd.f32 %v599_v14, %v3457_v43  ;;  %v3626_v32 = vpop.f32.mrf.mxu3 }
 0x12b   : > { %v1410_v15 = vpop.f32.mrf.mxu0  ;;  %v1219_v46 = vadd.f32 %v3549_v45, %v935_v5  ;;  %v1307_v45 = vpack.c.bf16 %v1279_v16, %v1278_v13  ;;  %v1000_v16 = vld [vmem:[%s3230_s28 + $0x102] sm:$0xff] }
 0x12d   : > { %v3619_v49 = vadd.f32 %v1408_v53, %v1219_v46 }
 0x130   : > { %v842_v10 = vpop.f32.mrf.mxu2 }
 0x131   : > { %v936_v47 = vadd.f32 %v842_v10, %v600_v39  ;;  %v602_v42 = vpop.f32.mrf.mxu1  ;;  %v1001_v39 = vld [vmem:[%s3230_s28 + $0x10a] sm:$0xff] }
 0x132   : > { %v603_v14 = vadd.f32 %v602_v42, %v3473_v61  ;;  %v3636_v13 = vpop.f32.mrf.mxu3  ;;  %v3641_v10 = vpack.c.bf16 %v1001_v39, %v1000_v16 }
 0x133   : > { %v1413_v5 = vpop.f32.mrf.mxu0  ;;  %v1220_v53 = vadd.f32 %v3559_v60, %v936_v47 }
 0x134   : > { %2985 = vmatmul.msk.bf16.gmra.mxu1 %vm326_vm1, %v252_v30  ;;  %v226_v30 = vld [vmem:[%s3230_s28 + $0xd8] sm:$0xff] }
 0x135   : > { %3007 = vmatmul.msk.bf16.gmra.mxu2 %vm326_vm1, %v3538_v57  ;;  %v3633_v43 = vadd.f32 %v1410_v15, %v1220_v53  ;;  %v225_v57 = vld [vmem:[%s3230_s28 + $0xd0] sm:$0xff]  ;;  %v1280_v15 = vld [vmem:[%s3230_s28 + $0xe3] sm:$0xff] }
 0x136   : > { %3051 = vmatmul.msk.bf16.gmra.mxu0 %vm326_vm1, %v1307_v45  ;;  %v1281_v45 = vld [vmem:[%s3230_s28 + $0xeb] sm:$0xff]  ;;  %v253_v53 = vpack.c.bf16 %v226_v30, %v225_v57 }
 0x137   : > { %3032 = vmatmul.msk.bf16.gmra.mxu3 %vm326_vm1, %v3641_v10 }
 0x138   : > { %v845_v46 = vpop.f32.mrf.mxu2 }
 0x139   : > { %v937_v22 = vadd.f32 %v845_v46, %v603_v14  ;;  %v604_v48 = vpop.f32.mrf.mxu1 }
 0x13a   : > { %v605_v61 = vadd.f32 %v604_v48, %v3483_v3  ;;  %v3652_v16 = vpop.f32.mrf.mxu3 }
 0x13b   : > { %v1415_v27 = vpop.f32.mrf.mxu0  ;;  %v1221_v60 = vadd.f32 %v3574_v29, %v937_v22  ;;  %v1308_v29 = vpack.c.bf16 %v1281_v45, %v1280_v15  ;;  %v1002_v45 = vld [vmem:[%s3230_s28 + $0x112] sm:$0xff] }
 0x13d   : > { %v3645_v47 = vadd.f32 %v1413_v5, %v1221_v60 }
 0x140   : > { %v847_v42 = vpop.f32.mrf.mxu2 }
 0x141   : > { %v938_v14 = vadd.f32 %v847_v42, %v605_v61  ;;  %v607_v46 = vpop.f32.mrf.mxu1  ;;  %v1003_v61 = vld [vmem:[%s3230_s28 + $0x11a] sm:$0xff] }
 0x142   : > { %v608_v48 = vadd.f32 %v607_v46, %v3501_v31  ;;  %v3662_v15 = vpop.f32.mrf.mxu3  ;;  %v3667_v42 = vpack.c.bf16 %v1003_v61, %v1002_v45 }
 0x143   : > { %v1418_v22 = vpop.f32.mrf.mxu0  ;;  %v1222_v5 = vadd.f32 %v3584_v62, %v938_v14 }
 0x144   : > { %2986 = vmatmul.msk.bf16.gmra.mxu1 %vm326_vm1, %v253_v53  ;;  %v228_v53 = vld [vmem:[%s3230_s28 + $0xe8] sm:$0xff] }
 0x145   : > { %3008 = vmatmul.msk.bf16.gmra.mxu2 %vm326_vm1, %v3563_v11  ;;  %v3659_v3 = vadd.f32 %v1415_v27, %v1222_v5  ;;  %v227_v11 = vld [vmem:[%s3230_s28 + $0xe0] sm:$0xff]  ;;  %v1282_v27 = vld [vmem:[%s3230_s28 + $0xf3] sm:$0xff] }
 0x146   : > { %3052 = vmatmul.msk.bf16.gmra.mxu0 %vm326_vm1, %v1308_v29  ;;  %v1283_v29 = vld [vmem:[%s3230_s28 + $0xfb] sm:$0xff]  ;;  %v254_v5 = vpack.c.bf16 %v228_v53, %v227_v11 }
 0x147   : > { %3033 = vmatmul.msk.bf16.gmra.mxu3 %vm326_vm1, %v3667_v42 }
 0x148   : > { %v850_v60 = vpop.f32.mrf.mxu2 }
 0x149   : > { %v939_v39 = vadd.f32 %v850_v60, %v608_v48  ;;  %v609_v57 = vpop.f32.mrf.mxu1 }
 0x14a   : > { %v610_v31 = vadd.f32 %v609_v57, %v3511_v37  ;;  %v3678_v45 = vpop.f32.mrf.mxu3 }
 0x14b   : > { %v1420_v30 = vpop.f32.mrf.mxu0  ;;  %v1223_v62 = vadd.f32 %v3600_v44, %v939_v39  ;;  %v1309_v44 = vpack.c.bf16 %v1283_v29, %v1282_v27  ;;  %v1004_v29 = vld [vmem:[%s3230_s28 + $0x122] sm:$0xff] }
 0x14d   : > { %v3671_v14 = vadd.f32 %v1418_v22, %v1223_v62 }
 0x150   : > { %v852_v46 = vpop.f32.mrf.mxu2 }
 0x151   : > { %v940_v48 = vadd.f32 %v852_v46, %v610_v31  ;;  %v612_v60 = vpop.f32.mrf.mxu1  ;;  %v1005_v31 = vld [vmem:[%s3230_s28 + $0x12a] sm:$0xff] }
 0x152   : > { %v613_v57 = vadd.f32 %v612_v60, %v3359_v51  ;;  %v3688_v27 = vpop.f32.mrf.mxu3  ;;  %v3693_v46 = vpack.c.bf16 %v1005_v31, %v1004_v29 }
 0x153   : > { %v1423_v39 = vpop.f32.mrf.mxu0  ;;  %v1224_v22 = vadd.f32 %v3610_v50, %v940_v48 }
 0x154   : > { %2987 = vmatmul.msk.bf16.gmra.mxu1 %vm326_vm1, %v254_v5  ;;  %v230_v5 = vld [vmem:[%s3230_s28 + $0xf8] sm:$0xff] }
 0x155   : > { %3009 = vmatmul.msk.bf16.gmra.mxu2 %vm326_vm1, %v3589_v20  ;;  %v3685_v37 = vadd.f32 %v1420_v30, %v1224_v22  ;;  %v229_v20 = vld [vmem:[%s3230_s28 + $0xf0] sm:$0xff]  ;;  %v1284_v30 = vld [vmem:[%s3230_s28 + $0x103] sm:$0xff] }
 0x156   : > { %3053 = vmatmul.msk.bf16.gmra.mxu0 %vm326_vm1, %v1309_v44  ;;  %v1285_v44 = vld [vmem:[%s3230_s28 + $0x10b] sm:$0xff]  ;;  %v255_v22 = vpack.c.bf16 %v230_v5, %v229_v20 }
 0x157   : > { %3034 = vmatmul.msk.bf16.gmra.mxu3 %vm326_vm1, %v3693_v46 }
 0x158   : > { %v855_v62 = vpop.f32.mrf.mxu2 }
 0x159   : > { %v941_v61 = vadd.f32 %v855_v62, %v613_v57  ;;  %v614_v11 = vpop.f32.mrf.mxu1 }
 0x15a   : > { %v615_v51 = vadd.f32 %v614_v11, %v3368_v55  ;;  %v3704_v29 = vpop.f32.mrf.mxu3 }
 0x15b   : > { %v1425_v53 = vpop.f32.mrf.mxu0  ;;  %v1225_v50 = vadd.f32 %v3626_v32, %v941_v61  ;;  %v1310_v32 = vpack.c.bf16 %v1285_v44, %v1284_v30  ;;  %v1006_v44 = vld [vmem:[%s3230_s28 + $0x132] sm:$0xff] }
 0x15d   : > { %v3697_v48 = vadd.f32 %v1423_v39, %v1225_v50 }
 0x160   : > { %v857_v60 = vpop.f32.mrf.mxu2 }
 0x161   : > { %v942_v57 = vadd.f32 %v857_v60, %v615_v51  ;;  %v617_v62 = vpop.f32.mrf.mxu1  ;;  %v1007_v51 = vld [vmem:[%s3230_s28 + $0x13a] sm:$0xff] }
 0x162   : > { %v618_v11 = vadd.f32 %v617_v62, %v3384_v2  ;;  %v3714_v30 = vpop.f32.mrf.mxu3  ;;  %v3719_v60 = vpack.c.bf16 %v1007_v51, %v1006_v44 }
 0x163   : > { %v1428_v61 = vpop.f32.mrf.mxu0  ;;  %v1226_v39 = vadd.f32 %v3636_v13, %v942_v57 }
 0x164   : > { %2988 = vmatmul.msk.bf16.gmra.mxu1 %vm326_vm1, %v255_v22  ;;  %v232_v22 = vld [vmem:[%s3230_s28 + $0x108] sm:$0xff] }
 0x165   : > { %3010 = vmatmul.msk.bf16.gmra.mxu2 %vm326_vm1, %v3615_v38  ;;  %v3711_v55 = vadd.f32 %v1425_v53, %v1226_v39  ;;  %v231_v38 = vld [vmem:[%s3230_s28 + $0x100] sm:$0xff]  ;;  %v1286_v53 = vld [vmem:[%s3230_s28 + $0x113] sm:$0xff] }
 0x166   : > { %3054 = vmatmul.msk.bf16.gmra.mxu0 %vm326_vm1, %v1310_v32  ;;  %v1287_v32 = vld [vmem:[%s3230_s28 + $0x11b] sm:$0xff]  ;;  %v256_v39 = vpack.c.bf16 %v232_v22, %v231_v38 }
 0x167   : > { %3035 = vmatmul.msk.bf16.gmra.mxu3 %vm326_vm1, %v3719_v60 }
 0x168   : > { %v860_v50 = vpop.f32.mrf.mxu2 }
 0x169   : > { %v943_v31 = vadd.f32 %v860_v50, %v618_v11  ;;  %v619_v20 = vpop.f32.mrf.mxu1 }
 0x16a   : > { %v620_v2 = vadd.f32 %v619_v20, %v3395_v7  ;;  %v3730_v44 = vpop.f32.mrf.mxu3 }
 0x16b   : > { %v1430_v5 = vpop.f32.mrf.mxu0  ;;  %v1227_v13 = vadd.f32 %v3652_v16, %v943_v31  ;;  %v1311_v16 = vpack.c.bf16 %v1287_v32, %v1286_v53  ;;  %v1008_v32 = vld [vmem:[%s3230_s28 + $0x142] sm:$0xff] }
 0x16d   : > { %v3723_v57 = vadd.f32 %v1428_v61, %v1227_v13 }
 0x170   : > { %v862_v62 = vpop.f32.mrf.mxu2 }
 0x171   : > { %v944_v11 = vadd.f32 %v862_v62, %v620_v2  ;;  %v622_v50 = vpop.f32.mrf.mxu1  ;;  %v1009_v2 = vld [vmem:[%s3230_s28 + $0x14a] sm:$0xff] }
 0x172   : > { %v623_v20 = vadd.f32 %v622_v50, %v3413_v19  ;;  %v3740_v53 = vpop.f32.mrf.mxu3  ;;  %v1030_v62 = vpack.c.bf16 %v1009_v2, %v1008_v32 }
 0x173   : > { %v1433_v31 = vpop.f32.mrf.mxu0  ;;  %v1228_v61 = vadd.f32 %v3662_v15, %v944_v11 }
 0x174   : > { %2989 = vmatmul.msk.bf16.gmra.mxu1 %vm326_vm1, %v256_v39  ;;  %v234_v39 = vld [vmem:[%s3230_s28 + $0x118] sm:$0xff] }
 0x175   : > { %3011 = vmatmul.msk.bf16.gmra.mxu2 %vm326_vm1, %v3641_v10  ;;  %v3737_v7 = vadd.f32 %v1430_v5, %v1228_v61  ;;  %v233_v10 = vld [vmem:[%s3230_s28 + $0x110] sm:$0xff] }
 0x176   : > { %3055 = vmatmul.msk.bf16.gmra.mxu0 %vm326_vm1, %v1311_v16  ;;  %v1288_v16 = vld [vmem:[%s3230_s28 + $0x123] sm:$0xff]  ;;  %v1289_v5 = vld [vmem:[%s3230_s28 + $0x12b] sm:$0xff]  ;;  %v257_v61 = vpack.c.bf16 %v234_v39, %v233_v10 }
 0x177   : > { %4488 = vst [vmem:[#allocation5_spill] sm:$0xff] %v3737_v7  ;;  %3036 = vmatmul.msk.bf16.gmra.mxu3 %vm326_vm1, %v1030_v62  ;;  %v1312_v7 = vpack.c.bf16 %v1289_v5, %v1288_v16  ;;  %v1010_v39 = vld [vmem:[%s3230_s28 + $0x152] sm:$0xf]  ;;  %v235_v5 = vld [vmem:[%s3230_s28 + $0x120] sm:$0xff] }
 0x178   : > { %v865_v13 = vpop.f32.mrf.mxu2  ;;  %v1031_v16 = vpack.c.bf16 %v1010_v39, %v1010_v39 }
 0x179   : > { %v945_v51 = vadd.f32 %v865_v13, %v623_v20  ;;  %v624_v38 = vpop.f32.mrf.mxu1 }
 0x17a   : > { %v625_v19 = vadd.f32 %v624_v38, %v3425_v24 }
 0x17b   : > { %v1435_v22 = vpop.f32.mrf.mxu0  ;;  %v1229_v15 = vadd.f32 %v3678_v45, %v945_v51  ;;  %v3753_v51 = vpop.f32.mrf.mxu3 }
 0x17d   : > { %v3747_v11 = vadd.f32 %v1433_v31, %v1229_v15 }
 0x180   : > { %v867_v50 = vpop.f32.mrf.mxu2 }
 0x181   : > { %v946_v20 = vadd.f32 %v867_v50, %v625_v19  ;;  %v627_v13 = vpop.f32.mrf.mxu1  ;;  %v236_v19 = vld [vmem:[%s3230_s28 + $0x128] sm:$0xff]  ;;  %v1290_v50 = vld [vmem:[%s3230_s28 + $0x133] sm:$0xff] }
 0x182   : > { %v628_v38 = vadd.f32 %v627_v13, %v3443_v36 }
 0x183   : > { %v1438_v45 = vpop.f32.mrf.mxu0  ;;  %v1230_v31 = vadd.f32 %v3688_v27, %v946_v20  ;;  %v3763_v10 = vpop.f32.mrf.mxu3 }
 0x184   : > { %2990 = vmatmul.msk.bf16.gmra.mxu1 %vm326_vm1, %v257_v61  ;;  %v258_v61 = vpack.c.bf16 %v236_v19, %v235_v5  ;;  %v2106_v5 = vld [vmem:[%s3230_s28 + $0x25] sm:$0xff]  ;;  %v2107_v19 = vld [vmem:[%s3230_s28 + $0x2d] sm:$0xff] }
 0x185   : > { %3012 = vmatmul.msk.bf16.gmra.mxu2 %vm326_vm1, %v3667_v42  ;;  %v3760_v24 = vadd.f32 %v1435_v22, %v1230_v31 }
 0x186   : > { %3056 = vmatmul.msk.bf16.gmra.mxu0 %vm326_vm1, %v1312_v7  ;;  %v1291_v7 = vld [vmem:[%s3230_s28 + $0x13b] sm:$0xff] }
 0x187   : > { %3037 = vmatmul.msk.bf16.gmra.mxu3 %vm326_vm1, %v1031_v16  ;;  %v1313_v31 = vpack.c.bf16 %v1291_v7, %v1290_v50  ;;  %v2147_v50 = vpack.c.bf16 %v2107_v19, %v2106_v5  ;;  %v238_v7 = vld [vmem:[%s3230_s28 + $0x138] sm:$0xff] }
 0x188   : > { %v870_v15 = vpop.f32.mrf.mxu2 }
 0x189   : > { %v947_v32 = vadd.f32 %v870_v15, %v628_v38  ;;  %v629_v2 = vpop.f32.mrf.mxu1 }
 0x18a   : > { %v630_v36 = vadd.f32 %v629_v2, %v3455_v41 }
 0x18b   : > { %v1440_v62 = vpop.f32.mrf.mxu0  ;;  %v1231_v27 = vadd.f32 %v3704_v29, %v947_v32  ;;  %v3775_v38 = vpop.f32.mrf.mxu3 }
 0x18d   : > { %v3769_v42 = vadd.f32 %v1438_v45, %v1231_v27 }
 0x190   : > { %v872_v22 = vpop.f32.mrf.mxu2 }
 0x191   : > { %v948_v20 = vadd.f32 %v872_v22, %v630_v36  ;;  %v632_v13 = vpop.f32.mrf.mxu1  ;;  %v1292_v22 = vld [vmem:[%s3230_s28 + $0x143] sm:$0xff] }
 0x192   : > { %v633_v15 = vadd.f32 %v632_v13, %v3471_v58 }
 0x193   : > { %v1443_v29 = vpop.f32.mrf.mxu0  ;;  %v1232_v45 = vadd.f32 %v3714_v30, %v948_v20  ;;  %v3785_v16 = vpop.f32.mrf.mxu3 }
 0x194   : > { %2991 = vmatmul.msk.bf16.gmra.mxu1 %vm326_vm1, %v258_v61 }
 0x195   : > { %3013 = vmatmul.msk.bf16.gmra.mxu2 %vm326_vm1, %v3693_v46  ;;  %v3782_v41 = vadd.f32 %v1440_v62, %v1232_v45  ;;  %v237_v46 = vld [vmem:[%s3230_s28 + $0x130] sm:$0xff] }
 0x196   : > { %3057 = vmatmul.msk.bf16.gmra.mxu0 %vm326_vm1, %v1313_v31  ;;  %v1293_v62 = vld [vmem:[%s3230_s28 + $0x14b] sm:$0xff]  ;;  %v259_v20 = vpack.c.bf16 %v238_v7, %v237_v46  ;;  %v2109_v46 = vld [vmem:[%s3230_s28 + $0x3d] sm:$0xff] }
 0x197   : > { %3105 = vmatmul.msk.bf16.vlgmr.msra.gmra.mxu3 %vm326_vm1, %v2147_v50  ;;  %v1314_v45 = vpack.c.bf16 %v1293_v62, %v1292_v22  ;;  %v2108_v50 = vld [vmem:[%s3230_s28 + $0x35] sm:$0xff]  ;;  %v239_v22 = vld [vmem:[%s3230_s28 + $0x140] sm:$0xf] }
 0x198   : > { %v875_v32 = vpop.f32.mrf.mxu2  ;;  %v2148_v7 = vpack.c.bf16 %v2109_v46, %v2108_v50  ;;  %v726_v62 = vld [vmem:[%s3230_s28 + $0x142] sm:$0xf] }
 0x199   : > { %v949_v2 = vadd.f32 %v875_v32, %v633_v15  ;;  %v634_v27 = vpop.f32.mrf.mxu1  ;;  %v2110_v46 = vld [vmem:[%s3230_s28 + $0x45] sm:$0xff] }
 0x19a   : > { %v635_v58 = vadd.f32 %v634_v27, %v3481_v1 }
 0x19b   : > { %v1445_v39 = vpop.f32.mrf.mxu0  ;;  %v1233_v30 = vadd.f32 %v3730_v44, %v949_v2  ;;  %v3798_v15 = vpop.f32.mrf.mxu3 }
 0x19d   : > { %v3792_v36 = vadd.f32 %v1443_v29, %v1233_v30 }
 0x1a0   : > { %v877_v61 = vpop.f32.mrf.mxu2 }
 0x1a1   : > { %v950_v13 = vadd.f32 %v877_v61, %v635_v58  ;;  %v637_v31 = vpop.f32.mrf.mxu1  ;;  %v1294_v58 = vld [vmem:[%s3230_s28 + $0x153] sm:$0xf]  ;;  %v260_v61 = vpack.c.bf16 %v239_v22, %v239_v22 }
 0x1a2   : > { %v638_v32 = vadd.f32 %v637_v31, %v3499_v28  ;;  %v747_v31 = vpack.c.bf16 %v726_v62, %v726_v62  ;;  %v1538_v62 = vld [vmem:[%s3230_s28 + $0x14] sm:$0xff] }
 0x1a3   : > { %v1448_v44 = vpop.f32.mrf.mxu0  ;;  %v1234_v29 = vadd.f32 %v3740_v53, %v950_v13  ;;  %v3808_v19 = vpop.f32.mrf.mxu3 }
 0x1a4   : > { %2992 = vmatmul.msk.bf16.gmra.mxu1 %vm326_vm1, %v259_v20 }
 0x1a5   : > { %3014 = vmatmul.msk.bf16.gmra.mxu2 %vm326_vm1, %v3719_v60  ;;  %v3805_v1 = vadd.f32 %v1445_v39, %v1234_v29 }
 0x1a6   : > { %3058 = vmatmul.msk.bf16.gmra.mxu0 %vm326_vm1, %v1314_v45  ;;  %v1315_v45 = vpack.c.bf16 %v1294_v58, %v1294_v58  ;;  %v1539_v58 = vld [vmem:[%s3230_s28 + $0x1c] sm:$0xff] }
 0x1a7   : > { %3106 = vmatmul.msk.bf16.gmra.mxu3 %vm326_vm1, %v2148_v7  ;;  %v2111_v7 = vld [vmem:[%s3230_s28 + $0x4d] sm:$0xff] }
 0x1a8   : > { %v880_v2 = vpop.f32.mrf.mxu2  ;;  %v2149_v22 = vpack.c.bf16 %v2111_v7, %v2110_v46 }
 0x1a9   : > { %v951_v27 = vadd.f32 %v880_v2, %v638_v32  ;;  %v639_v30 = vpop.f32.mrf.mxu1 }
 0x1aa   : > { %v640_v28 = vadd.f32 %v639_v30, %v3509_v35 }
 0x1ab   : > { %v1450_v5 = vpop.f32.mrf.mxu0  ;;  %v1235_v53 = vadd.f32 %v3753_v51, %v951_v27  ;;  %v3820_v29 = vpop.f32.mrf.mxu3 }
 0x1ad   : > { %v3814_v60 = vadd.f32 %v1448_v44, %v1235_v53 }
 0x1b0   : > { %v882_v39 = vpop.f32.mrf.mxu2 }
 0x1b1   : > { %v952_v20 = vadd.f32 %v882_v39, %v640_v28  ;;  %v642_v13 = vpop.f32.mrf.mxu1  ;;  %v1822_v28 = vld [vmem:[%s3230_s28 + $0x24] sm:$0xff]  ;;  %v1823_v39 = vld [vmem:[%s3230_s28 + $0x2c] sm:$0xff] }
 0x1b2   : > { %v643_v32 = vadd.f32 %v642_v13, %v3366_v54  ;;  %v2391_v54 = vld [vmem:[%s3230_s28 + $0x2e] sm:$0xff] }
 0x1b3   : > { %v1453_v51 = vpop.f32.mrf.mxu0  ;;  %v1236_v44 = vadd.f32 %v3763_v10, %v952_v20  ;;  %v3829_v10 = vpop.f32.mrf.mxu3 }
 0x1b4   : > { %2993 = vmatmul.msk.bf16.gmra.mxu1 %vm326_vm1, %v260_v61  ;;  %v2390_v61 = vld [vmem:[%s3230_s28 + $0x26] sm:$0xff] }
 0x1b5   : > { %3015 = vmatmul.msk.bf16.gmra.mxu2 %vm326_vm1, %v747_v31  ;;  %v3826_v35 = vadd.f32 %v1450_v5, %v1236_v44  ;;  %v1579_v31 = vpack.c.bf16 %v1539_v58, %v1538_v62  ;;  %v2112_v58 = vld [vmem:[%s3230_s28 + $0x55] sm:$0xff] }
 0x1b6   : > { %3059 = vmatmul.msk.bf16.gmra.mxu0 %vm326_vm1, %v1315_v45 }
 0x1b7   : > { %3107 = vmatmul.msk.bf16.gmra.mxu3 %vm326_vm1, %v2149_v22 }
 0x1b8   : > { %v885_v2 = vpop.f32.mrf.mxu2 }
 0x1b9   : > { %v953_v27 = vadd.f32 %v885_v2, %v643_v32  ;;  %v644_v30 = vpop.f32.mrf.mxu1  ;;  %v2431_v32 = vpack.c.bf16 %v2391_v54, %v2390_v61  ;;  %v1824_v61 = vld [vmem:[%s3230_s28 + $0x34] sm:$0xff] }
 0x1ba   : > { %v645_v20 = vadd.f32 %v644_v30, %v3382_v0 }
 0x1bb   : > { %v1455_v53 = vpop.f32.mrf.mxu0  ;;  %v1237_v50 = vadd.f32 %v3775_v38, %v953_v27  ;;  %v1863_v38 = vpack.c.bf16 %v1823_v39, %v1822_v28  ;;  %v3844_v27 = vpop.f32.mrf.mxu3  ;;  %v2113_v28 = vld [vmem:[%s3230_s28 + $0x5d] sm:$0xff] }
 0x1bc   : > { %v2150_v39 = vpack.c.bf16 %v2113_v28, %v2112_v58 }
 0x1bd   : > { %v3837_v5 = vadd.f32 %v1453_v51, %v1237_v50 }
 0x1c0   : > { %v887_v13 = vpop.f32.mrf.mxu2 }
 0x1c1   : > { %v954_v45 = vadd.f32 %v887_v13, %v645_v20  ;;  %v647_v44 = vpop.f32.mrf.mxu1  ;;  %v1825_v20 = vld [vmem:[%s3230_s28 + $0x3c] sm:$0xff] }
 0x1c2   : > { %v648_v30 = vadd.f32 %v647_v44, %v3393_v6  ;;  %v2392_v13 = vld [vmem:[%s3230_s28 + $0x36] sm:$0xff] }
 0x1c3   : > { %v1458_v2 = vpop.f32.mrf.mxu0  ;;  %v1238_v51 = vadd.f32 %v3785_v16, %v954_v45  ;;  %v3853_v62 = vpop.f32.mrf.mxu3 }
 0x1c4   : > { %3061 = vmatmul.msk.bf16.vlgmr.msra.gmra.mxu1 %vm326_vm1, %v1579_v31 }
 0x1c5   : > { %3083 = vmatmul.msk.bf16.vlgmr.msra.gmra.mxu2 %vm326_vm1, %v1863_v38  ;;  %v3850_v0 = vadd.f32 %v1455_v53, %v1238_v51  ;;  %v2393_v53 = vld [vmem:[%s3230_s28 + $0x3e] sm:$0xff] }
 0x1c6   : > { %3127 = vmatmul.msk.bf16.vlgmr.msra.gmra.mxu0 %vm326_vm1, %v2431_v32  ;;  %v1864_v32 = vpack.c.bf16 %v1825_v20, %v1824_v61  ;;  %v2432_v51 = vpack.c.bf16 %v2393_v53, %v2392_v13  ;;  %v1826_v20 = vld [vmem:[%s3230_s28 + $0x44] sm:$0xff]  ;;  %v1827_v53 = vld [vmem:[%s3230_s28 + $0x4c] sm:$0xff] }
 0x1c7   : > { %3108 = vmatmul.msk.bf16.gmra.mxu3 %vm326_vm1, %v2150_v39  ;;  %v2115_v39 = vld [vmem:[%s3230_s28 + $0x6d] sm:$0xff] }
 0x1c8   : > { %v890_v50 = vpop.f32.mrf.mxu2 }
 0x1c9   : > { %v955_v46 = vadd.f32 %v890_v50, %v648_v30  ;;  %v649_v7 = vpop.f32.mrf.mxu1 }
 0x1ca   : > { %v650_v6 = vadd.f32 %v649_v7, %v3411_v17 }
 0x1cb   : > { %v1460_v22 = vpop.f32.mrf.mxu0  ;;  %v1239_v16 = vadd.f32 %v3798_v15, %v955_v46  ;;  %v3866_v30 = vpop.f32.mrf.mxu3 }
 0x1cd   : > { %v3859_v54 = vadd.f32 %v1458_v2, %v1239_v16 }
 0x1d0   : > { %v892_v31 = vpop.f32.mrf.mxu2 }
 0x1d1   : > { %v956_v45 = vadd.f32 %v892_v31, %v650_v6  ;;  %v652_v44 = vpop.f32.mrf.mxu1  ;;  %v2394_v6 = vld [vmem:[%s3230_s28 + $0x46] sm:$0xff] }
 0x1d2   : > { %v653_v50 = vadd.f32 %v652_v44, %v3423_v23 }
 0x1d3   : > { %v1463_v15 = vpop.f32.mrf.mxu0  ;;  %v1240_v2 = vadd.f32 %v3808_v19, %v956_v45  ;;  %v3875_v28 = vpop.f32.mrf.mxu3 }
 0x1d4   : > { %3062 = vmatmul.msk.bf16.gmra.mxu1 %vm326_vm1, %v1863_v38  ;;  %v2114_v38 = vld [vmem:[%s3230_s28 + $0x65] sm:$0xff] }
 0x1d5   : > { %3084 = vmatmul.msk.bf16.gmra.mxu2 %vm326_vm1, %v1864_v32  ;;  %v3872_v17 = vadd.f32 %v1460_v22, %v1240_v2  ;;  %v2151_v61 = vpack.c.bf16 %v2115_v39, %v2114_v38  ;;  %v2395_v22 = vld [vmem:[%s3230_s28 + $0x4e] sm:$0xff] }
 0x1d6   : > { %3128 = vmatmul.msk.bf16.gmra.mxu0 %vm326_vm1, %v2432_v51  ;;  %v1865_v51 = vpack.c.bf16 %v1827_v53, %v1826_v20  ;;  %v2433_v2 = vpack.c.bf16 %v2395_v22, %v2394_v6  ;;  %v1828_v53 = vld [vmem:[%s3230_s28 + $0x54] sm:$0xff]  ;;  %v1829_v22 = vld [vmem:[%s3230_s28 + $0x5c] sm:$0xff] }
 0x1d7   : > { %3109 = vmatmul.msk.bf16.gmra.mxu3 %vm326_vm1, %v2151_v61  ;;  %v2117_v61 = vld [vmem:[%s3230_s28 + $0x7d] sm:$0xff] }
 0x1d8   : > { %v895_v46 = vpop.f32.mrf.mxu2 }
 0x1d9   : > { %v957_v7 = vadd.f32 %v895_v46, %v653_v50  ;;  %v654_v16 = vpop.f32.mrf.mxu1 }
 0x1da   : > { %v655_v23 = vadd.f32 %v654_v16, %v3441_v34 }
 0x1db   : > { %v1465_v58 = vpop.f32.mrf.mxu0  ;;  %v1241_v19 = vadd.f32 %v3820_v29, %v957_v7  ;;  %v3888_v50 = vpop.f32.mrf.mxu3 }
 0x1dd   : > { %v3881_v13 = vadd.f32 %v1463_v15, %v1241_v19 }
 0x1e0   : > { %v897_v31 = vpop.f32.mrf.mxu2 }
 0x1e1   : > { %v958_v45 = vadd.f32 %v897_v31, %v655_v23  ;;  %v657_v44 = vpop.f32.mrf.mxu1  ;;  %v2396_v23 = vld [vmem:[%s3230_s28 + $0x56] sm:$0xff] }
 0x1e2   : > { %v658_v46 = vadd.f32 %v657_v44, %v3453_v40 }
 0x1e3   : > { %v1468_v29 = vpop.f32.mrf.mxu0  ;;  %v1242_v15 = vadd.f32 %v3829_v10, %v958_v45  ;;  %v3897_v39 = vpop.f32.mrf.mxu3 }
 0x1e4   : > { %3063 = vmatmul.msk.bf16.gmra.mxu1 %vm326_vm1, %v1864_v32  ;;  %v2116_v32 = vld [vmem:[%s3230_s28 + $0x75] sm:$0xff] }
 0x1e5   : > { %3085 = vmatmul.msk.bf16.gmra.mxu2 %vm326_vm1, %v1865_v51  ;;  %v3894_v34 = vadd.f32 %v1465_v58, %v1242_v15  ;;  %v2152_v20 = vpack.c.bf16 %v2117_v61, %v2116_v32  ;;  %v2397_v58 = vld [vmem:[%s3230_s28 + $0x5e] sm:$0xff] }
 0x1e6   : > { %3129 = vmatmul.msk.bf16.gmra.mxu0 %vm326_vm1, %v2433_v2  ;;  %v1866_v2 = vpack.c.bf16 %v1829_v22, %v1828_v53  ;;  %v2434_v15 = vpack.c.bf16 %v2397_v58, %v2396_v23  ;;  %v1830_v22 = vld [vmem:[%s3230_s28 + $0x64] sm:$0xff]  ;;  %v1831_v58 = vld [vmem:[%s3230_s28 + $0x6c] sm:$0xff] }
 0x1e7   : > { %3110 = vmatmul.msk.bf16.gmra.mxu3 %vm326_vm1, %v2152_v20  ;;  %v2119_v20 = vld [vmem:[%s3230_s28 + $0x8d] sm:$0xff] }
 0x1e8   : > { %v900_v7 = vpop.f32.mrf.mxu2 }
 0x1e9   : > { %v959_v16 = vadd.f32 %v900_v7, %v658_v46  ;;  %v659_v19 = vpop.f32.mrf.mxu1 }
 0x1ea   : > { %v660_v40 = vadd.f32 %v659_v19, %v3469_v52 }
 0x1eb   : > { %v1470_v38 = vpop.f32.mrf.mxu0  ;;  %v1243_v10 = vadd.f32 %v3844_v27, %v959_v16  ;;  %v3910_v46 = vpop.f32.mrf.mxu3 }
 0x1ed   : > { %v3903_v6 = vadd.f32 %v1468_v29, %v1243_v10 }
 0x1f0   : > { %v902_v31 = vpop.f32.mrf.mxu2 }
 0x1f1   : > { %v960_v45 = vadd.f32 %v902_v31, %v660_v40  ;;  %v662_v44 = vpop.f32.mrf.mxu1  ;;  %v2398_v40 = vld [vmem:[%s3230_s28 + $0x66] sm:$0xff] }
 0x1f2   : > { %v663_v7 = vadd.f32 %v662_v44, %v3479_v63 }
 0x1f3   : > { %v1473_v27 = vpop.f32.mrf.mxu0  ;;  %v1244_v29 = vadd.f32 %v3853_v62, %v960_v45  ;;  %v3919_v61 = vpop.f32.mrf.mxu3 }
 0x1f4   : > { %3064 = vmatmul.msk.bf16.gmra.mxu1 %vm326_vm1, %v1865_v51  ;;  %v2118_v51 = vld [vmem:[%s3230_s28 + $0x85] sm:$0xff] }
 0x1f5   : > { %3086 = vmatmul.msk.bf16.gmra.mxu2 %vm326_vm1, %v1866_v2  ;;  %v3916_v52 = vadd.f32 %v1470_v38, %v1244_v29  ;;  %v2153_v53 = vpack.c.bf16 %v2119_v20, %v2118_v51  ;;  %v2399_v38 = vld [vmem:[%s3230_s28 + $0x6e] sm:$0xff] }
 0x1f6   : > { %3130 = vmatmul.msk.bf16.gmra.mxu0 %vm326_vm1, %v2434_v15  ;;  %v1867_v15 = vpack.c.bf16 %v1831_v58, %v1830_v22  ;;  %v2435_v29 = vpack.c.bf16 %v2399_v38, %v2398_v40  ;;  %v1832_v58 = vld [vmem:[%s3230_s28 + $0x74] sm:$0xff]  ;;  %v1833_v38 = vld [vmem:[%s3230_s28 + $0x7c] sm:$0xff] }
 0x1f7   : > { %3111 = vmatmul.msk.bf16.gmra.mxu3 %vm326_vm1, %v2153_v53  ;;  %v2121_v53 = vld [vmem:[%s3230_s28 + $0x9d] sm:$0xff] }
 0x1f8   : > { %v905_v16 = vpop.f32.mrf.mxu2 }
 0x1f9   : > { %v961_v19 = vadd.f32 %v905_v16, %v663_v7  ;;  %v664_v10 = vpop.f32.mrf.mxu1 }
 0x1fa   : > { %v665_v63 = vadd.f32 %v664_v10, %v3497_v59 }
 0x1fb   : > { %v1475_v32 = vpop.f32.mrf.mxu0  ;;  %v1245_v62 = vadd.f32 %v3866_v30, %v961_v19  ;;  %v3932_v7 = vpop.f32.mrf.mxu3 }
 0x1fd   : > { %v3925_v23 = vadd.f32 %v1473_v27, %v1245_v62 }
 0x200   : > { %v907_v31 = vpop.f32.mrf.mxu2 }
 0x201   : > { %v962_v45 = vadd.f32 %v907_v31, %v665_v63  ;;  %v667_v44 = vpop.f32.mrf.mxu1  ;;  %v2400_v63 = vld [vmem:[%s3230_s28 + $0x76] sm:$0xff] }
 0x202   : > { %v668_v16 = vadd.f32 %v667_v44, %v3507_v33 }
 0x203   : > { %v1478_v30 = vpop.f32.mrf.mxu0  ;;  %v1246_v27 = vadd.f32 %v3875_v28, %v962_v45  ;;  %v3941_v20 = vpop.f32.mrf.mxu3 }
 0x204   : > { %3065 = vmatmul.msk.bf16.gmra.mxu1 %vm326_vm1, %v1866_v2  ;;  %v2120_v2 = vld [vmem:[%s3230_s28 + $0x95] sm:$0xff] }
 0x205   : > { %3087 = vmatmul.msk.bf16.gmra.mxu2 %vm326_vm1, %v1867_v15  ;;  %v3938_v59 = vadd.f32 %v1475_v32, %v1246_v27  ;;  %v2154_v22 = vpack.c.bf16 %v2121_v53, %v2120_v2  ;;  %v2401_v32 = vld [vmem:[%s3230_s28 + $0x7e] sm:$0xff] }
 0x206   : > { %3131 = vmatmul.msk.bf16.gmra.mxu0 %vm326_vm1, %v2435_v29  ;;  %v1868_v29 = vpack.c.bf16 %v1833_v38, %v1832_v58  ;;  %v2436_v27 = vpack.c.bf16 %v2401_v32, %v2400_v63  ;;  %v1834_v38 = vld [vmem:[%s3230_s28 + $0x84] sm:$0xff]  ;;  %v1835_v32 = vld [vmem:[%s3230_s28 + $0x8c] sm:$0xff] }
 0x207   : > { %3112 = vmatmul.msk.bf16.gmra.mxu3 %vm326_vm1, %v2154_v22  ;;  %v2122_v22 = vld [vmem:[%s3230_s28 + $0xa5] sm:$0xff] }
 0x208   : > { %v910_v19 = vpop.f32.mrf.mxu2 }
 0x209   : > { %v963_v10 = vadd.f32 %v910_v19, %v668_v16  ;;  %v669_v62 = vpop.f32.mrf.mxu1 }
 0x20a   : > { %v670_v33 = vadd.f32 %v669_v62, %v3525_v12 }
 0x20b   : > { %v1480_v51 = vpop.f32.mrf.mxu0  ;;  %v1247_v28 = vadd.f32 %v3888_v50, %v963_v10  ;;  %v3954_v16 = vpop.f32.mrf.mxu3 }
 0x20d   : > { %v3947_v40 = vadd.f32 %v1478_v30, %v1247_v28 }
 0x210   : > { %v912_v31 = vpop.f32.mrf.mxu2 }
 0x211   : > { %v964_v45 = vadd.f32 %v912_v31, %v670_v33  ;;  %v672_v44 = vpop.f32.mrf.mxu1  ;;  %v2402_v33 = vld [vmem:[%s3230_s28 + $0x86] sm:$0xff]  ;;  %v2403_v31 = vld [vmem:[%s3230_s28 + $0x8e] sm:$0xff] }
 0x212   : > { %v673_v19 = vadd.f32 %v672_v44, %v3386_v4 }
 0x213   : > { %v1483_v50 = vpop.f32.mrf.mxu0  ;;  %v1248_v30 = vadd.f32 %v3897_v39, %v964_v45  ;;  %v1211_v53 = vpop.f32.mrf.mxu3 }
 0x214   : > { %3066 = vmatmul.msk.bf16.gmra.mxu1 %vm326_vm1, %v1867_v15  ;;  %v2123_v15 = vld [vmem:[%s3230_s28 + $0xad] sm:$0xff] }
 0x215   : > { %3088 = vmatmul.msk.bf16.gmra.mxu2 %vm326_vm1, %v1868_v29  ;;  %v3960_v12 = vadd.f32 %v1480_v51, %v1248_v30  ;;  %v2155_v58 = vpack.c.bf16 %v2123_v15, %v2122_v22  ;;  %v2437_v30 = vpack.c.bf16 %v2403_v31, %v2402_v33  ;;  %v1837_v31 = vld [vmem:[%s3230_s28 + $0x9c] sm:$0xff] }
 0x216   : > { %3132 = vmatmul.msk.bf16.gmra.mxu0 %vm326_vm1, %v2436_v27  ;;  %v1869_v27 = vpack.c.bf16 %v1835_v32, %v1834_v38  ;;  %v1836_v38 = vld [vmem:[%s3230_s28 + $0x94] sm:$0xff] }
 0x217   : > { %3113 = vmatmul.msk.bf16.gmra.mxu3 %vm326_vm1, %v2155_v58  ;;  %v2125_v58 = vld [vmem:[%s3230_s28 + $0xbd] sm:$0xff] }
 0x218   : > { %v915_v10 = vpop.f32.mrf.mxu2 }
 0x219   : > { %v965_v62 = vadd.f32 %v915_v10, %v673_v19  ;;  %v674_v28 = vpop.f32.mrf.mxu1  ;;  %v4489_v10 = vld [vmem:[#allocation2_spill] sm:$0xff] }
 0x21a   : > { %v675_v4 = vadd.f32 %v674_v28, %v3397_v8 }
 0x21b   : > { %v1485_v2 = vpop.f32.mrf.mxu0  ;;  %v1249_v39 = vadd.f32 %v3910_v46, %v965_v62  ;;  %v3974_v19 = vpop.f32.mrf.mxu3 }
 0x21d   : > { %v3967_v63 = vadd.f32 %v1483_v50, %v1249_v39 }
 0x220   : > { %v917_v51 = vpop.f32.mrf.mxu2 }
 0x221   : > { %v966_v45 = vadd.f32 %v917_v51, %v675_v4  ;;  %v677_v44 = vpop.f32.mrf.mxu1  ;;  %v2404_v4 = vld [vmem:[%s3230_s28 + $0x96] sm:$0xff]  ;;  %v4491_v51 = vld [vmem:[#allocation3_spill] sm:$0xff] }
 0x222   : > { %v678_v62 = vadd.f32 %v677_v44, %v4489_v10  ;;  %v1870_v10 = vpack.c.bf16 %v1837_v31, %v1836_v38 }
 0x223   : > { %v1488_v46 = vpop.f32.mrf.mxu0  ;;  %v1250_v50 = vadd.f32 %v3919_v61, %v966_v45  ;;  %v3983_v15 = vpop.f32.mrf.mxu3 }
 0x224   : > { %3067 = vmatmul.msk.bf16.gmra.mxu1 %vm326_vm1, %v1868_v29  ;;  %v2124_v29 = vld [vmem:[%s3230_s28 + $0xb5] sm:$0xff] }
 0x225   : > { %3089 = vmatmul.msk.bf16.gmra.mxu2 %vm326_vm1, %v1869_v27  ;;  %v3980_v8 = vadd.f32 %v1485_v2, %v1250_v50  ;;  %v2156_v32 = vpack.c.bf16 %v2125_v58, %v2124_v29  ;;  %v2405_v2 = vld [vmem:[%s3230_s28 + $0x9e] sm:$0xff] }
 0x226   : > { %3133 = vmatmul.msk.bf16.gmra.mxu0 %vm326_vm1, %v2437_v30 }
 0x227   : > { %3114 = vmatmul.msk.bf16.gmra.mxu3 %vm326_vm1, %v2156_v32 }
 0x228   : > { %v920_v28 = vpop.f32.mrf.mxu2 }
 0x229   : > { %v967_v53 = vadd.f32 %v920_v28, %v678_v62  ;;  %v679_v39 = vpop.f32.mrf.mxu1  ;;  %v2438_v62 = vpack.c.bf16 %v2405_v2, %v2404_v4  ;;  %v2127_v4 = vld [vmem:[%s3230_s28 + $0xcd] sm:$0xff]  ;;  %v1838_v2 = vld [vmem:[%s3230_s28 + $0xa4] sm:$0xff] }
 0x22a   : > { %v680_v45 = vadd.f32 %v679_v39, %v4491_v51  ;;  %v4493_v39 = vld [vmem:[#allocation4_spill] sm:$0xff] }
 0x22b   : > { %v1490_v22 = vpop.f32.mrf.mxu0  ;;  %v1251_v61 = vadd.f32 %v3932_v7, %v967_v53  ;;  %v3996_v28 = vpop.f32.mrf.mxu3 }
 0x22d   : > { %v3989_v33 = vadd.f32 %v1488_v46, %v1251_v61 }
 0x22f   : > { %4490 = vst [vmem:[#allocation2_spill] sm:$0xff] %v3989_v33 }
 0x230   : > { %v922_v44 = vpop.f32.mrf.mxu2 }
 0x231   : > { %v968_v30 = vadd.f32 %v922_v44, %v680_v45  ;;  %v682_v50 = vpop.f32.mrf.mxu1  ;;  %v1839_v44 = vld [vmem:[%s3230_s28 + $0xac] sm:$0xff] }
 0x232   : > { %v683_v61 = vadd.f32 %v682_v50, %v4493_v39 }
 0x233   : > { %v1493_v7 = vpop.f32.mrf.mxu0  ;;  %v1252_v46 = vadd.f32 %v3941_v20, %v968_v30  ;;  %v4005_v31 = vpop.f32.mrf.mxu3  ;;  %v2406_v30 = vld [vmem:[%s3230_s28 + $0xa6] sm:$0xff] }
 0x234   : > { %3068 = vmatmul.msk.bf16.gmra.mxu1 %vm326_vm1, %v1869_v27  ;;  %v2126_v27 = vld [vmem:[%s3230_s28 + $0xc5] sm:$0xff] }
 0x235   : > { %3090 = vmatmul.msk.bf16.gmra.mxu2 %vm326_vm1, %v1870_v10  ;;  %v4002_v53 = vadd.f32 %v1490_v22, %v1252_v46  ;;  %v2157_v51 = vpack.c.bf16 %v2127_v4, %v2126_v27  ;;  %v2407_v22 = vld [vmem:[%s3230_s28 + $0xae] sm:$0xff]  ;;  %v1871_v46 = vpack.c.bf16 %v1839_v44, %v1838_v2  ;;  %v2129_v2 = vld [vmem:[%s3230_s28 + $0xdd] sm:$0xff] }
 0x236   : > { %3134 = vmatmul.msk.bf16.gmra.mxu0 %vm326_vm1, %v2438_v62  ;;  %v2439_v39 = vpack.c.bf16 %v2407_v22, %v2406_v30  ;;  %v2128_v4 = vld [vmem:[%s3230_s28 + $0xd5] sm:$0xff] }
 0x237   : > { %4492 = vst [vmem:[#allocation3_spill] sm:$0xff] %v4002_v53  ;;  %3115 = vmatmul.msk.bf16.gmra.mxu3 %vm326_vm1, %v2157_v51  ;;  %v1840_v44 = vld [vmem:[%s3230_s28 + $0xb4] sm:$0xff]  ;;  %v2158_v30 = vpack.c.bf16 %v2129_v2, %v2128_v4  ;;  %v1841_v22 = vld [vmem:[%s3230_s28 + $0xbc] sm:$0xff] }
 0x238   : > { %v925_v29 = vpop.f32.mrf.mxu2 }
 0x239   : > { %v969_v58 = vadd.f32 %v925_v29, %v683_v61  ;;  %v684_v38 = vpop.f32.mrf.mxu1 }
 0x23b   : > { %v1495_v32 = vpop.f32.mrf.mxu0  ;;  %v1253_v20 = vadd.f32 %v3954_v16, %v969_v58  ;;  %v4017_v29 = vpop.f32.mrf.mxu3 }
 0x23d   : > { %v4011_v45 = vadd.f32 %v1493_v7, %v1253_v20 }
 0x23f   : > { %4494 = vst [vmem:[#allocation4_spill] sm:$0xff] %v4011_v45 }
 0x240   : > { %v927_v50 = vpop.f32.mrf.mxu2 }
 0x241   : > { %v1677_v62 = vpop.f32.mrf.mxu1  ;;  %v2408_v50 = vld [vmem:[%s3230_s28 + $0xb6] sm:$0xff] }
 0x242   : > { %v1781_v16 = vadd.f32 %v1677_v62, %v3542_v25  ;;  %v4036_v25 = vld [vmem:[%s4483_s3] ss:$0 sm:$0xff] }
 0x243   : > { %v2529_v61 = vpop.f32.mrf.mxu0  ;;  %v4023_v20 = vpop.f32.mrf.mxu3  ;;  %v2409_v62 = vld [vmem:[%s3230_s28 + $0xbe] sm:$0xff] }
 0x244   : > { %3069 = vmatmul.msk.bf16.gmra.mxu1 %vm326_vm1, %v1870_v10  ;;  %v4029_v10 = vld [vmem:[%s4482_s2] ss:$0 sm:$0xff]  ;;  %v2440_v45 = vpack.c.bf16 %v2409_v62, %v2408_v50 }
 0x245   : > { %3091 = vmatmul.msk.bf16.gmra.mxu2 %vm326_vm1, %v1871_v46 }
 0x246   : > { %3135 = vmatmul.msk.bf16.gmra.mxu0 %vm326_vm1, %v2439_v39 }
 0x247   : > { %3116 = vmatmul.msk.bf16.gmra.mxu3 %vm326_vm1, %v2158_v30 }
 0x248   : > { %v1961_v7 = vpop.f32.mrf.mxu2 }
 0x249   : > { %v2065_v58 = vadd.f32 %v1961_v7, %v1781_v16  ;;  %v1679_v38 = vpop.f32.mrf.mxu1 }
 0x24a   : > { %v1782_v39 = vadd.f32 %v1679_v38, %v3556_v56 }
 0x24b   : > { %v2531_v32 = vpop.f32.mrf.mxu0  ;;  %v2349_v27 = vadd.f32 %v3974_v19, %v2065_v58  ;;  %v4047_v33 = vpop.f32.mrf.mxu3 }
 0x24d   : > { %v2633_v51 = vadd.f32 %v2529_v61, %v2349_v27  ;;  %v1872_v27 = vpack.c.bf16 %v1841_v22, %v1840_v44 }
 0x24f   : > { %v2678_v19 = vmul.f32 %v4029_v10, %v2633_v51 }
 0x250   : > { %v1963_v16 = vpop.f32.mrf.mxu2 }
 0x251   : > { %v2723_v61 = vadd.f32 %v4036_v25, %v2678_v19  ;;  %v2066_v7 = vadd.f32 %v1963_v16, %v1782_v39  ;;  %v1682_v58 = vpop.f32.mrf.mxu1  ;;  %v2130_v19 = vld [vmem:[%s3230_s28 + $0xe5] sm:$0xff]  ;;  %v2131_v39 = vld [vmem:[%s3230_s28 + $0xed] sm:$0xff] }
 0x252   : > { %v1783_v51 = vadd.f32 %v1682_v58, %v3567_v18  ;;  %v2159_v18 = vpack.c.bf16 %v2131_v39, %v2130_v19  ;;  %v1843_v58 = vld [vmem:[%s3230_s28 + $0xcc] sm:$0xff] }
 0x253   : > { %v2534_v53 = vpop.f32.mrf.mxu0  ;;  %v2764_v4 = vmax.f32 %v2723_v61, 0.0  ;;  %v2350_v2 = vadd.f32 %v3983_v15, %v2066_v7  ;;  %v4063_v50 = vpop.f32.mrf.mxu3  ;;  %v1842_v7 = vld [vmem:[%s3230_s28 + $0xc4] sm:$0xff] }
 0x254   : > { %3070 = vmatmul.msk.bf16.gmra.mxu1 %vm326_vm1, %v1871_v46 }
 0x255   : > { %v2805_v56 = vpack.c.bf16 %v2764_v4, %v2764_v4  ;;  %v2634_v38 = vadd.f32 %v2531_v32, %v2350_v2  ;;  %3092 = vmatmul.msk.bf16.gmra.mxu2 %vm326_vm1, %v1872_v27  ;;  %v2410_v4 = vld [vmem:[%s3230_s28 + $0xc6] sm:$0xff]  ;;  %v2411_v2 = vld [vmem:[%s3230_s28 + $0xce] sm:$0xff] }
 0x256   : > { %3136 = vmatmul.msk.bf16.gmra.mxu0 %vm326_vm1, %v2440_v45 }
 0x257   : > { %2847 = vst.msk [vmem:[%s4053_s22] sm:$0xf] %vm2846_vm2, %v2805_v56  ;;  %v2679_v15 = vmul.f32 %v4029_v10, %v2634_v38  ;;  %3117 = vmatmul.msk.bf16.gmra.mxu3 %vm326_vm1, %v2159_v18 }
 0x258   : > { %v1966_v44 = vpop.f32.mrf.mxu2 }
 0x259   : > { %v2724_v46 = vadd.f32 %v4036_v25, %v2679_v15  ;;  %v2067_v30 = vadd.f32 %v1966_v44, %v1783_v51  ;;  %v1684_v32 = vpop.f32.mrf.mxu1 }
 0x25a   : > { %v1784_v38 = vadd.f32 %v1684_v32, %v3581_v9 }
 0x25b   : > { %v2536_v22 = vpop.f32.mrf.mxu0  ;;  %v2765_v45 = vmax.f32 %v2724_v46, 0.0  ;;  %v2351_v62 = vadd.f32 %v3996_v28, %v2067_v30  ;;  %v2441_v46 = vpack.c.bf16 %v2411_v2, %v2410_v4  ;;  %v2132_v2 = vld [vmem:[%s3230_s28 + $0xf5] sm:$0xff] }
 0x25d   : > { %v2806_v16 = vpack.c.bf16 %v2765_v45, %v2765_v45  ;;  %v2635_v61 = vadd.f32 %v2534_v53, %v2351_v62  ;;  %v1873_v53 = vpack.c.bf16 %v1843_v58, %v1842_v7  ;;  %v4078_v45 = vpop.f32.mrf.mxu3 }
 0x25f   : > { %2848 = vst.msk [vmem:[%s4053_s22 + $0x4] sm:$0xf] %vm2846_vm2, %v2806_v16  ;;  %v2680_v56 = vmul.f32 %v4029_v10, %v2635_v61 }
 0x260   : > { %v1968_v15 = vpop.f32.mrf.mxu2 }
 0x261   : > { %v2725_v28 = vadd.f32 %v4036_v25, %v2680_v56  ;;  %v2068_v51 = vadd.f32 %v1968_v15, %v1784_v38  ;;  %v1687_v44 = vpop.f32.mrf.mxu1  ;;  %v2133_v56 = vld [vmem:[%s3230_s28 + $0xfd] sm:$0xff] }
 0x262   : > { %v1785_v16 = vadd.f32 %v1687_v44, %v3593_v21  ;;  %v2160_v21 = vpack.c.bf16 %v2133_v56, %v2132_v2  ;;  %v2412_v44 = vld [vmem:[%s3230_s28 + $0xd6] sm:$0xff] }
 0x263   : > { %v2539_v30 = vpop.f32.mrf.mxu0  ;;  %v2766_v62 = vmax.f32 %v2725_v28, 0.0  ;;  %v2352_v19 = vadd.f32 %v4005_v31, %v2068_v51  ;;  %v1844_v28 = vld [vmem:[%s3230_s28 + $0xd4] sm:$0xff]  ;;  %v1845_v51 = vld [vmem:[%s3230_s28 + $0xdc] sm:$0xff] }
 0x264   : > { %3071 = vmatmul.msk.bf16.gmra.mxu1 %vm326_vm1, %v1872_v27 }
 0x265   : > { %v2807_v9 = vpack.c.bf16 %v2766_v62, %v2766_v62  ;;  %v2636_v32 = vadd.f32 %v2536_v22, %v2352_v19  ;;  %3093 = vmatmul.msk.bf16.gmra.mxu2 %vm326_vm1, %v1873_v53  ;;  %v4089_v18 = vpop.f32.mrf.mxu3 }
 0x266   : > { %3137 = vmatmul.msk.bf16.gmra.mxu0 %vm326_vm1, %v2441_v46  ;;  %v2413_v46 = vld [vmem:[%s3230_s28 + $0xde] sm:$0xff] }
 0x267   : > { %2849 = vst.msk [vmem:[%s4053_s22 + $0x8] sm:$0xf] %vm2846_vm2, %v2807_v9  ;;  %v2681_v39 = vmul.f32 %v4029_v10, %v2636_v32  ;;  %3118 = vmatmul.msk.bf16.gmra.mxu3 %vm326_vm1, %v2160_v21 }
 0x268   : > { %v1971_v31 = vpop.f32.mrf.mxu2 }
 0x269   : > { %v2726_v27 = vadd.f32 %v4036_v25, %v2681_v39  ;;  %v2069_v61 = vadd.f32 %v1971_v31, %v1785_v16  ;;  %v1689_v22 = vpop.f32.mrf.mxu1  ;;  %v2442_v16 = vpack.c.bf16 %v2413_v46, %v2412_v44  ;;  %v2135_v44 = vld [vmem:[%s3230_s28 + $0x10d] sm:$0xff] }
 0x26a   : > { %v1786_v19 = vadd.f32 %v1689_v22, %v3607_v26 }
 0x26b   : > { %v2541_v7 = vpop.f32.mrf.mxu0  ;;  %v2767_v58 = vmax.f32 %v2726_v27, 0.0  ;;  %v2353_v4 = vadd.f32 %v4017_v29, %v2069_v61 }
 0x26d   : > { %v2808_v38 = vpack.c.bf16 %v2767_v58, %v2767_v58  ;;  %v2637_v15 = vadd.f32 %v2539_v30, %v2353_v4  ;;  %v1874_v30 = vpack.c.bf16 %v1845_v51, %v1844_v28  ;;  %v4104_v27 = vpop.f32.mrf.mxu3  ;;  %v2134_v51 = vld [vmem:[%s3230_s28 + $0x105] sm:$0xff] }
 0x26f   : > { %2850 = vst.msk [vmem:[%s4053_s22 + $0xc] sm:$0xf] %vm2846_vm2, %v2808_v38  ;;  %v2682_v62 = vmul.f32 %v4029_v10, %v2637_v15 }
 0x270   : > { %v1973_v9 = vpop.f32.mrf.mxu2 }
 0x271   : > { %v2727_v29 = vadd.f32 %v4036_v25, %v2682_v62  ;;  %v2070_v32 = vadd.f32 %v1973_v9, %v1786_v19  ;;  %v1692_v39 = vpop.f32.mrf.mxu1  ;;  %v1846_v19 = vld [vmem:[%s3230_s28 + $0xe4] sm:$0xff]  ;;  %v1847_v9 = vld [vmem:[%s3230_s28 + $0xec] sm:$0xff] }
 0x272   : > { %v1787_v2 = vadd.f32 %v1692_v39, %v3619_v49  ;;  %v2161_v49 = vpack.c.bf16 %v2135_v44, %v2134_v51 }
 0x273   : > { %v2544_v31 = vpop.f32.mrf.mxu0  ;;  %v2768_v61 = vmax.f32 %v2727_v29, 0.0  ;;  %v2354_v58 = vadd.f32 %v4023_v20, %v2070_v32  ;;  %v2414_v29 = vld [vmem:[%s3230_s28 + $0xe6] sm:$0xff]  ;;  %v2415_v32 = vld [vmem:[%s3230_s28 + $0xee] sm:$0xff] }
 0x274   : > { %3072 = vmatmul.msk.bf16.gmra.mxu1 %vm326_vm1, %v1873_v53 }
 0x275   : > { %v2809_v26 = vpack.c.bf16 %v2768_v61, %v2768_v61  ;;  %v2638_v22 = vadd.f32 %v2541_v7, %v2354_v58  ;;  %3094 = vmatmul.msk.bf16.gmra.mxu2 %vm326_vm1, %v1874_v30  ;;  %v4115_v15 = vpop.f32.mrf.mxu3 }
 0x276   : > { %3138 = vmatmul.msk.bf16.gmra.mxu0 %vm326_vm1, %v2442_v16 }
 0x277   : > { %2851 = vst.msk [vmem:[%s4053_s22 + $0x10] sm:$0xf] %vm2846_vm2, %v2809_v26  ;;  %v2683_v4 = vmul.f32 %v4029_v10, %v2638_v22  ;;  %3119 = vmatmul.msk.bf16.gmra.mxu3 %vm326_vm1, %v2161_v49  ;;  %v2443_v22 = vpack.c.bf16 %v2415_v32, %v2414_v29  ;;  %v2137_v49 = vld [vmem:[%s3230_s28 + $0x11d] sm:$0xff]  ;;  %v1848_v32 = vld [vmem:[%s3230_s28 + $0xf4] sm:$0xff] }
 0x278   : > { %v1976_v20 = vpop.f32.mrf.mxu2 }
 0x279   : > { %v2728_v53 = vadd.f32 %v4036_v25, %v2683_v4  ;;  %v2071_v56 = vadd.f32 %v1976_v20, %v1787_v2  ;;  %v1694_v7 = vpop.f32.mrf.mxu1 }
 0x27a   : > { %v1788_v16 = vadd.f32 %v1694_v7, %v3633_v43 }
 0x27b   : > { %v2546_v38 = vpop.f32.mrf.mxu0  ;;  %v2769_v28 = vmax.f32 %v2728_v53, 0.0  ;;  %v2355_v21 = vadd.f32 %v4047_v33, %v2071_v56 }
 0x27d   : > { %v2810_v46 = vpack.c.bf16 %v2769_v28, %v2769_v28  ;;  %v2639_v62 = vadd.f32 %v2544_v31, %v2355_v21  ;;  %v1875_v31 = vpack.c.bf16 %v1847_v9, %v1846_v19  ;;  %v4130_v2 = vpop.f32.mrf.mxu3  ;;  %v2136_v19 = vld [vmem:[%s3230_s28 + $0x115] sm:$0xff] }
 0x27f   : > { %2852 = vst.msk [vmem:[%s4053_s22 + $0x14] sm:$0xf] %vm2846_vm2, %v2810_v46  ;;  %v2684_v39 = vmul.f32 %v4029_v10, %v2639_v62 }
 0x280   : > { %v1978_v61 = vpop.f32.mrf.mxu2 }
 0x281   : > { %v2729_v33 = vadd.f32 %v4036_v25, %v2684_v39  ;;  %v2072_v58 = vadd.f32 %v1978_v61, %v1788_v16  ;;  %v1697_v26 = vpop.f32.mrf.mxu1  ;;  %v1849_v39 = vld [vmem:[%s3230_s28 + $0xfc] sm:$0xff] }
 0x282   : > { %v1789_v28 = vadd.f32 %v1697_v26, %v3645_v47  ;;  %v2162_v47 = vpack.c.bf16 %v2137_v49, %v2136_v19  ;;  %v2416_v16 = vld [vmem:[%s3230_s28 + $0xf6] sm:$0xff]  ;;  %v2417_v61 = vld [vmem:[%s3230_s28 + $0xfe] sm:$0xff] }
 0x283   : > { %v2549_v4 = vpop.f32.mrf.mxu0  ;;  %v2770_v20 = vmax.f32 %v2729_v33, 0.0  ;;  %v2356_v53 = vadd.f32 %v4063_v50, %v2072_v58 }
 0x284   : > { %3073 = vmatmul.msk.bf16.gmra.mxu1 %vm326_vm1, %v1874_v30 }
 0x285   : > { %v2811_v43 = vpack.c.bf16 %v2770_v20, %v2770_v20  ;;  %v2640_v56 = vadd.f32 %v2546_v38, %v2356_v53  ;;  %3095 = vmatmul.msk.bf16.gmra.mxu2 %vm326_vm1, %v1875_v31  ;;  %v4141_v44 = vpop.f32.mrf.mxu3  ;;  %v2444_v53 = vpack.c.bf16 %v2417_v61, %v2416_v16  ;;  %v1851_v16 = vld [vmem:[%s3230_s28 + $0x10c] sm:$0xff] }
 0x286   : > { %3139 = vmatmul.msk.bf16.gmra.mxu0 %vm326_vm1, %v2443_v22  ;;  %v2418_v61 = vld [vmem:[%s3230_s28 + $0x106] sm:$0xff] }
 0x287   : > { %2853 = vst.msk [vmem:[%s4053_s22 + $0x18] sm:$0xf] %vm2846_vm2, %v2811_v43  ;;  %v2685_v7 = vmul.f32 %v4029_v10, %v2640_v56  ;;  %3120 = vmatmul.msk.bf16.gmra.mxu3 %vm326_vm1, %v2162_v47 }
 0x288   : > { %v1981_v50 = vpop.f32.mrf.mxu2 }
 0x289   : > { %v2730_v30 = vadd.f32 %v4036_v25, %v2685_v7  ;;  %v2073_v21 = vadd.f32 %v1981_v50, %v1789_v28  ;;  %v1699_v38 = vpop.f32.mrf.mxu1 }
 0x28a   : > { %v1790_v58 = vadd.f32 %v1699_v38, %v3659_v3 }
 0x28b   : > { %v2551_v51 = vpop.f32.mrf.mxu0  ;;  %v2771_v46 = vmax.f32 %v2730_v30, 0.0  ;;  %v2357_v62 = vadd.f32 %v4078_v45, %v2073_v21 }
 0x28d   : > { %v2812_v9 = vpack.c.bf16 %v2771_v46, %v2771_v46  ;;  %v2641_v29 = vadd.f32 %v2549_v4, %v2357_v62  ;;  %v1876_v4 = vpack.c.bf16 %v1849_v39, %v1848_v32  ;;  %v4156_v56 = vpop.f32.mrf.mxu3  ;;  %v1850_v39 = vld [vmem:[%s3230_s28 + $0x104] sm:$0xff] }
 0x28f   : > { %2854 = vst.msk [vmem:[%s4053_s22 + $0x1c] sm:$0xf] %vm2846_vm2, %v2812_v9  ;;  %v2686_v33 = vmul.f32 %v4029_v10, %v2641_v29  ;;  %v2138_v9 = vld [vmem:[%s3230_s28 + $0x125] sm:$0xff]  ;;  %v2139_v29 = vld [vmem:[%s3230_s28 + $0x12d] sm:$0xff] }
 0x290   : > { %v1983_v26 = vpop.f32.mrf.mxu2 }
 0x291   : > { %v2731_v45 = vadd.f32 %v4036_v25, %v2686_v33  ;;  %v2074_v22 = vadd.f32 %v1983_v26, %v1790_v58  ;;  %v1702_v20 = vpop.f32.mrf.mxu1  ;;  %v2419_v33 = vld [vmem:[%s3230_s28 + $0x10e] sm:$0xff] }
 0x292   : > { %v1791_v21 = vadd.f32 %v1702_v20, %v3671_v14  ;;  %v2163_v14 = vpack.c.bf16 %v2139_v29, %v2138_v9  ;;  %v2140_v9 = vld [vmem:[%s3230_s28 + $0x135] sm:$0xff]  ;;  %v2141_v29 = vld [vmem:[%s3230_s28 + $0x13d] sm:$0xff] }
 0x293   : > { %v2554_v43 = vpop.f32.mrf.mxu0  ;;  %v2772_v7 = vmax.f32 %v2731_v45, 0.0  ;;  %v2358_v28 = vadd.f32 %v4089_v18, %v2074_v22 }
 0x294   : > { %3074 = vmatmul.msk.bf16.gmra.mxu1 %vm326_vm1, %v1875_v31 }
 0x295   : > { %v2813_v3 = vpack.c.bf16 %v2772_v7, %v2772_v7  ;;  %v2642_v50 = vadd.f32 %v2551_v51, %v2358_v28  ;;  %3096 = vmatmul.msk.bf16.gmra.mxu2 %vm326_vm1, %v1876_v4  ;;  %v4167_v62 = vpop.f32.mrf.mxu3 }
 0x296   : > { %3140 = vmatmul.msk.bf16.gmra.mxu0 %vm326_vm1, %v2444_v53  ;;  %v1877_v53 = vpack.c.bf16 %v1851_v16, %v1850_v39  ;;  %v1852_v39 = vld [vmem:[%s3230_s28 + $0x114] sm:$0xff] }
 0x297   : > { %2855 = vst.msk [vmem:[%s4053_s22 + $0x20] sm:$0xf] %vm2846_vm2, %v2813_v3  ;;  %v2687_v30 = vmul.f32 %v4029_v10, %v2642_v50  ;;  %3121 = vmatmul.msk.bf16.gmra.mxu3 %vm326_vm1, %v2163_v14  ;;  %v1853_v14 = vld [vmem:[%s3230_s28 + $0x11c] sm:$0xff] }
 0x298   : > { %v1986_v18 = vpop.f32.mrf.mxu2  ;;  %v2420_v16 = vld [vmem:[%s3230_s28 + $0x116] sm:$0xff] }
 0x299   : > { %v2732_v31 = vadd.f32 %v4036_v25, %v2687_v30  ;;  %v2075_v38 = vadd.f32 %v1986_v18, %v1791_v21  ;;  %v1704_v51 = vpop.f32.mrf.mxu1 }
 0x29a   : > { %v1792_v26 = vadd.f32 %v1704_v51, %v3685_v37 }
 0x29b   : > { %v2556_v46 = vpop.f32.mrf.mxu0  ;;  %v2773_v19 = vmax.f32 %v2732_v31, 0.0  ;;  %v2359_v49 = vadd.f32 %v4104_v27, %v2075_v38 }
 0x29d   : > { %v2814_v32 = vpack.c.bf16 %v2773_v19, %v2773_v19  ;;  %v2643_v47 = vadd.f32 %v2554_v43, %v2359_v49  ;;  %v2445_v43 = vpack.c.bf16 %v2419_v33, %v2418_v61  ;;  %v4182_v28 = vpop.f32.mrf.mxu3  ;;  %v2421_v61 = vld [vmem:[%s3230_s28 + $0x11e] sm:$0xff] }
 0x29f   : > { %2856 = vst.msk [vmem:[%s4053_s22 + $0x24] sm:$0xf] %vm2846_vm2, %v2814_v32  ;;  %v2688_v58 = vmul.f32 %v4029_v10, %v2643_v47 }
 0x2a0   : > { %v1988_v45 = vpop.f32.mrf.mxu2 }
 0x2a1   : > { %v2733_v27 = vadd.f32 %v4036_v25, %v2688_v58  ;;  %v2076_v22 = vadd.f32 %v1988_v45, %v1792_v26  ;;  %v1707_v20 = vpop.f32.mrf.mxu1 }
 0x2a2   : > { %v1793_v18 = vadd.f32 %v1707_v20, %v3697_v48  ;;  %v2164_v48 = vpack.c.bf16 %v2141_v29, %v2140_v9  ;;  %v2446_v20 = vpack.c.bf16 %v2421_v61, %v2420_v16  ;;  %v4495_v16 = vld [vmem:[#allocation5_spill] sm:$0xff] }
 0x2a3   : > { %v2559_v7 = vpop.f32.mrf.mxu0  ;;  %v2774_v3 = vmax.f32 %v2733_v27, 0.0  ;;  %v2360_v50 = vadd.f32 %v4115_v15, %v2076_v22  ;;  %v1878_v22 = vpack.c.bf16 %v1853_v14, %v1852_v39  ;;  %v2422_v39 = vld [vmem:[%s3230_s28 + $0x126] sm:$0xff] }
 0x2a4   : > { %3075 = vmatmul.msk.bf16.gmra.mxu1 %vm326_vm1, %v1876_v4 }
 0x2a5   : > { %v2815_v37 = vpack.c.bf16 %v2774_v3, %v2774_v3  ;;  %v2644_v30 = vadd.f32 %v2556_v46, %v2360_v50  ;;  %3097 = vmatmul.msk.bf16.gmra.mxu2 %vm326_vm1, %v1877_v53  ;;  %v4193_v46 = vpop.f32.mrf.mxu3 }
 0x2a6   : > { %3141 = vmatmul.msk.bf16.gmra.mxu0 %vm326_vm1, %v2445_v43 }
 0x2a7   : > { %2857 = vst.msk [vmem:[%s4053_s22 + $0x28] sm:$0xf] %vm2846_vm2, %v2815_v37  ;;  %v2689_v21 = vmul.f32 %v4029_v10, %v2644_v30  ;;  %3122 = vmatmul.msk.bf16.gmra.mxu3 %vm326_vm1, %v2164_v48  ;;  %v2423_v48 = vld [vmem:[%s3230_s28 + $0x12e] sm:$0xff] }
 0x2a8   : > { %v1991_v15 = vpop.f32.mrf.mxu2 }
 0x2a9   : > { %v2734_v4 = vadd.f32 %v4036_v25, %v2689_v21  ;;  %v2077_v31 = vadd.f32 %v1991_v15, %v1793_v18  ;;  %v1709_v38 = vpop.f32.mrf.mxu1 }
 0x2aa   : > { %v1794_v58 = vadd.f32 %v1709_v38, %v3711_v55 }
 0x2ab   : > { %v2561_v51 = vpop.f32.mrf.mxu0  ;;  %v2775_v19 = vmax.f32 %v2734_v4, 0.0  ;;  %v2361_v49 = vadd.f32 %v4130_v2, %v2077_v31 }
 0x2ad   : > { %v2816_v32 = vpack.c.bf16 %v2775_v19, %v2775_v19  ;;  %v2645_v47 = vadd.f32 %v2559_v7, %v2361_v49  ;;  %v4208_v7 = vpop.f32.mrf.mxu3  ;;  %v2142_v19 = vld [vmem:[%s3230_s28 + $0x145] sm:$0xff]  ;;  %v2143_v49 = vld [vmem:[%s3230_s28 + $0x14d] sm:$0xff] }
 0x2af   : > { %2858 = vst.msk [vmem:[%s4053_s22 + $0x2c] sm:$0xf] %vm2846_vm2, %v2816_v32  ;;  %v2690_v33 = vmul.f32 %v4029_v10, %v2645_v47  ;;  %v1854_v32 = vld [vmem:[%s3230_s28 + $0x124] sm:$0xff]  ;;  %v1855_v47 = vld [vmem:[%s3230_s28 + $0x12c] sm:$0xff] }
 0x2b0   : > { %v1993_v26 = vpop.f32.mrf.mxu2 }
 0x2b1   : > { %v2735_v2 = vadd.f32 %v4036_v25, %v2690_v33  ;;  %v2078_v45 = vadd.f32 %v1993_v26, %v1794_v58  ;;  %v1712_v27 = vpop.f32.mrf.mxu1 }
 0x2b2   : > { %v1795_v21 = vadd.f32 %v1712_v27, %v3723_v57  ;;  %v2165_v57 = vpack.c.bf16 %v2143_v49, %v2142_v19 }
 0x2b3   : > { %v2564_v43 = vpop.f32.mrf.mxu0  ;;  %v2776_v3 = vmax.f32 %v2735_v2, 0.0  ;;  %v2362_v50 = vadd.f32 %v4141_v44, %v2078_v45  ;;  %v1879_v2 = vpack.c.bf16 %v1855_v47, %v1854_v32  ;;  %v2447_v45 = vpack.c.bf16 %v2423_v48, %v2422_v39  ;;  %v2424_v32 = vld [vmem:[%s3230_s28 + $0x136] sm:$0xff] }
 0x2b4   : > { %3076 = vmatmul.msk.bf16.gmra.mxu1 %vm326_vm1, %v1877_v53 }
 0x2b5   : > { %v2817_v55 = vpack.c.bf16 %v2776_v3, %v2776_v3  ;;  %v2646_v37 = vadd.f32 %v2561_v51, %v2362_v50  ;;  %3098 = vmatmul.msk.bf16.gmra.mxu2 %vm326_vm1, %v1878_v22  ;;  %v4219_v31 = vpop.f32.mrf.mxu3 }
 0x2b6   : > { %3142 = vmatmul.msk.bf16.gmra.mxu0 %vm326_vm1, %v2446_v20 }
 0x2b7   : > { %2859 = vst.msk [vmem:[%s4053_s22 + $0x30] sm:$0xf] %vm2846_vm2, %v2817_v55  ;;  %v2691_v30 = vmul.f32 %v4029_v10, %v2646_v37  ;;  %3123 = vmatmul.msk.bf16.gmra.mxu3 %vm326_vm1, %v2165_v57  ;;  %v2425_v57 = vld [vmem:[%s3230_s28 + $0x13e] sm:$0xff] }
 0x2b8   : > { %v1996_v44 = vpop.f32.mrf.mxu2 }
 0x2b9   : > { %v2736_v53 = vadd.f32 %v4036_v25, %v2691_v30  ;;  %v2079_v18 = vadd.f32 %v1996_v44, %v1795_v21  ;;  %v1714_v15 = vpop.f32.mrf.mxu1 }
 0x2ba   : > { %v1796_v61 = vadd.f32 %v1714_v15, %v4495_v16 }
 0x2bb   : > { %v2566_v4 = vpop.f32.mrf.mxu0  ;;  %v2777_v38 = vmax.f32 %v2736_v53, 0.0  ;;  %v2363_v51 = vadd.f32 %v4156_v56, %v2079_v18 }
 0x2bd   : > { %v2818_v9 = vpack.c.bf16 %v2777_v38, %v2777_v38  ;;  %v2647_v29 = vadd.f32 %v2564_v43, %v2363_v51  ;;  %v4234_v20 = vpop.f32.mrf.mxu3  ;;  %v2144_v38 = vld [vmem:[%s3230_s28 + $0x155] sm:$0xff]  ;;  %v2145_v51 = vld [vmem:[%s3230_s28 + $0x15d] sm:$0xff] }
 0x2bf   : > { %2860 = vst.msk [vmem:[%s4053_s22 + $0x34] sm:$0xf] %vm2846_vm2, %v2818_v9  ;;  %v2692_v14 = vmul.f32 %v4029_v10, %v2647_v29  ;;  %v1856_v9 = vld [vmem:[%s3230_s28 + $0x134] sm:$0xff]  ;;  %v1857_v29 = vld [vmem:[%s3230_s28 + $0x13c] sm:$0xff] }
 0x2c0   : > { %v1998_v33 = vpop.f32.mrf.mxu2 }
 0x2c1   : > { %v2737_v56 = vadd.f32 %v4036_v25, %v2692_v14  ;;  %v2080_v58 = vadd.f32 %v1998_v33, %v1796_v61  ;;  %v1717_v26 = vpop.f32.mrf.mxu1  ;;  %v1880_v61 = vpack.c.bf16 %v1857_v29, %v1856_v9  ;;  %v2448_v33 = vpack.c.bf16 %v2425_v57, %v2424_v32 }
 0x2c2   : > { %v1797_v30 = vadd.f32 %v1717_v26, %v3747_v11  ;;  %v2166_v11 = vpack.c.bf16 %v2145_v51, %v2144_v38  ;;  %v1859_v38 = vld [vmem:[%s3230_s28 + $0x14c] sm:$0xff] }
 0x2c3   : > { %v2569_v27 = vpop.f32.mrf.mxu0  ;;  %v2778_v43 = vmax.f32 %v2737_v56, 0.0  ;;  %v2364_v3 = vadd.f32 %v4167_v62, %v2080_v58  ;;  %v2427_v51 = vld [vmem:[%s3230_s28 + $0x14e] sm:$0xff] }
 0x2c4   : > { %3077 = vmatmul.msk.bf16.gmra.mxu1 %vm326_vm1, %v1878_v22 }
 0x2c5   : > { %v2819_v50 = vpack.c.bf16 %v2778_v43, %v2778_v43  ;;  %v2648_v55 = vadd.f32 %v2566_v4, %v2364_v3  ;;  %3099 = vmatmul.msk.bf16.gmra.mxu2 %vm326_vm1, %v1879_v2  ;;  %v4245_v18 = vpop.f32.mrf.mxu3 }
 0x2c6   : > { %3143 = vmatmul.msk.bf16.gmra.mxu0 %vm326_vm1, %v2447_v45 }
 0x2c7   : > { %2861 = vst.msk [vmem:[%s4053_s22 + $0x38] sm:$0xf] %vm2846_vm2, %v2819_v50  ;;  %v2693_v37 = vmul.f32 %v4029_v10, %v2648_v55  ;;  %3124 = vmatmul.msk.bf16.gmra.mxu3 %vm326_vm1, %v2166_v11 }
 0x2c8   : > { %v2001_v62 = vpop.f32.mrf.mxu2 }
 0x2c9   : > { %v2738_v22 = vadd.f32 %v4036_v25, %v2693_v37  ;;  %v2081_v21 = vadd.f32 %v2001_v62, %v1797_v30  ;;  %v1719_v44 = vpop.f32.mrf.mxu1 }
 0x2ca   : > { %v1798_v39 = vadd.f32 %v1719_v44, %v3760_v24 }
 0x2cb   : > { %v2571_v53 = vpop.f32.mrf.mxu0  ;;  %v2779_v15 = vmax.f32 %v2738_v22, 0.0  ;;  %v2365_v4 = vadd.f32 %v4182_v28, %v2081_v21  ;;  %v2146_v21 = vld [vmem:[%s3230_s28 + $0x165] sm:$0xf] }
 0x2cd   : > { %v2820_v19 = vpack.c.bf16 %v2779_v15, %v2779_v15  ;;  %v2649_v49 = vadd.f32 %v2569_v27, %v2365_v4  ;;  %v4260_v58 = vpop.f32.mrf.mxu3  ;;  %v1858_v15 = vld [vmem:[%s3230_s28 + $0x144] sm:$0xff]  ;;  %v2167_v4 = vpack.c.bf16 %v2146_v21, %v2146_v21 }
 0x2ce   : > { %v1881_v32 = vpack.c.bf16 %v1859_v38, %v1858_v15 }
 0x2cf   : > { %2862 = vst.msk [vmem:[%s4053_s22 + $0x3c] sm:$0xf] %vm2846_vm2, %v2820_v19  ;;  %v2694_v47 = vmul.f32 %v4029_v10, %v2649_v49 }
 0x2d0   : > { %v2003_v48 = vpop.f32.mrf.mxu2 }
 0x2d1   : > { %v2739_v28 = vadd.f32 %v4036_v25, %v2694_v47  ;;  %v2082_v14 = vadd.f32 %v2003_v48, %v1798_v39  ;;  %v1722_v16 = vpop.f32.mrf.mxu1 }
 0x2d2   : > { %v1799_v3 = vadd.f32 %v1722_v16, %v3769_v42  ;;  %v2426_v42 = vld [vmem:[%s3230_s28 + $0x146] sm:$0xff] }
 0x2d3   : > { %v2574_v56 = vpop.f32.mrf.mxu0  ;;  %v2780_v26 = vmax.f32 %v2739_v28, 0.0  ;;  %v2366_v45 = vadd.f32 %v4193_v46, %v2082_v14  ;;  %v2449_v57 = vpack.c.bf16 %v2427_v51, %v2426_v42 }
 0x2d4   : > { %3078 = vmatmul.msk.bf16.gmra.mxu1 %vm326_vm1, %v1879_v2 }
 0x2d5   : > { %v2821_v24 = vpack.c.bf16 %v2780_v26, %v2780_v26  ;;  %v2650_v27 = vadd.f32 %v2571_v53, %v2366_v45  ;;  %3100 = vmatmul.msk.bf16.gmra.mxu2 %vm326_vm1, %v1880_v61  ;;  %v4271_v30 = vpop.f32.mrf.mxu3 }
 0x2d6   : > { %3144 = vmatmul.msk.bf16.gmra.mxu0 %vm326_vm1, %v2448_v33 }
 0x2d7   : > { %2863 = vst.msk [vmem:[%s4053_s22 + $0x40] sm:$0xf] %vm2846_vm2, %v2821_v24  ;;  %v2695_v43 = vmul.f32 %v4029_v10, %v2650_v27  ;;  %3125 = vmatmul.msk.bf16.gmra.mxu3 %vm326_vm1, %v2167_v4 }
 0x2d8   : > { %v2006_v46 = vpop.f32.mrf.mxu2 }
 0x2d9   : > { %v2740_v2 = vadd.f32 %v4036_v25, %v2695_v43  ;;  %v2083_v50 = vadd.f32 %v2006_v46, %v1799_v3  ;;  %v1724_v55 = vpop.f32.mrf.mxu1 }
 0x2da   : > { %v1800_v49 = vadd.f32 %v1724_v55, %v3782_v41  ;;  %v2428_v55 = vld [vmem:[%s3230_s28 + $0x156] sm:$0xff] }
 0x2db   : > { %v2576_v37 = vpop.f32.mrf.mxu0  ;;  %v2781_v62 = vmax.f32 %v2740_v2, 0.0  ;;  %v2367_v22 = vadd.f32 %v4208_v7, %v2083_v50  ;;  %v1860_v2 = vld [vmem:[%s3230_s28 + $0x154] sm:$0xff]  ;;  %v1861_v50 = vld [vmem:[%s3230_s28 + $0x15c] sm:$0xff] }
 0x2dc   : > { %v1882_v15 = vpack.c.bf16 %v1861_v50, %v1860_v2 }
 0x2dd   : > { %v2822_v44 = vpack.c.bf16 %v2781_v62, %v2781_v62  ;;  %v2651_v53 = vadd.f32 %v2574_v56, %v2367_v22  ;;  %v4285_v39 = vpop.f32.mrf.mxu3 }
 0x2df   : > { %2864 = vst.msk [vmem:[%s4053_s22 + $0x44] sm:$0xf] %vm2846_vm2, %v2822_v44  ;;  %v2696_v19 = vmul.f32 %v4029_v10, %v2651_v53 }
 0x2e0   : > { %v2008_v9 = vpop.f32.mrf.mxu2 }
 0x2e1   : > { %v2741_v7 = vadd.f32 %v4036_v25, %v2696_v19  ;;  %v2084_v11 = vadd.f32 %v2008_v9, %v1800_v49  ;;  %v1727_v29 = vpop.f32.mrf.mxu1 }
 0x2e2   : > { %v1801_v33 = vadd.f32 %v1727_v29, %v3792_v36 }
 0x2e3   : > { %v2579_v47 = vpop.f32.mrf.mxu0  ;;  %v2782_v48 = vmax.f32 %v2741_v7, 0.0  ;;  %v2368_v28 = vadd.f32 %v4219_v31, %v2084_v11 }
 0x2e4   : > { %3079 = vmatmul.msk.bf16.gmra.mxu1 %vm326_vm1, %v1880_v61 }
 0x2e5   : > { %v2823_v14 = vpack.c.bf16 %v2782_v48, %v2782_v48  ;;  %v2652_v41 = vadd.f32 %v2576_v37, %v2368_v28  ;;  %3101 = vmatmul.msk.bf16.gmra.mxu2 %vm326_vm1, %v1881_v32  ;;  %v4296_v24 = vpop.f32.mrf.mxu3  ;;  %v2429_v37 = vld [vmem:[%s3230_s28 + $0x15e] sm:$0xff] }
 0x2e6   : > { %3145 = vmatmul.msk.bf16.gmra.mxu0 %vm326_vm1, %v2449_v57 }
 0x2e7   : > { %2865 = vst.msk [vmem:[%s4053_s22 + $0x48] sm:$0xf] %vm2846_vm2, %v2823_v14  ;;  %v2697_v16 = vmul.f32 %v4029_v10, %v2652_v41  ;;  %v1578_v41 = vld [vmem:[%s3230_s28 + $0x154] sm:$0xf] }
 0x2e8   : > { %v2011_v31 = vpop.f32.mrf.mxu2 }
 0x2e9   : > { %v2742_v61 = vadd.f32 %v4036_v25, %v2697_v16  ;;  %v2085_v56 = vadd.f32 %v2011_v31, %v1801_v33  ;;  %v1729_v26 = vpop.f32.mrf.mxu1  ;;  %v1862_v16 = vld [vmem:[%s3230_s28 + $0x164] sm:$0xf] }
 0x2ea   : > { %v1802_v62 = vadd.f32 %v1729_v26, %v3805_v1  ;;  %v2430_v33 = vld [vmem:[%s3230_s28 + $0x166] sm:$0xf] }
 0x2eb   : > { %v2581_v45 = vpop.f32.mrf.mxu0  ;;  %v2783_v27 = vmax.f32 %v2742_v61, 0.0  ;;  %v2369_v43 = vadd.f32 %v4234_v20, %v2085_v56  ;;  %v2450_v20 = vpack.c.bf16 %v2429_v37, %v2428_v55  ;;  %v1599_v56 = vpack.c.bf16 %v1578_v41, %v1578_v41 }
 0x2ed   : > { %v2824_v3 = vpack.c.bf16 %v2783_v27, %v2783_v27  ;;  %v2653_v46 = vadd.f32 %v2579_v47, %v2369_v43  ;;  %v4308_v38 = vpop.f32.mrf.mxu3  ;;  %v1883_v43 = vpack.c.bf16 %v1862_v16, %v1862_v16 }
 0x2ef   : > { %2866 = vst.msk [vmem:[%s4053_s22 + $0x4c] sm:$0xf] %vm2846_vm2, %v2824_v3  ;;  %v2698_v36 = vmul.f32 %v4029_v10, %v2653_v46 }
 0x2f0   : > { %v2013_v22 = vpop.f32.mrf.mxu2 }
 0x2f1   : > { %v2743_v21 = vadd.f32 %v4036_v25, %v2698_v36  ;;  %v2086_v44 = vadd.f32 %v2013_v22, %v1802_v62  ;;  %v1732_v53 = vpop.f32.mrf.mxu1 }
 0x2f2   : > { %v1803_v9 = vadd.f32 %v1732_v53, %v3814_v60 }
 0x2f3   : > { %v2584_v4 = vpop.f32.mrf.mxu0  ;;  %v2784_v42 = vmax.f32 %v2743_v21, 0.0  ;;  %v2370_v51 = vadd.f32 %v4245_v18, %v2086_v44 }
 0x2f4   : > { %3080 = vmatmul.msk.bf16.gmra.mxu1 %vm326_vm1, %v1881_v32 }
 0x2f5   : > { %v2825_v19 = vpack.c.bf16 %v2784_v42, %v2784_v42  ;;  %v2654_v49 = vadd.f32 %v2581_v45, %v2370_v51  ;;  %3102 = vmatmul.msk.bf16.gmra.mxu2 %vm326_vm1, %v1882_v15  ;;  %v4319_v57 = vpop.f32.mrf.mxu3 }
 0x2f6   : > { %3146 = vmatmul.msk.bf16.gmra.mxu0 %vm326_vm1, %v2450_v20 }
 0x2f7   : > { %2867 = vst.msk [vmem:[%s4053_s22 + $0x50] sm:$0xf] %vm2846_vm2, %v2825_v19  ;;  %v2699_v1 = vmul.f32 %v4029_v10, %v2654_v49 }
 0x2f8   : > { %v2016_v7 = vpop.f32.mrf.mxu2 }
 0x2f9   : > { %v2744_v18 = vadd.f32 %v4036_v25, %v2699_v1  ;;  %v2087_v11 = vadd.f32 %v2016_v7, %v1803_v9  ;;  %v1734_v29 = vpop.f32.mrf.mxu1 }
 0x2fa   : > { %v1804_v31 = vadd.f32 %v1734_v29, %v3826_v35 }
 0x2fb   : > { %v2586_v32 = vpop.f32.mrf.mxu0  ;;  %v2785_v47 = vmax.f32 %v2744_v18, 0.0  ;;  %v2371_v48 = vadd.f32 %v4260_v58, %v2087_v11  ;;  %v2451_v58 = vpack.c.bf16 %v2430_v33, %v2430_v33 }
 0x2fd   : > { %v2826_v28 = vpack.c.bf16 %v2785_v47, %v2785_v47  ;;  %v2655_v14 = vadd.f32 %v2584_v4, %v2371_v48  ;;  %v4330_v46 = vpop.f32.mrf.mxu3 }
 0x2ff   : > { %2868 = vst.msk [vmem:[%s4053_s22 + $0x54] sm:$0xf] %vm2846_vm2, %v2826_v28  ;;  %v2700_v60 = vmul.f32 %v4029_v10, %v2655_v14 }
 0x300   : > { %v2018_v61 = vpop.f32.mrf.mxu2 }
 0x301   : > { %v2745_v26 = vadd.f32 %v4036_v25, %v2700_v60  ;;  %v2088_v45 = vadd.f32 %v2018_v61, %v1804_v31  ;;  %v1737_v27 = vpop.f32.mrf.mxu1 }
 0x302   : > { %v1805_v36 = vadd.f32 %v1737_v27, %v3837_v5 }
 0x303   : > { %v2589_v3 = vpop.f32.mrf.mxu0  ;;  %v2786_v2 = vmax.f32 %v2745_v26, 0.0  ;;  %v2372_v50 = vadd.f32 %v4271_v30, %v2088_v45 }
 0x304   : > { %3081 = vmatmul.msk.bf16.gmra.mxu1 %vm326_vm1, %v1599_v56 }
 0x305   : > { %v2827_v55 = vpack.c.bf16 %v2786_v2, %v2786_v2  ;;  %v2656_v37 = vadd.f32 %v2586_v32, %v2372_v50  ;;  %3103 = vmatmul.msk.bf16.gmra.mxu2 %vm326_vm1, %v1883_v43  ;;  %v4341_v53 = vpop.f32.mrf.mxu3 }
 0x306   : > { %3147 = vmatmul.msk.bf16.gmra.mxu0 %vm326_vm1, %v2451_v58 }
 0x307   : > { %2869 = vst.msk [vmem:[%s4053_s22 + $0x58] sm:$0xf] %vm2846_vm2, %v2827_v55  ;;  %v2701_v35 = vmul.f32 %v4029_v10, %v2656_v37 }
 0x308   : > { %v2021_v62 = vpop.f32.mrf.mxu2 }
 0x309   : > { %v2746_v22 = vadd.f32 %v4036_v25, %v2701_v35  ;;  %v2089_v21 = vadd.f32 %v2021_v62, %v1805_v36  ;;  %v1739_v30 = vpop.f32.mrf.mxu1 }
 0x30a   : > { %v1806_v5 = vadd.f32 %v1739_v30, %v3850_v0 }
 0x30b   : > { %v2591_v44 = vpop.f32.mrf.mxu0  ;;  %v2787_v15 = vmax.f32 %v2746_v22, 0.0  ;;  %v2373_v20 = vadd.f32 %v4285_v39, %v2089_v21 }
 0x30d   : > { %v2828_v4 = vpack.c.bf16 %v2787_v15, %v2787_v15  ;;  %v2657_v42 = vadd.f32 %v2589_v3, %v2373_v20  ;;  %v4349_v18 = vpop.f32.mrf.mxu3 }
 0x30f   : > { %2870 = vst.msk [vmem:[%s4053_s22 + $0x5c] sm:$0xf] %vm2846_vm2, %v2828_v4  ;;  %v2702_v51 = vmul.f32 %v4029_v10, %v2657_v42  ;;  %v4388_v42 = vld [vmem:[%s4483_s3] ss:$0 sm:$0xff] }
 0x310   : > { %v2023_v19 = vpop.f32.mrf.mxu2 }
 0x311   : > { %v2747_v49 = vadd.f32 %v4036_v25, %v2702_v51  ;;  %v2090_v1 = vadd.f32 %v2023_v19, %v1806_v5  ;;  %v1742_v9 = vpop.f32.mrf.mxu1 }
 0x312   : > { %v1807_v0 = vadd.f32 %v1742_v9, %v3859_v54 }
 0x313   : > { %v2594_v7 = vpop.f32.mrf.mxu0  ;;  %v2788_v11 = vmax.f32 %v2747_v49, 0.0  ;;  %v2374_v39 = vadd.f32 %v4296_v24, %v2090_v1 }
 0x315   : > { %v2829_v29 = vpack.c.bf16 %v2788_v11, %v2788_v11  ;;  %v2658_v32 = vadd.f32 %v2591_v44, %v2374_v39  ;;  %v4357_v33 = vpop.f32.mrf.mxu3 }
 0x317   : > { %2871 = vst.msk [vmem:[%s4053_s22 + $0x60] sm:$0xf] %vm2846_vm2, %v2829_v29  ;;  %v2703_v47 = vmul.f32 %v4029_v10, %v2658_v32 }
 0x318   : > { %v2026_v48 = vpop.f32.mrf.mxu2 }
 0x319   : > { %v2748_v28 = vadd.f32 %v4036_v25, %v2703_v47  ;;  %v2091_v14 = vadd.f32 %v2026_v48, %v1807_v0  ;;  %v1744_v41 = vpop.f32.mrf.mxu1 }
 0x31a   : > { %v1808_v54 = vadd.f32 %v1744_v41, %v3872_v17 }
 0x31b   : > { %v2596_v16 = vpop.f32.mrf.mxu0  ;;  %v2789_v60 = vmax.f32 %v2748_v28, 0.0  ;;  %v2375_v24 = vadd.f32 %v4308_v38, %v2091_v14 }
 0x31d   : > { %v2830_v31 = vpack.c.bf16 %v2789_v60, %v2789_v60  ;;  %v2659_v61 = vadd.f32 %v2594_v7, %v2375_v24  ;;  %v4365_v3 = vpop.f32.mrf.mxu3 }
 0x31f   : > { %2872 = vst.msk [vmem:[%s4053_s22 + $0x64] sm:$0xf] %vm2846_vm2, %v2830_v31  ;;  %v2704_v56 = vmul.f32 %v4029_v10, %v2659_v61 }
 0x320   : > { %v2028_v26 = vpop.f32.mrf.mxu2 }
 0x321   : > { %v2749_v45 = vadd.f32 %v4036_v25, %v2704_v56  ;;  %v2092_v27 = vadd.f32 %v2028_v26, %v1808_v54  ;;  %v1747_v43 = vpop.f32.mrf.mxu1 }
 0x322   : > { %v1809_v17 = vadd.f32 %v1747_v43, %v3881_v13  ;;  %v4381_v13 = vld [vmem:[%s4482_s2] ss:$0 sm:$0xff] }
 0x323   : > { %v2599_v58 = vpop.f32.mrf.mxu0  ;;  %v2790_v2 = vmax.f32 %v2749_v45, 0.0  ;;  %v2376_v38 = vadd.f32 %v4319_v57, %v2092_v27 }
 0x325   : > { %v2831_v50 = vpack.c.bf16 %v2790_v2, %v2790_v2  ;;  %v2660_v55 = vadd.f32 %v2596_v16, %v2376_v38  ;;  %v4373_v30 = vpop.f32.mrf.mxu3 }
 0x327   : > { %2873 = vst.msk [vmem:[%s4053_s22 + $0x68] sm:$0xf] %vm2846_vm2, %v2831_v50  ;;  %v2705_v37 = vmul.f32 %v4029_v10, %v2660_v55 }
 0x328   : > { %v2031_v35 = vpop.f32.mrf.mxu2 }
 0x329   : > { %v2750_v36 = vadd.f32 %v4036_v25, %v2705_v37  ;;  %v2093_v62 = vadd.f32 %v2031_v35, %v1809_v17  ;;  %v1749_v22 = vpop.f32.mrf.mxu1 }
 0x32a   : > { %v1810_v25 = vadd.f32 %v1749_v22, %v3894_v34 }
 0x32b   : > { %v2601_v21 = vpop.f32.mrf.mxu0  ;;  %v2791_v44 = vmax.f32 %v2750_v36, 0.0  ;;  %v2377_v57 = vadd.f32 %v4330_v46, %v2093_v62 }
 0x32d   : > { %v2832_v15 = vpack.c.bf16 %v2791_v44, %v2791_v44  ;;  %v2661_v20 = vadd.f32 %v2599_v58, %v2377_v57  ;;  %v4391_v49 = vpop.f32.mrf.mxu3 }
 0x32f   : > { %2874 = vst.msk [vmem:[%s4053_s22 + $0x6c] sm:$0xf] %vm2846_vm2, %v2832_v15  ;;  %v2706_v10 = vmul.f32 %v4381_v13, %v2661_v20 }
 0x330   : > { %v2033_v4 = vpop.f32.mrf.mxu2 }
 0x331   : > { %v2751_v46 = vadd.f32 %v4388_v42, %v2706_v10  ;;  %v2094_v51 = vadd.f32 %v2033_v4, %v1810_v25  ;;  %v1752_v5 = vpop.f32.mrf.mxu1 }
 0x332   : > { %v1811_v39 = vadd.f32 %v1752_v5, %v3903_v6 }
 0x333   : > { %v2604_v19 = vpop.f32.mrf.mxu0  ;;  %v2792_v1 = vmax.f32 %v2751_v46, 0.0  ;;  %v2378_v9 = vadd.f32 %v4341_v53, %v2094_v51 }
 0x335   : > { %v2833_v7 = vpack.c.bf16 %v2792_v1, %v2792_v1  ;;  %v2662_v11 = vadd.f32 %v2601_v21, %v2378_v9  ;;  %v4399_v28 = vpop.f32.mrf.mxu3 }
 0x337   : > { %2875 = vst.msk [vmem:[%s4053_s22 + $0x70] sm:$0xf] %vm2846_vm2, %v2833_v7  ;;  %v2707_v34 = vmul.f32 %v4381_v13, %v2662_v11 }
 0x338   : > { %v2036_v29 = vpop.f32.mrf.mxu2 }
 0x339   : > { %v2752_v32 = vadd.f32 %v4388_v42, %v2707_v34  ;;  %v2095_v47 = vadd.f32 %v2036_v29, %v1811_v39  ;;  %v1754_v0 = vpop.f32.mrf.mxu1 }
 0x33a   : > { %v1812_v6 = vadd.f32 %v1754_v0, %v3916_v52 }
 0x33b   : > { %v2606_v48 = vpop.f32.mrf.mxu0  ;;  %v2793_v14 = vmax.f32 %v2752_v32, 0.0  ;;  %v2379_v53 = vadd.f32 %v4349_v18, %v2095_v47 }
 0x33d   : > { %v2834_v41 = vpack.c.bf16 %v2793_v14, %v2793_v14  ;;  %v2663_v16 = vadd.f32 %v2604_v19, %v2379_v53  ;;  %v4407_v26 = vpop.f32.mrf.mxu3 }
 0x33f   : > { %2876 = vst.msk [vmem:[%s4053_s22 + $0x74] sm:$0xf] %vm2846_vm2, %v2834_v41  ;;  %v2708_v60 = vmul.f32 %v4381_v13, %v2663_v16 }
 0x340   : > { %v2038_v24 = vpop.f32.mrf.mxu2 }
 0x341   : > { %v2753_v31 = vadd.f32 %v4388_v42, %v2708_v60  ;;  %v2096_v61 = vadd.f32 %v2038_v24, %v1812_v6  ;;  %v1757_v56 = vpop.f32.mrf.mxu1 }
 0x342   : > { %v1813_v52 = vadd.f32 %v1757_v56, %v3925_v23 }
 0x343   : > { %v2609_v54 = vpop.f32.mrf.mxu0  ;;  %v2794_v45 = vmax.f32 %v2753_v31, 0.0  ;;  %v2380_v18 = vadd.f32 %v4357_v33, %v2096_v61 }
 0x345   : > { %v2835_v27 = vpack.c.bf16 %v2794_v45, %v2794_v45  ;;  %v2664_v43 = vadd.f32 %v2606_v48, %v2380_v18  ;;  %v4415_v17 = vpop.f32.mrf.mxu3 }
 0x347   : > { %2877 = vst.msk [vmem:[%s4053_s22 + $0x78] sm:$0xf] %vm2846_vm2, %v2835_v27  ;;  %v2709_v58 = vmul.f32 %v4381_v13, %v2664_v43 }
 0x348   : > { %v2041_v2 = vpop.f32.mrf.mxu2 }
 0x349   : > { %v2754_v38 = vadd.f32 %v4388_v42, %v2709_v58  ;;  %v2097_v50 = vadd.f32 %v2041_v2, %v1813_v52  ;;  %v1759_v55 = vpop.f32.mrf.mxu1 }
 0x34a   : > { %v1814_v23 = vadd.f32 %v1759_v55, %v3938_v59 }
 0x34b   : > { %v2611_v37 = vpop.f32.mrf.mxu0  ;;  %v2795_v35 = vmax.f32 %v2754_v38, 0.0  ;;  %v2381_v33 = vadd.f32 %v4365_v3, %v2097_v50 }
 0x34d   : > { %v2836_v36 = vpack.c.bf16 %v2795_v35, %v2795_v35  ;;  %v2665_v62 = vadd.f32 %v2609_v54, %v2381_v33  ;;  %v4423_v10 = vpop.f32.mrf.mxu3 }
 0x34f   : > { %2878 = vst.msk [vmem:[%s4053_s22 + $0x7c] sm:$0xf] %vm2846_vm2, %v2836_v36  ;;  %v2710_v22 = vmul.f32 %v4381_v13, %v2665_v62 }
 0x350   : > { %v2043_v21 = vpop.f32.mrf.mxu2 }
 0x351   : > { %v2755_v44 = vadd.f32 %v4388_v42, %v2710_v22  ;;  %v2098_v57 = vadd.f32 %v2043_v21, %v1814_v23  ;;  %v1762_v15 = vpop.f32.mrf.mxu1  ;;  %v4496_v22 = vld [vmem:[#allocation2_spill] sm:$0xff] }
 0x352   : > { %v1815_v59 = vadd.f32 %v1762_v15, %v3947_v40 }
 0x353   : > { %v2614_v20 = vpop.f32.mrf.mxu0  ;;  %v2796_v25 = vmax.f32 %v2755_v44, 0.0  ;;  %v2382_v3 = vadd.f32 %v4373_v30, %v2098_v57 }
 0x355   : > { %v2837_v4 = vpack.c.bf16 %v2796_v25, %v2796_v25  ;;  %v2666_v46 = vadd.f32 %v2611_v37, %v2382_v3  ;;  %v4431_v11 = vpop.f32.mrf.mxu3 }
 0x357   : > { %2879 = vst.msk [vmem:[%s4053_s22 + $0x80] sm:$0xf] %vm2846_vm2, %v2837_v4  ;;  %v2711_v51 = vmul.f32 %v4381_v13, %v2666_v46  ;;  %v4497_v46 = vld [vmem:[#allocation3_spill] sm:$0xff] }
 0x358   : > { %v2046_v5 = vpop.f32.mrf.mxu2 }
 0x359   : > { %v2756_v19 = vadd.f32 %v4388_v42, %v2711_v51  ;;  %v2099_v1 = vadd.f32 %v2046_v5, %v1815_v59  ;;  %v1764_v9 = vpop.f32.mrf.mxu1 }
 0x35a   : > { %v1816_v40 = vadd.f32 %v1764_v9, %v3960_v12 }
 0x35b   : > { %v2616_v7 = vpop.f32.mrf.mxu0  ;;  %v2797_v34 = vmax.f32 %v2756_v19, 0.0  ;;  %v2383_v30 = vadd.f32 %v4391_v49, %v2099_v1 }
 0x35d   : > { %v2838_v39 = vpack.c.bf16 %v2797_v34, %v2797_v34  ;;  %v2667_v29 = vadd.f32 %v2614_v20, %v2383_v30  ;;  %v4439_v41 = vpop.f32.mrf.mxu3 }
 0x35f   : > { %2880 = vst.msk [vmem:[%s4053_s22 + $0x84] sm:$0xf] %vm2846_vm2, %v2838_v39  ;;  %v2712_v32 = vmul.f32 %v4381_v13, %v2667_v29  ;;  %v4498_v29 = vld [vmem:[#allocation4_spill] sm:$0xff] }
 0x360   : > { %v2048_v47 = vpop.f32.mrf.mxu2 }
 0x361   : > { %v2757_v0 = vadd.f32 %v4388_v42, %v2712_v32  ;;  %v2100_v48 = vadd.f32 %v2048_v47, %v1816_v40  ;;  %v1767_v14 = vpop.f32.mrf.mxu1 }
 0x362   : > { %v1817_v12 = vadd.f32 %v1767_v14, %v3967_v63 }
 0x363   : > { %v2619_v53 = vpop.f32.mrf.mxu0  ;;  %v2798_v16 = vmax.f32 %v2757_v0, 0.0  ;;  %v2384_v49 = vadd.f32 %v4399_v28, %v2100_v48 }
 0x365   : > { %v2839_v60 = vpack.c.bf16 %v2798_v16, %v2798_v16  ;;  %v2668_v6 = vadd.f32 %v2616_v7, %v2384_v49  ;;  %v2347_v18 = vpop.f32.mrf.mxu3 }
 0x367   : > { %2881 = vst.msk [vmem:[%s4053_s22 + $0x88] sm:$0xf] %vm2846_vm2, %v2839_v60  ;;  %v2713_v24 = vmul.f32 %v4381_v13, %v2668_v6 }
 0x368   : > { %v2051_v31 = vpop.f32.mrf.mxu2 }
 0x369   : > { %v2758_v61 = vadd.f32 %v4388_v42, %v2713_v24  ;;  %v2101_v56 = vadd.f32 %v2051_v31, %v1817_v12  ;;  %v1769_v54 = vpop.f32.mrf.mxu1 }
 0x36a   : > { %v1818_v2 = vadd.f32 %v1769_v54, %v3980_v8 }
 0x36b   : > { %v2621_v45 = vpop.f32.mrf.mxu0  ;;  %v2799_v27 = vmax.f32 %v2758_v61, 0.0  ;;  %v2385_v28 = vadd.f32 %v4407_v26, %v2101_v56 }
 0x36d   : > { %v2840_v43 = vpack.c.bf16 %v2799_v27, %v2799_v27  ;;  %v2669_v58 = vadd.f32 %v2619_v53, %v2385_v28 }
 0x36f   : > { %2882 = vst.msk [vmem:[%s4053_s22 + $0x8c] sm:$0xf] %vm2846_vm2, %v2840_v43  ;;  %v2714_v52 = vmul.f32 %v4381_v13, %v2669_v58 }
 0x370   : > { %v2053_v63 = vpop.f32.mrf.mxu2 }
 0x371   : > { %v2759_v38 = vadd.f32 %v4388_v42, %v2714_v52  ;;  %v2102_v50 = vadd.f32 %v2053_v63, %v1818_v2  ;;  %v1772_v55 = vpop.f32.mrf.mxu1 }
 0x372   : > { %v1819_v23 = vadd.f32 %v1772_v55, %v4496_v22 }
 0x373   : > { %v2624_v37 = vpop.f32.mrf.mxu0  ;;  %v2800_v35 = vmax.f32 %v2759_v38, 0.0  ;;  %v2386_v33 = vadd.f32 %v4415_v17, %v2102_v50 }
 0x375   : > { %v2841_v36 = vpack.c.bf16 %v2800_v35, %v2800_v35  ;;  %v2670_v26 = vadd.f32 %v2621_v45, %v2386_v33 }
 0x377   : > { %2883 = vst.msk [vmem:[%s4053_s22 + $0x90] sm:$0xf] %vm2846_vm2, %v2841_v36  ;;  %v2715_v62 = vmul.f32 %v4381_v13, %v2670_v26 }
 0x378   : > { %v2056_v21 = vpop.f32.mrf.mxu2 }
 0x379   : > { %v2760_v8 = vadd.f32 %v4388_v42, %v2715_v62  ;;  %v2103_v44 = vadd.f32 %v2056_v21, %v1819_v23  ;;  %v1774_v57 = vpop.f32.mrf.mxu1 }
 0x37a   : > { %v1820_v51 = vadd.f32 %v1774_v57, %v4497_v46 }
 0x37b   : > { %v2626_v15 = vpop.f32.mrf.mxu0  ;;  %v2801_v20 = vmax.f32 %v2760_v8, 0.0  ;;  %v2387_v25 = vadd.f32 %v4423_v10, %v2103_v44 }
 0x37d   : > { %v2842_v3 = vpack.c.bf16 %v2801_v20, %v2801_v20  ;;  %v2671_v17 = vadd.f32 %v2624_v37, %v2387_v25 }
 0x37f   : > { %2884 = vst.msk [vmem:[%s4053_s22 + $0x94] sm:$0xf] %vm2846_vm2, %v2842_v3  ;;  %v2716_v4 = vmul.f32 %v4381_v13, %v2671_v17 }
 0x380   : > { %v2058_v59 = vpop.f32.mrf.mxu2 }
 0x381   : > { %v2761_v5 = vadd.f32 %v4388_v42, %v2716_v4  ;;  %v2104_v19 = vadd.f32 %v2058_v59, %v1820_v51  ;;  %v1777_v1 = vpop.f32.mrf.mxu1 }
 0x382   : > { %v1821_v32 = vadd.f32 %v1777_v1, %v4498_v29 }
 0x383   : > { %v2629_v9 = vpop.f32.mrf.mxu0  ;;  %v2802_v7 = vmax.f32 %v2761_v5, 0.0  ;;  %v2388_v34 = vadd.f32 %v4431_v11, %v2104_v19 }
 0x385   : > { %v2843_v30 = vpack.c.bf16 %v2802_v7, %v2802_v7  ;;  %v2672_v10 = vadd.f32 %v2626_v15, %v2388_v34 }
 0x387   : > { %2885 = vst.msk [vmem:[%s4053_s22 + $0x98] sm:$0xf] %vm2846_vm2, %v2843_v30  ;;  %v2717_v39 = vmul.f32 %v4381_v13, %v2672_v10 }
 0x388   : > { %v2061_v40 = vpop.f32.mrf.mxu2 }
 0x389   : > { %v2762_v47 = vadd.f32 %v4388_v42, %v2717_v39  ;;  %v2105_v0 = vadd.f32 %v2061_v40, %v1821_v32  ;;  %v1779_v48 = vpop.f32.mrf.mxu1 }
 0x38b   : > { %v2631_v14 = vpop.f32.mrf.mxu0  ;;  %v2803_v53 = vmax.f32 %v2762_v47, 0.0  ;;  %v2389_v16 = vadd.f32 %v4439_v41, %v2105_v0 }
 0x38d   : > { %v2844_v49 = vpack.c.bf16 %v2803_v53, %v2803_v53  ;;  %v2673_v11 = vadd.f32 %v2629_v9, %v2389_v16 }
 0x38f   : > { %2886 = vst.msk [vmem:[%s4053_s22 + $0x9c] sm:$0xf] %vm2846_vm2, %v2844_v49  ;;  %v2718_v60 = vmul.f32 %v4381_v13, %v2673_v11 }
 0x390   : > { %v2063_v6 = vpop.f32.mrf.mxu2 }
 0x391   : > { %v2763_v24 = vadd.f32 %v4388_v42, %v2718_v60 }
 0x393   : > { %v2804_v12 = vmax.f32 %v2763_v24, 0.0 }
 0x395   : > { %v2845_v31 = vpack.c.bf16 %v2804_v12, %v2804_v12 }
 0x397   : > { %2888 = vst.msk [vmem:[%s4053_s22 + $0xa0] sm:$0x3] %vm2887_vm3, %v2845_v31 }
 0x398 PF: > { %s14_s15 = sadd.s32 1, %s3173_s15  }
 0x399   : > { %p11_p4 = scmp.ge.s32.totalorder %s14_s15, 4  }
 0x39b   :  { %13 = sbr.rel (!%p11_p4) target bundleno = 1 (0x1), region = 74 }

// kernel: fsm_forward.7
= control target key start
LH: loop header
LB: loop body
LE: loop exit
PB: predicated region body
PF: predicated region fallthrough
CT: control target
= control target key end

     0   :  { %s4504_s18 = smov 0   ;;  %s6107_s0 = inlined_call_operand.vmem [shape: bf16[2,362,4], index: 0, kind: input, shape index: {}]   ;;  %s6108_s1 = inlined_call_operand.vmem [shape: bf16[9,4,8], index: 1, kind: input, shape index: {}]   ;;  %s6109_s2 = inlined_call_operand.vmem [shape: f32[1,8], index: 2, kind: input, shape index: {}]   ;;  %s6110_s3 = inlined_call_operand.vmem [shape: f32[1,8], index: 3, kind: input, shape index: {}]   ;;  %s6111_s4 = inlined_call_operand.vmem [shape: f32[2,324,8], index: 4, kind: input, shape index: {}]   ;;  %s6112_s5 = inlined_call_operand.vmem [shape: f32[2,324,8], index: 5, kind: output, shape index: {}]  }
   0x1 LB: > { %s3819_s19 = sadd.s32 4294967295, %s4472_s18   ;;  %p3823_p0 = scmp.ge.s32.totalorder %s4472_s18, 1  ;;  %s4472_s18 = sphi %s4504_s18, %s15_s18  }
   0x2   : > { %p197_p1 = scmp.lt.s32.totalorder %s4472_s18, 3 }
   0x4   : > { %p198_p2 = pnand %p3823_p0, %p197_p1 }
   0x6   : > { %201 = sbr.rel (%p198_p2) target bundleno = 924 (0x39c), region = 40 }
   0xb   : > { %v3827_v0 = vld [vmem:[%s6108_s1 + $0x2] sm:$0x3]  ;;  %vm626_vm0 = vcmask 1041408   ;;  %p230_p3 = scmp.lt.s32.totalorder %s3819_s19, 1  ;;  %v3946_v2 = vld [vmem:[%s6108_s1 + $0x4] sm:$0x3] }
   0xc   : > { %v628_v1 = vsel %vm626_vm0, %v3827_v0, 0  ;;  %v287_v3 = vld [vmem:[%s6108_s1] sm:$0x3]  ;;  %v1017_v4 = vsel %vm626_vm0, %v3946_v2, 0  ;;  %v4066_v6 = vld [vmem:[%s6108_s1 + $0x8] sm:$0x3] }
   0xd   : > { %4423 = vmatpush.bf16.msra.mxu1 %v628_v1  ;;  %4424 = vmatpush.bf16.msra.mxu2 %v628_v1  ;;  %s6170_s19 = smov (!%p230_p3, %s3819_s19), 1  ;;  %v790_v5 = vsel %vm626_vm0, %v287_v3, 0  ;;  %v1839_v7 = vsel %vm626_vm0, %v4066_v6, 0  ;;  %vm394_vm1 = vsmask.f32 7424  ;;  %vm562_vm2 = vcmask 31744  }
   0xe   : > { %637 = vmatpush.bf16.msra.mxu0 %v628_v1  ;;  %s4426_s28 = smul.u32 184, %s6170_s19  ;;  %4425 = vmatpush.bf16.msra.mxu3 %v628_v1  ;;  %v3968_v1 = vld [vmem:[%s6108_s1 + $0x6] sm:$0x3]  ;;  %vm911_vm3 = vcmask 1046528   ;;  %vm1586_vm4 = vsmask.f32 6400 }
   0xf   : > { %vm2819_vm5 = vsmask.f32 5376  ;;  %vm2001_vm6 = vcmask 1045504   ;;  %vm3234_vm7 = vcmask 1044480   ;;  %s4427_s17 = smul.u32 328, %s6170_s19  ;;  %vm3709_vm8 = vcmask 64512  }
  0x10   : > { %s4534_s6 = scalar_lea.vmem %s6107_s0, %s4426_s28  ;;  %vm3750_vm9 = vcmask 60416  }
  0x11   : > { %1026 = vmatpush.bf16.msrb.mxu2 %v1017_v4  ;;  %799 = vmatpush.bf16.msrb.mxu1 %v790_v5  ;;  %v4537_v8 = vld [vmem:[%s4534_s6 + $0x30] sm:$0xff]  ;;  %v4540_v9 = vld [vmem:[%s4534_s6 + $0x38] sm:$0xff]  ;;  %v4543_v10 = vld [vmem:[%s4534_s6 + $0x60] sm:$0xff]  ;;  %v1424_v5 = vsel %vm626_vm0, %v3968_v1, 0  ;;  %s5508_s26 = scalar_lea.vmem %s6111_s4, %s4427_s17  ;;  %s5531_s29 = scalar_lea.vmem %s6112_s5, %s4427_s17 }
  0x12   : > { %1848 = vmatpush.bf16.msrb.mxu0 %v1839_v7  ;;  %v4546_v11 = vld [vmem:[%s4534_s6 + $0x68] sm:$0xff]  ;;  %v4549_v12 = vld [vmem:[%s4534_s6] sm:$0xff]   ;;  %v443_v14 = vshll.u32 %v4537_v8, 16  ;;  %v447_v15 = vshrl.u32 %v4537_v8, 16  ;;  %v451_v16 = vshll.u32 %v4540_v9, 16  ;;  %v491_v17 = vshll.u32 %v4543_v10, 16  ;;  %1433 = vmatpush.bf16.msrb.mxu3 %v1424_v5 }
  0x13   : > { %v4552_v13 = vld [vmem:[%s4534_s6 + $0x8] sm:$0xff]  ;;  %v495_v18 = vshrl.u32 %v4543_v10, 16  ;;  %v499_v19 = vshll.u32 %v4546_v11, 16  ;;  %v396_v20 = vshrl.u32 %v4549_v12, 16  ;;  %v398_v21 = vshll.u32 %v4549_v12, 16  ;;  %v4575_v35 = vld [vmem:[%s4534_s6 + $0x40] sm:$0xff] }
  0x14   : > { %v4562_v22 = vrot.slane %v443_v14, 1  ;;  %v453_v23 = vrot.slane %v451_v16, 1  ;;  %v4564_v24 = vrot.slane %v491_v17, 1  ;;  %v403_v25 = vshll.u32 %v4552_v13, 16  ;;  %v4579_v36 = vld [vmem:[%s4534_s6 + $0x70] sm:$0xff]  ;;  %v4356_v38 = vld [vmem:[%s4534_s6 + $0x98] sm:$0xff] }
  0x15   : > { %v501_v26 = vrot.slane %v499_v19, 1  ;;  %v400_v27 = vrot.slane %v398_v21, 1  ;;  %v4355_v37 = vld [vmem:[%s4534_s6 + $0x90] sm:$0xff]  ;;  %v455_v40 = vshrl.u32 %v4540_v9, 16  ;;  %v459_v41 = vshll.u32 %v4575_v35, 16  ;;  %v4603_v62 = vld [vmem:[%s4534_s6 + $0x48] sm:$0xff] }
  0x16   : > { %v449_v28 = vor.u32 %v447_v15, %v4562_v22  ;;  %v497_v29 = vor.u32 %v495_v18, %v4564_v24  ;;  %v405_v30 = vrot.slane %v403_v25, 1  ;;  %v4584_v39 = vld [vmem:[%s4534_s6 + $0x10] sm:$0xff]  ;;  %v539_v42 = vshll.u32 %v4355_v37, 16  ;;  %v288_v63 = vld [vmem:[%s4534_s6 + $0xa0] sm:$0x7]  ;;  %v4608_v0 = vld [vmem:[%s4534_s6 + $0x78] sm:$0xff] }
  0x17   : > { %v401_v31 = vor.u32 %v400_v27, %v396_v20  ;;  %v503_v43 = vshrl.u32 %v4546_v11, 16  ;;  %v507_v44 = vshll.u32 %v4579_v36, 16  ;;  %v543_v45 = vshrl.u32 %v4355_v37, 16  ;;  %v4614_v4 = vld [vmem:[%s4534_s6 + $0x18] sm:$0xff] }
  0x18   : > { %v454_v32 = vsel %vm394_vm1, %v449_v28, %v453_v23  ;;  %v502_v33 = vsel %vm394_vm1, %v497_v29, %v501_v26  ;;  %v547_v46 = vshll.u32 %v4356_v38, 16  ;;  %v407_v47 = vshrl.u32 %v4552_v13, 16  ;;  %v4628_v29 = vld [vmem:[%s4534_s6 + $0x58] sm:$0xff] }
  0x19   : > { %3910 = vmatmul.msk.bf16.vlgmr.msra.gmra.mxu1 %vm562_vm2, %v454_v32  ;;  %3916 = vmatmul.msk.bf16.vlgmr.msra.gmra.mxu2 %vm562_vm2, %v502_v33  ;;  %v406_v34 = vsel %vm394_vm1, %v401_v31, %v405_v30  ;;  %v411_v48 = vshll.u32 %v4584_v39, 16  ;;  %v4592_v49 = vrot.slane %v539_v42, 1  ;;  %v457_v52 = vor.u32 %v455_v40, %v453_v23  ;;  %v4642_v40 = vld [vmem:[%s4534_s6 + $0x80] sm:$0xff] }
  0x1a   : > { %3904 = vmatmul.msk.bf16.vlgmr.msra.gmra.mxu0 %vm562_vm2, %v406_v34  ;;  %v549_v50 = vrot.slane %v547_v46, 1  ;;  %v461_v53 = vrot.slane %v459_v41, 1  ;;  %v505_v54 = vor.u32 %v503_v43, %v501_v26  ;;  %v509_v55 = vrot.slane %v507_v44, 1  ;;  %v4646_v43 = vld [vmem:[%s4534_s6 + $0x20] sm:$0xff]  ;;  %v4649_v44 = vld [vmem:[%s4534_s6 + $0x88] sm:$0xff] }
  0x1b   : > { %v545_v51 = vor.u32 %v543_v45, %v4592_v49  ;;  %v409_v56 = vor.u32 %v407_v47, %v405_v30  ;;  %v413_v57 = vrot.slane %v411_v48, 1  ;;  %v372_v2 = vunpack.c.l.b16 %v288_v63 }
  0x1c   : > { %v462_v59 = vsel %vm394_vm1, %v457_v52, %v461_v53  ;;  %v510_v60 = vsel %vm394_vm1, %v505_v54, %v509_v55  ;;  %v551_v3 = vshrl.u32 %v4356_v38, 16  ;;  %v463_v7 = vshrl.u32 %v4575_v35, 16  ;;  %v4638_v38 = vld [vmem:[%s4534_s6 + $0x50] sm:$0xff]  ;;  %v4657_v52 = vld [vmem:[%s4534_s6 + $0x28] sm:$0xff] }
  0x1d   : > { %v550_v58 = vsel %vm394_vm1, %v545_v51, %v549_v50  ;;  %v414_v61 = vsel %vm394_vm1, %v409_v56, %v413_v57  ;;  %v4617_v6 = vpack.c.b16 %v372_v2, %v372_v2  ;;  %v467_v14 = vshll.u32 %v4603_v62, 16 }
  0x1e   : > { %3922 = vmatmul.msk.bf16.vlgmr.msra.gmra.mxu3 %vm562_vm2, %v550_v58  ;;  %v511_v15 = vshrl.u32 %v4579_v36, 16  ;;  %v515_v16 = vshll.u32 %v4608_v0, 16  ;;  %v553_v17 = vor.u32 %v551_v3, %v549_v50  ;;  %v415_v19 = vshrl.u32 %v4584_v39, 16 }
  0x1f   : > { %v555_v18 = vshll.u32 %v4617_v6, 16  ;;  %v419_v20 = vshll.u32 %v4614_v4, 16  ;;  %v465_v23 = vor.u32 %v463_v7, %v461_v53  ;;  %v469_v25 = vrot.slane %v467_v14, 1 }
  0x20   : > { %v513_v26 = vor.u32 %v511_v15, %v509_v55  ;;  %v517_v27 = vrot.slane %v515_v16, 1  ;;  %v417_v30 = vor.u32 %v415_v19, %v413_v57  ;;  %v483_v34 = vshll.u32 %v4628_v29, 16 }
  0x21   : > { %v557_v21 = vrot.slane %v555_v18, 1  ;;  %v421_v31 = vrot.slane %v419_v20, 1  ;;  %v470_v32 = vsel %vm394_vm1, %v465_v23, %v469_v25  ;;  %v487_v42 = vshrl.u32 %v4628_v29, 16  ;;  %v4682_v23 = vld [vmem:[%s4534_s6 + $0xc] sm:$0xf] }
  0x22   : > { %v518_v33 = vsel %vm394_vm1, %v513_v26, %v517_v27  ;;  %v485_v41 = vrot.slane %v483_v34, 1  ;;  %v559_v45 = vshrl.u32 %v4617_v6, 16  ;;  %v471_v47 = vshrl.u32 %v4603_v62, 16 }
  0x23   : > { %v558_v28 = vsel %vm394_vm1, %v553_v17, %v557_v21  ;;  %v422_v37 = vsel %vm394_vm1, %v417_v30, %v421_v31  ;;  %v475_v48 = vshll.u32 %v4638_v38, 16  ;;  %v519_v50 = vshrl.u32 %v4608_v0, 16 }
  0x24   : > { %v489_v46 = vor.u32 %v487_v42, %v485_v41  ;;  %v523_v51 = vshll.u32 %v4642_v40, 16  ;;  %v423_v54 = vshrl.u32 %v4614_v4, 16  ;;  %v427_v55 = vshll.u32 %v4646_v43, 16 }
  0x25   : > { %v531_v56 = vshll.u32 %v4649_v44, 16  ;;  %v561_v57 = vor.u32 %v559_v45, %v557_v21  ;;  %v473_v58 = vor.u32 %v471_v47, %v469_v25  ;;  %v435_v63 = vshll.u32 %v4657_v52, 16  ;;  %v1173_v21 = vld [vmem:[%s4534_s6 + $0x8] sm:$0xe]  ;;  %v4357_v25 = vld [vmem:[%s4534_s6 + $0x10] sm:$0xff] }
  0x26   : > { %v4661_v53 = vsel %vm394_vm1, %v489_v46, %v4564_v24  ;;  %v425_v1 = vor.u32 %v423_v54, %v421_v31  ;;  %v429_v2 = vrot.slane %v427_v55, 1  ;;  %v535_v24 = vshrl.u32 %v4649_v44, 16  ;;  %v4358_v54 = vld [vmem:[%s4534_s6 + $0x18] sm:$0xff] }
  0x27   : > { %v533_v3 = vrot.slane %v531_v56, 1  ;;  %v437_v14 = vrot.slane %v435_v63, 1  ;;  %v439_v16 = vshrl.u32 %v4657_v52, 16  ;;  %v1257_v26 = vunpack.c.l.b16 %v1173_v21  ;;  %v4359_v63 = vld [vmem:[%s4534_s6 + $0x20] sm:$0xff] }
  0x28   : > { %v430_v17 = vsel %vm394_vm1, %v425_v1, %v429_v2  ;;  %v479_v30 = vshrl.u32 %v4638_v38, 16  ;;  %v527_v31 = vshrl.u32 %v4642_v40, 16  ;;  %v4421_v1 = vld [vmem:[%s4534_s6] sm:$0xe] }
  0x29   : > { %3911 = vmatmul.msk.bf16.gmra.mxu1 %vm562_vm2, %v462_v59  ;;  %3917 = vmatmul.msk.bf16.gmra.mxu2 %vm562_vm2, %v510_v60  ;;  %v477_v59 = vrot.slane %v475_v48, 1  ;;  %v521_v60 = vor.u32 %v519_v50, %v517_v27  ;;  %v537_v15 = vor.u32 %v535_v24, %v533_v3  ;;  %v441_v19 = vor.u32 %v439_v16, %v437_v14  ;;  %v4110_v48 = vld [vmem:[%s6108_s1 + $0xc] sm:$0x3] }
  0x2a   : > { %3905 = vmatmul.msk.bf16.gmra.mxu0 %vm562_vm2, %v414_v61  ;;  %v525_v61 = vrot.slane %v523_v51, 1  ;;  %v6113_v27 = vunpack.c.l.b16 %v4682_v23  ;;  %v2514_v50 = vsel %vm626_vm0, %v4110_v48, 0  ;;  %v4088_v51 = vld [vmem:[%s6108_s1 + $0xa] sm:$0x3]  ;;  %v1596_v24 = vshrl.u32 %v4357_v25, 16  ;;  %v4361_v48 = vld [vmem:[%s4534_s6 + $0x30] sm:$0xff] }
  0x2b   : > { %v478_v5 = vsel %vm394_vm1, %v473_v58, %v477_v59  ;;  %v542_v18 = vsel %vm394_vm1, %v537_v15, %v4592_v49  ;;  %v446_v20 = vsel %vm394_vm1, %v441_v19, %v4562_v22  ;;  %v481_v34 = vor.u32 %v479_v30, %v477_v59  ;;  %2523 = vmatpush.bf16.msra.mxu2 %v2514_v50 }
  0x2c   : > { %v526_v7 = vsel %vm394_vm1, %v521_v60, %v525_v61  ;;  %v1298_v49 = vpack.c.b16 %v6113_v27, %v1257_v26  ;;  %v2107_v56 = vsel %vm626_vm0, %v4088_v51, 0  ;;  %v1322_v59 = vrot.slane %v4358_v54, 1 }
  0x2d   : > { %v486_v45 = vsel %vm394_vm1, %v481_v34, %v485_v41  ;;  %v4212_v41 = vld [vmem:[%s6108_s1 + $0xe] sm:$0x3]  ;;  %2116 = vmatpush.bf16.msra.mxu1 %v2107_v56  ;;  %v1608_v30 = vshll.u32 %v4358_v54, 16  ;;  %v915_v34 = vrot.slane %v4584_v39, 1  ;;  %v1328_v51 = vrot.slane %v4361_v48, 1 }
  0x2e   : > { %3923 = vmatmul.msk.bf16.gmra.mxu3 %vm562_vm2, %v558_v28  ;;  %v1320_v28 = vrot.slane %v4357_v25, 1  ;;  %v3072_v55 = vsel %vm626_vm0, %v4212_v41, 0  ;;  %v927_v27 = vrot.slane %v4575_v35, 1 }
  0x2f   : > { %3081 = vmatpush.bf16.msra.mxu3 %v3072_v55 }
  0x30   : > { %v1323_v60 = vsel %vm911_vm3, %v1320_v28, %v1322_v59 }
  0x39   : > { %3912 = vmatmul.msk.bf16.gmra.mxu1 %vm562_vm2, %v470_v32  ;;  %3918 = vmatmul.msk.bf16.gmra.mxu2 %vm562_vm2, %v518_v33  ;;  %v431_v32 = vshrl.u32 %v4646_v43, 16  ;;  %v1319_v33 = vrot.slane %v1298_v49, 1 }
  0x3a   : > { %3906 = vmatmul.msk.bf16.gmra.mxu0 %vm562_vm2, %v422_v37  ;;  %v529_v37 = vor.u32 %v527_v31, %v525_v61  ;;  %v4420_v61 = vld [vmem:[%s4534_s6] sm:$0xf0]  ;;  %v4360_v31 = vld [vmem:[%s4534_s6 + $0x28] sm:$0xff] }
  0x3b   : > { %v1321_v22 = vsel %vm911_vm3, %v1319_v33, %v1320_v28  ;;  %v433_v42 = vor.u32 %v431_v32, %v429_v2  ;;  %v1588_v2 = vshrl.u32 %v1298_v49, 16  ;;  %v1605_v28 = vshrl.u32 %v4358_v54, 16 }
  0x3c   : > { %v534_v46 = vsel %vm394_vm1, %v529_v37, %v533_v3  ;;  %v1591_v3 = vshll.u32 %v1298_v49, 16  ;;  %v1610_v33 = vrot.slane %v1608_v30, 2  ;;  %v917_v54 = vrot.slane %v4614_v4, 1 }
  0x3d   : > { %v438_v47 = vsel %vm394_vm1, %v433_v42, %v437_v14  ;;  %v4422_v14 = vor.u32 %v4421_v1, %v4420_v61  ;;  %v1590_v15 = vrot.slane %v1588_v2, 1  ;;  %v1607_v32 = vrot.slane %v1605_v28, 1  ;;  %v4362_v2 = vld [vmem:[%s4534_s6 + $0x38] sm:$0xff]  ;;  %v4363_v28 = vld [vmem:[%s4534_s6 + $0x40] sm:$0xff] }
  0x3e   : > { %3924 = vmatmul.msk.bf16.gmra.mxu3 %vm562_vm2, %v561_v57  ;;  %v4314_v57 = vld [vmem:[%s6108_s1 + $0x10] sm:$0x3]  ;;  %v1593_v16 = vrot.slane %v1591_v3, 2  ;;  %v1626_v61 = vshll.u32 %v4360_v31, 16 }
  0x3f   : > { %v3340_v58 = vsel %vm626_vm0, %v4314_v57, 0  ;;  %v912_v21 = vrot.slane %v4422_v14, 1  ;;  %v1611_v42 = vor.u32 %v1610_v33, %v1607_v32  ;;  %v919_v14 = vrot.slane %v4646_v43, 1 }
  0x40   : > { %3349 = vmatpush.bf16.msra.mxu0 %v3340_v58 }
  0x49   : > { %3913 = vmatmul.msk.bf16.gmra.mxu1 %vm562_vm2, %v478_v5  ;;  %3919 = vmatmul.msk.bf16.gmra.mxu2 %vm562_vm2, %v526_v7  ;;  %v1599_v5 = vshll.u32 %v4357_v25, 16  ;;  %v1324_v7 = vrot.slane %v4359_v63, 1 }
  0x4a   : > { %3907 = vmatmul.msk.bf16.gmra.mxu0 %vm562_vm2, %v430_v17  ;;  %v1598_v17 = vrot.slane %v1596_v24, 1 }
  0x4b   : > { %v1601_v19 = vrot.slane %v1599_v5, 2  ;;  %v1628_v5 = vrot.slane %v1626_v61, 2 }
  0x4d   : > { %v1602_v26 = vor.u32 %v1601_v19, %v1598_v17  ;;  %v920_v19 = vsel %vm911_vm3, %v917_v54, %v919_v14 }
  0x4e   : > { %4045 = vmatmul.msk.bf16.vlgmr.msrb.gmra.mxu3 %vm562_vm2, %v1321_v22  ;;  %v1326_v22 = vrot.slane %v4360_v31, 1 }
  0x50   : > { %v1327_v37 = vsel %vm911_vm3, %v1324_v7, %v1326_v22  ;;  %v1329_v55 = vsel %vm911_vm3, %v1326_v22, %v1328_v51  ;;  %v1332_v22 = vrot.slane %v4363_v28, 1 }
  0x59   : > { %3914 = vmatmul.msk.bf16.gmra.mxu1 %vm562_vm2, %v486_v45  ;;  %3920 = vmatmul.msk.bf16.gmra.mxu2 %vm562_vm2, %v534_v46  ;;  %v1612_v45 = vsel %vm1586_vm4, %v1602_v26, %v1611_v42  ;;  %v1614_v46 = vshrl.u32 %v4359_v63, 16 }
  0x5a   : > { %3908 = vmatmul.msk.bf16.gmra.mxu0 %vm562_vm2, %v438_v47  ;;  %v1617_v47 = vshll.u32 %v4359_v63, 16 }
  0x5b   : > { %v1616_v50 = vrot.slane %v1614_v46, 1 }
  0x5c   : > { %v1619_v41 = vrot.slane %v1617_v47, 2 }
  0x5e   : > { %4046 = vmatmul.msk.bf16.gmra.mxu3 %vm562_vm2, %v1323_v60  ;;  %v1620_v56 = vor.u32 %v1619_v41, %v1616_v50  ;;  %v1623_v60 = vshrl.u32 %v4360_v31, 16  ;;  %v1641_v50 = vshrl.u32 %v4362_v2, 16  ;;  %v1644_v41 = vshll.u32 %v4362_v2, 16 }
  0x60   : > { %v1625_v24 = vrot.slane %v1623_v60, 1 }
  0x69   : > { %3915 = vmatmul.msk.bf16.gmra.mxu1 %vm562_vm2, %v4661_v53  ;;  %3921 = vmatmul.msk.bf16.gmra.mxu2 %vm562_vm2, %v542_v18  ;;  %v1325_v53 = vsel %vm911_vm3, %v1322_v59, %v1324_v7  ;;  %v913_v18 = vrot.slane %v4552_v13, 1  ;;  %v1621_v59 = vsel %vm1586_vm4, %v1611_v42, %v1620_v56  ;;  %v1330_v7 = vrot.slane %v4362_v2, 1 }
  0x6a   : > { %3909 = vmatmul.msk.bf16.gmra.mxu0 %vm562_vm2, %v446_v20  ;;  %v1594_v20 = vor.u32 %v1593_v16, %v1590_v15  ;;  %v1629_v15 = vor.u32 %v1628_v5, %v1625_v24 }
  0x6b   : > { %v914_v49 = vsel %vm911_vm3, %v912_v21, %v913_v18 }
  0x6c   : > { %v1603_v25 = vsel %vm1586_vm4, %v1594_v20, %v1602_v26  ;;  %v1630_v21 = vsel %vm1586_vm4, %v1620_v56, %v1629_v15  ;;  %v1632_v20 = vshrl.u32 %v4361_v48, 16  ;;  %v1635_v26 = vshll.u32 %v4361_v48, 16 }
  0x6e   : > { %4047 = vmatmul.msk.bf16.gmra.mxu3 %vm562_vm2, %v1325_v53  ;;  %v1634_v31 = vrot.slane %v1632_v20, 1  ;;  %v1637_v32 = vrot.slane %v1635_v26, 2  ;;  %v1653_v20 = vshll.u32 %v4363_v28, 16 }
  0x79   : > { %3925 = vmatmul.msk.bf16.vlgmr.msrb.gmra.mxu1 %vm562_vm2, %v4549_v12  ;;  %3947 = vmatmul.msk.bf16.vlgmr.msrb.gmra.mxu2 %vm562_vm2, %v914_v49  ;;  %v916_v12 = vsel %vm911_vm3, %v913_v18, %v915_v34 }
  0x7a   : > { %4067 = vmatmul.msk.bf16.vlgmr.msrb.gmra.mxu0 %vm562_vm2, %v1603_v25 }
  0x7e   : > { %4048 = vmatmul.msk.bf16.gmra.mxu3 %vm562_vm2, %v1327_v37  ;;  %v1638_v37 = vor.u32 %v1637_v32, %v1634_v31  ;;  %v4365_v32 = vld [vmem:[%s4534_s6 + $0x50] sm:$0xff] }
  0x80   : > { %v1639_v47 = vsel %vm1586_vm4, %v1629_v15, %v1638_v37 }
  0x89   : > { %3926 = vmatmul.msk.bf16.gmra.mxu1 %vm562_vm2, %v4552_v13  ;;  %3948 = vmatmul.msk.bf16.gmra.mxu2 %vm562_vm2, %v916_v12  ;;  %v918_v13 = vsel %vm911_vm3, %v915_v34, %v917_v54  ;;  %v1333_v34 = vsel %vm911_vm3, %v1330_v7, %v1332_v22 }
  0x8a   : > { %4068 = vmatmul.msk.bf16.gmra.mxu0 %vm562_vm2, %v1612_v45 }
  0x8e   : > { %4049 = vmatmul.msk.bf16.gmra.mxu3 %vm562_vm2, %v1329_v55  ;;  %v4364_v55 = vld [vmem:[%s4534_s6 + $0x48] sm:$0xff] }
  0x8f   : > { %v1334_v61 = vrot.slane %v4364_v55, 1 }
  0x91   : > { %v1335_v24 = vsel %vm911_vm3, %v1332_v22, %v1334_v61 }
  0x96   : > { %v4748_v57 = vpop.f32.mrf.mxu1 }
  0x97   : > { %v4751_v58 = vpop.f32.mrf.mxu0 }
  0x99   : > { %3927 = vmatmul.msk.bf16.gmra.mxu1 %vm562_vm2, %v4584_v39  ;;  %3949 = vmatmul.msk.bf16.gmra.mxu2 %vm562_vm2, %v918_v13  ;;  %v1331_v39 = vsel %vm911_vm3, %v1328_v51, %v1330_v7  ;;  %v1643_v13 = vrot.slane %v1641_v50, 1 }
  0x9a   : > { %4069 = vmatmul.msk.bf16.gmra.mxu0 %vm562_vm2, %v1621_v59  ;;  %v1646_v59 = vrot.slane %v1644_v41, 2 }
  0x9c   : > { %v4758_v63 = vpop.f32.mrf.mxu2  ;;  %v1647_v5 = vor.u32 %v1646_v59, %v1643_v13 }
  0x9e   : > { %v4760_v1 = vpop.f32.mrf.mxu1  ;;  %4050 = vmatmul.msk.bf16.gmra.mxu3 %vm562_vm2, %v1331_v39  ;;  %v1648_v15 = vsel %vm1586_vm4, %v1638_v37, %v1647_v5 }
  0x9f   : > { %v4763_v3 = vpop.f32.mrf.mxu0 }
  0xa1   : > { %v4776_v18 = vpop.f32.mrf.mxu3 }
  0xa2   : > { %6115 = vst [vmem:[#allocation2_spill] sm:$0xff] %v4776_v18 }
  0xa4   : > { %v4767_v16 = vpop.f32.mrf.mxu2 }
  0xa6   : > { %v4770_v17 = vpop.f32.mrf.mxu1 }
  0xa7   : > { %v4773_v53 = vpop.f32.mrf.mxu0 }
  0xa9   : > { %3928 = vmatmul.msk.bf16.gmra.mxu1 %vm562_vm2, %v4614_v4  ;;  %3950 = vmatmul.msk.bf16.gmra.mxu2 %vm562_vm2, %v920_v19  ;;  %v4789_v33 = vpop.f32.mrf.mxu3  ;;  %v921_v4 = vrot.slane %v4657_v52, 1 }
  0xaa   : > { %4070 = vmatmul.msk.bf16.gmra.mxu0 %vm562_vm2, %v1630_v21  ;;  %6117 = vst [vmem:[#allocation4_spill] sm:$0xff] %v4789_v33  ;;  %v1650_v21 = vshrl.u32 %v4363_v28, 16 }
  0xab   : > { %v922_v45 = vsel %vm911_vm3, %v919_v14, %v921_v4 }
  0xac   : > { %v4782_v49 = vpop.f32.mrf.mxu2 }
  0xad   : > { %6116 = vst [vmem:[#allocation3_spill] sm:$0xff] %v4782_v49 }
  0xae   : > { %v4784_v25 = vpop.f32.mrf.mxu1  ;;  %4051 = vmatmul.msk.bf16.gmra.mxu3 %vm562_vm2, %v1333_v34  ;;  %v1655_v34 = vrot.slane %v1653_v20, 2 }
  0xaf   : > { %v4787_v30 = vpop.f32.mrf.mxu0 }
  0xb1   : > { %v4802_v48 = vpop.f32.mrf.mxu3 }
  0xb2   : > { %6119 = vst [vmem:[#allocation6_spill] sm:$0xff] %v4802_v48 }
  0xb4   : > { %v4793_v42 = vpop.f32.mrf.mxu2 }
  0xb5   : > { %6118 = vst [vmem:[#allocation5_spill] sm:$0xff] %v4793_v42 }
  0xb6   : > { %v4796_v12 = vpop.f32.mrf.mxu1 }
  0xb7   : > { %v4799_v46 = vpop.f32.mrf.mxu0 }
  0xb9   : > { %3929 = vmatmul.msk.bf16.gmra.mxu1 %vm562_vm2, %v4646_v43  ;;  %3951 = vmatmul.msk.bf16.gmra.mxu2 %vm562_vm2, %v922_v45  ;;  %v4815_v60 = vpop.f32.mrf.mxu3  ;;  %v923_v43 = vrot.slane %v4537_v8, 1  ;;  %v1336_v45 = vrot.slane %v4365_v32, 1 }
  0xba   : > { %4071 = vmatmul.msk.bf16.gmra.mxu0 %vm562_vm2, %v1639_v47  ;;  %6121 = vst [vmem:[#allocation8_spill] sm:$0xff] %v4815_v60  ;;  %v925_v47 = vrot.slane %v4540_v9, 1 }
  0xbb   : > { %v924_v14 = vsel %vm911_vm3, %v921_v4, %v923_v43  ;;  %v1652_v4 = vrot.slane %v1650_v21, 1 }
  0xbc   : > { %v4808_v51 = vpop.f32.mrf.mxu2  ;;  %v926_v13 = vsel %vm911_vm3, %v923_v43, %v925_v47 }
  0xbd   : > { %6120 = vst [vmem:[#allocation7_spill] sm:$0xff] %v4808_v51  ;;  %v1656_v50 = vor.u32 %v1655_v34, %v1652_v4  ;;  %v4366_v4 = vld [vmem:[%s4534_s6 + $0x58] sm:$0xff] }
  0xbe   : > { %v4810_v54 = vpop.f32.mrf.mxu1  ;;  %4052 = vmatmul.msk.bf16.gmra.mxu3 %vm562_vm2, %v1335_v24 }
  0xbf   : > { %v4813_v56 = vpop.f32.mrf.mxu0  ;;  %v1657_v24 = vsel %vm1586_vm4, %v1647_v5, %v1656_v50 }
  0xc1   : > { %v4828_v19 = vpop.f32.mrf.mxu3 }
  0xc2   : > { %6123 = vst [vmem:[#allocation10_spill] sm:$0xff] %v4828_v19  ;;  %v928_v19 = vsel %vm911_vm3, %v925_v47, %v927_v27  ;;  %v4367_v47 = vld [vmem:[%s4534_s6 + $0x60] sm:$0xff] }
  0xc4   : > { %v4819_v7 = vpop.f32.mrf.mxu2 }
  0xc5   : > { %6122 = vst [vmem:[#allocation9_spill] sm:$0xff] %v4819_v7 }
  0xc6   : > { %v4822_v2 = vpop.f32.mrf.mxu1 }
  0xc7   : > { %v4825_v39 = vpop.f32.mrf.mxu0 }
  0xc9   : > { %3930 = vmatmul.msk.bf16.gmra.mxu1 %vm562_vm2, %v4657_v52  ;;  %3952 = vmatmul.msk.bf16.gmra.mxu2 %vm562_vm2, %v924_v14  ;;  %v741_v37 = vpop.f32.mrf.mxu3  ;;  %v1337_v52 = vsel %vm911_vm3, %v1334_v61, %v1336_v45  ;;  %v1659_v61 = vshrl.u32 %v4364_v55, 16 }
  0xca   : > { %4072 = vmatmul.msk.bf16.gmra.mxu0 %vm562_vm2, %v1648_v15  ;;  %v1662_v15 = vshll.u32 %v4364_v55, 16 }
  0xcb   : > { %v1661_v34 = vrot.slane %v1659_v61, 1 }
  0xcc   : > { %v4834_v26 = vpop.f32.mrf.mxu2  ;;  %v1664_v37 = vrot.slane %v1662_v15, 2 }
  0xcd   : > { %6124 = vst [vmem:[#allocation11_spill] sm:$0xff] %v4834_v26 }
  0xce   : > { %v4836_v31 = vpop.f32.mrf.mxu1  ;;  %4053 = vmatmul.msk.bf16.gmra.mxu3 %vm562_vm2, %v1337_v52  ;;  %v1338_v52 = vrot.slane %v4366_v4, 1 }
  0xcf   : > { %v4839_v22 = vpop.f32.mrf.mxu0 }
  0xd1   : > { %v1435_v14 = vpop.f32.mrf.mxu3 }
  0xd4   : > { %v4843_v41 = vpop.f32.mrf.mxu2 }
  0xd5   : > { %6125 = vst [vmem:[#allocation12_spill] sm:$0xff] %v4843_v41 }
  0xd6   : > { %v4846_v28 = vpop.f32.mrf.mxu1 }
  0xd7   : > { %v4849_v59 = vpop.f32.mrf.mxu0 }
  0xd9   : > { %3931 = vmatmul.msk.bf16.gmra.mxu1 %vm562_vm2, %v4537_v8  ;;  %3953 = vmatmul.msk.bf16.gmra.mxu2 %vm562_vm2, %v926_v13  ;;  %v1437_v5 = vpop.f32.mrf.mxu3  ;;  %v1339_v8 = vsel %vm911_vm3, %v1336_v45, %v1338_v52  ;;  %v1665_v13 = vor.u32 %v1664_v37, %v1661_v34  ;;  %v1668_v45 = vshrl.u32 %v4365_v32, 16  ;;  %v1671_v34 = vshll.u32 %v4365_v32, 16 }
  0xda   : > { %4073 = vmatmul.msk.bf16.gmra.mxu0 %vm562_vm2, %v1657_v24 }
  0xdb   : > { %v1666_v61 = vsel %vm1586_vm4, %v1656_v50, %v1665_v13  ;;  %v1670_v33 = vrot.slane %v1668_v45, 1  ;;  %v1673_v50 = vrot.slane %v1671_v34, 2 }
  0xdc   : > { %v4856_v21 = vpop.f32.mrf.mxu2 }
  0xdd   : > { %6126 = vst [vmem:[#allocation13_spill] sm:$0xff] %v4856_v21  ;;  %v1674_v21 = vor.u32 %v1673_v50, %v1670_v33  ;;  %v1680_v50 = vshll.u32 %v4366_v4, 16 }
  0xde   : > { %v4858_v20 = vpop.f32.mrf.mxu1  ;;  %4054 = vmatmul.msk.bf16.gmra.mxu3 %vm562_vm2, %v1339_v8 }
  0xdf   : > { %v4861_v43 = vpop.f32.mrf.mxu0  ;;  %v1675_v45 = vsel %vm1586_vm4, %v1665_v13, %v1674_v21  ;;  %v1682_v42 = vrot.slane %v1680_v50, 2 }
  0xe1   : > { %v4874_v15 = vpop.f32.mrf.mxu3 }
  0xe4   : > { %v4865_v24 = vpop.f32.mrf.mxu2 }
  0xe5   : > { %6127 = vst [vmem:[#allocation14_spill] sm:$0xff] %v4865_v24  ;;  %v1340_v24 = vrot.slane %v4367_v47, 1 }
  0xe6   : > { %v4868_v55 = vpop.f32.mrf.mxu1 }
  0xe7   : > { %v4871_v60 = vpop.f32.mrf.mxu0 }
  0xe9   : > { %3932 = vmatmul.msk.bf16.gmra.mxu1 %vm562_vm2, %v4540_v9  ;;  %3954 = vmatmul.msk.bf16.gmra.mxu2 %vm562_vm2, %v928_v19  ;;  %v4887_v18 = vpop.f32.mrf.mxu3  ;;  %v929_v9 = vrot.slane %v4603_v62, 1  ;;  %v1341_v19 = vsel %vm911_vm3, %v1338_v52, %v1340_v24  ;;  %v1677_v52 = vshrl.u32 %v4366_v4, 16 }
  0xea   : > { %4074 = vmatmul.msk.bf16.gmra.mxu0 %vm562_vm2, %v1666_v61 }
  0xeb   : > { %v1679_v51 = vrot.slane %v1677_v52, 1 }
  0xec   : > { %v4880_v37 = vpop.f32.mrf.mxu2 }
  0xed   : > { %6128 = vst [vmem:[#allocation15_spill] sm:$0xff] %v4880_v37  ;;  %v930_v37 = vsel %vm911_vm3, %v927_v27, %v929_v9  ;;  %v4904_v27 = vld [vmem:[%s4534_s6 + $0x68] sm:$0xff] }
  0xee   : > { %v4882_v8 = vpop.f32.mrf.mxu1  ;;  %4055 = vmatmul.msk.bf16.gmra.mxu3 %vm562_vm2, %v1341_v19 }
  0xef   : > { %v4885_v48 = vpop.f32.mrf.mxu0 }
  0xf1   : > { %v4896_v34 = vpop.f32.mrf.mxu3 }
  0xf4   : > { %v4891_v61 = vpop.f32.mrf.mxu2 }
  0xf5   : > { %6129 = vst [vmem:[#allocation16_spill] sm:$0xff] %v4891_v61 }
  0xf6   : > { %v801_v32 = vpop.f32.mrf.mxu1 }
  0xf7   : > { %v1850_v41 = vpop.f32.mrf.mxu0  ;;  %v802_v33 = vadd.f32 %v801_v32, %v4751_v58  ;;  %v1683_v32 = vor.u32 %v1682_v42, %v1679_v51  ;;  %v1686_v51 = vshrl.u32 %v4367_v47, 16 }
  0xf9   : > { %3933 = vmatmul.msk.bf16.gmra.mxu1 %vm562_vm2, %v4575_v35  ;;  %3955 = vmatmul.msk.bf16.gmra.mxu2 %vm562_vm2, %v930_v37  ;;  %v4906_v49 = vpop.f32.mrf.mxu3  ;;  %v1342_v35 = vrot.slane %v4904_v27, 1 }
  0xfa   : > { %4075 = vmatmul.msk.bf16.gmra.mxu0 %vm562_vm2, %v1675_v45  ;;  %v931_v45 = vrot.slane %v4638_v38, 1 }
  0xfb   : > { %v1343_v58 = vsel %vm911_vm3, %v1340_v24, %v1342_v35 }
  0xfc   : > { %v1028_v19 = vpop.f32.mrf.mxu2  ;;  %v932_v52 = vsel %vm911_vm3, %v929_v9, %v931_v45 }
  0xfd   : > { %v1132_v61 = vadd.f32 %v1028_v19, %v802_v33 }
  0xfe   : > { %v803_v26 = vpop.f32.mrf.mxu1  ;;  %4056 = vmatmul.msk.bf16.gmra.mxu3 %vm562_vm2, %v1343_v58  ;;  %v4927_v58 = vld [vmem:[%s4534_s6 + $0x70] sm:$0xff] }
  0xff   : > { %v1539_v7 = vadd.f32 %v1435_v14, %v1132_v61  ;;  %v1852_v13 = vpop.f32.mrf.mxu0  ;;  %v804_v4 = vadd.f32 %v803_v26, %v4763_v3  ;;  %v1689_v26 = vshll.u32 %v4367_v47, 16 }
 0x101   : > { %v4909_v37 = vadd.f32 %v1850_v41, %v1539_v7  ;;  %v1684_v7 = vsel %vm1586_vm4, %v1674_v21, %v1683_v32  ;;  %v4917_v41 = vpop.f32.mrf.mxu3 }
 0x104   : > { %v1030_v33 = vpop.f32.mrf.mxu2 }
 0x105   : > { %v1133_v14 = vadd.f32 %v1030_v33, %v804_v4  ;;  %v1688_v33 = vrot.slane %v1686_v51, 1 }
 0x106   : > { %v806_v61 = vpop.f32.mrf.mxu1 }
 0x107   : > { %v1540_v50 = vadd.f32 %v1437_v5, %v1133_v14  ;;  %v1855_v19 = vpop.f32.mrf.mxu0  ;;  %v807_v42 = vadd.f32 %v806_v61, %v4773_v53  ;;  %v933_v53 = vrot.slane %v4628_v29, 1 }
 0x109   : > { %3934 = vmatmul.msk.bf16.gmra.mxu1 %vm562_vm2, %v4603_v62  ;;  %3956 = vmatmul.msk.bf16.gmra.mxu2 %vm562_vm2, %v932_v52  ;;  %v4922_v3 = vadd.f32 %v1852_v13, %v1540_v50  ;;  %v1691_v62 = vrot.slane %v1689_v26, 2  ;;  %v4930_v14 = vpop.f32.mrf.mxu3  ;;  %v1344_v13 = vrot.slane %v4927_v58, 1  ;;  %v934_v51 = vsel %vm911_vm3, %v931_v45, %v933_v53 }
 0x10a   : > { %4076 = vmatmul.msk.bf16.gmra.mxu0 %vm562_vm2, %v1684_v7  ;;  %v1695_v45 = vshrl.u32 %v4904_v27, 16 }
 0x10b   : > { %v1345_v47 = vsel %vm911_vm3, %v1342_v35, %v1344_v13  ;;  %v1692_v50 = vor.u32 %v1691_v62, %v1688_v33  ;;  %v4954_v33 = vld [vmem:[%s4534_s6 + $0x78] sm:$0xff] }
 0x10c   : > { %v1033_v24 = vpop.f32.mrf.mxu2 }
 0x10d   : > { %v1134_v5 = vadd.f32 %v1033_v24, %v807_v42 }
 0x10e   : > { %v808_v9 = vpop.f32.mrf.mxu1  ;;  %4057 = vmatmul.msk.bf16.gmra.mxu3 %vm562_vm2, %v1345_v47  ;;  %v1697_v47 = vrot.slane %v1695_v45, 1 }
 0x10f   : > { %v1541_v21 = vadd.f32 %v4874_v15, %v1134_v5  ;;  %v1857_v4 = vpop.f32.mrf.mxu0  ;;  %v809_v61 = vadd.f32 %v808_v9, %v4787_v30 }
 0x111   : > { %v4933_v52 = vadd.f32 %v1855_v19, %v1541_v21  ;;  %v1693_v19 = vsel %vm1586_vm4, %v1683_v32, %v1692_v50  ;;  %v4942_v5 = vpop.f32.mrf.mxu3 }
 0x114   : > { %v1035_v7 = vpop.f32.mrf.mxu2 }
 0x115   : > { %v1135_v15 = vadd.f32 %v1035_v7, %v809_v61  ;;  %v1346_v7 = vrot.slane %v4954_v33, 1 }
 0x116   : > { %v811_v42 = vpop.f32.mrf.mxu1 }
 0x117   : > { %v1542_v26 = vadd.f32 %v4887_v18, %v1135_v15  ;;  %v1860_v24 = vpop.f32.mrf.mxu0  ;;  %v812_v35 = vadd.f32 %v811_v42, %v4799_v46  ;;  %v1698_v18 = vshll.u32 %v4904_v27, 16  ;;  %v935_v46 = vrot.slane %v4543_v10, 1 }
 0x118   : > { %v1347_v27 = vsel %vm911_vm3, %v1344_v13, %v1346_v7 }
 0x119   : > { %3935 = vmatmul.msk.bf16.gmra.mxu1 %vm562_vm2, %v4638_v38  ;;  %3957 = vmatmul.msk.bf16.gmra.mxu2 %vm562_vm2, %v934_v51  ;;  %v4947_v30 = vadd.f32 %v1857_v4, %v1542_v26  ;;  %v1700_v61 = vrot.slane %v1698_v18, 2  ;;  %v4957_v4 = vpop.f32.mrf.mxu3 }
 0x11a   : > { %4077 = vmatmul.msk.bf16.gmra.mxu0 %vm562_vm2, %v1693_v19 }
 0x11b   : > { %v1701_v51 = vor.u32 %v1700_v61, %v1697_v47 }
 0x11c   : > { %v1038_v9 = vpop.f32.mrf.mxu2 }
 0x11d   : > { %v1136_v21 = vadd.f32 %v1038_v9, %v812_v35  ;;  %v936_v35 = vsel %vm911_vm3, %v933_v53, %v935_v46  ;;  %v1704_v53 = vshrl.u32 %v4927_v58, 16 }
 0x11e   : > { %v813_v32 = vpop.f32.mrf.mxu1  ;;  %4058 = vmatmul.msk.bf16.gmra.mxu3 %vm562_vm2, %v1347_v27 }
 0x11f   : > { %v1543_v62 = vadd.f32 %v4896_v34, %v1136_v21  ;;  %v1862_v38 = vpop.f32.mrf.mxu0  ;;  %v814_v42 = vadd.f32 %v813_v32, %v4813_v56  ;;  %v1706_v61 = vrot.slane %v1704_v53, 1 }
 0x121   : > { %v4960_v15 = vadd.f32 %v1860_v24, %v1543_v62  ;;  %v1702_v24 = vsel %vm1586_vm4, %v1692_v50, %v1701_v51  ;;  %v4969_v9 = vpop.f32.mrf.mxu3  ;;  %v4981_v62 = vld [vmem:[%s4534_s6 + $0x80] sm:$0xff] }
 0x124   : > { %v1040_v26 = vpop.f32.mrf.mxu2 }
 0x125   : > { %v1137_v34 = vadd.f32 %v1040_v26, %v814_v42  ;;  %v1348_v42 = vrot.slane %v4981_v62, 1 }
 0x126   : > { %v816_v19 = vpop.f32.mrf.mxu1 }
 0x127   : > { %v1544_v45 = vadd.f32 %v4906_v49, %v1137_v34  ;;  %v1865_v18 = vpop.f32.mrf.mxu0  ;;  %v817_v13 = vadd.f32 %v816_v19, %v4825_v39  ;;  %v1707_v49 = vshll.u32 %v4927_v58, 16  ;;  %v937_v39 = vrot.slane %v4546_v11, 1 }
 0x128   : > { %v1349_v58 = vsel %vm911_vm3, %v1346_v7, %v1348_v42  ;;  %v1713_v7 = vshrl.u32 %v4954_v33, 16 }
 0x129   : > { %3936 = vmatmul.msk.bf16.gmra.mxu1 %vm562_vm2, %v4628_v29  ;;  %3958 = vmatmul.msk.bf16.gmra.mxu2 %vm562_vm2, %v936_v35  ;;  %v4974_v56 = vadd.f32 %v1862_v38, %v1544_v45  ;;  %v1709_v27 = vrot.slane %v1707_v49, 2  ;;  %v4984_v38 = vpop.f32.mrf.mxu3 }
 0x12a   : > { %4078 = vmatmul.msk.bf16.gmra.mxu0 %vm562_vm2, %v1702_v24  ;;  %v938_v24 = vsel %vm911_vm3, %v935_v46, %v937_v39 }
 0x12b   : > { %v1710_v19 = vor.u32 %v1709_v27, %v1706_v61 }
 0x12c   : > { %v1043_v21 = vpop.f32.mrf.mxu2 }
 0x12d   : > { %v1138_v32 = vadd.f32 %v1043_v21, %v817_v13 }
 0x12e   : > { %v818_v50 = vpop.f32.mrf.mxu1  ;;  %4059 = vmatmul.msk.bf16.gmra.mxu3 %vm562_vm2, %v1349_v58  ;;  %v939_v58 = vrot.slane %v4579_v36, 1  ;;  %v4438_v36 = vld [vmem:[%s4534_s6 + $0x68] sm:$0xff] }
 0x12f   : > { %v1545_v47 = vadd.f32 %v4917_v41, %v1138_v32  ;;  %v1867_v29 = vpop.f32.mrf.mxu0  ;;  %v819_v34 = vadd.f32 %v818_v50, %v4839_v22  ;;  %v5008_v32 = vld [vmem:[%s4534_s6 + $0x88] sm:$0xff] }
 0x130   : > { %v1350_v27 = vrot.slane %v5008_v32, 1 }
 0x131   : > { %v4987_v26 = vadd.f32 %v1865_v18, %v1545_v47  ;;  %v1711_v18 = vsel %vm1586_vm4, %v1701_v51, %v1710_v19  ;;  %v4996_v49 = vpop.f32.mrf.mxu3  ;;  %v1715_v47 = vrot.slane %v1713_v7, 1 }
 0x134   : > { %v1045_v35 = vpop.f32.mrf.mxu2 }
 0x135   : > { %v1139_v41 = vadd.f32 %v1045_v35, %v819_v34 }
 0x136   : > { %v821_v45 = vpop.f32.mrf.mxu1 }
 0x137   : > { %v1546_v13 = vadd.f32 %v4930_v14, %v1139_v41  ;;  %v1870_v53 = vpop.f32.mrf.mxu0  ;;  %v822_v22 = vadd.f32 %v821_v45, %v4849_v59  ;;  %v1716_v14 = vshll.u32 %v4954_v33, 16  ;;  %v1351_v33 = vsel %vm911_vm3, %v1348_v42, %v1350_v27 }
 0x139   : > { %3937 = vmatmul.msk.bf16.gmra.mxu1 %vm562_vm2, %v4543_v10  ;;  %3959 = vmatmul.msk.bf16.gmra.mxu2 %vm562_vm2, %v938_v24  ;;  %v5001_v11 = vadd.f32 %v1867_v29, %v1546_v13  ;;  %v1718_v61 = vrot.slane %v1716_v14, 2  ;;  %v5011_v29 = vpop.f32.mrf.mxu3  ;;  %v940_v24 = vsel %vm911_vm3, %v937_v39, %v939_v58  ;;  %v1722_v39 = vshrl.u32 %v4981_v62, 16 }
 0x13a   : > { %4079 = vmatmul.msk.bf16.gmra.mxu0 %vm562_vm2, %v1711_v18 }
 0x13b   : > { %v1719_v35 = vor.u32 %v1718_v61, %v1715_v47 }
 0x13c   : > { %v1048_v46 = vpop.f32.mrf.mxu2 }
 0x13d   : > { %v1140_v21 = vadd.f32 %v1048_v46, %v822_v22  ;;  %v5035_v46 = vld [vmem:[%s4534_s6 + $0x90] sm:$0xff] }
 0x13e   : > { %v823_v51 = vpop.f32.mrf.mxu1  ;;  %4060 = vmatmul.msk.bf16.gmra.mxu3 %vm562_vm2, %v1351_v33  ;;  %v1352_v61 = vrot.slane %v5035_v46, 1  ;;  %v941_v33 = vrot.slane %v4608_v0, 1  ;;  %v4439_v0 = vld [vmem:[%s4534_s6 + $0x70] sm:$0xff] }
 0x13f   : > { %v1547_v50 = vadd.f32 %v4942_v5, %v1140_v21  ;;  %v1872_v10 = vpop.f32.mrf.mxu0  ;;  %v824_v34 = vadd.f32 %v823_v51, %v4861_v43 }
 0x141   : > { %v5014_v59 = vadd.f32 %v1870_v53, %v1547_v50  ;;  %v1720_v53 = vsel %vm1586_vm4, %v1710_v19, %v1719_v35  ;;  %v5023_v22 = vpop.f32.mrf.mxu3  ;;  %v1724_v50 = vrot.slane %v1722_v39, 1 }
 0x144   : > { %v1050_v41 = vpop.f32.mrf.mxu2 }
 0x145   : > { %v1141_v5 = vadd.f32 %v1050_v41, %v824_v34 }
 0x146   : > { %v826_v45 = vpop.f32.mrf.mxu1 }
 0x147   : > { %v1548_v13 = vadd.f32 %v4957_v4, %v1141_v5  ;;  %v1875_v18 = vpop.f32.mrf.mxu0  ;;  %v827_v42 = vadd.f32 %v826_v45, %v4871_v60  ;;  %v1725_v4 = vshll.u32 %v4981_v62, 16  ;;  %v1353_v62 = vsel %vm911_vm3, %v1350_v27, %v1352_v61 }
 0x149   : > { %3938 = vmatmul.msk.bf16.gmra.mxu1 %vm562_vm2, %v4438_v36  ;;  %3960 = vmatmul.msk.bf16.gmra.mxu2 %vm562_vm2, %v940_v24  ;;  %v5028_v43 = vadd.f32 %v1872_v10, %v1548_v13  ;;  %v1727_v47 = vrot.slane %v1725_v4, 2  ;;  %v5038_v10 = vpop.f32.mrf.mxu3  ;;  %v942_v24 = vsel %vm911_vm3, %v939_v58, %v941_v33  ;;  %v1731_v58 = vshrl.u32 %v5008_v32, 16  ;;  %v5062_v4 = vld [vmem:[%s4534_s6 + $0x98] sm:$0xff] }
 0x14a   : > { %4080 = vmatmul.msk.bf16.gmra.mxu0 %vm562_vm2, %v1720_v53 }
 0x14b   : > { %v1728_v41 = vor.u32 %v1727_v47, %v1724_v50  ;;  %v1354_v50 = vrot.slane %v5062_v4, 1  ;;  %v943_v47 = vrot.slane %v4642_v40, 1  ;;  %v4440_v40 = vld [vmem:[%s4534_s6 + $0x78] sm:$0xff] }
 0x14c   : > { %v1053_v7 = vpop.f32.mrf.mxu2 }
 0x14d   : > { %v1142_v14 = vadd.f32 %v1053_v7, %v827_v42 }
 0x14e   : > { %v828_v19 = vpop.f32.mrf.mxu1  ;;  %4061 = vmatmul.msk.bf16.gmra.mxu3 %vm562_vm2, %v1353_v62 }
 0x14f   : > { %v1549_v21 = vadd.f32 %v4969_v9, %v1142_v14  ;;  %v1877_v51 = vpop.f32.mrf.mxu0  ;;  %v829_v34 = vadd.f32 %v828_v19, %v4885_v48  ;;  %v1733_v19 = vrot.slane %v1731_v58, 1  ;;  %v5089_v58 = vld [vmem:[%s4534_s6 + $0xa0] sm:$0xff] }
 0x151   : > { %v5041_v60 = vadd.f32 %v1875_v18, %v1549_v21  ;;  %v1729_v18 = vsel %vm1586_vm4, %v1719_v35, %v1728_v41  ;;  %v5050_v36 = vpop.f32.mrf.mxu3 }
 0x154   : > { %v1055_v5 = vpop.f32.mrf.mxu2 }
 0x155   : > { %v1143_v9 = vadd.f32 %v1055_v5, %v829_v34 }
 0x156   : > { %v831_v45 = vpop.f32.mrf.mxu1 }
 0x157   : > { %v1550_v13 = vadd.f32 %v4984_v38, %v1143_v9  ;;  %v1880_v53 = vpop.f32.mrf.mxu0  ;;  %v832_v27 = vadd.f32 %v831_v45, %v4748_v57  ;;  %v1734_v38 = vshll.u32 %v5008_v32, 16  ;;  %v1355_v32 = vsel %vm911_vm3, %v1352_v61, %v1354_v50 }
 0x158   : > { %v944_v45 = vsel %vm911_vm3, %v941_v33, %v943_v47  ;;  %v1740_v33 = vshrl.u32 %v5035_v46, 16 }
 0x159   : > { %3939 = vmatmul.msk.bf16.gmra.mxu1 %vm562_vm2, %v4439_v0  ;;  %3961 = vmatmul.msk.bf16.gmra.mxu2 %vm562_vm2, %v942_v24  ;;  %v5055_v48 = vadd.f32 %v1877_v51, %v1550_v13  ;;  %v1736_v21 = vrot.slane %v1734_v38, 2  ;;  %v5065_v51 = vpop.f32.mrf.mxu3 }
 0x15a   : > { %4081 = vmatmul.msk.bf16.gmra.mxu0 %vm562_vm2, %v1729_v18 }
 0x15b   : > { %v1737_v34 = vor.u32 %v1736_v21, %v1733_v19  ;;  %v945_v19 = vrot.slane %v4649_v44, 1  ;;  %v4441_v44 = vld [vmem:[%s4534_s6 + $0x80] sm:$0xff] }
 0x15c   : > { %v1058_v42 = vpop.f32.mrf.mxu2 }
 0x15d   : > { %v1144_v39 = vadd.f32 %v1058_v42, %v832_v27 }
 0x15e   : > { %v833_v35 = vpop.f32.mrf.mxu1  ;;  %4062 = vmatmul.msk.bf16.gmra.mxu3 %vm562_vm2, %v1355_v32 }
 0x15f   : > { %v1551_v7 = vadd.f32 %v4996_v49, %v1144_v39  ;;  %v1882_v14 = vpop.f32.mrf.mxu0  ;;  %v834_v62 = vadd.f32 %v833_v35, %v4760_v1  ;;  %v1742_v39 = vrot.slane %v1740_v33, 1 }
 0x161   : > { %v5068_v57 = vadd.f32 %v1880_v53, %v1551_v7  ;;  %v1738_v53 = vsel %vm1586_vm4, %v1728_v41, %v1737_v34  ;;  %v5077_v18 = vpop.f32.mrf.mxu3 }
 0x164   : > { %v1060_v5 = vpop.f32.mrf.mxu2 }
 0x165   : > { %v1145_v49 = vadd.f32 %v1060_v5, %v834_v62 }
 0x166   : > { %v836_v9 = vpop.f32.mrf.mxu1 }
 0x167   : > { %v1552_v24 = vadd.f32 %v5011_v29, %v1145_v49  ;;  %v1885_v13 = vpop.f32.mrf.mxu0  ;;  %v837_v61 = vadd.f32 %v836_v9, %v4770_v17  ;;  %v1743_v29 = vshll.u32 %v5035_v46, 16  ;;  %v946_v49 = vsel %vm911_vm3, %v943_v47, %v945_v19 }
 0x168   : > { %v1749_v47 = vshrl.u32 %v5062_v4, 16 }
 0x169   : > { %3940 = vmatmul.msk.bf16.gmra.mxu1 %vm562_vm2, %v4440_v40  ;;  %3962 = vmatmul.msk.bf16.gmra.mxu2 %vm562_vm2, %v944_v45  ;;  %v5082_v1 = vadd.f32 %v1882_v14, %v1552_v24  ;;  %v1745_v35 = vrot.slane %v1743_v29, 2  ;;  %v5092_v7 = vpop.f32.mrf.mxu3  ;;  %v1356_v14 = vrot.slane %v5089_v58, 1 }
 0x16a   : > { %4082 = vmatmul.msk.bf16.gmra.mxu0 %vm562_vm2, %v1738_v53  ;;  %v1213_v53 = vld [vmem:[%s4534_s6 + $0xa8] sm:$0x7] }
 0x16b   : > { %v1357_v46 = vsel %vm911_vm3, %v1354_v50, %v1356_v14  ;;  %v1746_v32 = vor.u32 %v1745_v35, %v1742_v39  ;;  %v1297_v40 = vunpack.c.l.b16 %v1213_v53  ;;  %v4442_v35 = vld [vmem:[%s4534_s6 + $0x90] sm:$0xff] }
 0x16c   : > { %v1063_v0 = vpop.f32.mrf.mxu2 }
 0x16d   : > { %v1146_v27 = vadd.f32 %v1063_v0, %v837_v61  ;;  %v1747_v24 = vsel %vm1586_vm4, %v1737_v34, %v1746_v32  ;;  %v1318_v29 = vpack.c.b16 %v1297_v40, %v1297_v40 }
 0x16e   : > { %v838_v41 = vpop.f32.mrf.mxu1  ;;  %4063 = vmatmul.msk.bf16.gmra.mxu3 %vm562_vm2, %v1357_v46  ;;  %v947_v46 = vrot.slane %v4442_v35, 1 }
 0x16f   : > { %v1553_v38 = vadd.f32 %v5023_v22, %v1146_v27  ;;  %v1887_v42 = vpop.f32.mrf.mxu0  ;;  %v839_v21 = vadd.f32 %v838_v41, %v4784_v25  ;;  %v1751_v41 = vrot.slane %v1749_v47, 1  ;;  %v1358_v39 = vrot.slane %v1318_v29, 1  ;;  %v1580_v29 = vld [vmem:[%s4534_s6 + $0xa8] sm:$0xf] }
 0x171   : > { %v5095_v17 = vadd.f32 %v1885_v13, %v1553_v38  ;;  %v5104_v13 = vpop.f32.mrf.mxu3 }
 0x174   : > { %v1065_v62 = vpop.f32.mrf.mxu2 }
 0x175   : > { %v1147_v22 = vadd.f32 %v1065_v62, %v839_v21 }
 0x176   : > { %v841_v5 = vpop.f32.mrf.mxu1 }
 0x177   : > { %v1554_v9 = vadd.f32 %v5038_v10, %v1147_v22  ;;  %v1890_v45 = vpop.f32.mrf.mxu0  ;;  %v842_v50 = vadd.f32 %v841_v5, %v4796_v12  ;;  %v1752_v10 = vshll.u32 %v5062_v4, 16  ;;  %v1359_v4 = vsel %vm911_vm3, %v1356_v14, %v1358_v39 }
 0x179   : > { %3941 = vmatmul.msk.bf16.gmra.mxu1 %vm562_vm2, %v4441_v44  ;;  %3963 = vmatmul.msk.bf16.gmra.mxu2 %vm562_vm2, %v946_v49  ;;  %v5109_v25 = vadd.f32 %v1887_v42, %v1554_v9  ;;  %v1754_v38 = vrot.slane %v1752_v10, 2  ;;  %v5117_v42 = vpop.f32.mrf.mxu3  ;;  %v948_v49 = vsel %vm911_vm3, %v945_v19, %v947_v46  ;;  %v1761_v19 = vshll.u32 %v5089_v58, 16 }
 0x17a   : > { %4083 = vmatmul.msk.bf16.gmra.mxu0 %vm562_vm2, %v1747_v24 }
 0x17b   : > { %v1755_v62 = vor.u32 %v1754_v38, %v1751_v41  ;;  %v1584_v38 = vunpack.c.l.b16 %v1580_v29 }
 0x17c   : > { %v1068_v34 = vpop.f32.mrf.mxu2 }
 0x17d   : > { %v1148_v61 = vadd.f32 %v1068_v34, %v842_v50  ;;  %v4443_v50 = vld [vmem:[%s4534_s6 + $0x88] sm:$0xff] }
 0x17e   : > { %v843_v33 = vpop.f32.mrf.mxu1  ;;  %4064 = vmatmul.msk.bf16.gmra.mxu3 %vm562_vm2, %v1359_v4 }
 0x17f   : > { %v1555_v0 = vadd.f32 %v5050_v36, %v1148_v61  ;;  %v1892_v27 = vpop.f32.mrf.mxu0  ;;  %v844_v21 = vadd.f32 %v843_v33, %v4810_v54  ;;  %v1763_v61 = vrot.slane %v1761_v19, 2 }
 0x181   : > { %v5119_v12 = vadd.f32 %v1890_v45, %v1555_v0  ;;  %v1756_v45 = vsel %vm1586_vm4, %v1746_v32, %v1755_v62  ;;  %v5128_v44 = vpop.f32.mrf.mxu3 }
 0x184   : > { %v1070_v22 = vpop.f32.mrf.mxu2 }
 0x185   : > { %v1149_v36 = vadd.f32 %v1070_v22, %v844_v21 }
 0x186   : > { %v846_v5 = vpop.f32.mrf.mxu1 }
 0x187   : > { %v1556_v9 = vadd.f32 %v5065_v51, %v1149_v36  ;;  %v1895_v24 = vpop.f32.mrf.mxu0  ;;  %v847_v14 = vadd.f32 %v846_v5, %v4822_v2  ;;  %v1758_v51 = vshrl.u32 %v5089_v58, 16 }
 0x189   : > { %3942 = vmatmul.msk.bf16.gmra.mxu1 %vm562_vm2, %v4443_v50  ;;  %3964 = vmatmul.msk.bf16.gmra.mxu2 %vm562_vm2, %v948_v49  ;;  %v5133_v54 = vadd.f32 %v1892_v27, %v1556_v9  ;;  %v1760_v40 = vrot.slane %v1758_v51, 1  ;;  %v5140_v33 = vpop.f32.mrf.mxu3  ;;  %v4444_v27 = vld [vmem:[%s4534_s6 + $0x98] sm:$0xff]  ;;  %v5151_v9 = vpack.c.b16 %v1584_v38, %v1584_v38 }
 0x18a   : > { %4084 = vmatmul.msk.bf16.gmra.mxu0 %vm562_vm2, %v1756_v45  ;;  %v949_v2 = vrot.slane %v4444_v27, 1  ;;  %v5157_v45 = vld [vmem:[%s4534_s6 + $0x14] sm:$0xf] }
 0x18b   : > { %v1764_v58 = vor.u32 %v1763_v61, %v1760_v40  ;;  %v1767_v51 = vshrl.u32 %v5151_v9, 16  ;;  %v1770_v19 = vshll.u32 %v5151_v9, 16 }
 0x18c   : > { %v1073_v32 = vpop.f32.mrf.mxu2  ;;  %v950_v22 = vsel %vm911_vm3, %v947_v46, %v949_v2 }
 0x18d   : > { %v1150_v47 = vadd.f32 %v1073_v32, %v847_v14  ;;  %v1765_v49 = vsel %vm1586_vm4, %v1755_v62, %v1764_v58 }
 0x18e   : > { %v848_v10 = vpop.f32.mrf.mxu1  ;;  %4065 = vmatmul.msk.bf16.gmra.mxu3 %vm562_vm2, %v1358_v39  ;;  %v2757_v39 = vunpack.c.l.b16 %v5157_v45 }
 0x18f   : > { %v1557_v53 = vadd.f32 %v5077_v18, %v1150_v47  ;;  %v1897_v34 = vpop.f32.mrf.mxu0  ;;  %v849_v41 = vadd.f32 %v848_v10, %v4836_v31  ;;  %v2670_v31 = vld [vmem:[%s4534_s6 + $0x10] sm:$0xc] }
 0x190   : > { %v2756_v50 = vunpack.c.l.b16 %v2670_v31 }
 0x191   : > { %v5143_v0 = vadd.f32 %v1895_v24, %v1557_v53  ;;  %v5153_v24 = vpop.f32.mrf.mxu3 }
 0x192   : > { %v2798_v62 = vpack.c.b16 %v2757_v39, %v2756_v50  ;;  %v951_v50 = vrot.slane %v4617_v6, 1 }
 0x194   : > { %v1075_v4 = vpop.f32.mrf.mxu2  ;;  %v2821_v47 = vshrl.u32 %v2798_v62, 16 }
 0x195   : > { %v1151_v18 = vadd.f32 %v1075_v4, %v849_v41 }
 0x196   : > { %v851_v21 = vpop.f32.mrf.mxu1  ;;  %v2823_v61 = vrot.slane %v2821_v47, 2 }
 0x197   : > { %v1558_v36 = vadd.f32 %v5092_v7, %v1151_v18  ;;  %v1900_v5 = vpop.f32.mrf.mxu0  ;;  %v5166_v7 = vld [vmem:[%s4534_s6 + $0x18] sm:$0xff]  ;;  %v852_v14 = vadd.f32 %v851_v21, %v4846_v28  ;;  %v1769_v18 = vrot.slane %v1767_v51, 1  ;;  %v1772_v21 = vrot.slane %v1770_v19, 2 }
 0x198   : > { %v2829_v10 = vshrl.u32 %v5166_v7, 16  ;;  %v2832_v53 = vshll.u32 %v5166_v7, 16  ;;  %v952_v19 = vsel %vm911_vm3, %v949_v2, %v951_v50  ;;  %v3236_v45 = vrot.slane %v5166_v7, 3 }
 0x199   : > { %3943 = vmatmul.msk.bf16.gmra.mxu1 %vm562_vm2, %v4442_v35  ;;  %3965 = vmatmul.msk.bf16.gmra.mxu2 %vm562_vm2, %v950_v22  ;;  %v5162_v46 = vadd.f32 %v1897_v34, %v1558_v36  ;;  %v2824_v35 = vshll.u32 %v2798_v62, 16  ;;  %v5176_v22 = vpop.f32.mrf.mxu3 }
 0x19a   : > { %4085 = vmatmul.msk.bf16.gmra.mxu0 %vm562_vm2, %v1765_v49  ;;  %v2831_v41 = vrot.slane %v2829_v10, 2  ;;  %v2834_v38 = vrot.slane %v2832_v53, 3  ;;  %v5195_v53 = vld [vmem:[%s4534_s6 + $0x20] sm:$0xff] }
 0x19b   : > { %v2826_v29 = vrot.slane %v2824_v35, 3 }
 0x19c   : > { %v1078_v32 = vpop.f32.mrf.mxu2  ;;  %v2835_v49 = vor.u32 %v2834_v38, %v2831_v41 }
 0x19d   : > { %v1152_v34 = vadd.f32 %v1078_v32, %v852_v14  ;;  %v2827_v36 = vor.u32 %v2826_v29, %v2823_v61  ;;  %v1773_v32 = vor.u32 %v1772_v21, %v1769_v18  ;;  %v286_v29 = vld [vmem:[%s4534_s6 + $0xa0] sm:$0x3] }
 0x19e   : > { %v853_v40 = vpop.f32.mrf.mxu1  ;;  %v744_v21 = vunpack.c.l.b16 %v286_v29 }
 0x19f   : > { %v1559_v4 = vadd.f32 %v5104_v13, %v1152_v34  ;;  %v1902_v28 = vpop.f32.mrf.mxu0  ;;  %v2836_v62 = vsel %vm2819_vm5, %v2827_v36, %v2835_v49  ;;  %v854_v14 = vadd.f32 %v853_v40, %v4858_v20  ;;  %v1774_v10 = vsel %vm1586_vm4, %v1764_v58, %v1773_v32 }
 0x1a0   : > { %4293 = vmatmul.msk.bf16.vlgmr.msra.gmra.mxu3 %vm562_vm2, %v2836_v62  ;;  %v2841_v40 = vshll.u32 %v5195_v53, 16 }
 0x1a1   : > { %v5178_v31 = vadd.f32 %v1900_v5, %v1559_v4  ;;  %v5187_v6 = vpop.f32.mrf.mxu3 }
 0x1a2   : > { %v2843_v41 = vrot.slane %v2841_v40, 3 }
 0x1a4   : > { %v1080_v47 = vpop.f32.mrf.mxu2 }
 0x1a5   : > { %v1153_v13 = vadd.f32 %v1080_v47, %v854_v14 }
 0x1a6   : > { %v856_v51 = vpop.f32.mrf.mxu1 }
 0x1a7   : > { %v1560_v35 = vadd.f32 %v5117_v42, %v1153_v13  ;;  %v1905_v5 = vpop.f32.mrf.mxu0  ;;  %v857_v2 = vadd.f32 %v856_v51, %v4868_v55  ;;  %v2838_v42 = vshrl.u32 %v5195_v53, 16  ;;  %v1995_v51 = vld [vmem:[%s4534_s6 + $0x8] sm:$0xc] }
 0x1a9   : > { %3944 = vmatmul.msk.bf16.gmra.mxu1 %vm562_vm2, %v4444_v27  ;;  %3966 = vmatmul.msk.bf16.gmra.mxu2 %vm562_vm2, %v952_v19  ;;  %v5191_v20 = vadd.f32 %v1902_v28, %v1560_v35  ;;  %v2840_v27 = vrot.slane %v2838_v42, 2  ;;  %v5202_v28 = vpop.f32.mrf.mxu3  ;;  %v4113_v42 = vld [vmem:[%s4534_s6 + $0x10] sm:$0xc] }
 0x1aa   : > { %4086 = vmatmul.msk.bf16.gmra.mxu0 %vm562_vm2, %v1774_v10 }
 0x1ab   : > { %v2844_v18 = vor.u32 %v2843_v41, %v2840_v27 }
 0x1ac   : > { %v1083_v34 = vpop.f32.mrf.mxu2 }
 0x1ad   : > { %v1154_v58 = vadd.f32 %v1083_v34, %v857_v2  ;;  %v2845_v36 = vsel %vm2819_vm5, %v2835_v49, %v2844_v18  ;;  %v5220_v2 = vld [vmem:[%s4534_s6 + $0x28] sm:$0xff] }
 0x1ae   : > { %v858_v61 = vpop.f32.mrf.mxu1  ;;  %v2850_v29 = vshll.u32 %v5220_v2, 16 }
 0x1af   : > { %v1561_v38 = vadd.f32 %v5128_v44, %v1154_v58  ;;  %v1907_v4 = vpop.f32.mrf.mxu0  ;;  %v859_v62 = vadd.f32 %v858_v61, %v4882_v8  ;;  %v745_v44 = vpack.c.b16 %v744_v21, %v744_v21  ;;  %v1999_v8 = vunpack.c.l.b16 %v1995_v51 }
 0x1b0   : > { %4294 = vmatmul.msk.bf16.gmra.mxu3 %vm562_vm2, %v2845_v36  ;;  %v2847_v61 = vshrl.u32 %v5220_v2, 16  ;;  %v2852_v36 = vrot.slane %v2850_v29, 3 }
 0x1b1   : > { %v5204_v55 = vadd.f32 %v1905_v5, %v1561_v38  ;;  %v5211_v10 = vpop.f32.mrf.mxu3  ;;  %v3228_v5 = vld [vmem:[%s4534_s6 + $0x10] sm:$0x8] }
 0x1b2   : > { %v3232_v40 = vunpack.c.l.b16 %v3228_v5  ;;  %v2849_v21 = vrot.slane %v2847_v61, 2 }
 0x1b4   : > { %v1085_v14 = vpop.f32.mrf.mxu2 }
 0x1b5   : > { %v1155_v47 = vadd.f32 %v1085_v14, %v859_v62  ;;  %v3233_v14 = vpack.c.b16 %v2757_v39, %v3232_v40 }
 0x1b6   : > { %v861_v13 = vpop.f32.mrf.mxu1 }
 0x1b7   : > { %v1562_v19 = vadd.f32 %v5140_v33, %v1155_v47  ;;  %v1910_v35 = vpop.f32.mrf.mxu0  ;;  %v862_v34 = vadd.f32 %v861_v13, %v4758_v63  ;;  %v4376_v33 = vld [vmem:[%s4534_s6 + $0x10] sm:$0xf0] }
 0x1b9   : > { %3945 = vmatmul.msk.bf16.gmra.mxu1 %vm562_vm2, %v745_v44  ;;  %3967 = vmatmul.msk.bf16.gmra.mxu2 %vm562_vm2, %v951_v50  ;;  %v5216_v49 = vadd.f32 %v1907_v4, %v1562_v19  ;;  %v6130_v50 = vunpack.c.l.b16 %v4682_v23  ;;  %v5230_v4 = vld [vmem:[%s4534_s6 + $0x18] sm:$0xff]  ;;  %v5235_v47 = vpop.f32.mrf.mxu3  ;;  %v2853_v44 = vor.u32 %v2852_v36, %v2849_v21  ;;  %v4445_v23 = vld [vmem:[%s4534_s6 + $0x10] sm:$0xff]  ;;  %v4378_v36 = vld [vmem:[%s4534_s6 + $0x20] sm:$0xff] }
 0x1ba   : > { %4087 = vmatmul.msk.bf16.gmra.mxu0 %vm562_vm2, %v1773_v32  ;;  %v4114_v32 = vor.u32 %v4376_v33, %v4113_v42  ;;  %v2003_v19 = vrot.slane %v4445_v23, 2 }
 0x1bb   : > { %v2000_v41 = vpack.c.b16 %v6130_v50, %v1999_v8  ;;  %v2410_v8 = vrot.slane %v5230_v4, 2  ;;  %v6131_v50 = vld [vmem:[#allocation3_spill] sm:$0xff] }
 0x1bc   : > { %v1088_v58 = vpop.f32.mrf.mxu2  ;;  %v2409_v5 = vrot.slane %v4114_v32, 2 }
 0x1bd   : > { %v1156_v27 = vadd.f32 %v1088_v58, %v862_v34  ;;  %v2002_v13 = vrot.slane %v2000_v41, 2  ;;  %v2854_v34 = vsel %vm2819_vm5, %v2844_v18, %v2853_v44 }
 0x1be   : > { %v863_v38 = vpop.f32.mrf.mxu1  ;;  %v2411_v58 = vsel %vm2001_vm6, %v2409_v5, %v2410_v8 }
 0x1bf   : > { %v1563_v63 = vadd.f32 %v5153_v24, %v1156_v27  ;;  %v1912_v62 = vpop.f32.mrf.mxu0  ;;  %v864_v42 = vadd.f32 %v863_v38, %v4767_v16  ;;  %v3235_v24 = vrot.slane %v3233_v14, 3  ;;  %v2004_v40 = vsel %vm2001_vm6, %v2002_v13, %v2003_v19  ;;  %v5257_v27 = vld [vmem:[%s4534_s6 + $0x30] sm:$0xff] }
 0x1c0   : > { %4295 = vmatmul.msk.bf16.gmra.mxu3 %vm562_vm2, %v2854_v34  ;;  %v2859_v4 = vshll.u32 %v5257_v27, 16 }
 0x1c1   : > { %v5237_v51 = vadd.f32 %v1910_v35, %v1563_v63  ;;  %v3237_v16 = vsel %vm3234_vm7, %v3235_v24, %v3236_v45  ;;  %v5249_v29 = vpop.f32.mrf.mxu3 }
 0x1c2   : > { %v2861_v14 = vrot.slane %v2859_v4, 3 }
 0x1c4   : > { %v1090_v39 = vpop.f32.mrf.mxu2 }
 0x1c5   : > { %v1157_v35 = vadd.f32 %v1090_v39, %v864_v42  ;;  %v4446_v42 = vld [vmem:[%s4534_s6 + $0x18] sm:$0xff]  ;;  %v2412_v39 = vrot.slane %v4378_v36, 2 }
 0x1c6   : > { %v866_v33 = vpop.f32.mrf.mxu1  ;;  %v2005_v24 = vrot.slane %v4446_v42, 2 }
 0x1c7   : > { %v1564_v18 = vadd.f32 %v5176_v22, %v1157_v35  ;;  %v1915_v61 = vpop.f32.mrf.mxu0  ;;  %v867_v41 = vadd.f32 %v866_v33, %v6131_v50  ;;  %v2856_v22 = vshrl.u32 %v5257_v27, 16  ;;  %v6132_v33 = vld [vmem:[#allocation5_spill] sm:$0xff] }
 0x1c8   : > { %v2006_v50 = vsel %vm2001_vm6, %v2003_v19, %v2005_v24  ;;  %v5285_v19 = vld [vmem:[%s4534_s6 + $0x38] sm:$0xff] }
 0x1c9   : > { %4089 = vmatmul.msk.bf16.vlgmr.msra.gmra.mxu1 %vm562_vm2, %v2004_v40  ;;  %4191 = vmatmul.msk.bf16.vlgmr.msra.gmra.mxu2 %vm562_vm2, %v2411_v58  ;;  %v5253_v7 = vadd.f32 %v1912_v62, %v1564_v18  ;;  %v2858_v63 = vrot.slane %v2856_v22, 2  ;;  %v5264_v23 = vpop.f32.mrf.mxu3  ;;  %v3238_v58 = vrot.slane %v5195_v53, 3 }
 0x1ca   : > { %4315 = vmatmul.msk.bf16.vlgmr.msra.gmra.mxu0 %vm562_vm2, %v3237_v16 }
 0x1cb   : > { %v2862_v5 = vor.u32 %v2861_v14, %v2858_v63  ;;  %v4379_v63 = vld [vmem:[%s4534_s6 + $0x28] sm:$0xff] }
 0x1cc   : > { %v1093_v38 = vpop.f32.mrf.mxu2 }
 0x1cd   : > { %v1158_v32 = vadd.f32 %v1093_v38, %v867_v41  ;;  %v2863_v35 = vsel %vm2819_vm5, %v2853_v44, %v2862_v5  ;;  %v3239_v44 = vsel %vm3234_vm7, %v3236_v45, %v3238_v58  ;;  %v2868_v45 = vshll.u32 %v5285_v19, 16 }
 0x1ce   : > { %v868_v21 = vpop.f32.mrf.mxu1 }
 0x1cf   : > { %v1565_v62 = vadd.f32 %v5187_v6, %v1158_v32  ;;  %v1917_v13 = vpop.f32.mrf.mxu0  ;;  %v869_v40 = vadd.f32 %v868_v21, %v6132_v33 }
 0x1d0   : > { %4296 = vmatmul.msk.bf16.gmra.mxu3 %vm562_vm2, %v2863_v35 }
 0x1d1   : > { %v5266_v34 = vadd.f32 %v1915_v61, %v1565_v62  ;;  %v2413_v61 = vsel %vm2001_vm6, %v2410_v8, %v2412_v39  ;;  %v5277_v22 = vpop.f32.mrf.mxu3  ;;  %v6133_v8 = vld [vmem:[#allocation7_spill] sm:$0xff]  ;;  %v2870_v62 = vrot.slane %v2868_v45, 3 }
 0x1d4   : > { %v1095_v18 = vpop.f32.mrf.mxu2 }
 0x1d5   : > { %v1159_v6 = vadd.f32 %v1095_v18, %v869_v40  ;;  %v4447_v18 = vld [vmem:[%s4534_s6 + $0x20] sm:$0xff] }
 0x1d6   : > { %v871_v16 = vpop.f32.mrf.mxu1 }
 0x1d7   : > { %v1566_v41 = vadd.f32 %v5202_v28, %v1159_v6  ;;  %v1920_v38 = vpop.f32.mrf.mxu0  ;;  %v872_v4 = vadd.f32 %v871_v16, %v6133_v8  ;;  %v2865_v28 = vshrl.u32 %v5285_v19, 16  ;;  %v2007_v6 = vrot.slane %v4447_v18, 2 }
 0x1d8   : > { %v2414_v16 = vrot.slane %v4379_v63, 2 }
 0x1d9   : > { %4090 = vmatmul.msk.bf16.gmra.mxu1 %vm562_vm2, %v2006_v50  ;;  %4192 = vmatmul.msk.bf16.gmra.mxu2 %vm562_vm2, %v2413_v61  ;;  %v5281_v53 = vadd.f32 %v1917_v13, %v1566_v41  ;;  %v2867_v14 = vrot.slane %v2865_v28, 2  ;;  %v5292_v35 = vpop.f32.mrf.mxu3  ;;  %v6134_v61 = vld [vmem:[#allocation9_spill] sm:$0xff] }
 0x1da   : > { %4316 = vmatmul.msk.bf16.gmra.mxu0 %vm562_vm2, %v3239_v44  ;;  %v3240_v44 = vrot.slane %v5220_v2, 3 }
 0x1db   : > { %v2871_v33 = vor.u32 %v2870_v62, %v2867_v14 }
 0x1dc   : > { %v1098_v32 = vpop.f32.mrf.mxu2 }
 0x1dd   : > { %v1160_v21 = vadd.f32 %v1098_v32, %v872_v4  ;;  %v2872_v50 = vsel %vm2819_vm5, %v2862_v5, %v2871_v33  ;;  %v2008_v32 = vsel %vm2001_vm6, %v2005_v24, %v2007_v6  ;;  %v3241_v5 = vsel %vm3234_vm7, %v3238_v58, %v3240_v44  ;;  %v5313_v24 = vld [vmem:[%s4534_s6 + $0x40] sm:$0xff] }
 0x1de   : > { %v873_v36 = vpop.f32.mrf.mxu1  ;;  %v2877_v58 = vshll.u32 %v5313_v24, 16 }
 0x1df   : > { %v1567_v13 = vadd.f32 %v5211_v10, %v1160_v21  ;;  %v1922_v42 = vpop.f32.mrf.mxu0  ;;  %v874_v41 = vadd.f32 %v873_v36, %v6134_v61 }
 0x1e0   : > { %4297 = vmatmul.msk.bf16.gmra.mxu3 %vm562_vm2, %v2872_v50  ;;  %v2879_v50 = vrot.slane %v2877_v58, 3 }
 0x1e1   : > { %v5294_v40 = vadd.f32 %v1920_v38, %v1567_v13  ;;  %v2415_v38 = vsel %vm2001_vm6, %v2412_v39, %v2414_v16  ;;  %v5305_v21 = vpop.f32.mrf.mxu3  ;;  %v6135_v39 = vld [vmem:[#allocation11_spill] sm:$0xff]  ;;  %v4380_v13 = vld [vmem:[%s4534_s6 + $0x30] sm:$0xff] }
 0x1e4   : > { %v1100_v8 = vpop.f32.mrf.mxu2 }
 0x1e5   : > { %v1161_v10 = vadd.f32 %v1100_v8, %v874_v41 }
 0x1e6   : > { %v876_v4 = vpop.f32.mrf.mxu1 }
 0x1e7   : > { %v1568_v28 = vadd.f32 %v5235_v47, %v1161_v10  ;;  %v1925_v45 = vpop.f32.mrf.mxu0  ;;  %v877_v36 = vadd.f32 %v876_v4, %v6135_v39  ;;  %v2874_v47 = vshrl.u32 %v5313_v24, 16 }
 0x1e9   : > { %4091 = vmatmul.msk.bf16.gmra.mxu1 %vm562_vm2, %v2008_v32  ;;  %4193 = vmatmul.msk.bf16.gmra.mxu2 %vm562_vm2, %v2415_v38  ;;  %v5309_v2 = vadd.f32 %v1922_v42, %v1568_v28  ;;  %v2876_v18 = vrot.slane %v2874_v47, 2  ;;  %v5320_v41 = vpop.f32.mrf.mxu3  ;;  %v4448_v32 = vld [vmem:[%s4534_s6 + $0x28] sm:$0xff]  ;;  %v2416_v38 = vrot.slane %v4380_v13, 2 }
 0x1ea   : > { %4317 = vmatmul.msk.bf16.gmra.mxu0 %vm562_vm2, %v3241_v5  ;;  %v2009_v4 = vrot.slane %v4448_v32, 2  ;;  %v6137_v5 = vld [vmem:[#allocation12_spill] sm:$0xff] }
 0x1eb   : > { %v2880_v8 = vor.u32 %v2879_v50, %v2876_v18 }
 0x1ec   : > { %v1103_v63 = vpop.f32.mrf.mxu2  ;;  %v2010_v58 = vsel %vm2001_vm6, %v2007_v6, %v2009_v4  ;;  %v5341_v6 = vld [vmem:[%s4534_s6 + $0x48] sm:$0xff] }
 0x1ed   : > { %v1162_v14 = vadd.f32 %v1103_v63, %v877_v36  ;;  %v2881_v28 = vsel %vm2819_vm5, %v2871_v33, %v2880_v8  ;;  %v3242_v36 = vrot.slane %v5257_v27, 3 }
 0x1ee   : > { %v878_v62 = vpop.f32.mrf.mxu1 }
 0x1ef   : > { %v1569_v42 = vadd.f32 %v5249_v29, %v1162_v14  ;;  %v1927_v61 = vpop.f32.mrf.mxu0  ;;  %v879_v39 = vadd.f32 %v878_v62, %v6137_v5  ;;  %v3243_v33 = vsel %vm3234_vm7, %v3240_v44, %v3242_v36  ;;  %v2886_v44 = vshll.u32 %v5341_v6, 16 }
 0x1f0   : > { %4298 = vmatmul.msk.bf16.gmra.mxu3 %vm562_vm2, %v2881_v28  ;;  %v4381_v28 = vld [vmem:[%s4534_s6 + $0x38] sm:$0xff] }
 0x1f1   : > { %v5322_v10 = vadd.f32 %v1925_v45, %v1569_v42  ;;  %v2417_v45 = vsel %vm2001_vm6, %v2414_v16, %v2416_v38  ;;  %v5333_v18 = vpop.f32.mrf.mxu3  ;;  %v6139_v16 = vld [vmem:[#allocation13_spill] sm:$0xff] }
 0x1f3   : > { %6136 = vst [vmem:[#allocation3_spill] sm:$0xff] %v5322_v10 }
 0x1f4   : > { %v1105_v63 = vpop.f32.mrf.mxu2 }
 0x1f5   : > { %v1163_v29 = vadd.f32 %v1105_v63, %v879_v39  ;;  %v2888_v39 = vrot.slane %v2886_v44, 3 }
 0x1f6   : > { %v881_v47 = vpop.f32.mrf.mxu1 }
 0x1f7   : > { %v1570_v14 = vadd.f32 %v5264_v23, %v1163_v29  ;;  %v1930_v13 = vpop.f32.mrf.mxu0  ;;  %v882_v62 = vadd.f32 %v881_v47, %v6139_v16  ;;  %v2883_v23 = vshrl.u32 %v5341_v6, 16 }
 0x1f9   : > { %4092 = vmatmul.msk.bf16.gmra.mxu1 %vm562_vm2, %v2010_v58  ;;  %4194 = vmatmul.msk.bf16.gmra.mxu2 %vm562_vm2, %v2417_v45  ;;  %v5337_v27 = vadd.f32 %v1927_v61, %v1570_v14  ;;  %v2885_v5 = vrot.slane %v2883_v23, 2  ;;  %v5348_v29 = vpop.f32.mrf.mxu3  ;;  %v4449_v14 = vld [vmem:[%s4534_s6 + $0x30] sm:$0xff] }
 0x1fa   : > { %4318 = vmatmul.msk.bf16.gmra.mxu0 %vm562_vm2, %v3243_v33  ;;  %v2011_v47 = vrot.slane %v4449_v14, 2  ;;  %v2418_v33 = vrot.slane %v4381_v28, 2 }
 0x1fb   : > { %6138 = vst [vmem:[#allocation5_spill] sm:$0xff] %v5337_v27  ;;  %v2889_v58 = vor.u32 %v2888_v39, %v2885_v5  ;;  %v6141_v27 = vld [vmem:[#allocation14_spill] sm:$0xff] }
 0x1fc   : > { %v1108_v50 = vpop.f32.mrf.mxu2  ;;  %v2012_v44 = vsel %vm2001_vm6, %v2009_v4, %v2011_v47  ;;  %v6143_v4 = vld [vmem:[#allocation15_spill] sm:$0xff] }
 0x1fd   : > { %v1164_v42 = vadd.f32 %v1108_v50, %v882_v62  ;;  %v2890_v16 = vsel %vm2819_vm5, %v2880_v8, %v2889_v58  ;;  %v3244_v62 = vrot.slane %v5285_v19, 3 }
 0x1fe   : > { %v883_v32 = vpop.f32.mrf.mxu1 }
 0x1ff   : > { %v1571_v61 = vadd.f32 %v5277_v22, %v1164_v42  ;;  %v1932_v63 = vpop.f32.mrf.mxu0  ;;  %v884_v10 = vadd.f32 %v883_v32, %v6141_v27  ;;  %v3245_v8 = vsel %vm3234_vm7, %v3242_v36, %v3244_v62 }
 0x200   : > { %4299 = vmatmul.msk.bf16.gmra.mxu3 %vm562_vm2, %v2890_v16 }
 0x201   : > { %v5350_v45 = vadd.f32 %v1930_v13, %v1571_v61  ;;  %v2419_v13 = vsel %vm2001_vm6, %v2416_v38, %v2418_v33  ;;  %v5361_v5 = vpop.f32.mrf.mxu3  ;;  %v4382_v61 = vld [vmem:[%s4534_s6 + $0x40] sm:$0xff] }
 0x203   : > { %6140 = vst [vmem:[#allocation7_spill] sm:$0xff] %v5350_v45 }
 0x204   : > { %v1110_v50 = vpop.f32.mrf.mxu2 }
 0x205   : > { %v1165_v22 = vadd.f32 %v1110_v50, %v884_v10  ;;  %v5369_v10 = vld [vmem:[%s4534_s6 + $0x50] sm:$0xff] }
 0x206   : > { %v886_v23 = vpop.f32.mrf.mxu1  ;;  %v2895_v36 = vshll.u32 %v5369_v10, 16 }
 0x207   : > { %v1572_v42 = vadd.f32 %v5292_v35, %v1165_v22  ;;  %v1935_v28 = vpop.f32.mrf.mxu0  ;;  %v887_v38 = vadd.f32 %v886_v23, %v6143_v4  ;;  %v2892_v35 = vshrl.u32 %v5369_v10, 16 }
 0x208   : > { %v2897_v16 = vrot.slane %v2895_v36, 3 }
 0x209   : > { %4093 = vmatmul.msk.bf16.gmra.mxu1 %vm562_vm2, %v2012_v44  ;;  %4195 = vmatmul.msk.bf16.gmra.mxu2 %vm562_vm2, %v2419_v13  ;;  %v5365_v19 = vadd.f32 %v1932_v63, %v1572_v42  ;;  %v2894_v14 = vrot.slane %v2892_v35, 2  ;;  %v5376_v22 = vpop.f32.mrf.mxu3  ;;  %v4450_v42 = vld [vmem:[%s4534_s6 + $0x38] sm:$0xff] }
 0x20a   : > { %4319 = vmatmul.msk.bf16.gmra.mxu0 %vm562_vm2, %v3245_v8  ;;  %v2013_v23 = vrot.slane %v4450_v42, 2  ;;  %v2420_v8 = vrot.slane %v4382_v61, 2 }
 0x20b   : > { %6142 = vst [vmem:[#allocation9_spill] sm:$0xff] %v5365_v19  ;;  %v2898_v44 = vor.u32 %v2897_v16, %v2894_v14  ;;  %v6145_v19 = vld [vmem:[#allocation16_spill] sm:$0xff] }
 0x20c   : > { %v1113_v27 = vpop.f32.mrf.mxu2  ;;  %v2014_v36 = vsel %vm2001_vm6, %v2011_v47, %v2013_v23  ;;  %v6147_v47 = vld [vmem:[#allocation2_spill] sm:$0xff] }
 0x20d   : > { %v1166_v32 = vadd.f32 %v1113_v27, %v887_v38  ;;  %v2899_v4 = vsel %vm2819_vm5, %v2889_v58, %v2898_v44  ;;  %v3246_v38 = vrot.slane %v5313_v24, 3 }
 0x20e   : > { %v888_v39 = vpop.f32.mrf.mxu1 }
 0x20f   : > { %v1573_v63 = vadd.f32 %v5305_v21, %v1166_v32  ;;  %v1937_v50 = vpop.f32.mrf.mxu0  ;;  %v889_v45 = vadd.f32 %v888_v39, %v6145_v19  ;;  %v3247_v58 = vsel %vm3234_vm7, %v3244_v62, %v3246_v38 }
 0x210   : > { %4300 = vmatmul.msk.bf16.gmra.mxu3 %vm562_vm2, %v2899_v4 }
 0x211   : > { %v5378_v13 = vadd.f32 %v1935_v28, %v1573_v63  ;;  %v2421_v28 = vsel %vm2001_vm6, %v2418_v33, %v2420_v8  ;;  %v5389_v14 = vpop.f32.mrf.mxu3  ;;  %v4383_v63 = vld [vmem:[%s4534_s6 + $0x48] sm:$0xff] }
 0x213   : > { %6144 = vst [vmem:[#allocation11_spill] sm:$0xff] %v5378_v13 }
 0x214   : > { %v1115_v27 = vpop.f32.mrf.mxu2 }
 0x215   : > { %v1167_v21 = vadd.f32 %v1115_v27, %v889_v45  ;;  %v5397_v45 = vld [vmem:[%s4534_s6 + $0x58] sm:$0xff] }
 0x216   : > { %v891_v35 = vpop.f32.mrf.mxu1  ;;  %v2904_v62 = vshll.u32 %v5397_v45, 16 }
 0x217   : > { %v1574_v32 = vadd.f32 %v5320_v41, %v1167_v21  ;;  %v1940_v61 = vpop.f32.mrf.mxu0  ;;  %v892_v33 = vadd.f32 %v891_v35, %v6147_v47  ;;  %v2901_v41 = vshrl.u32 %v5397_v45, 16  ;;  %v2422_v35 = vrot.slane %v4383_v63, 2 }
 0x218   : > { %v2906_v4 = vrot.slane %v2904_v62, 3 }
 0x219   : > { %4094 = vmatmul.msk.bf16.gmra.mxu1 %vm562_vm2, %v2014_v36  ;;  %4196 = vmatmul.msk.bf16.gmra.mxu2 %vm562_vm2, %v2421_v28  ;;  %v5393_v24 = vadd.f32 %v1937_v50, %v1574_v32  ;;  %v2903_v42 = vrot.slane %v2901_v41, 2  ;;  %v1537_v21 = vpop.f32.mrf.mxu3  ;;  %v4451_v32 = vld [vmem:[%s4534_s6 + $0x40] sm:$0xff] }
 0x21a   : > { %4320 = vmatmul.msk.bf16.gmra.mxu0 %vm562_vm2, %v3247_v58  ;;  %v2015_v58 = vrot.slane %v4451_v32, 2 }
 0x21b   : > { %6146 = vst [vmem:[#allocation12_spill] sm:$0xff] %v5393_v24  ;;  %v2907_v36 = vor.u32 %v2906_v4, %v2903_v42  ;;  %v6148_v24 = vld [vmem:[#allocation4_spill] sm:$0xff] }
 0x21c   : > { %v1118_v19 = vpop.f32.mrf.mxu2  ;;  %v2016_v62 = vsel %vm2001_vm6, %v2013_v23, %v2015_v58  ;;  %v6150_v23 = vld [vmem:[#allocation6_spill] sm:$0xff] }
 0x21d   : > { %v1168_v39 = vadd.f32 %v1118_v19, %v892_v33  ;;  %v2908_v47 = vsel %vm2819_vm5, %v2898_v44, %v2907_v36  ;;  %v3248_v33 = vrot.slane %v5341_v6, 3 }
 0x21e   : > { %v893_v16 = vpop.f32.mrf.mxu1 }
 0x21f   : > { %v1575_v50 = vadd.f32 %v5333_v18, %v1168_v39  ;;  %v1942_v27 = vpop.f32.mrf.mxu0  ;;  %v894_v13 = vadd.f32 %v893_v16, %v6148_v24  ;;  %v3249_v44 = vsel %vm3234_vm7, %v3246_v38, %v3248_v33 }
 0x220   : > { %4301 = vmatmul.msk.bf16.gmra.mxu3 %vm562_vm2, %v2908_v47 }
 0x221   : > { %v5404_v28 = vadd.f32 %v1940_v61, %v1575_v50  ;;  %v2423_v61 = vsel %vm2001_vm6, %v2420_v8, %v2422_v35  ;;  %v4384_v50 = vld [vmem:[%s4534_s6 + $0x50] sm:$0xff] }
 0x223   : > { %v5415_v42 = vpop.f32.mrf.mxu3 }
 0x224   : > { %v1120_v19 = vpop.f32.mrf.mxu2 }
 0x225   : > { %v1169_v41 = vadd.f32 %v1120_v19, %v894_v13  ;;  %v5423_v13 = vld [vmem:[%s4534_s6 + $0x60] sm:$0xff] }
 0x226   : > { %v896_v18 = vpop.f32.mrf.mxu1  ;;  %v2913_v38 = vshll.u32 %v5423_v13, 16 }
 0x227   : > { %v1576_v39 = vadd.f32 %v5348_v29, %v1169_v41  ;;  %v1945_v63 = vpop.f32.mrf.mxu0  ;;  %v897_v8 = vadd.f32 %v896_v18, %v6150_v23  ;;  %v2910_v29 = vshrl.u32 %v5423_v13, 16  ;;  %v6152_v23 = vld [vmem:[#allocation8_spill] sm:$0xff] }
 0x228   : > { %v2915_v32 = vrot.slane %v2913_v38, 3 }
 0x229   : > { %4095 = vmatmul.msk.bf16.gmra.mxu1 %vm562_vm2, %v2016_v62  ;;  %4197 = vmatmul.msk.bf16.gmra.mxu2 %vm562_vm2, %v2423_v61  ;;  %v5419_v6 = vadd.f32 %v1942_v27, %v1576_v39  ;;  %v2912_v21 = vrot.slane %v2910_v29, 2  ;;  %v4452_v61 = vld [vmem:[%s4534_s6 + $0x48] sm:$0xff]  ;;  %v2424_v39 = vrot.slane %v4384_v50, 2 }
 0x22a   : > { %4321 = vmatmul.msk.bf16.gmra.mxu0 %vm562_vm2, %v3249_v44  ;;  %v2017_v18 = vrot.slane %v4452_v61, 2  ;;  %v4385_v61 = vld [vmem:[%s4534_s6 + $0x58] sm:$0xff] }
 0x22b   : > { %6149 = vst [vmem:[#allocation13_spill] sm:$0xff] %v5419_v6  ;;  %v5430_v19 = vpop.f32.mrf.mxu3  ;;  %v2916_v41 = vor.u32 %v2915_v32, %v2912_v21 }
 0x22c   : > { %v1123_v24 = vpop.f32.mrf.mxu2  ;;  %v2018_v38 = vsel %vm2001_vm6, %v2015_v58, %v2017_v18  ;;  %v5451_v58 = vld [vmem:[%s4534_s6 + $0x68] sm:$0xff] }
 0x22d   : > { %v1170_v16 = vadd.f32 %v1123_v24, %v897_v8  ;;  %v2917_v44 = vsel %vm2819_vm5, %v2907_v36, %v2916_v41  ;;  %v3250_v8 = vrot.slane %v5369_v10, 3 }
 0x22e   : > { %v898_v4 = vpop.f32.mrf.mxu1 }
 0x22f   : > { %v1577_v27 = vadd.f32 %v5361_v5, %v1170_v16  ;;  %v1947_v47 = vpop.f32.mrf.mxu0  ;;  %v899_v6 = vadd.f32 %v898_v4, %v6152_v23  ;;  %v3251_v36 = vsel %vm3234_vm7, %v3248_v33, %v3250_v8  ;;  %v2922_v33 = vshll.u32 %v5451_v58, 16 }
 0x230   : > { %4302 = vmatmul.msk.bf16.gmra.mxu3 %vm562_vm2, %v2917_v44 }
 0x231   : > { %v5432_v62 = vadd.f32 %v1945_v63, %v1577_v27  ;;  %v2425_v63 = vsel %vm2001_vm6, %v2422_v35, %v2424_v39  ;;  %v6154_v35 = vld [vmem:[#allocation10_spill] sm:$0xff]  ;;  %v2924_v23 = vrot.slane %v2922_v33, 3 }
 0x233   : > { %6151 = vst [vmem:[#allocation14_spill] sm:$0xff] %v5432_v62  ;;  %v5443_v21 = vpop.f32.mrf.mxu3  ;;  %v5554_v62 = vld [vmem:[%s4534_s6 + $0x60] sm:$0xff] }
 0x234   : > { %v1125_v24 = vpop.f32.mrf.mxu2 }
 0x235   : > { %v1171_v5 = vadd.f32 %v1125_v24, %v899_v6 }
 0x236   : > { %v901_v29 = vpop.f32.mrf.mxu1 }
 0x237   : > { %v1578_v16 = vadd.f32 %v5376_v22, %v1171_v5  ;;  %v1950_v50 = vpop.f32.mrf.mxu0  ;;  %v902_v6 = vadd.f32 %v901_v29, %v6154_v35  ;;  %v2919_v22 = vshrl.u32 %v5451_v58, 16 }
 0x239   : > { %4096 = vmatmul.msk.bf16.gmra.mxu1 %vm562_vm2, %v2018_v38  ;;  %4198 = vmatmul.msk.bf16.gmra.mxu2 %vm562_vm2, %v2425_v63  ;;  %v5447_v10 = vadd.f32 %v1947_v47, %v1578_v16  ;;  %v2921_v44 = vrot.slane %v2919_v22, 2  ;;  %v4453_v16 = vld [vmem:[%s4534_s6 + $0x50] sm:$0xff] }
 0x23a   : > { %4322 = vmatmul.msk.bf16.gmra.mxu0 %vm562_vm2, %v3251_v36  ;;  %v2019_v29 = vrot.slane %v4453_v16, 2  ;;  %v2426_v36 = vrot.slane %v4385_v61, 2 }
 0x23b   : > { %6153 = vst [vmem:[#allocation15_spill] sm:$0xff] %v5447_v10  ;;  %v5458_v5 = vpop.f32.mrf.mxu3  ;;  %v2925_v38 = vor.u32 %v2924_v23, %v2921_v44  ;;  %v5481_v23 = vld [vmem:[%s4534_s6 + $0x60] sm:$0xff] }
 0x23c   : > { %v1128_v4 = vpop.f32.mrf.mxu2  ;;  %v2427_v33 = vsel %vm2001_vm6, %v2424_v39, %v2426_v36 }
 0x23d   : > { %v1172_v32 = vadd.f32 %v1128_v4, %v902_v6  ;;  %v2926_v35 = vsel %vm2819_vm5, %v2916_v41, %v2925_v38  ;;  %v3252_v6 = vrot.slane %v5397_v45, 3  ;;  %v5475_v45 = vld [vmem:[%s4534_s6 + $0x70] sm:$0xff] }
 0x23e   : > { %v903_v27 = vpop.f32.mrf.mxu1  ;;  %v2931_v39 = vshll.u32 %v5475_v45, 16 }
 0x23f   : > { %v1579_v47 = vadd.f32 %v5389_v14, %v1172_v32  ;;  %v1952_v24 = vpop.f32.mrf.mxu0  ;;  %v2020_v14 = vsel %vm2001_vm6, %v2017_v18, %v2019_v29  ;;  %v2928_v18 = vshrl.u32 %v5475_v45, 16 }
 0x240   : > { %4303 = vmatmul.msk.bf16.gmra.mxu3 %vm562_vm2, %v2926_v35  ;;  %v2933_v24 = vrot.slane %v2931_v39, 3  ;;  %v3254_v39 = vrot.slane %v5423_v13, 3 }
 0x241   : > { %v5460_v63 = vadd.f32 %v1950_v50, %v1579_v47  ;;  %v3253_v50 = vsel %vm3234_vm7, %v3250_v8, %v3252_v6  ;;  %v2930_v47 = vrot.slane %v2928_v18, 2 }
 0x243   : > { %6155 = vst [vmem:[#allocation16_spill] sm:$0xff] %v5460_v63  ;;  %v5469_v27 = vpop.f32.mrf.mxu3 }
 0x244   : > { %v1130_v4 = vpop.f32.mrf.mxu2 }
 0x246   : > { %v2118_v22 = vpop.f32.mrf.mxu1 }
 0x247   : > { %v3351_v32 = vpop.f32.mrf.mxu0  ;;  %v2222_v41 = vadd.f32 %v2118_v22, %v4909_v37  ;;  %v5488_v37 = vld [vmem:[%s6109_s2] ss:$0 sm:$0xff]  ;;  %v2934_v22 = vor.u32 %v2933_v24, %v2930_v47 }
 0x248   : > { %v3627_v24 = vld [vmem:[%s5508_s26] sm:$0xff] }
 0x249   : > { %4097 = vmatmul.msk.bf16.gmra.mxu1 %vm562_vm2, %v2020_v14  ;;  %4199 = vmatmul.msk.bf16.gmra.mxu2 %vm562_vm2, %v2427_v33  ;;  %v5495_v33 = vld [vmem:[%s6110_s3] ss:$0 sm:$0xff] }
 0x24a   : > { %4323 = vmatmul.msk.bf16.gmra.mxu0 %vm562_vm2, %v3253_v50  ;;  %v5498_v50 = vld [vmem:[%s4534_s6 + $0x58] sm:$0xff] }
 0x24b   : > { %v5490_v4 = vpop.f32.mrf.mxu3 }
 0x24c   : > { %v2525_v61 = vpop.f32.mrf.mxu2 }
 0x24d   : > { %v2629_v44 = vadd.f32 %v2525_v61, %v2222_v41  ;;  %v6114_v41 = vrot.slane %v5498_v50, 2  ;;  %v2935_v61 = vsel %vm2819_vm5, %v2925_v38, %v2934_v22 }
 0x24e   : > { %v2120_v8 = vpop.f32.mrf.mxu1 }
 0x24f   : > { %v3187_v16 = vadd.f32 %v5415_v42, %v2629_v44  ;;  %v3353_v35 = vpop.f32.mrf.mxu0  ;;  %v2223_v18 = vadd.f32 %v2120_v8, %v4922_v3  ;;  %v2022_v42 = vsel %vm2001_vm6, %v2019_v29, %v6114_v41 }
 0x250   : > { %4304 = vmatmul.msk.bf16.gmra.mxu3 %vm562_vm2, %v2935_v61  ;;  %v3255_v61 = vsel %vm3234_vm7, %v3252_v6, %v3254_v39 }
 0x251   : > { %v3455_v14 = vadd.f32 %v3351_v32, %v3187_v16 }
 0x253   : > { %v3500_v32 = vmul.f32 %v5488_v37, %v3455_v14  ;;  %v6156_v14 = vrot.slane %v5481_v23, 2  ;;  %v5524_v10 = vpop.f32.mrf.mxu3 }
 0x254   : > { %v2527_v44 = vpop.f32.mrf.mxu2 }
 0x255   : > { %v3545_v47 = vadd.f32 %v5495_v33, %v3500_v32  ;;  %v2630_v38 = vadd.f32 %v2527_v44, %v2223_v18  ;;  %v2429_v63 = vsel %vm2001_vm6, %v2426_v36, %v6156_v14 }
 0x256   : > { %v2123_v16 = vpop.f32.mrf.mxu1 }
 0x257   : > { %v3586_v3 = vmax.f32 %v3545_v47, 0.0  ;;  %v3188_v13 = vadd.f32 %v5430_v19, %v2630_v38  ;;  %v3356_v8 = vpop.f32.mrf.mxu0  ;;  %v5537_v19 = vld [vmem:[%s4534_s6 + $0x78] sm:$0xff]  ;;  %v2224_v32 = vadd.f32 %v2123_v16, %v4933_v52 }
 0x258   : > { %v2937_v44 = vshrl.u32 %v5537_v19, 16 }
 0x259   : > { %v3668_v29 = vadd.f32 %v3627_v24, %v3586_v3  ;;  %v3456_v36 = vadd.f32 %v3353_v35, %v3188_v13  ;;  %4098 = vmatmul.msk.bf16.gmra.mxu1 %vm562_vm2, %v2022_v42  ;;  %4200 = vmatmul.msk.bf16.gmra.mxu2 %vm562_vm2, %v2429_v63  ;;  %v2940_v35 = vshll.u32 %v5537_v19, 16  ;;  %v3628_v63 = vld [vmem:[%s5508_s26 + $0x8] sm:$0xff] }
 0x25a   : > { %4324 = vmatmul.msk.bf16.gmra.mxu0 %vm562_vm2, %v3255_v61  ;;  %v5548_v24 = vld [vmem:[%s4534_s6 + $0x68] sm:$0xff]  ;;  %v2939_v14 = vrot.slane %v2937_v44, 2 }
 0x25b   : > { %3710 = vst.msk [vmem:[%s5531_s29] sm:$0xff] %vm3709_vm8, %v3668_v29  ;;  %v3501_v6 = vmul.f32 %v5488_v37, %v3456_v36  ;;  %v2942_v3 = vrot.slane %v2940_v35, 3  ;;  %v5551_v16 = vpop.f32.mrf.mxu3  ;;  %v3256_v35 = vrot.slane %v5451_v58, 3 }
 0x25c   : > { %v2530_v18 = vpop.f32.mrf.mxu2 }
 0x25d   : > { %v3546_v42 = vadd.f32 %v5495_v33, %v3501_v6  ;;  %v2631_v47 = vadd.f32 %v2530_v18, %v2224_v32  ;;  %v2943_v29 = vor.u32 %v2942_v3, %v2939_v14  ;;  %v2023_v6 = vrot.slane %v5554_v62, 2  ;;  %v3629_v62 = vld [vmem:[%s5508_s26 + $0x10] sm:$0xff] }
 0x25e   : > { %v2125_v38 = vpop.f32.mrf.mxu1  ;;  %v2430_v32 = vrot.slane %v5548_v24, 2  ;;  %v3257_v3 = vsel %vm3234_vm7, %v3254_v39, %v3256_v35 }
 0x25f   : > { %v3587_v13 = vmax.f32 %v3546_v42, 0.0  ;;  %v3189_v61 = vadd.f32 %v5443_v21, %v2631_v47  ;;  %v3358_v52 = vpop.f32.mrf.mxu0  ;;  %v2944_v18 = vsel %vm2819_vm5, %v2934_v22, %v2943_v29  ;;  %v2225_v21 = vadd.f32 %v2125_v38, %v4947_v30 }
 0x260   : > { %4305 = vmatmul.msk.bf16.gmra.mxu3 %vm562_vm2, %v2944_v18  ;;  %v6157_v22 = vrot.slane %v5498_v50, 2 }
 0x261   : > { %v3669_v36 = vadd.f32 %v3628_v63, %v3587_v13  ;;  %v3457_v41 = vadd.f32 %v3356_v8, %v3189_v61 }
 0x262   : > { %v2024_v24 = vsel %vm2001_vm6, %v6157_v22, %v2023_v6 }
 0x263   : > { %3711 = vst.msk [vmem:[%s5531_s29 + $0x8] sm:$0xff] %vm3709_vm8, %v3669_v36  ;;  %v3502_v44 = vmul.f32 %v5488_v37, %v3457_v41  ;;  %v6158_v41 = vrot.slane %v5481_v23, 2  ;;  %v5575_v13 = vpop.f32.mrf.mxu3  ;;  %v5581_v23 = vld [vmem:[%s4534_s6 + $0x80] sm:$0xff] }
 0x264   : > { %v2532_v42 = vpop.f32.mrf.mxu2  ;;  %v2946_v18 = vshrl.u32 %v5581_v23, 16 }
 0x265   : > { %v3547_v8 = vadd.f32 %v5495_v33, %v3502_v44  ;;  %v2632_v47 = vadd.f32 %v2532_v42, %v2225_v21  ;;  %v2431_v30 = vsel %vm2001_vm6, %v6158_v41, %v2430_v32  ;;  %v3630_v42 = vld [vmem:[%s5508_s26 + $0x18] sm:$0xff] }
 0x266   : > { %v2128_v63 = vpop.f32.mrf.mxu1 }
 0x267   : > { %v3588_v38 = vmax.f32 %v3547_v8, 0.0  ;;  %v3190_v58 = vadd.f32 %v5458_v5, %v2632_v47  ;;  %v3361_v14 = vpop.f32.mrf.mxu0  ;;  %v2226_v50 = vadd.f32 %v2128_v63, %v4960_v15  ;;  %v5592_v47 = vld [vmem:[%s4534_s6 + $0x70] sm:$0xff] }
 0x269   : > { %v3670_v61 = vadd.f32 %v3629_v62, %v3588_v38  ;;  %v3458_v36 = vadd.f32 %v3358_v52, %v3190_v58  ;;  %4099 = vmatmul.msk.bf16.gmra.mxu1 %vm562_vm2, %v2024_v24  ;;  %4201 = vmatmul.msk.bf16.gmra.mxu2 %vm562_vm2, %v2431_v30  ;;  %v2949_v52 = vshll.u32 %v5581_v23, 16  ;;  %v2948_v62 = vrot.slane %v2946_v18, 2 }
 0x26a   : > { %4325 = vmatmul.msk.bf16.gmra.mxu0 %vm562_vm2, %v3257_v3  ;;  %v5598_v3 = vld [vmem:[%s4534_s6 + $0x68] sm:$0xff] }
 0x26b   : > { %3712 = vst.msk [vmem:[%s5531_s29 + $0x10] sm:$0xff] %vm3709_vm8, %v3670_v61  ;;  %v3503_v5 = vmul.f32 %v5488_v37, %v3458_v36  ;;  %v2951_v22 = vrot.slane %v2949_v52, 3  ;;  %v5595_v63 = vpop.f32.mrf.mxu3  ;;  %v2025_v61 = vrot.slane %v5598_v3, 2  ;;  %v2432_v36 = vrot.slane %v5592_v47, 2  ;;  %v3632_v3 = vld [vmem:[%s5508_s26 + $0x28] sm:$0xff] }
 0x26c   : > { %v2535_v39 = vpop.f32.mrf.mxu2 }
 0x26d   : > { %v3548_v44 = vadd.f32 %v5495_v33, %v3503_v5  ;;  %v2633_v21 = vadd.f32 %v2535_v39, %v2226_v50  ;;  %v2952_v30 = vor.u32 %v2951_v22, %v2948_v62  ;;  %v3258_v39 = vrot.slane %v5475_v45, 3 }
 0x26e   : > { %v2130_v8 = vpop.f32.mrf.mxu1 }
 0x26f   : > { %v3589_v24 = vmax.f32 %v3548_v44, 0.0  ;;  %v3191_v41 = vadd.f32 %v5469_v27, %v2633_v21  ;;  %v3363_v15 = vpop.f32.mrf.mxu0  ;;  %v2953_v5 = vsel %vm2819_vm5, %v2943_v29, %v2952_v30  ;;  %v2227_v27 = vadd.f32 %v2130_v8, %v4974_v56  ;;  %v3631_v44 = vld [vmem:[%s5508_s26 + $0x20] sm:$0xff] }
 0x270   : > { %4306 = vmatmul.msk.bf16.gmra.mxu3 %vm562_vm2, %v2953_v5  ;;  %v2026_v29 = vsel %vm2001_vm6, %v2023_v6, %v2025_v61  ;;  %v3259_v45 = vsel %vm3234_vm7, %v3256_v35, %v3258_v39  ;;  %v5621_v6 = vld [vmem:[%s4534_s6 + $0x88] sm:$0xff] }
 0x271   : > { %v3671_v38 = vadd.f32 %v3630_v42, %v3589_v24  ;;  %v3459_v58 = vadd.f32 %v3361_v14, %v3191_v41  ;;  %v2433_v42 = vsel %vm2001_vm6, %v2430_v32, %v2432_v36  ;;  %v2955_v41 = vshrl.u32 %v5621_v6, 16 }
 0x273   : > { %3713 = vst.msk [vmem:[%s5531_s29 + $0x18] sm:$0xff] %vm3709_vm8, %v3671_v38  ;;  %v3504_v50 = vmul.f32 %v5488_v37, %v3459_v58  ;;  %v5615_v8 = vpop.f32.mrf.mxu3 }
 0x274   : > { %v2537_v18 = vpop.f32.mrf.mxu2 }
 0x275   : > { %v3549_v14 = vadd.f32 %v5495_v33, %v3504_v50  ;;  %v2634_v52 = vadd.f32 %v2537_v18, %v2227_v27  ;;  %v5632_v50 = vld [vmem:[%s4534_s6 + $0x78] sm:$0xff]  ;;  %v2957_v27 = vrot.slane %v2955_v41, 2  ;;  %v3633_v41 = vld [vmem:[%s5508_s26 + $0x30] sm:$0xff] }
 0x276   : > { %v2133_v21 = vpop.f32.mrf.mxu1 }
 0x277   : > { %v3590_v47 = vmax.f32 %v3549_v14, 0.0  ;;  %v3192_v62 = vadd.f32 %v5490_v4, %v2634_v52  ;;  %v3366_v56 = vpop.f32.mrf.mxu0  ;;  %v2228_v32 = vadd.f32 %v2133_v21, %v4987_v26 }
 0x279   : > { %v3672_v22 = vadd.f32 %v3631_v44, %v3590_v47  ;;  %v3460_v24 = vadd.f32 %v3363_v15, %v3192_v62  ;;  %4100 = vmatmul.msk.bf16.gmra.mxu1 %vm562_vm2, %v2026_v29  ;;  %4202 = vmatmul.msk.bf16.gmra.mxu2 %vm562_vm2, %v2433_v42  ;;  %v2958_v15 = vshll.u32 %v5621_v6, 16  ;;  %v5638_v47 = vld [vmem:[%s4534_s6 + $0x70] sm:$0xff] }
 0x27a   : > { %4326 = vmatmul.msk.bf16.gmra.mxu0 %vm562_vm2, %v3259_v45  ;;  %v2027_v62 = vrot.slane %v5638_v47, 2  ;;  %v2434_v45 = vrot.slane %v5632_v50, 2  ;;  %v5672_v47 = vld [vmem:[%s4534_s6 + $0x80] sm:$0xff] }
 0x27b   : > { %3714 = vst.msk [vmem:[%s5531_s29 + $0x20] sm:$0xff] %vm3709_vm8, %v3672_v22  ;;  %v3505_v4 = vmul.f32 %v5488_v37, %v3460_v24  ;;  %v2960_v18 = vrot.slane %v2958_v15, 3  ;;  %v5635_v44 = vpop.f32.mrf.mxu3 }
 0x27c   : > { %v2540_v35 = vpop.f32.mrf.mxu2 }
 0x27d   : > { %v3550_v38 = vadd.f32 %v5495_v33, %v3505_v4  ;;  %v2635_v58 = vadd.f32 %v2540_v35, %v2228_v32  ;;  %v2961_v21 = vor.u32 %v2960_v18, %v2957_v27  ;;  %v3260_v4 = vrot.slane %v5537_v19, 3 }
 0x27e   : > { %v2135_v5 = vpop.f32.mrf.mxu1 }
 0x27f   : > { %v3591_v14 = vmax.f32 %v3550_v38, 0.0  ;;  %v3193_v52 = vadd.f32 %v5524_v10, %v2635_v58  ;;  %v3368_v26 = vpop.f32.mrf.mxu0  ;;  %v2962_v22 = vsel %vm2819_vm5, %v2952_v30, %v2961_v21  ;;  %v2229_v10 = vadd.f32 %v2135_v5, %v5001_v11 }
 0x280   : > { %4307 = vmatmul.msk.bf16.gmra.mxu3 %vm562_vm2, %v2962_v22  ;;  %v2028_v30 = vsel %vm2001_vm6, %v2025_v61, %v2027_v62  ;;  %v2435_v38 = vsel %vm2001_vm6, %v2432_v36, %v2434_v45  ;;  %v3261_v19 = vsel %vm3234_vm7, %v3258_v39, %v3260_v4  ;;  %v5661_v61 = vld [vmem:[%s4534_s6 + $0x90] sm:$0xff] }
 0x281   : > { %v3673_v29 = vadd.f32 %v3632_v3, %v3591_v14  ;;  %v3461_v42 = vadd.f32 %v3366_v56, %v3193_v52  ;;  %v2964_v18 = vshrl.u32 %v5661_v61, 16  ;;  %v2967_v14 = vshll.u32 %v5661_v61, 16 }
 0x283   : > { %3715 = vst.msk [vmem:[%s5531_s29 + $0x28] sm:$0xff] %vm3709_vm8, %v3673_v29  ;;  %v3506_v24 = vmul.f32 %v5488_v37, %v3461_v42  ;;  %v5655_v5 = vpop.f32.mrf.mxu3  ;;  %v3634_v29 = vld [vmem:[%s5508_s26 + $0x38] sm:$0xff]  ;;  %v2966_v22 = vrot.slane %v2964_v18, 2 }
 0x284   : > { %v2542_v32 = vpop.f32.mrf.mxu2 }
 0x285   : > { %v3551_v56 = vadd.f32 %v5495_v33, %v3506_v24  ;;  %v2636_v35 = vadd.f32 %v2542_v32, %v2229_v10  ;;  %v2969_v24 = vrot.slane %v2967_v14, 3 }
 0x286   : > { %v2138_v15 = vpop.f32.mrf.mxu1 }
 0x287   : > { %v3592_v58 = vmax.f32 %v3551_v56, 0.0  ;;  %v3194_v3 = vadd.f32 %v5551_v16, %v2636_v35  ;;  %v3371_v11 = vpop.f32.mrf.mxu0  ;;  %v2230_v36 = vadd.f32 %v2138_v15, %v5014_v59  ;;  %v2970_v35 = vor.u32 %v2969_v24, %v2966_v22 }
 0x289   : > { %v3674_v50 = vadd.f32 %v3633_v41, %v3592_v58  ;;  %v3462_v27 = vadd.f32 %v3368_v26, %v3194_v3  ;;  %4101 = vmatmul.msk.bf16.gmra.mxu1 %vm562_vm2, %v2028_v30  ;;  %4203 = vmatmul.msk.bf16.gmra.mxu2 %vm562_vm2, %v2435_v38  ;;  %v5678_v30 = vld [vmem:[%s4534_s6 + $0x78] sm:$0xff]  ;;  %v2436_v58 = vrot.slane %v5672_v47, 2  ;;  %v2971_v3 = vsel %vm2819_vm5, %v2961_v21, %v2970_v35 }
 0x28a   : > { %4327 = vmatmul.msk.bf16.gmra.mxu0 %vm562_vm2, %v3261_v19  ;;  %v2029_v38 = vrot.slane %v5678_v30, 2 }
 0x28b   : > { %3716 = vst.msk [vmem:[%s5531_s29 + $0x30] sm:$0xff] %vm3709_vm8, %v3674_v50  ;;  %v3507_v16 = vmul.f32 %v5488_v37, %v3462_v27  ;;  %v5675_v56 = vpop.f32.mrf.mxu3  ;;  %v3262_v50 = vrot.slane %v5581_v23, 3  ;;  %v2437_v18 = vsel %vm2001_vm6, %v2434_v45, %v2436_v58 }
 0x28c   : > { %v2545_v39 = vpop.f32.mrf.mxu2  ;;  %v2030_v21 = vsel %vm2001_vm6, %v2027_v62, %v2029_v38  ;;  %v5701_v62 = vld [vmem:[%s4534_s6 + $0x98] sm:$0xff] }
 0x28d   : > { %v3552_v52 = vadd.f32 %v5495_v33, %v3507_v16  ;;  %v2637_v26 = vadd.f32 %v2545_v39, %v2230_v36  ;;  %v3635_v36 = vld [vmem:[%s5508_s26 + $0x40] sm:$0xff]  ;;  %v3263_v23 = vsel %vm3234_vm7, %v3260_v4, %v3262_v50  ;;  %v2973_v47 = vshrl.u32 %v5701_v62, 16 }
 0x28e   : > { %v2140_v42 = vpop.f32.mrf.mxu1  ;;  %v2976_v22 = vshll.u32 %v5701_v62, 16 }
 0x28f   : > { %v3593_v10 = vmax.f32 %v3552_v52, 0.0  ;;  %v3195_v32 = vadd.f32 %v5575_v13, %v2637_v26  ;;  %v3373_v59 = vpop.f32.mrf.mxu0  ;;  %v2231_v13 = vadd.f32 %v2140_v42, %v5028_v43 }
 0x290   : > { %4308 = vmatmul.msk.bf16.gmra.mxu3 %vm562_vm2, %v2971_v3  ;;  %v2978_v30 = vrot.slane %v2976_v22, 3 }
 0x291   : > { %v3675_v41 = vadd.f32 %v3634_v29, %v3593_v10  ;;  %v3463_v15 = vadd.f32 %v3371_v11, %v3195_v32  ;;  %v3636_v32 = vld [vmem:[%s5508_s26 + $0x48] sm:$0xff] }
 0x293   : > { %3717 = vst.msk [vmem:[%s5531_s29 + $0x38] sm:$0xff] %vm3709_vm8, %v3675_v41  ;;  %v3508_v19 = vmul.f32 %v5488_v37, %v3463_v15  ;;  %v5695_v26 = vpop.f32.mrf.mxu3  ;;  %v5712_v41 = vld [vmem:[%s4534_s6 + $0x88] sm:$0xff]  ;;  %v2975_v15 = vrot.slane %v2973_v47, 2 }
 0x294   : > { %v2547_v27 = vpop.f32.mrf.mxu2 }
 0x295   : > { %v3553_v11 = vadd.f32 %v5495_v33, %v3508_v19  ;;  %v2638_v16 = vadd.f32 %v2547_v27, %v2231_v13  ;;  %v2979_v27 = vor.u32 %v2978_v30, %v2975_v15  ;;  %v3638_v30 = vld [vmem:[%s5508_s26 + $0x58] sm:$0xff] }
 0x296   : > { %v2143_v39 = vpop.f32.mrf.mxu1 }
 0x297   : > { %v3594_v14 = vmax.f32 %v3553_v11, 0.0  ;;  %v3196_v52 = vadd.f32 %v5595_v63, %v2638_v16  ;;  %v3376_v43 = vpop.f32.mrf.mxu0  ;;  %v2232_v45 = vadd.f32 %v2143_v39, %v5041_v60 }
 0x299   : > { %v3676_v29 = vadd.f32 %v3635_v36, %v3594_v14  ;;  %v3464_v42 = vadd.f32 %v3373_v59, %v3196_v52  ;;  %4102 = vmatmul.msk.bf16.gmra.mxu1 %vm562_vm2, %v2030_v21  ;;  %4204 = vmatmul.msk.bf16.gmra.mxu2 %vm562_vm2, %v2437_v18  ;;  %v5718_v36 = vld [vmem:[%s4534_s6 + $0x80] sm:$0xff]  ;;  %v2438_v21 = vrot.slane %v5712_v41, 2  ;;  %v2980_v18 = vsel %vm2819_vm5, %v2970_v35, %v2979_v27 }
 0x29a   : > { %4328 = vmatmul.msk.bf16.gmra.mxu0 %vm562_vm2, %v3263_v23  ;;  %v2031_v39 = vrot.slane %v5718_v36, 2  ;;  %v3264_v52 = vrot.slane %v5621_v6, 3 }
 0x29b   : > { %3718 = vst.msk [vmem:[%s5531_s29 + $0x40] sm:$0xff] %vm3709_vm8, %v3676_v29  ;;  %v3509_v63 = vmul.f32 %v5488_v37, %v3464_v42  ;;  %v5715_v13 = vpop.f32.mrf.mxu3  ;;  %v3637_v42 = vld [vmem:[%s5508_s26 + $0x50] sm:$0xff] }
 0x29c   : > { %v2550_v4 = vpop.f32.mrf.mxu2  ;;  %v2032_v35 = vsel %vm2001_vm6, %v2029_v38, %v2031_v39  ;;  %v3265_v6 = vsel %vm3234_vm7, %v3262_v50, %v3264_v52  ;;  %v5741_v38 = vld [vmem:[%s4534_s6 + $0xa0] sm:$0xff] }
 0x29d   : > { %v3554_v24 = vadd.f32 %v5495_v33, %v3509_v63  ;;  %v2639_v10 = vadd.f32 %v2550_v4, %v2232_v45  ;;  %v2439_v45 = vsel %vm2001_vm6, %v2436_v58, %v2438_v21 }
 0x29e   : > { %v2145_v59 = vpop.f32.mrf.mxu1 }
 0x29f   : > { %v3595_v3 = vmax.f32 %v3554_v24, 0.0  ;;  %v3197_v19 = vadd.f32 %v5615_v8, %v2639_v10  ;;  %v3378_v60 = vpop.f32.mrf.mxu0  ;;  %v2233_v8 = vadd.f32 %v2145_v59, %v5055_v48  ;;  %v2985_v59 = vshll.u32 %v5741_v38, 16 }
 0x2a0   : > { %4309 = vmatmul.msk.bf16.gmra.mxu3 %vm562_vm2, %v2980_v18 }
 0x2a1   : > { %v3677_v11 = vadd.f32 %v3636_v32, %v3595_v3  ;;  %v3465_v16 = vadd.f32 %v3376_v43, %v3197_v19  ;;  %v2982_v32 = vshrl.u32 %v5741_v38, 16  ;;  %v5752_v19 = vld [vmem:[%s4534_s6 + $0x90] sm:$0xff] }
 0x2a3   : > { %3719 = vst.msk [vmem:[%s5531_s29 + $0x48] sm:$0xff] %vm3709_vm8, %v3677_v11  ;;  %v3510_v14 = vmul.f32 %v5488_v37, %v3465_v16  ;;  %v5735_v22 = vpop.f32.mrf.mxu3  ;;  %v2987_v11 = vrot.slane %v2985_v59, 3 }
 0x2a4   : > { %v2552_v23 = vpop.f32.mrf.mxu2 }
 0x2a5   : > { %v3555_v43 = vadd.f32 %v5495_v33, %v3510_v14  ;;  %v2640_v29 = vadd.f32 %v2552_v23, %v2233_v8 }
 0x2a6   : > { %v2148_v63 = vpop.f32.mrf.mxu1 }
 0x2a7   : > { %v3596_v4 = vmax.f32 %v3555_v43, 0.0  ;;  %v3198_v47 = vadd.f32 %v5635_v44, %v2640_v29  ;;  %v3381_v48 = vpop.f32.mrf.mxu0  ;;  %v2234_v58 = vadd.f32 %v2148_v63, %v5068_v57  ;;  %v5758_v43 = vld [vmem:[%s4534_s6 + $0x88] sm:$0xff] }
 0x2a8   : > { %v2033_v29 = vrot.slane %v5758_v43, 2 }
 0x2a9   : > { %v3678_v24 = vadd.f32 %v3637_v42, %v3596_v4  ;;  %v3466_v10 = vadd.f32 %v3378_v60, %v3198_v47  ;;  %4103 = vmatmul.msk.bf16.gmra.mxu1 %vm562_vm2, %v2032_v35  ;;  %4205 = vmatmul.msk.bf16.gmra.mxu2 %vm562_vm2, %v2439_v45  ;;  %v2984_v60 = vrot.slane %v2982_v32, 2  ;;  %v2440_v42 = vrot.slane %v5752_v19, 2  ;;  %v3640_v19 = vld [vmem:[%s5508_s26 + $0x68] sm:$0xff] }
 0x2aa   : > { %4329 = vmatmul.msk.bf16.gmra.mxu0 %vm562_vm2, %v3265_v6  ;;  %v3266_v45 = vrot.slane %v5661_v61, 3  ;;  %v3639_v6 = vld [vmem:[%s5508_s26 + $0x60] sm:$0xff] }
 0x2ab   : > { %3720 = vst.msk [vmem:[%s5531_s29 + $0x50] sm:$0xff] %vm3709_vm8, %v3678_v24  ;;  %v3511_v44 = vmul.f32 %v5488_v37, %v3466_v10  ;;  %v5755_v18 = vpop.f32.mrf.mxu3  ;;  %v2988_v14 = vor.u32 %v2987_v11, %v2984_v60  ;;  %v2441_v10 = vsel %vm2001_vm6, %v2438_v21, %v2440_v42  ;;  %v5792_v11 = vld [vmem:[%s4534_s6 + $0x98] sm:$0xff] }
 0x2ac   : > { %v2555_v50 = vpop.f32.mrf.mxu2  ;;  %v3267_v61 = vsel %vm3234_vm7, %v3264_v52, %v3266_v45 }
 0x2ad   : > { %v3556_v41 = vadd.f32 %v5495_v33, %v3511_v44  ;;  %v2641_v15 = vadd.f32 %v2555_v50, %v2234_v58  ;;  %v2989_v63 = vsel %vm2819_vm5, %v2979_v27, %v2988_v14  ;;  %v2034_v27 = vsel %vm2001_vm6, %v2031_v39, %v2033_v29  ;;  %v5781_v39 = vld [vmem:[%s4534_s6 + $0xa8] sm:$0xff] }
 0x2ae   : > { %v2150_v3 = vpop.f32.mrf.mxu1 }
 0x2af   : > { %v3597_v16 = vmax.f32 %v3556_v41, 0.0  ;;  %v3199_v36 = vadd.f32 %v5655_v5, %v2641_v15  ;;  %v3383_v57 = vpop.f32.mrf.mxu0  ;;  %v2235_v5 = vadd.f32 %v2150_v3, %v5082_v1  ;;  %v2991_v41 = vshrl.u32 %v5781_v39, 16 }
 0x2b0   : > { %4310 = vmatmul.msk.bf16.gmra.mxu3 %vm562_vm2, %v2989_v63  ;;  %v2994_v15 = vshll.u32 %v5781_v39, 16 }
 0x2b1   : > { %v3679_v8 = vadd.f32 %v3638_v30, %v3597_v16  ;;  %v3467_v23 = vadd.f32 %v3381_v48, %v3199_v36  ;;  %v2993_v16 = vrot.slane %v2991_v41, 2  ;;  %v4415_v41 = vld [vmem:[%s4534_s6 + $0xb0] sm:$0x10] }
 0x2b2   : > { %v2996_v36 = vrot.slane %v2994_v15, 3 }
 0x2b3   : > { %3721 = vst.msk [vmem:[%s5531_s29 + $0x58] sm:$0xff] %vm3709_vm8, %v3679_v8  ;;  %v3512_v35 = vmul.f32 %v5488_v37, %v3467_v23  ;;  %v5775_v50 = vpop.f32.mrf.mxu3 }
 0x2b4   : > { %v2557_v4 = vpop.f32.mrf.mxu2  ;;  %v2997_v43 = vor.u32 %v2996_v36, %v2993_v16  ;;  %v3642_v16 = vld [vmem:[%s5508_s26 + $0x78] sm:$0xff] }
 0x2b5   : > { %v3557_v47 = vadd.f32 %v5495_v33, %v3512_v35  ;;  %v2642_v48 = vadd.f32 %v2557_v4, %v2235_v5  ;;  %v5798_v5 = vld [vmem:[%s4534_s6 + $0x90] sm:$0xff] }
 0x2b6   : > { %v2153_v24 = vpop.f32.mrf.mxu1  ;;  %v2035_v4 = vrot.slane %v5798_v5, 2 }
 0x2b7   : > { %v3598_v44 = vmax.f32 %v3557_v47, 0.0  ;;  %v3200_v58 = vadd.f32 %v5675_v56, %v2642_v48  ;;  %v3386_v1 = vpop.f32.mrf.mxu0  ;;  %v2236_v21 = vadd.f32 %v2153_v24, %v5095_v17  ;;  %v2442_v47 = vrot.slane %v5792_v11, 2 }
 0x2b8   : > { %v2998_v48 = vsel %vm2819_vm5, %v2988_v14, %v2997_v43  ;;  %v3268_v24 = vrot.slane %v5701_v62, 3  ;;  %v2036_v14 = vsel %vm2001_vm6, %v2033_v29, %v2035_v4  ;;  %v4291_v29 = vld [vmem:[%s4534_s6 + $0xb0] sm:$0xf] }
 0x2b9   : > { %v3680_v32 = vadd.f32 %v3639_v6, %v3598_v44  ;;  %v3468_v59 = vadd.f32 %v3383_v57, %v3200_v58  ;;  %4104 = vmatmul.msk.bf16.gmra.mxu1 %vm562_vm2, %v2034_v27  ;;  %4206 = vmatmul.msk.bf16.gmra.mxu2 %vm562_vm2, %v2441_v10  ;;  %v3641_v58 = vld [vmem:[%s5508_s26 + $0x70] sm:$0xff] }
 0x2ba   : > { %4330 = vmatmul.msk.bf16.gmra.mxu0 %vm562_vm2, %v3267_v61 }
 0x2bb   : > { %3722 = vst.msk [vmem:[%s5531_s29 + $0x60] sm:$0xff] %vm3709_vm8, %v3680_v32  ;;  %v3513_v56 = vmul.f32 %v5488_v37, %v3468_v59  ;;  %v5795_v23 = vpop.f32.mrf.mxu3  ;;  %v3269_v59 = vsel %vm3234_vm7, %v3266_v45, %v3268_v24 }
 0x2bc   : > { %v2560_v52 = vpop.f32.mrf.mxu2 }
 0x2bd   : > { %v3558_v30 = vadd.f32 %v5495_v33, %v3513_v56  ;;  %v2643_v3 = vadd.f32 %v2560_v52, %v2236_v21 }
 0x2be   : > { %v2155_v60 = vpop.f32.mrf.mxu1 }
 0x2bf   : > { %v3599_v57 = vmax.f32 %v3558_v30, 0.0  ;;  %v3201_v8 = vadd.f32 %v5695_v26, %v2643_v3  ;;  %v3388_v17 = vpop.f32.mrf.mxu0  ;;  %v2237_v26 = vadd.f32 %v2155_v60, %v5109_v25  ;;  %v2443_v25 = vsel %vm2001_vm6, %v2440_v42, %v2442_v47 }
 0x2c0   : > { %4311 = vmatmul.msk.bf16.gmra.mxu3 %vm562_vm2, %v2998_v48  ;;  %v5826_v42 = vor.u32 %v4415_v41, %v4291_v29 }
 0x2c1   : > { %v3681_v63 = vadd.f32 %v3640_v19, %v3599_v57  ;;  %v3469_v35 = vadd.f32 %v3386_v1, %v3201_v8  ;;  %v5837_v57 = vld [vmem:[%s4534_s6 + $0xa0] sm:$0xff] }
 0x2c2   : > { %v3000_v30 = vshrl.u32 %v5826_v42, 16  ;;  %v3003_v3 = vshll.u32 %v5826_v42, 16 }
 0x2c3   : > { %3723 = vst.msk [vmem:[%s5531_s29 + $0x68] sm:$0xff] %vm3709_vm8, %v3681_v63  ;;  %v3514_v6 = vmul.f32 %v5488_v37, %v3469_v35  ;;  %v5819_v56 = vpop.f32.mrf.mxu3 }
 0x2c4   : > { %v2562_v27 = vpop.f32.mrf.mxu2  ;;  %v3002_v8 = vrot.slane %v3000_v30, 2 }
 0x2c5   : > { %v3559_v10 = vadd.f32 %v5495_v33, %v3514_v6  ;;  %v2644_v44 = vadd.f32 %v2562_v27, %v2237_v26 }
 0x2c6   : > { %v2158_v1 = vpop.f32.mrf.mxu1 }
 0x2c7   : > { %v3600_v62 = vmax.f32 %v3559_v10, 0.0  ;;  %v3202_v61 = vadd.f32 %v5715_v13, %v2644_v44  ;;  %v3391_v32 = vpop.f32.mrf.mxu0  ;;  %v2238_v45 = vadd.f32 %v2158_v1, %v5119_v12  ;;  %v4462_v10 = vld [vmem:[%s4534_s6 + $0x98] sm:$0xff] }
 0x2c8   : > { %v2037_v44 = vrot.slane %v4462_v10, 2 }
 0x2c9   : > { %v3682_v21 = vadd.f32 %v3641_v58, %v3600_v62  ;;  %v3470_v52 = vadd.f32 %v3388_v17, %v3202_v61  ;;  %4105 = vmatmul.msk.bf16.gmra.mxu1 %vm562_vm2, %v2036_v14  ;;  %4207 = vmatmul.msk.bf16.gmra.mxu2 %vm562_vm2, %v2443_v25  ;;  %v3005_v17 = vrot.slane %v3003_v3, 3  ;;  %v2444_v58 = vrot.slane %v5837_v57, 2  ;;  %v5873_v3 = vld [vmem:[%s4534_s6 + $0xa8] sm:$0xff] }
 0x2ca   : > { %4331 = vmatmul.msk.bf16.gmra.mxu0 %vm562_vm2, %v3269_v59  ;;  %v3643_v59 = vld [vmem:[%s5508_s26 + $0x80] sm:$0xff] }
 0x2cb   : > { %3724 = vst.msk [vmem:[%s5531_s29 + $0x70] sm:$0xff] %vm3709_vm8, %v3682_v21  ;;  %v3515_v13 = vmul.f32 %v5488_v37, %v3470_v52  ;;  %v5840_v48 = vpop.f32.mrf.mxu3  ;;  %v3006_v6 = vor.u32 %v3005_v17, %v3002_v8  ;;  %v2445_v52 = vsel %vm2001_vm6, %v2442_v47, %v2444_v58  ;;  %v4463_v17 = vld [vmem:[%s4534_s6 + $0xa0] sm:$0xff] }
 0x2cc   : > { %v2565_v15 = vpop.f32.mrf.mxu2 }
 0x2cd   : > { %v3560_v19 = vadd.f32 %v5495_v33, %v3515_v13  ;;  %v2645_v60 = vadd.f32 %v2565_v15, %v2238_v45  ;;  %v3007_v1 = vsel %vm2819_vm5, %v2997_v43, %v3006_v6  ;;  %v2038_v43 = vsel %vm2001_vm6, %v2035_v4, %v2037_v44 }
 0x2ce   : > { %v2160_v36 = vpop.f32.mrf.mxu1 }
 0x2cf   : > { %v3601_v63 = vmax.f32 %v3560_v19, 0.0  ;;  %v3203_v35 = vadd.f32 %v5735_v22, %v2645_v60  ;;  %v3393_v12 = vpop.f32.mrf.mxu0  ;;  %v2239_v25 = vadd.f32 %v2160_v36, %v5133_v54  ;;  %v3270_v22 = vrot.slane %v5741_v38, 3 }
 0x2d0   : > { %4312 = vmatmul.msk.bf16.gmra.mxu3 %vm562_vm2, %v3007_v1  ;;  %v3645_v1 = vld [vmem:[%s5508_s26 + $0x90] sm:$0xff] }
 0x2d1   : > { %v3683_v26 = vadd.f32 %v3642_v16, %v3601_v63  ;;  %v3471_v27 = vadd.f32 %v3391_v32, %v3203_v35  ;;  %v3271_v41 = vsel %vm3234_vm7, %v3268_v24, %v3270_v22  ;;  %v3644_v24 = vld [vmem:[%s5508_s26 + $0x88] sm:$0xff]  ;;  %v2446_v63 = vrot.slane %v5873_v3, 2 }
 0x2d2   : > { %v3274_v3 = vrot.slane %v5826_v42, 3 }
 0x2d3   : > { %3725 = vst.msk [vmem:[%s5531_s29 + $0x78] sm:$0xff] %vm3709_vm8, %v3683_v26  ;;  %v3516_v14 = vmul.f32 %v5488_v37, %v3471_v27  ;;  %v5861_v13 = vpop.f32.mrf.mxu3  ;;  %v3272_v26 = vrot.slane %v5781_v39, 3  ;;  %v2303_v39 = vld [vmem:[%s4534_s6 + $0xb0] sm:$0xf] }
 0x2d4   : > { %v2567_v62 = vpop.f32.mrf.mxu2 }
 0x2d5   : > { %v3561_v61 = vadd.f32 %v5495_v33, %v3516_v14  ;;  %v2646_v32 = vadd.f32 %v2567_v62, %v2239_v25  ;;  %v2447_v62 = vsel %vm2001_vm6, %v2444_v58, %v2446_v63 }
 0x2d6   : > { %v2163_v21 = vpop.f32.mrf.mxu1 }
 0x2d7   : > { %v3602_v54 = vmax.f32 %v3561_v61, 0.0  ;;  %v3204_v38 = vadd.f32 %v5755_v18, %v2646_v32  ;;  %v3396_v29 = vpop.f32.mrf.mxu0  ;;  %v2240_v18 = vadd.f32 %v2163_v21, %v5143_v0  ;;  %v2039_v0 = vrot.slane %v4463_v17, 2 }
 0x2d9   : > { %v3684_v45 = vadd.f32 %v3643_v59, %v3602_v54  ;;  %v3472_v15 = vadd.f32 %v3393_v12, %v3204_v38  ;;  %4106 = vmatmul.msk.bf16.gmra.mxu1 %vm562_vm2, %v2038_v43  ;;  %4208 = vmatmul.msk.bf16.gmra.mxu2 %vm562_vm2, %v2445_v52  ;;  %v2040_v25 = vsel %vm2001_vm6, %v2037_v44, %v2039_v0  ;;  %v2387_v44 = vunpack.c.l.b16 %v2303_v39  ;;  %v3646_v38 = vld [vmem:[%s5508_s26 + $0x98] sm:$0xff] }
 0x2da   : > { %4332 = vmatmul.msk.bf16.gmra.mxu0 %vm562_vm2, %v3271_v41 }
 0x2db   : > { %3726 = vst.msk [vmem:[%s5531_s29 + $0x80] sm:$0xff] %vm3709_vm8, %v3684_v45  ;;  %v3517_v11 = vmul.f32 %v5488_v37, %v3472_v15  ;;  %v5876_v36 = vpop.f32.mrf.mxu3  ;;  %v2408_v41 = vpack.c.b16 %v2387_v44, %v2387_v44 }
 0x2dc   : > { %v2570_v5 = vpop.f32.mrf.mxu2 }
 0x2dd   : > { %v3562_v4 = vadd.f32 %v5495_v33, %v3517_v11  ;;  %v2647_v47 = vadd.f32 %v2570_v5, %v2240_v18 }
 0x2de   : > { %v2165_v30 = vpop.f32.mrf.mxu1 }
 0x2df   : > { %v3603_v19 = vmax.f32 %v3562_v4, 0.0  ;;  %v3205_v60 = vadd.f32 %v5775_v50, %v2647_v47  ;;  %v3398_v16 = vpop.f32.mrf.mxu0  ;;  %v2241_v12 = vadd.f32 %v2165_v30, %v5162_v46  ;;  %v3273_v46 = vsel %vm3234_vm7, %v3270_v22, %v3272_v26 }
 0x2e0   : > { %4313 = vmatmul.msk.bf16.gmra.mxu3 %vm562_vm2, %v3006_v6  ;;  %v2041_v47 = vrot.slane %v5151_v9, 2 }
 0x2e1   : > { %v3685_v57 = vadd.f32 %v3644_v24, %v3603_v19  ;;  %v3473_v8 = vadd.f32 %v3396_v29, %v3205_v60  ;;  %v2448_v24 = vrot.slane %v2408_v41, 2  ;;  %v5957_v41 = vld [vmem:[%s6110_s3] ss:$0 sm:$0xff] }
 0x2e3   : > { %3727 = vst.msk [vmem:[%s5531_s29 + $0x88] sm:$0xff] %vm3709_vm8, %v3685_v57  ;;  %v3518_v35 = vmul.f32 %v5488_v37, %v3473_v8  ;;  %v5893_v21 = vpop.f32.mrf.mxu3  ;;  %v2042_v8 = vsel %vm2001_vm6, %v2039_v0, %v2041_v47  ;;  %v2449_v9 = vsel %vm2001_vm6, %v2446_v63, %v2448_v24 }
 0x2e4   : > { %v2572_v50 = vpop.f32.mrf.mxu2 }
 0x2e5   : > { %v3563_v27 = vadd.f32 %v5495_v33, %v3518_v35  ;;  %v2648_v10 = vadd.f32 %v2572_v50, %v2241_v12 }
 0x2e6   : > { %v2168_v14 = vpop.f32.mrf.mxu1 }
 0x2e7   : > { %v3604_v61 = vmax.f32 %v3563_v27, 0.0  ;;  %v3206_v32 = vadd.f32 %v5795_v23, %v2648_v10  ;;  %v3401_v59 = vpop.f32.mrf.mxu0  ;;  %v2242_v58 = vadd.f32 %v2168_v14, %v5178_v31 }
 0x2e9   : > { %v3686_v6 = vadd.f32 %v3645_v1, %v3604_v61  ;;  %v3474_v43 = vadd.f32 %v3398_v16, %v3206_v32  ;;  %4107 = vmatmul.msk.bf16.gmra.mxu1 %vm562_vm2, %v2040_v25  ;;  %4209 = vmatmul.msk.bf16.gmra.mxu2 %vm562_vm2, %v2447_v62  ;;  %v3647_v16 = vld [vmem:[%s5508_s26 + $0xa0] sm:$0xff]  ;;  %v3648_v1 = vld [vmem:[%s5508_s26 + $0xa8] sm:$0xff] }
 0x2ea   : > { %4333 = vmatmul.msk.bf16.gmra.mxu0 %vm562_vm2, %v3273_v46 }
 0x2eb   : > { %3728 = vst.msk [vmem:[%s5531_s29 + $0x90] sm:$0xff] %vm3709_vm8, %v3686_v6  ;;  %v3519_v23 = vmul.f32 %v5488_v37, %v3474_v43  ;;  %v5905_v18 = vpop.f32.mrf.mxu3 }
 0x2ec   : > { %v2575_v22 = vpop.f32.mrf.mxu2 }
 0x2ed   : > { %v3564_v52 = vadd.f32 %v5495_v33, %v3519_v23  ;;  %v2649_v54 = vadd.f32 %v2575_v22, %v2242_v58  ;;  %v3649_v23 = vld [vmem:[%s5508_s26 + $0xb0] sm:$0xff] }
 0x2ee   : > { %v2170_v29 = vpop.f32.mrf.mxu1 }
 0x2ef   : > { %v3605_v45 = vmax.f32 %v3564_v52, 0.0  ;;  %v3207_v15 = vadd.f32 %v5819_v56, %v2649_v54  ;;  %v3403_v11 = vpop.f32.mrf.mxu0  ;;  %v2243_v30 = vadd.f32 %v2170_v29, %v5191_v20  ;;  %v3275_v20 = vsel %vm3234_vm7, %v3272_v26, %v3274_v3 }
 0x2f1   : > { %v3687_v5 = vadd.f32 %v3646_v38, %v3605_v45  ;;  %v3475_v4 = vadd.f32 %v3401_v59, %v3207_v15 }
 0x2f3   : > { %3729 = vst.msk [vmem:[%s5531_s29 + $0x98] sm:$0xff] %vm3709_vm8, %v3687_v5  ;;  %v3520_v31 = vmul.f32 %v5488_v37, %v3475_v4  ;;  %v5919_v50 = vpop.f32.mrf.mxu3 }
 0x2f4   : > { %v2577_v19 = vpop.f32.mrf.mxu2 }
 0x2f5   : > { %v3565_v60 = vadd.f32 %v5495_v33, %v3520_v31  ;;  %v2650_v56 = vadd.f32 %v2577_v19, %v2243_v30 }
 0x2f6   : > { %v2173_v57 = vpop.f32.mrf.mxu1 }
 0x2f7   : > { %v3606_v17 = vmax.f32 %v3565_v60, 0.0  ;;  %v3208_v35 = vadd.f32 %v5840_v48, %v2650_v56  ;;  %v3406_v12 = vpop.f32.mrf.mxu0  ;;  %v2244_v48 = vadd.f32 %v2173_v57, %v5204_v55  ;;  %v3651_v57 = vld [vmem:[%s5508_s26 + $0xc0] sm:$0xff] }
 0x2f9   : > { %v3688_v42 = vadd.f32 %v3647_v16, %v3606_v17  ;;  %v3476_v27 = vadd.f32 %v3403_v11, %v3208_v35  ;;  %4108 = vmatmul.msk.bf16.gmra.mxu1 %vm562_vm2, %v2042_v8  ;;  %4210 = vmatmul.msk.bf16.gmra.mxu2 %vm562_vm2, %v2449_v9  ;;  %v3650_v11 = vld [vmem:[%s5508_s26 + $0xb8] sm:$0xff] }
 0x2fa   : > { %4334 = vmatmul.msk.bf16.gmra.mxu0 %vm562_vm2, %v3275_v20 }
 0x2fb   : > { %3730 = vst.msk [vmem:[%s5531_s29 + $0xa0] sm:$0xff] %vm3709_vm8, %v3688_v42  ;;  %v3521_v0 = vmul.f32 %v5488_v37, %v3476_v27  ;;  %v5931_v32 = vpop.f32.mrf.mxu3 }
 0x2fc   : > { %v2580_v63 = vpop.f32.mrf.mxu2 }
 0x2fd   : > { %v3566_v26 = vadd.f32 %v5495_v33, %v3521_v0  ;;  %v2651_v10 = vadd.f32 %v2580_v63, %v2244_v48  ;;  %v3652_v63 = vld [vmem:[%s5508_s26 + $0xc8] sm:$0xff] }
 0x2fe   : > { %v2175_v14 = vpop.f32.mrf.mxu1 }
 0x2ff   : > { %v3607_v25 = vmax.f32 %v3566_v26, 0.0  ;;  %v3209_v62 = vadd.f32 %v5861_v13, %v2651_v10  ;;  %v3408_v61 = vpop.f32.mrf.mxu0  ;;  %v2245_v55 = vadd.f32 %v2175_v14, %v5216_v49  ;;  %v5950_v49 = vld [vmem:[%s6109_s2] ss:$0 sm:$0xff] }
 0x301   : > { %v3689_v59 = vadd.f32 %v3648_v1, %v3607_v25  ;;  %v3477_v46 = vadd.f32 %v3406_v12, %v3209_v62 }
 0x303   : > { %3731 = vst.msk [vmem:[%s5531_s29 + $0xa8] sm:$0xff] %vm3709_vm8, %v3689_v59  ;;  %v3522_v39 = vmul.f32 %v5488_v37, %v3477_v46  ;;  %v5940_v54 = vpop.f32.mrf.mxu3 }
 0x304   : > { %v2582_v6 = vpop.f32.mrf.mxu2 }
 0x305   : > { %v3567_v43 = vadd.f32 %v5495_v33, %v3522_v39  ;;  %v2652_v44 = vadd.f32 %v2582_v6, %v2245_v55  ;;  %v3653_v55 = vld [vmem:[%s5508_s26 + $0xd0] sm:$0xff] }
 0x306   : > { %v2178_v58 = vpop.f32.mrf.mxu1 }
 0x307   : > { %v3608_v22 = vmax.f32 %v3567_v43, 0.0  ;;  %v3210_v13 = vadd.f32 %v5876_v36, %v2652_v44  ;;  %v3411_v52 = vpop.f32.mrf.mxu0  ;;  %v2246_v33 = vadd.f32 %v2178_v58, %v5237_v51 }
 0x309   : > { %v3690_v38 = vadd.f32 %v3649_v23, %v3608_v22  ;;  %v3478_v29 = vadd.f32 %v3408_v61, %v3210_v13  ;;  %4109 = vmatmul.msk.bf16.gmra.mxu1 %vm562_vm2, %v2041_v47  ;;  %4211 = vmatmul.msk.bf16.gmra.mxu2 %vm562_vm2, %v2448_v24 }
 0x30a   : > { %4335 = vmatmul.msk.bf16.gmra.mxu0 %vm562_vm2, %v3274_v3 }
 0x30b   : > { %3732 = vst.msk [vmem:[%s5531_s29 + $0xb0] sm:$0xff] %vm3709_vm8, %v3690_v38  ;;  %v3523_v37 = vmul.f32 %v5950_v49, %v3478_v29  ;;  %v5962_v31 = vpop.f32.mrf.mxu3 }
 0x30c   : > { %v2585_v36 = vpop.f32.mrf.mxu2 }
 0x30d   : > { %v3568_v45 = vadd.f32 %v5957_v41, %v3523_v37  ;;  %v2653_v15 = vadd.f32 %v2585_v36, %v2246_v33  ;;  %v3654_v37 = vld [vmem:[%s5508_s26 + $0xd8] sm:$0xff] }
 0x30e   : > { %v2180_v5 = vpop.f32.mrf.mxu1 }
 0x30f   : > { %v3609_v4 = vmax.f32 %v3568_v45, 0.0  ;;  %v3211_v47 = vadd.f32 %v5893_v21, %v2653_v15  ;;  %v3413_v24 = vpop.f32.mrf.mxu0  ;;  %v2247_v19 = vadd.f32 %v2180_v5, %v5253_v7 }
 0x311   : > { %v3691_v30 = vadd.f32 %v3650_v11, %v3609_v4  ;;  %v3479_v51 = vadd.f32 %v3411_v52, %v3211_v47 }
 0x313   : > { %3733 = vst.msk [vmem:[%s5531_s29 + $0xb8] sm:$0xff] %vm3709_vm8, %v3691_v30  ;;  %v3524_v3 = vmul.f32 %v5950_v49, %v3479_v51  ;;  %v5971_v35 = vpop.f32.mrf.mxu3  ;;  %v3655_v51 = vld [vmem:[%s5508_s26 + $0xe0] sm:$0xff] }
 0x314   : > { %v2587_v60 = vpop.f32.mrf.mxu2 }
 0x315   : > { %v3569_v56 = vadd.f32 %v5957_v41, %v3524_v3  ;;  %v2654_v16 = vadd.f32 %v2587_v60, %v2247_v19 }
 0x316   : > { %v2183_v8 = vpop.f32.mrf.mxu1 }
 0x317   : > { %v3610_v21 = vmax.f32 %v3569_v56, 0.0  ;;  %v3212_v9 = vadd.f32 %v5905_v18, %v2654_v16  ;;  %v3416_v17 = vpop.f32.mrf.mxu0  ;;  %v2248_v42 = vadd.f32 %v2183_v8, %v5266_v34  ;;  %v6159_v8 = vld [vmem:[#allocation3_spill] sm:$0xff] }
 0x319   : > { %v3692_v12 = vadd.f32 %v3651_v57, %v3610_v21  ;;  %v3480_v20 = vadd.f32 %v3413_v24, %v3212_v9 }
 0x31b   : > { %3734 = vst.msk [vmem:[%s5531_s29 + $0xc0] sm:$0xff] %vm3709_vm8, %v3692_v12  ;;  %v3525_v7 = vmul.f32 %v5950_v49, %v3480_v20  ;;  %v5980_v14 = vpop.f32.mrf.mxu3  ;;  %v3656_v20 = vld [vmem:[%s5508_s26 + $0xe8] sm:$0xff] }
 0x31c   : > { %v2590_v27 = vpop.f32.mrf.mxu2 }
 0x31d   : > { %v3570_v0 = vadd.f32 %v5957_v41, %v3525_v7  ;;  %v2655_v48 = vadd.f32 %v2590_v27, %v2248_v42 }
 0x31e   : > { %v2185_v26 = vpop.f32.mrf.mxu1 }
 0x31f   : > { %v3611_v18 = vmax.f32 %v3570_v0, 0.0  ;;  %v3213_v10 = vadd.f32 %v5919_v50, %v2655_v48  ;;  %v3418_v1 = vpop.f32.mrf.mxu0  ;;  %v2249_v61 = vadd.f32 %v2185_v26, %v5281_v53 }
 0x321   : > { %v3693_v25 = vadd.f32 %v3652_v63, %v3611_v18  ;;  %v3481_v62 = vadd.f32 %v3416_v17, %v3213_v10  ;;  %v6160_v18 = vld [vmem:[#allocation5_spill] sm:$0xff] }
 0x323   : > { %3735 = vst.msk [vmem:[%s5531_s29 + $0xc8] sm:$0xff] %vm3709_vm8, %v3693_v25  ;;  %v3526_v34 = vmul.f32 %v5950_v49, %v3481_v62  ;;  %v5989_v23 = vpop.f32.mrf.mxu3 }
 0x324   : > { %v2592_v59 = vpop.f32.mrf.mxu2 }
 0x325   : > { %v3571_v46 = vadd.f32 %v5957_v41, %v3526_v34  ;;  %v2656_v39 = vadd.f32 %v2592_v59, %v2249_v61  ;;  %v3657_v34 = vld [vmem:[%s5508_s26 + $0xf0] sm:$0xff] }
 0x326   : > { %v2188_v6 = vpop.f32.mrf.mxu1 }
 0x327   : > { %v3612_v50 = vmax.f32 %v3571_v46, 0.0  ;;  %v3214_v43 = vadd.f32 %v5931_v32, %v2656_v39  ;;  %v3421_v44 = vpop.f32.mrf.mxu0  ;;  %v2250_v13 = vadd.f32 %v2188_v6, %v5294_v40 }
 0x329   : > { %v3694_v58 = vadd.f32 %v3653_v55, %v3612_v50  ;;  %v3482_v22 = vadd.f32 %v3418_v1, %v3214_v43  ;;  %v6161_v43 = vld [vmem:[#allocation7_spill] sm:$0xff] }
 0x32b   : > { %3736 = vst.msk [vmem:[%s5531_s29 + $0xd0] sm:$0xff] %vm3709_vm8, %v3694_v58  ;;  %v3527_v53 = vmul.f32 %v5950_v49, %v3482_v22  ;;  %v5998_v15 = vpop.f32.mrf.mxu3 }
 0x32c   : > { %v2595_v52 = vpop.f32.mrf.mxu2 }
 0x32d   : > { %v3572_v38 = vadd.f32 %v5957_v41, %v3527_v53  ;;  %v2657_v29 = vadd.f32 %v2595_v52, %v2250_v13  ;;  %v3658_v13 = vld [vmem:[%s5508_s26 + $0xf8] sm:$0xff] }
 0x32e   : > { %v2190_v33 = vpop.f32.mrf.mxu1 }
 0x32f   : > { %v3613_v32 = vmax.f32 %v3572_v38, 0.0  ;;  %v3215_v36 = vadd.f32 %v5940_v54, %v2657_v29  ;;  %v3423_v45 = vpop.f32.mrf.mxu0  ;;  %v2251_v4 = vadd.f32 %v2190_v33, %v5309_v2 }
 0x331   : > { %v3695_v11 = vadd.f32 %v3654_v37, %v3613_v32  ;;  %v3483_v5 = vadd.f32 %v3421_v44, %v3215_v36 }
 0x333   : > { %3737 = vst.msk [vmem:[%s5531_s29 + $0xd8] sm:$0xff] %vm3709_vm8, %v3695_v11  ;;  %v3528_v40 = vmul.f32 %v5950_v49, %v3483_v5  ;;  %v6007_v56 = vpop.f32.mrf.mxu3 }
 0x334   : > { %v2597_v47 = vpop.f32.mrf.mxu2 }
 0x335   : > { %v3573_v24 = vadd.f32 %v5957_v41, %v3528_v40  ;;  %v2658_v30 = vadd.f32 %v2597_v47, %v2251_v4  ;;  %v3659_v47 = vld [vmem:[%s5508_s26 + $0x100] sm:$0xff] }
 0x336   : > { %v2193_v3 = vpop.f32.mrf.mxu1 }
 0x337   : > { %v3614_v54 = vmax.f32 %v3573_v24, 0.0  ;;  %v3216_v19 = vadd.f32 %v5962_v31, %v2658_v30  ;;  %v3426_v60 = vpop.f32.mrf.mxu0  ;;  %v2252_v21 = vadd.f32 %v2193_v3, %v6159_v8 }
 0x339   : > { %v3696_v16 = vadd.f32 %v3655_v51, %v3614_v54  ;;  %v3484_v57 = vadd.f32 %v3423_v45, %v3216_v19  ;;  %v6162_v45 = vld [vmem:[#allocation9_spill] sm:$0xff] }
 0x33b   : > { %3738 = vst.msk [vmem:[%s5531_s29 + $0xe0] sm:$0xff] %vm3709_vm8, %v3696_v16  ;;  %v3529_v2 = vmul.f32 %v5950_v49, %v3484_v57  ;;  %v6016_v0 = vpop.f32.mrf.mxu3  ;;  %v6163_v16 = vld [vmem:[#allocation11_spill] sm:$0xff] }
 0x33c   : > { %v2600_v9 = vpop.f32.mrf.mxu2 }
 0x33d   : > { %v3574_v17 = vadd.f32 %v5957_v41, %v3529_v2  ;;  %v2659_v12 = vadd.f32 %v2600_v9, %v2252_v21  ;;  %v3660_v9 = vld [vmem:[%s5508_s26 + $0x108] sm:$0xff] }
 0x33e   : > { %v2195_v7 = vpop.f32.mrf.mxu1 }
 0x33f   : > { %v3615_v31 = vmax.f32 %v3574_v17, 0.0  ;;  %v3217_v42 = vadd.f32 %v5971_v35, %v2659_v12  ;;  %v3428_v27 = vpop.f32.mrf.mxu0  ;;  %v2253_v10 = vadd.f32 %v2195_v7, %v6160_v18 }
 0x341   : > { %v3697_v48 = vadd.f32 %v3656_v20, %v3615_v31  ;;  %v3485_v63 = vadd.f32 %v3426_v60, %v3217_v42 }
 0x343   : > { %3739 = vst.msk [vmem:[%s5531_s29 + $0xe8] sm:$0xff] %vm3709_vm8, %v3697_v48  ;;  %v3530_v26 = vmul.f32 %v5950_v49, %v3485_v63  ;;  %v6025_v39 = vpop.f32.mrf.mxu3  ;;  %v6164_v48 = vld [vmem:[#allocation12_spill] sm:$0xff] }
 0x344   : > { %v2602_v1 = vpop.f32.mrf.mxu2 }
 0x345   : > { %v3575_v25 = vadd.f32 %v5957_v41, %v3530_v26  ;;  %v2660_v62 = vadd.f32 %v2602_v1, %v2253_v10  ;;  %v3661_v1 = vld [vmem:[%s5508_s26 + $0x110] sm:$0xff] }
 0x346   : > { %v2198_v61 = vpop.f32.mrf.mxu1 }
 0x347   : > { %v3616_v35 = vmax.f32 %v3575_v25, 0.0  ;;  %v3218_v59 = vadd.f32 %v5980_v14, %v2660_v62  ;;  %v3431_v46 = vpop.f32.mrf.mxu0  ;;  %v2254_v44 = vadd.f32 %v2198_v61, %v6161_v43 }
 0x349   : > { %v3698_v55 = vadd.f32 %v3657_v34, %v3616_v35  ;;  %v3486_v6 = vadd.f32 %v3428_v27, %v3218_v59 }
 0x34b   : > { %3740 = vst.msk [vmem:[%s5531_s29 + $0xf0] sm:$0xff] %vm3709_vm8, %v3698_v55  ;;  %v3531_v50 = vmul.f32 %v5950_v49, %v3486_v6  ;;  %v6034_v37 = vpop.f32.mrf.mxu3 }
 0x34c   : > { %v2605_v58 = vpop.f32.mrf.mxu2 }
 0x34d   : > { %v3576_v22 = vadd.f32 %v5957_v41, %v3531_v50  ;;  %v2661_v53 = vadd.f32 %v2605_v58, %v2254_v44  ;;  %v3662_v44 = vld [vmem:[%s5508_s26 + $0x118] sm:$0xff] }
 0x34e   : > { %v2200_v52 = vpop.f32.mrf.mxu1 }
 0x34f   : > { %v3617_v14 = vmax.f32 %v3576_v22, 0.0  ;;  %v3219_v38 = vadd.f32 %v5989_v23, %v2661_v53  ;;  %v3433_v29 = vpop.f32.mrf.mxu0  ;;  %v2255_v11 = vadd.f32 %v2200_v52, %v6162_v45  ;;  %v3663_v45 = vld [vmem:[%s5508_s26 + $0x120] sm:$0xff] }
 0x351   : > { %v3699_v33 = vadd.f32 %v3658_v13, %v3617_v14  ;;  %v3487_v32 = vadd.f32 %v3431_v46, %v3219_v38 }
 0x353   : > { %3741 = vst.msk [vmem:[%s5531_s29 + $0xf8] sm:$0xff] %vm3709_vm8, %v3699_v33  ;;  %v3532_v36 = vmul.f32 %v5950_v49, %v3487_v32  ;;  %v6043_v3 = vpop.f32.mrf.mxu3 }
 0x354   : > { %v2607_v5 = vpop.f32.mrf.mxu2 }
 0x355   : > { %v3577_v40 = vadd.f32 %v5957_v41, %v3532_v36  ;;  %v2662_v4 = vadd.f32 %v2607_v5, %v2255_v11 }
 0x356   : > { %v2203_v24 = vpop.f32.mrf.mxu1 }
 0x357   : > { %v3618_v23 = vmax.f32 %v3577_v40, 0.0  ;;  %v3220_v30 = vadd.f32 %v5998_v15, %v2662_v4  ;;  %v3436_v51 = vpop.f32.mrf.mxu0  ;;  %v2256_v57 = vadd.f32 %v2203_v24, %v6163_v16 }
 0x359   : > { %v3700_v54 = vadd.f32 %v3659_v47, %v3618_v23  ;;  %v3488_v19 = vadd.f32 %v3433_v29, %v3220_v30  ;;  %v6166_v23 = vld [vmem:[#allocation14_spill] sm:$0xff] }
 0x35b   : > { %3742 = vst.msk [vmem:[%s5531_s29 + $0x100] sm:$0xff] %vm3709_vm8, %v3700_v54  ;;  %v3533_v60 = vmul.f32 %v5950_v49, %v3488_v19  ;;  %v6052_v7 = vpop.f32.mrf.mxu3 }
 0x35c   : > { %v2610_v2 = vpop.f32.mrf.mxu2 }
 0x35d   : > { %v3578_v8 = vadd.f32 %v5957_v41, %v3533_v60  ;;  %v2663_v21 = vadd.f32 %v2610_v2, %v2256_v57  ;;  %v3664_v60 = vld [vmem:[%s5508_s26 + $0x128] sm:$0xff] }
 0x35e   : > { %v2205_v17 = vpop.f32.mrf.mxu1 }
 0x35f   : > { %v3619_v15 = vmax.f32 %v3578_v8, 0.0  ;;  %v3221_v12 = vadd.f32 %v6007_v56, %v2663_v21  ;;  %v3438_v20 = vpop.f32.mrf.mxu0  ;;  %v2257_v63 = vadd.f32 %v2205_v17, %v6164_v48  ;;  %v6167_v17 = vld [vmem:[#allocation15_spill] sm:$0xff] }
 0x361   : > { %v3701_v31 = vadd.f32 %v3660_v9, %v3619_v15  ;;  %v3489_v42 = vadd.f32 %v3436_v51, %v3221_v12 }
 0x363   : > { %3743 = vst.msk [vmem:[%s5531_s29 + $0x108] sm:$0xff] %vm3709_vm8, %v3701_v31  ;;  %v3534_v27 = vmul.f32 %v5950_v49, %v3489_v42  ;;  %v6061_v61 = vpop.f32.mrf.mxu3  ;;  %v3665_v42 = vld [vmem:[%s5508_s26 + $0x130] sm:$0xff] }
 0x364   : > { %v2612_v26 = vpop.f32.mrf.mxu2 }
 0x365   : > { %v3579_v18 = vadd.f32 %v5957_v41, %v3534_v27  ;;  %v2664_v10 = vadd.f32 %v2612_v26, %v2257_v63 }
 0x366   : > { %v2208_v25 = vpop.f32.mrf.mxu1 }
 0x367   : > { %v3620_v56 = vmax.f32 %v3579_v18, 0.0  ;;  %v3222_v62 = vadd.f32 %v6016_v0, %v2664_v10  ;;  %v3441_v34 = vpop.f32.mrf.mxu0  ;;  %v2258_v55 = vadd.f32 %v2208_v25, %v5404_v28  ;;  %v6165_v28 = vld [vmem:[#allocation13_spill] sm:$0xff] }
 0x369   : > { %v3702_v35 = vadd.f32 %v3661_v1, %v3620_v56  ;;  %v3490_v59 = vadd.f32 %v3438_v20, %v3222_v62  ;;  %v6168_v1 = vld [vmem:[#allocation16_spill] sm:$0xff] }
 0x36b   : > { %3744 = vst.msk [vmem:[%s5531_s29 + $0x110] sm:$0xff] %vm3709_vm8, %v3702_v35  ;;  %v3535_v46 = vmul.f32 %v5950_v49, %v3490_v59  ;;  %v3185_v13 = vpop.f32.mrf.mxu3  ;;  %v3666_v35 = vld [vmem:[%s5508_s26 + $0x138] sm:$0xff] }
 0x36c   : > { %v2615_v6 = vpop.f32.mrf.mxu2 }
 0x36d   : > { %v3580_v50 = vadd.f32 %v5957_v41, %v3535_v46  ;;  %v2665_v43 = vadd.f32 %v2615_v6, %v2258_v55 }
 0x36e   : > { %v2210_v58 = vpop.f32.mrf.mxu1 }
 0x36f   : > { %v3621_v0 = vmax.f32 %v3580_v50, 0.0  ;;  %v3223_v22 = vadd.f32 %v6025_v39, %v2665_v43  ;;  %v3443_v53 = vpop.f32.mrf.mxu0  ;;  %v2259_v29 = vadd.f32 %v2210_v58, %v6165_v28 }
 0x371   : > { %v3703_v52 = vadd.f32 %v3662_v44, %v3621_v0  ;;  %v3491_v14 = vadd.f32 %v3441_v34, %v3223_v22  ;;  %v3667_v0 = vld [vmem:[%s5508_s26 + $0x140] sm:$0xf] }
 0x373   : > { %3745 = vst.msk [vmem:[%s5531_s29 + $0x118] sm:$0xff] %vm3709_vm8, %v3703_v52  ;;  %v3536_v38 = vmul.f32 %v5950_v49, %v3491_v14 }
 0x374   : > { %v2617_v33 = vpop.f32.mrf.mxu2 }
 0x375   : > { %v3581_v32 = vadd.f32 %v5957_v41, %v3536_v38  ;;  %v2666_v36 = vadd.f32 %v2617_v33, %v2259_v29 }
 0x376   : > { %v2213_v11 = vpop.f32.mrf.mxu1 }
 0x377   : > { %v3622_v5 = vmax.f32 %v3581_v32, 0.0  ;;  %v3224_v39 = vadd.f32 %v6034_v37, %v2666_v36  ;;  %v3446_v40 = vpop.f32.mrf.mxu0  ;;  %v2260_v30 = vadd.f32 %v2213_v11, %v6166_v23 }
 0x379   : > { %v3704_v4 = vadd.f32 %v3663_v45, %v3622_v5  ;;  %v3492_v47 = vadd.f32 %v3443_v53, %v3224_v39 }
 0x37b   : > { %3746 = vst.msk [vmem:[%s5531_s29 + $0x120] sm:$0xff] %vm3709_vm8, %v3704_v4  ;;  %v3537_v24 = vmul.f32 %v5950_v49, %v3492_v47 }
 0x37c   : > { %v2620_v51 = vpop.f32.mrf.mxu2 }
 0x37d   : > { %v3582_v54 = vadd.f32 %v5957_v41, %v3537_v24  ;;  %v2667_v19 = vadd.f32 %v2620_v51, %v2260_v30 }
 0x37e   : > { %v2215_v16 = vpop.f32.mrf.mxu1 }
 0x37f   : > { %v3623_v57 = vmax.f32 %v3582_v54, 0.0  ;;  %v3225_v37 = vadd.f32 %v6043_v3, %v2667_v19  ;;  %v3448_v2 = vpop.f32.mrf.mxu0  ;;  %v2261_v15 = vadd.f32 %v2215_v16, %v6167_v17 }
 0x381   : > { %v3705_v8 = vadd.f32 %v3664_v60, %v3623_v57  ;;  %v3493_v21 = vadd.f32 %v3446_v40, %v3225_v37 }
 0x383   : > { %3747 = vst.msk [vmem:[%s5531_s29 + $0x128] sm:$0xff] %vm3709_vm8, %v3705_v8  ;;  %v3538_v9 = vmul.f32 %v5950_v49, %v3493_v21 }
 0x384   : > { %v2622_v12 = vpop.f32.mrf.mxu2 }
 0x385   : > { %v3583_v20 = vadd.f32 %v5957_v41, %v3538_v9  ;;  %v2668_v31 = vadd.f32 %v2622_v12, %v2261_v15 }
 0x386   : > { %v2218_v27 = vpop.f32.mrf.mxu1 }
 0x387   : > { %v3624_v48 = vmax.f32 %v3583_v20, 0.0  ;;  %v3226_v3 = vadd.f32 %v6052_v7, %v2668_v31  ;;  %v3451_v63 = vpop.f32.mrf.mxu0  ;;  %v2262_v25 = vadd.f32 %v2218_v27, %v6168_v1 }
 0x389   : > { %v3706_v26 = vadd.f32 %v3665_v42, %v3624_v48  ;;  %v3494_v18 = vadd.f32 %v3448_v2, %v3226_v3 }
 0x38b   : > { %3748 = vst.msk [vmem:[%s5531_s29 + $0x130] sm:$0xff] %vm3709_vm8, %v3706_v26  ;;  %v3539_v10 = vmul.f32 %v5950_v49, %v3494_v18 }
 0x38c   : > { %v2625_v56 = vpop.f32.mrf.mxu2 }
 0x38d   : > { %v3584_v62 = vadd.f32 %v5957_v41, %v3539_v10  ;;  %v2669_v34 = vadd.f32 %v2625_v56, %v2262_v25 }
 0x38e   : > { %v2220_v59 = vpop.f32.mrf.mxu1 }
 0x38f   : > { %v3625_v46 = vmax.f32 %v3584_v62, 0.0  ;;  %v3227_v7 = vadd.f32 %v6061_v61, %v2669_v34  ;;  %v3453_v55 = vpop.f32.mrf.mxu0 }
 0x391   : > { %v3707_v6 = vadd.f32 %v3666_v35, %v3625_v46  ;;  %v3495_v50 = vadd.f32 %v3451_v63, %v3227_v7 }
 0x393   : > { %3749 = vst.msk [vmem:[%s5531_s29 + $0x138] sm:$0xff] %vm3709_vm8, %v3707_v6  ;;  %v3540_v43 = vmul.f32 %v5950_v49, %v3495_v50 }
 0x394   : > { %v2627_v44 = vpop.f32.mrf.mxu2 }
 0x395   : > { %v3585_v58 = vadd.f32 %v5957_v41, %v3540_v43 }
 0x397   : > { %v3626_v22 = vmax.f32 %v3585_v58, 0.0 }
 0x399   : > { %v3708_v53 = vadd.f32 %v3667_v0, %v3626_v22 }
 0x39b   : > { %3751 = vst.msk [vmem:[%s5531_s29 + $0x140] sm:$0xf] %vm3750_vm9, %v3708_v53 }
 0x39c PF: > { %s15_s18 = sadd.s32 1, %s4472_s18  }
 0x39d   : > { %p12_p4 = scmp.ge.s32.totalorder %s15_s18, 4  }
 0x39f   :  { %14 = sbr.rel (!%p12_p4) target bundleno = 1 (0x1), region = 81 }

</bundles_post_ra>
